<compile_context>
chip_gen: v5e
topology: v5e:2x2
jax: 0.10.0
libtpu: 0.0.40
codegen_flags: <defaults>
</compile_context>

<pallas_src>
import numpy as np
import jax
import jax.numpy as jnp
from jax.experimental import pallas as pl
from jax.experimental.pallas import tpu as pltpu


# --------------------------- host-side helpers ------------------------------

def _bilinear_matrix(in_size, out_size):
    """align_corners=True bilinear interpolation matrix (out_size, in_size), numpy."""
    if out_size == 1 or in_size == 1:
        M = np.zeros((out_size, in_size), np.float64)
        M[:, 0] = 1.0
        return M
    i = np.arange(out_size, dtype=np.float64)
    src = i * (in_size - 1) / (out_size - 1)
    i0 = np.clip(np.floor(src).astype(np.int64), 0, in_size - 1)
    i1 = np.clip(i0 + 1, 0, in_size - 1)
    frac = src - i0
    M = np.zeros((out_size, in_size), np.float64)
    M[np.arange(out_size), i0] += 1.0 - frac
    M[np.arange(out_size), i1] += frac
    return M


def _cff_tap_matrices(hl, wl, pad=2, dil=2):
    """Per-tap matrices T_t (9, Hh*Wh, Hl*Wl) folding x2-bilinear upsample + zero pad +
    dilation-2 tap shift of a 3x3 conv into one matmul per tap."""
    hh, wh = 2 * hl, 2 * wl
    a = np.pad(_bilinear_matrix(hl, hh), ((pad, pad), (0, 0)))   # (hh+2p, hl)
    b = np.pad(_bilinear_matrix(wl, wh), ((pad, pad), (0, 0)))   # (wh+2p, wl)
    taps = [np.kron(a[ky * dil:ky * dil + hh, :], b[kx * dil:kx * dil + wh, :])
            for ky in range(3) for kx in range(3)]
    return np.stack(taps, axis=0)                                # (9, hh*wh, hl*wl)


def bn_fold(gamma, beta, mean, var, eps=1e-5):
    scale = gamma / jnp.sqrt(var + eps)
    bias = beta - mean * scale
    return scale, bias


# ------------------------------ Pallas kernels ------------------------------

def _cff_kernel(xl_ref, xh_ref, taps_ref, wlow_ref, slow_ref, blow_ref,
                whigh_ref, shigh_ref, bhigh_ref, wclst_ref,
                x_out_ref, cls_out_ref):
    """Fused Cascade-Feature-Fusion block for one batch element (flat spatial layout).

    xl: (1, Hl*Wl, Cl)  xh: (1, Hh*Wh, Ch)  taps: (9, Hh*Wh, Hl*Wl)
    wlow: (Cl, 9*Cout)  whigh: (Ch, Cout)   wclst: (NC, Cout)
    outputs: x_out (1, Hh*Wh, Cout) flat NHWC, cls_out (1, NC, Hh*Wh) class-major.
    """
    mh, cout = x_out_ref.shape[1], x_out_ref.shape[2]

    # dilated (d=2) 3x3 conv on the (x2-upsampled + zero-padded) low input:
    #   y_low = sum_t T_t @ (xl @ W_t),  K per tap = Cl (full MXU K), f32 accumulation.
    xl = xl_ref[0].astype(jnp.bfloat16)                                     # (ml, cl)
    z = jnp.dot(xl, wlow_ref[...], preferred_element_type=jnp.float32)      # (ml, 9*cout)
    z = z.astype(jnp.bfloat16)
    y_low = jnp.zeros((mh, cout), jnp.float32)
    for t in range(9):
        y_low = y_low + jnp.dot(taps_ref[t], z[:, t * cout:(t + 1) * cout],
                                preferred_element_type=jnp.float32)
    y_low = y_low * slow_ref[...] + blow_ref[...]                           # folded BN (conv_low)

    # high branch: 1x1 conv + folded BN; fused add + relu.
    y_high = jnp.dot(xh_ref[0].astype(jnp.bfloat16), whigh_ref[...],
                     preferred_element_type=jnp.float32)                    # (mh, cout)
    y_high = y_high * shigh_ref[...] + bhigh_ref[...]                       # folded BN (conv_high)
    x_out_ref[0] = jnp.maximum(y_low + y_high, 0.0)

    # classifier 1x1 conv on the post-conv_low feature, emitted class-major so the
    # wrapper only needs a free reshape to NCHW:  cls[n, m] = sum_k wcls[k,n] y_low[m,k]
    cls_out_ref[0] = jnp.einsum('nk,mk->nm', wclst_ref[...], y_low.astype(jnp.bfloat16),
                                preferred_element_type=jnp.float32)


def _head_tail_kernel(x_ref, g_ref, a2_ref, r2_ref, a4_ref, r4_ref, up2_ref, up8_ref):
    """Fused head tail (conv_cls + up_x2 + up_x8) for one batch element, whole image.

    x: (1, H, W*C).  g folds the 1x1 class projection and interleaves classes
    class-major along the columns; r2/r4 are block-diagonal (per-class) column-upsample
    matrices, a2/a4 are the row-upsample matrices.  Outputs are channel-first (NCHW),
    and the up_x8 stores are lane-dense (OW8 = 128 on the lane axis).
    """
    nc, oh2, ow2 = up2_ref.shape[1], up2_ref.shape[2], up2_ref.shape[3]
    ow8 = up8_ref.shape[3]

    # class projection (conv_cls), applied before upsampling (linear ops commute):
    # y0[h, c*W + w] = sum_k x[h, w, k] * w_cls[k, c]
    y0 = jnp.dot(x_ref[0].astype(jnp.bfloat16), g_ref[...],
                 preferred_element_type=jnp.float32)                        # (h, nc*w)
    # bilinear x2 (rows, then per-class columns)
    t2 = jnp.dot(a2_ref[...], y0.astype(jnp.bfloat16),
                 preferred_element_type=jnp.float32)                        # (oh2, nc*w)
    u2 = jnp.dot(t2.astype(jnp.bfloat16), r2_ref[...],
                 preferred_element_type=jnp.float32)                        # (oh2, nc*ow2)
    # bilinear x4 on top of up_x2
    t8 = jnp.dot(a4_ref[...], u2.astype(jnp.bfloat16),
                 preferred_element_type=jnp.float32)                        # (oh8, nc*ow2)
    u8 = jnp.dot(t8.astype(jnp.bfloat16), r4_ref[...],
                 preferred_element_type=jnp.float32)                        # (oh8, nc*ow8)

    # scatter the class-major column blocks into channel-first (NCHW) outputs.
    for cidx in range(nc):
        up2_ref[0, cidx] = u2[:, cidx * ow2:(cidx + 1) * ow2]
        up8_ref[0, cidx] = u8[:, cidx * ow8:(cidx + 1) * ow8]               # 128-lane aligned


# ------------------------------ JAX wrappers ---------------------------------

def cff_block(p, xl_flat, xh_flat, hl, wl):
    """Fused CFF block.  Inputs flat NHWC (N, H*W, C); returns
    (x_out flat NHWC (N, Hh*Wh, Cout), x_cls NCHW (N, NC, Hh, Wh))."""
    n, ml, cl = xl_flat.shape
    hh, wh = 2 * hl, 2 * wl
    mh = hh * wh
    nh, mh_chk, ch = xh_flat.shape
    assert n == nh and mh_chk == mh and ml == hl * wl
    cout = p['w_high'].shape[1]
    nc = p['w_cls'].shape[1]

    taps = jnp.asarray(_cff_tap_matrices(hl, wl), jnp.bfloat16)              # (9, mh, ml)
    # HWIO (3,3,Cl,Cout) -> (Cl, 9*Cout) so tap t's weights sit at lanes [t*Cout, (t+1)*Cout)
    w_low = jnp.transpose(p['w_low'], (2, 0, 1, 3)).reshape(cl, 9 * cout).astype(jnp.bfloat16)
    w_high = p['w_high'].astype(jnp.bfloat16)
    w_cls_t = p['w_cls'].T.astype(jnp.bfloat16)                              # (nc, cout)
    s_low = p['scale_low'].reshape(1, cout)
    b_low = p['bias_low'].reshape(1, cout)
    s_high = p['scale_high'].reshape(1, cout)
    b_high = p['bias_high'].reshape(1, cout)

    x_out, cls_out = pl.pallas_call(
        _cff_kernel,
        out_shape=(jax.ShapeDtypeStruct((n, mh, cout), jnp.float32),
                   jax.ShapeDtypeStruct((n, nc, mh), jnp.float32)),
        grid=(n,),
        in_specs=[
            pl.BlockSpec((1, ml, cl), lambda i: (i, 0, 0)),
            pl.BlockSpec((1, mh, ch), lambda i: (i, 0, 0)),
            pl.BlockSpec((9, mh, ml), lambda i: (0, 0, 0)),
            pl.BlockSpec((cl, 9 * cout), lambda i: (0, 0)),
            pl.BlockSpec((1, cout), lambda i: (0, 0)),
            pl.BlockSpec((1, cout), lambda i: (0, 0)),
            pl.BlockSpec((ch, cout), lambda i: (0, 0)),
            pl.BlockSpec((1, cout), lambda i: (0, 0)),
            pl.BlockSpec((1, cout), lambda i: (0, 0)),
            pl.BlockSpec((nc, cout), lambda i: (0, 0)),
        ],
        out_specs=[
            pl.BlockSpec((1, mh, cout), lambda i: (i, 0, 0)),
            pl.BlockSpec((1, nc, mh), lambda i: (i, 0, 0)),
        ],
        compiler_params=pltpu.CompilerParams(dimension_semantics=("parallel",)),
    )(xl_flat, xh_flat, taps, w_low, s_low, b_low, w_high, s_high, b_high, w_cls_t)
    # free row-major reshape to NCHW
    return x_out, cls_out.reshape(n, nc, hh, wh)


def head_tail(w_cls, x_flat, h, w):
    """Fused conv_cls + up_x2 + up_x8.  Input flat NHWC (N, H*W, C); returns
    up_x2 NCHW (N, NC, 2H, 2W) and up_x8 NCHW (N, NC, 8H, 8W)."""
    n, m, c = x_flat.shape
    assert m == h * w
    nc = w_cls.shape[1]
    oh2, ow2 = 2 * h, 2 * w
    oh8, ow8 = 4 * oh2, 4 * ow2

    x2d = x_flat.reshape(n, h, w * c)                                        # free reshape

    # conv_cls as a block matrix, classes interleaved class-major along columns:
    # g[w*C + k, c*W + w'] = w_cls[k, c] * (w == w')
    eye_w = jnp.eye(w, dtype=w_cls.dtype)
    g = jnp.einsum('kc,vu->vkcu', w_cls, eye_w).reshape(w * c, nc * w).astype(jnp.bfloat16)

    a2 = jnp.asarray(_bilinear_matrix(h, oh2), jnp.bfloat16)                          # (oh2, h)
    r2 = jnp.asarray(np.kron(np.eye(nc), _bilinear_matrix(w, ow2).T), jnp.bfloat16)   # (nc*w, nc*ow2)
    a4 = jnp.asarray(_bilinear_matrix(oh2, oh8), jnp.bfloat16)                        # (oh8, oh2)
    r4 = jnp.asarray(np.kron(np.eye(nc), _bilinear_matrix(ow2, ow8).T), jnp.bfloat16) # (nc*ow2, nc*ow8)

    up2, up8 = pl.pallas_call(
        _head_tail_kernel,
        out_shape=(jax.ShapeDtypeStruct((n, nc, oh2, ow2), jnp.float32),
                   jax.ShapeDtypeStruct((n, nc, oh8, ow8), jnp.float32)),
        grid=(n,),
        in_specs=[
            pl.BlockSpec((1, h, w * c), lambda i: (i, 0, 0)),
            pl.BlockSpec((w * c, nc * w), lambda i: (0, 0)),
            pl.BlockSpec((oh2, h), lambda i: (0, 0)),
            pl.BlockSpec((nc * w, nc * ow2), lambda i: (0, 0)),
            pl.BlockSpec((oh8, oh2), lambda i: (0, 0)),
            pl.BlockSpec((nc * ow2, nc * ow8), lambda i: (0, 0)),
        ],
        out_specs=[
            pl.BlockSpec((1, nc, oh2, ow2), lambda i: (i, 0, 0, 0)),
            pl.BlockSpec((1, nc, oh8, ow8), lambda i: (i, 0, 0, 0)),
        ],
        compiler_params=pltpu.CompilerParams(dimension_semantics=("parallel",)),
    )(x2d, g, a2, r2, a4, r4)
    return up2, up8


# ------------------------------ Model glue ----------------------------------

def ic_head_block(params, x1, x2, x4):
    """ICHeadBlock forward. Inputs NCHW (PyTorch convention); outputs NCHW
    (emitted channel-first by the kernels, no output transposes)."""
    def to_flat(t):
        nb, cc, hh, ww = t.shape
        return jnp.transpose(t, (0, 2, 3, 1)).reshape(nb, hh * ww, cc).astype(jnp.float32), hh, ww

    x1f, h1, w1 = to_flat(x1)
    x2f, h2, w2 = to_flat(x2)
    x4f, h4, w4 = to_flat(x4)

    x_cff_24, x_24_cls = cff_block(params['cff_24'], x4f, x2f, h4, w4)
    x_cff_12, x_12_cls = cff_block(params['cff_12'], x_cff_24, x1f, h2, w2)
    up_x2, up_x8 = head_tail(params['w_cls'], x_cff_12, h1, w1)

    # outputs.reverse() in the PyTorch module
    return up_x8, up_x2, x_12_cls, x_24_cls


def make_params(key, num_classes):
    def normal(k, shape, std=0.05):
        return std * jax.random.normal(k, shape, dtype=jnp.float32)

    def bn_params(k, c):
        k1, k2, k3, k4 = jax.random.split(k, 4)
        gamma = 1.0 + 0.1 * jax.random.normal(k1, (c,), jnp.float32)
        beta = 0.1 * jax.random.normal(k2, (c,), jnp.float32)
        mean = 0.1 * jax.random.normal(k3, (c,), jnp.float32)
        var = 1.0 + 0.5 * jax.random.uniform(k4, (c,), jnp.float32)
        return bn_fold(gamma, beta, mean, var)

    def cff_params(k, c_low, c_high, c_out, nc):
        k1, k2, k3, k4, k5 = jax.random.split(k, 5)
        s_l, b_l = bn_params(k2, c_out)
        s_h, b_h = bn_params(k4, c_out)
        return dict(
            w_low=normal(k1, (3, 3, c_low, c_out)),      # HWIO
            scale_low=s_l, bias_low=b_l,
            w_high=normal(k3, (c_high, c_out)),          # (Cin, Cout)
            scale_high=s_h, bias_high=b_h,
            w_cls=normal(k5, (c_out, nc)),
        )

    k1, k2, k3 = jax.random.split(key, 3)
    return dict(
        cff_12=cff_params(k1, 128, 64, 128, num_classes),
        cff_24=cff_params(k2, 256, 256, 128, num_classes),
        w_cls=normal(k3, (128, num_classes)),
    )


# ---------------------------------- main -------------------------------------

if __name__ == "__main__":
    num_classes = 5
    key = jax.random.PRNGKey(0)
    kp, k1, k2, k4 = jax.random.split(key, 4)

    params = make_params(kp, num_classes)

    # NCHW inputs, consistent with ICNet branch resolutions (x1: 1/4, x2: 1/8, x4: 1/16).
    x1 = jax.random.normal(k1, (2, 64, 16, 16), jnp.float32)
    x2 = jax.random.normal(k2, (2, 256, 8, 8), jnp.float32)
    x4 = jax.random.normal(k4, (2, 256, 4, 4), jnp.float32)

    fwd = jax.jit(ic_head_block)
    up_x8, up_x2, x_12_cls, x_24_cls = fwd(params, x1, x2, x4)
    jax.block_until_ready((up_x8, up_x2, x_12_cls, x_24_cls))

    assert up_x8.shape == (2, num_classes, 128, 128)
    assert up_x2.shape == (2, num_classes, 32, 32)
    assert x_12_cls.shape == (2, num_classes, 16, 16)
    assert x_24_cls.shape == (2, num_classes, 8, 8)
    assert all(bool(jnp.isfinite(t).all()) for t in (up_x8, up_x2, x_12_cls, x_24_cls))

    print("KERNEL_OK")
</pallas_src>

<mosaic_0001>
module attributes {stable_mosaic.version = 11 : i64} {
  func.func @_cff_kernel(%arg0: i32, %arg1: memref<1x16x256xf32, #tpu.memory_space<vmem>>, %arg2: memref<1x64x256xf32, #tpu.memory_space<vmem>>, %arg3: memref<9x64x16xbf16, #tpu.memory_space<vmem>>, %arg4: memref<256x1152xbf16, #tpu.memory_space<vmem>>, %arg5: memref<1x128xf32, #tpu.memory_space<vmem>>, %arg6: memref<1x128xf32, #tpu.memory_space<vmem>>, %arg7: memref<256x128xbf16, #tpu.memory_space<vmem>>, %arg8: memref<1x128xf32, #tpu.memory_space<vmem>>, %arg9: memref<1x128xf32, #tpu.memory_space<vmem>>, %arg10: memref<5x128xbf16, #tpu.memory_space<vmem>>, %arg11: memref<1x64x128xf32, #tpu.memory_space<vmem>>, %arg12: memref<1x5x64xf32, #tpu.memory_space<vmem>>) attributes {dimension_semantics = [#tpu.dimension_semantics<parallel>], iteration_bounds = array<i64: 2>, scalar_prefetch = 0 : i64, scratch_operands = 0 : i64, tpu.core_type = #tpu.core_type<tc>, window_params = [{transform_indices = @transform_0, window_bounds = array<i64: 1, 16, 256>}, {transform_indices = @transform_1, window_bounds = array<i64: 1, 64, 256>}, {pipeline_mode = #tpu.pipeline_mode<synchronous>, transform_indices = @transform_2, window_bounds = array<i64: 9, 64, 16>}, {pipeline_mode = #tpu.pipeline_mode<synchronous>, transform_indices = @transform_3, window_bounds = array<i64: 256, 1152>}, {pipeline_mode = #tpu.pipeline_mode<synchronous>, transform_indices = @transform_4, window_bounds = array<i64: 1, 128>}, {pipeline_mode = #tpu.pipeline_mode<synchronous>, transform_indices = @transform_5, window_bounds = array<i64: 1, 128>}, {pipeline_mode = #tpu.pipeline_mode<synchronous>, transform_indices = @transform_6, window_bounds = array<i64: 256, 128>}, {pipeline_mode = #tpu.pipeline_mode<synchronous>, transform_indices = @transform_7, window_bounds = array<i64: 1, 128>}, {pipeline_mode = #tpu.pipeline_mode<synchronous>, transform_indices = @transform_8, window_bounds = array<i64: 1, 128>}, {pipeline_mode = #tpu.pipeline_mode<synchronous>, transform_indices = @transform_9, window_bounds = array<i64: 5, 128>}, {transform_indices = @transform_10, window_bounds = array<i64: 1, 64, 128>}, {transform_indices = @transform_11, window_bounds = array<i64: 1, 5, 64>}]} {
    %c0 = arith.constant 0 : index
    %c0_0 = arith.constant 0 : index
    %c0_1 = arith.constant 0 : index
    %0 = vector.load %arg1[%c0, %c0_0, %c0_1] : memref<1x16x256xf32, #tpu.memory_space<vmem>>, vector<1x16x256xf32>
    %1 = vector.shape_cast %0 : vector<1x16x256xf32> to vector<16x256xf32>
    %2 = arith.truncf %1 : vector<16x256xf32> to vector<16x256xbf16>
    %c0_2 = arith.constant 0 : index
    %c0_3 = arith.constant 0 : index
    %3 = vector.load %arg4[%c0_2, %c0_3] : memref<256x1152xbf16, #tpu.memory_space<vmem>>, vector<256x1152xbf16>
    %cst = arith.constant dense<0.000000e+00> : vector<16x1152xf32>
    %4 = tpu.matmul %2, %3, %cst {dimension_numbers = #tpu.dot_dimension_numbers<[1], [0], [0], [1], [0, 0, 1, 1], [], []>} : vector<16x256xbf16>, vector<256x1152xbf16>, vector<16x1152xf32> -> vector<16x1152xf32>
    %5 = arith.truncf %4 : vector<16x1152xf32> to vector<16x1152xbf16>
    %cst_4 = arith.constant 0.000000e+00 : f32
    %6 = vector.broadcast %cst_4 : f32 to vector<64x128xf32>
    %c0_5 = arith.constant 0 : index
    %c0_6 = arith.constant 0 : index
    %c0_7 = arith.constant 0 : index
    %7 = vector.load %arg3[%c0_5, %c0_6, %c0_7] : memref<9x64x16xbf16, #tpu.memory_space<vmem>>, vector<1x64x16xbf16>
    %8 = vector.shape_cast %7 : vector<1x64x16xbf16> to vector<64x16xbf16>
    %9 = vector.extract_strided_slice %5 {offsets = [0, 0], sizes = [16, 128], strides = [1, 1]} : vector<16x1152xbf16> to vector<16x128xbf16>
    %cst_8 = arith.constant dense<0.000000e+00> : vector<64x128xf32>
    %10 = tpu.matmul %8, %9, %cst_8 {dimension_numbers = #tpu.dot_dimension_numbers<[1], [0], [0], [1], [0, 0, 1, 1], [], []>} : vector<64x16xbf16>, vector<16x128xbf16>, vector<64x128xf32> -> vector<64x128xf32>
    %11 = arith.addf %6, %10 : vector<64x128xf32>
    %c1 = arith.constant 1 : index
    %c0_9 = arith.constant 0 : index
    %c0_10 = arith.constant 0 : index
    %12 = vector.load %arg3[%c1, %c0_9, %c0_10] : memref<9x64x16xbf16, #tpu.memory_space<vmem>>, vector<1x64x16xbf16>
    %13 = vector.shape_cast %12 : vector<1x64x16xbf16> to vector<64x16xbf16>
    %14 = vector.extract_strided_slice %5 {offsets = [0, 128], sizes = [16, 128], strides = [1, 1]} : vector<16x1152xbf16> to vector<16x128xbf16>
    %cst_11 = arith.constant dense<0.000000e+00> : vector<64x128xf32>
    %15 = tpu.matmul %13, %14, %cst_11 {dimension_numbers = #tpu.dot_dimension_numbers<[1], [0], [0], [1], [0, 0, 1, 1], [], []>} : vector<64x16xbf16>, vector<16x128xbf16>, vector<64x128xf32> -> vector<64x128xf32>
    %16 = arith.addf %11, %15 : vector<64x128xf32>
    %c2 = arith.constant 2 : index
    %c0_12 = arith.constant 0 : index
    %c0_13 = arith.constant 0 : index
    %17 = vector.load %arg3[%c2, %c0_12, %c0_13] : memref<9x64x16xbf16, #tpu.memory_space<vmem>>, vector<1x64x16xbf16>
    %18 = vector.shape_cast %17 : vector<1x64x16xbf16> to vector<64x16xbf16>
    %19 = vector.extract_strided_slice %5 {offsets = [0, 256], sizes = [16, 128], strides = [1, 1]} : vector<16x1152xbf16> to vector<16x128xbf16>
    %cst_14 = arith.constant dense<0.000000e+00> : vector<64x128xf32>
    %20 = tpu.matmul %18, %19, %cst_14 {dimension_numbers = #tpu.dot_dimension_numbers<[1], [0], [0], [1], [0, 0, 1, 1], [], []>} : vector<64x16xbf16>, vector<16x128xbf16>, vector<64x128xf32> -> vector<64x128xf32>
    %21 = arith.addf %16, %20 : vector<64x128xf32>
    %c3 = arith.constant 3 : index
    %c0_15 = arith.constant 0 : index
    %c0_16 = arith.constant 0 : index
    %22 = vector.load %arg3[%c3, %c0_15, %c0_16] : memref<9x64x16xbf16, #tpu.memory_space<vmem>>, vector<1x64x16xbf16>
    %23 = vector.shape_cast %22 : vector<1x64x16xbf16> to vector<64x16xbf16>
    %24 = vector.extract_strided_slice %5 {offsets = [0, 384], sizes = [16, 128], strides = [1, 1]} : vector<16x1152xbf16> to vector<16x128xbf16>
    %cst_17 = arith.constant dense<0.000000e+00> : vector<64x128xf32>
    %25 = tpu.matmul %23, %24, %cst_17 {dimension_numbers = #tpu.dot_dimension_numbers<[1], [0], [0], [1], [0, 0, 1, 1], [], []>} : vector<64x16xbf16>, vector<16x128xbf16>, vector<64x128xf32> -> vector<64x128xf32>
    %26 = arith.addf %21, %25 : vector<64x128xf32>
    %c4 = arith.constant 4 : index
    %c0_18 = arith.constant 0 : index
    %c0_19 = arith.constant 0 : index
    %27 = vector.load %arg3[%c4, %c0_18, %c0_19] : memref<9x64x16xbf16, #tpu.memory_space<vmem>>, vector<1x64x16xbf16>
    %28 = vector.shape_cast %27 : vector<1x64x16xbf16> to vector<64x16xbf16>
    %29 = vector.extract_strided_slice %5 {offsets = [0, 512], sizes = [16, 128], strides = [1, 1]} : vector<16x1152xbf16> to vector<16x128xbf16>
    %cst_20 = arith.constant dense<0.000000e+00> : vector<64x128xf32>
    %30 = tpu.matmul %28, %29, %cst_20 {dimension_numbers = #tpu.dot_dimension_numbers<[1], [0], [0], [1], [0, 0, 1, 1], [], []>} : vector<64x16xbf16>, vector<16x128xbf16>, vector<64x128xf32> -> vector<64x128xf32>
    %31 = arith.addf %26, %30 : vector<64x128xf32>
    %c5 = arith.constant 5 : index
    %c0_21 = arith.constant 0 : index
    %c0_22 = arith.constant 0 : index
    %32 = vector.load %arg3[%c5, %c0_21, %c0_22] : memref<9x64x16xbf16, #tpu.memory_space<vmem>>, vector<1x64x16xbf16>
    %33 = vector.shape_cast %32 : vector<1x64x16xbf16> to vector<64x16xbf16>
    %34 = vector.extract_strided_slice %5 {offsets = [0, 640], sizes = [16, 128], strides = [1, 1]} : vector<16x1152xbf16> to vector<16x128xbf16>
    %cst_23 = arith.constant dense<0.000000e+00> : vector<64x128xf32>
    %35 = tpu.matmul %33, %34, %cst_23 {dimension_numbers = #tpu.dot_dimension_numbers<[1], [0], [0], [1], [0, 0, 1, 1], [], []>} : vector<64x16xbf16>, vector<16x128xbf16>, vector<64x128xf32> -> vector<64x128xf32>
    %36 = arith.addf %31, %35 : vector<64x128xf32>
    %c6 = arith.constant 6 : index
    %c0_24 = arith.constant 0 : index
    %c0_25 = arith.constant 0 : index
    %37 = vector.load %arg3[%c6, %c0_24, %c0_25] : memref<9x64x16xbf16, #tpu.memory_space<vmem>>, vector<1x64x16xbf16>
    %38 = vector.shape_cast %37 : vector<1x64x16xbf16> to vector<64x16xbf16>
    %39 = vector.extract_strided_slice %5 {offsets = [0, 768], sizes = [16, 128], strides = [1, 1]} : vector<16x1152xbf16> to vector<16x128xbf16>
    %cst_26 = arith.constant dense<0.000000e+00> : vector<64x128xf32>
    %40 = tpu.matmul %38, %39, %cst_26 {dimension_numbers = #tpu.dot_dimension_numbers<[1], [0], [0], [1], [0, 0, 1, 1], [], []>} : vector<64x16xbf16>, vector<16x128xbf16>, vector<64x128xf32> -> vector<64x128xf32>
    %41 = arith.addf %36, %40 : vector<64x128xf32>
    %c7 = arith.constant 7 : index
    %c0_27 = arith.constant 0 : index
    %c0_28 = arith.constant 0 : index
    %42 = vector.load %arg3[%c7, %c0_27, %c0_28] : memref<9x64x16xbf16, #tpu.memory_space<vmem>>, vector<1x64x16xbf16>
    %43 = vector.shape_cast %42 : vector<1x64x16xbf16> to vector<64x16xbf16>
    %44 = vector.extract_strided_slice %5 {offsets = [0, 896], sizes = [16, 128], strides = [1, 1]} : vector<16x1152xbf16> to vector<16x128xbf16>
    %cst_29 = arith.constant dense<0.000000e+00> : vector<64x128xf32>
    %45 = tpu.matmul %43, %44, %cst_29 {dimension_numbers = #tpu.dot_dimension_numbers<[1], [0], [0], [1], [0, 0, 1, 1], [], []>} : vector<64x16xbf16>, vector<16x128xbf16>, vector<64x128xf32> -> vector<64x128xf32>
    %46 = arith.addf %41, %45 : vector<64x128xf32>
    %c8 = arith.constant 8 : index
    %c0_30 = arith.constant 0 : index
    %c0_31 = arith.constant 0 : index
    %47 = vector.load %arg3[%c8, %c0_30, %c0_31] : memref<9x64x16xbf16, #tpu.memory_space<vmem>>, vector<1x64x16xbf16>
    %48 = vector.shape_cast %47 : vector<1x64x16xbf16> to vector<64x16xbf16>
    %49 = vector.extract_strided_slice %5 {offsets = [0, 1024], sizes = [16, 128], strides = [1, 1]} : vector<16x1152xbf16> to vector<16x128xbf16>
    %cst_32 = arith.constant dense<0.000000e+00> : vector<64x128xf32>
    %50 = tpu.matmul %48, %49, %cst_32 {dimension_numbers = #tpu.dot_dimension_numbers<[1], [0], [0], [1], [0, 0, 1, 1], [], []>} : vector<64x16xbf16>, vector<16x128xbf16>, vector<64x128xf32> -> vector<64x128xf32>
    %51 = arith.addf %46, %50 : vector<64x128xf32>
    %c0_33 = arith.constant 0 : index
    %c0_34 = arith.constant 0 : index
    %52 = vector.load %arg5[%c0_33, %c0_34] : memref<1x128xf32, #tpu.memory_space<vmem>>, vector<1x128xf32>
    %53 = vector.broadcast %52 : vector<1x128xf32> to vector<64x128xf32>
    %54 = arith.mulf %51, %53 : vector<64x128xf32>
    %c0_35 = arith.constant 0 : index
    %c0_36 = arith.constant 0 : index
    %55 = vector.load %arg6[%c0_35, %c0_36] : memref<1x128xf32, #tpu.memory_space<vmem>>, vector<1x128xf32>
    %56 = vector.broadcast %55 : vector<1x128xf32> to vector<64x128xf32>
    %57 = arith.addf %54, %56 : vector<64x128xf32>
    %c0_37 = arith.constant 0 : index
    %c0_38 = arith.constant 0 : index
    %c0_39 = arith.constant 0 : index
    %58 = vector.load %arg2[%c0_37, %c0_38, %c0_39] : memref<1x64x256xf32, #tpu.memory_space<vmem>>, vector<1x64x256xf32>
    %59 = vector.shape_cast %58 : vector<1x64x256xf32> to vector<64x256xf32>
    %60 = arith.truncf %59 : vector<64x256xf32> to vector<64x256xbf16>
    %c0_40 = arith.constant 0 : index
    %c0_41 = arith.constant 0 : index
    %61 = vector.load %arg7[%c0_40, %c0_41] : memref<256x128xbf16, #tpu.memory_space<vmem>>, vector<256x128xbf16>
    %cst_42 = arith.constant dense<0.000000e+00> : vector<64x128xf32>
    %62 = tpu.matmul %60, %61, %cst_42 {dimension_numbers = #tpu.dot_dimension_numbers<[1], [0], [0], [1], [0, 0, 1, 1], [], []>} : vector<64x256xbf16>, vector<256x128xbf16>, vector<64x128xf32> -> vector<64x128xf32>
    %c0_43 = arith.constant 0 : index
    %c0_44 = arith.constant 0 : index
    %63 = vector.load %arg8[%c0_43, %c0_44] : memref<1x128xf32, #tpu.memory_space<vmem>>, vector<1x128xf32>
    %64 = vector.broadcast %63 : vector<1x128xf32> to vector<64x128xf32>
    %65 = arith.mulf %62, %64 : vector<64x128xf32>
    %c0_45 = arith.constant 0 : index
    %c0_46 = arith.constant 0 : index
    %66 = vector.load %arg9[%c0_45, %c0_46] : memref<1x128xf32, #tpu.memory_space<vmem>>, vector<1x128xf32>
    %67 = vector.broadcast %66 : vector<1x128xf32> to vector<64x128xf32>
    %68 = arith.addf %65, %67 : vector<64x128xf32>
    %69 = arith.addf %57, %68 : vector<64x128xf32>
    %cst_47 = arith.constant 0.000000e+00 : f32
    %70 = vector.broadcast %cst_47 : f32 to vector<64x128xf32>
    %71 = arith.maximumf %69, %70 : vector<64x128xf32>
    %c0_48 = arith.constant 0 : index
    %c0_49 = arith.constant 0 : index
    %c0_50 = arith.constant 0 : index
    %72 = vector.load %arg11[%c0_48, %c0_49, %c0_50] : memref<1x64x128xf32, #tpu.memory_space<vmem>>, vector<1x64x128xf32>
    %73 = vector.shape_cast %72 : vector<1x64x128xf32> to vector<64x128xf32>
    %74 = vector.shape_cast %71 : vector<64x128xf32> to vector<1x64x128xf32>
    tpu.vector_store %arg11[%c0_48, %c0_49, %c0_50], %74 {strides = array<i32>} : memref<1x64x128xf32, #tpu.memory_space<vmem>>, vector<1x64x128xf32>,
    %c0_51 = arith.constant 0 : index
    %c0_52 = arith.constant 0 : index
    %75 = vector.load %arg10[%c0_51, %c0_52] : memref<5x128xbf16, #tpu.memory_space<vmem>>, vector<5x128xbf16>
    %76 = arith.truncf %57 : vector<64x128xf32> to vector<64x128xbf16>
    "tpu.trace_start"() <{level = 10 : i32, message = "nk,mk->nm"}> : () -> ()
    %cst_53 = arith.constant dense<0.000000e+00> : vector<5x64xf32>
    %77 = tpu.matmul %75, %76, %cst_53 {dimension_numbers = #tpu.dot_dimension_numbers<[1], [1], [0], [0], [0, 0, 1, 0], [], []>} : vector<5x128xbf16>, vector<64x128xbf16>, vector<5x64xf32> -> vector<5x64xf32>
    "tpu.trace_stop"() : () -> ()
    %c0_54 = arith.constant 0 : index
    %c0_55 = arith.constant 0 : index
    %c0_56 = arith.constant 0 : index
    %78 = vector.load %arg12[%c0_54, %c0_55, %c0_56] : memref<1x5x64xf32, #tpu.memory_space<vmem>>, vector<1x5x64xf32>
    %79 = vector.shape_cast %78 : vector<1x5x64xf32> to vector<5x64xf32>
    %80 = vector.shape_cast %77 : vector<5x64xf32> to vector<1x5x64xf32>
    tpu.vector_store %arg12[%c0_54, %c0_55, %c0_56], %80 {strides = array<i32>} : memref<1x5x64xf32, #tpu.memory_space<vmem>>, vector<1x5x64xf32>,
    return
  }
  func.func @transform_0(%arg0: i32) -> (i32, i32, i32) {
    %c0_i32 = arith.constant 0 : i32
    %c0_i32_0 = arith.constant 0 : i32
    %c0_i32_1 = arith.constant 0 : i32
    return %arg0, %c0_i32, %c0_i32_0 : i32, i32, i32
  }
  func.func @transform_1(%arg0: i32) -> (i32, i32, i32) {
    %c0_i32 = arith.constant 0 : i32
    %c0_i32_0 = arith.constant 0 : i32
    %c0_i32_1 = arith.constant 0 : i32
    return %arg0, %c0_i32, %c0_i32_0 : i32, i32, i32
  }
  func.func @transform_2(%arg0: i32) -> (i32, i32, i32) {
    %c0_i32 = arith.constant 0 : i32
    %c0_i32_0 = arith.constant 0 : i32
    %c0_i32_1 = arith.constant 0 : i32
    %c0_i32_2 = arith.constant 0 : i32
    return %c0_i32, %c0_i32_0, %c0_i32_1 : i32, i32, i32
  }
  func.func @transform_3(%arg0: i32) -> (i32, i32) {
    %c0_i32 = arith.constant 0 : i32
    %c0_i32_0 = arith.constant 0 : i32
    %c0_i32_1 = arith.constant 0 : i32
    return %c0_i32, %c0_i32_0 : i32, i32
  }
  func.func @transform_4(%arg0: i32) -> (i32, i32) {
    %c0_i32 = arith.constant 0 : i32
    %c0_i32_0 = arith.constant 0 : i32
    %c0_i32_1 = arith.constant 0 : i32
    return %c0_i32, %c0_i32_0 : i32, i32
  }
  func.func @transform_5(%arg0: i32) -> (i32, i32) {
    %c0_i32 = arith.constant 0 : i32
    %c0_i32_0 = arith.constant 0 : i32
    %c0_i32_1 = arith.constant 0 : i32
    return %c0_i32, %c0_i32_0 : i32, i32
  }
  func.func @transform_6(%arg0: i32) -> (i32, i32) {
    %c0_i32 = arith.constant 0 : i32
    %c0_i32_0 = arith.constant 0 : i32
    %c0_i32_1 = arith.constant 0 : i32
    return %c0_i32, %c0_i32_0 : i32, i32
  }
  func.func @transform_7(%arg0: i32) -> (i32, i32) {
    %c0_i32 = arith.constant 0 : i32
    %c0_i32_0 = arith.constant 0 : i32
    %c0_i32_1 = arith.constant 0 : i32
    return %c0_i32, %c0_i32_0 : i32, i32
  }
  func.func @transform_8(%arg0: i32) -> (i32, i32) {
    %c0_i32 = arith.constant 0 : i32
    %c0_i32_0 = arith.constant 0 : i32
    %c0_i32_1 = arith.constant 0 : i32
    return %c0_i32, %c0_i32_0 : i32, i32
  }
  func.func @transform_9(%arg0: i32) -> (i32, i32) {
    %c0_i32 = arith.constant 0 : i32
    %c0_i32_0 = arith.constant 0 : i32
    %c0_i32_1 = arith.constant 0 : i32
    return %c0_i32, %c0_i32_0 : i32, i32
  }
  func.func @transform_10(%arg0: i32) -> (i32, i32, i32) {
    %c0_i32 = arith.constant 0 : i32
    %c0_i32_0 = arith.constant 0 : i32
    %c0_i32_1 = arith.constant 0 : i32
    return %arg0, %c0_i32, %c0_i32_0 : i32, i32, i32
  }
  func.func @transform_11(%arg0: i32) -> (i32, i32, i32) {
    %c0_i32 = arith.constant 0 : i32
    %c0_i32_0 = arith.constant 0 : i32
    %c0_i32_1 = arith.constant 0 : i32
    return %arg0, %c0_i32, %c0_i32_0 : i32, i32, i32
  }
}

module attributes {stable_mosaic.version = 11 : i64} {
  func.func @_cff_kernel(%arg0: i32, %arg1: memref<1x64x128xf32, #tpu.memory_space<vmem>>, %arg2: memref<1x256x64xf32, #tpu.memory_space<vmem>>, %arg3: memref<9x256x64xbf16, #tpu.memory_space<vmem>>, %arg4: memref<128x1152xbf16, #tpu.memory_space<vmem>>, %arg5: memref<1x128xf32, #tpu.memory_space<vmem>>, %arg6: memref<1x128xf32, #tpu.memory_space<vmem>>, %arg7: memref<64x128xbf16, #tpu.memory_space<vmem>>, %arg8: memref<1x128xf32, #tpu.memory_space<vmem>>, %arg9: memref<1x128xf32, #tpu.memory_space<vmem>>, %arg10: memref<5x128xbf16, #tpu.memory_space<vmem>>, %arg11: memref<1x256x128xf32, #tpu.memory_space<vmem>>, %arg12: memref<1x5x256xf32, #tpu.memory_space<vmem>>) attributes {dimension_semantics = [#tpu.dimension_semantics<parallel>], iteration_bounds = array<i64: 2>, scalar_prefetch = 0 : i64, scratch_operands = 0 : i64, tpu.core_type = #tpu.core_type<tc>, window_params = [{transform_indices = @transform_0, window_bounds = array<i64: 1, 64, 128>}, {transform_indices = @transform_1, window_bounds = array<i64: 1, 256, 64>}, {pipeline_mode = #tpu.pipeline_mode<synchronous>, transform_indices = @transform_2, window_bounds = array<i64: 9, 256, 64>}, {pipeline_mode = #tpu.pipeline_mode<synchronous>, transform_indices = @transform_3, window_bounds = array<i64: 128, 1152>}, {pipeline_mode = #tpu.pipeline_mode<synchronous>, transform_indices = @transform_4, window_bounds = array<i64: 1, 128>}, {pipeline_mode = #tpu.pipeline_mode<synchronous>, transform_indices = @transform_5, window_bounds = array<i64: 1, 128>}, {pipeline_mode = #tpu.pipeline_mode<synchronous>, transform_indices = @transform_6, window_bounds = array<i64: 64, 128>}, {pipeline_mode = #tpu.pipeline_mode<synchronous>, transform_indices = @transform_7, window_bounds = array<i64: 1, 128>}, {pipeline_mode = #tpu.pipeline_mode<synchronous>, transform_indices = @transform_8, window_bounds = array<i64: 1, 128>}, {pipeline_mode = #tpu.pipeline_mode<synchronous>, transform_indices = @transform_9, window_bounds = array<i64: 5, 128>}, {transform_indices = @transform_10, window_bounds = array<i64: 1, 256, 128>}, {transform_indices = @transform_11, window_bounds = array<i64: 1, 5, 256>}]} {
    %c0 = arith.constant 0 : index
    %c0_0 = arith.constant 0 : index
    %c0_1 = arith.constant 0 : index
    %0 = vector.load %arg1[%c0, %c0_0, %c0_1] : memref<1x64x128xf32, #tpu.memory_space<vmem>>, vector<1x64x128xf32>
    %1 = vector.shape_cast %0 : vector<1x64x128xf32> to vector<64x128xf32>
    %2 = arith.truncf %1 : vector<64x128xf32> to vector<64x128xbf16>
    %c0_2 = arith.constant 0 : index
    %c0_3 = arith.constant 0 : index
    %3 = vector.load %arg4[%c0_2, %c0_3] : memref<128x1152xbf16, #tpu.memory_space<vmem>>, vector<128x1152xbf16>
    %cst = arith.constant dense<0.000000e+00> : vector<64x1152xf32>
    %4 = tpu.matmul %2, %3, %cst {dimension_numbers = #tpu.dot_dimension_numbers<[1], [0], [0], [1], [0, 0, 1, 1], [], []>} : vector<64x128xbf16>, vector<128x1152xbf16>, vector<64x1152xf32> -> vector<64x1152xf32>
    %5 = arith.truncf %4 : vector<64x1152xf32> to vector<64x1152xbf16>
    %cst_4 = arith.constant 0.000000e+00 : f32
    %6 = vector.broadcast %cst_4 : f32 to vector<256x128xf32>
    %c0_5 = arith.constant 0 : index
    %c0_6 = arith.constant 0 : index
    %c0_7 = arith.constant 0 : index
    %7 = vector.load %arg3[%c0_5, %c0_6, %c0_7] : memref<9x256x64xbf16, #tpu.memory_space<vmem>>, vector<1x256x64xbf16>
    %8 = vector.shape_cast %7 : vector<1x256x64xbf16> to vector<256x64xbf16>
    %9 = vector.extract_strided_slice %5 {offsets = [0, 0], sizes = [64, 128], strides = [1, 1]} : vector<64x1152xbf16> to vector<64x128xbf16>
    %cst_8 = arith.constant dense<0.000000e+00> : vector<256x128xf32>
    %10 = tpu.matmul %8, %9, %cst_8 {dimension_numbers = #tpu.dot_dimension_numbers<[1], [0], [0], [1], [0, 0, 1, 1], [], []>} : vector<256x64xbf16>, vector<64x128xbf16>, vector<256x128xf32> -> vector<256x128xf32>
    %11 = arith.addf %6, %10 : vector<256x128xf32>
    %c1 = arith.constant 1 : index
    %c0_9 = arith.constant 0 : index
    %c0_10 = arith.constant 0 : index
    %12 = vector.load %arg3[%c1, %c0_9, %c0_10] : memref<9x256x64xbf16, #tpu.memory_space<vmem>>, vector<1x256x64xbf16>
    %13 = vector.shape_cast %12 : vector<1x256x64xbf16> to vector<256x64xbf16>
    %14 = vector.extract_strided_slice %5 {offsets = [0, 128], sizes = [64, 128], strides = [1, 1]} : vector<64x1152xbf16> to vector<64x128xbf16>
    %cst_11 = arith.constant dense<0.000000e+00> : vector<256x128xf32>
    %15 = tpu.matmul %13, %14, %cst_11 {dimension_numbers = #tpu.dot_dimension_numbers<[1], [0], [0], [1], [0, 0, 1, 1], [], []>} : vector<256x64xbf16>, vector<64x128xbf16>, vector<256x128xf32> -> vector<256x128xf32>
    %16 = arith.addf %11, %15 : vector<256x128xf32>
    %c2 = arith.constant 2 : index
    %c0_12 = arith.constant 0 : index
    %c0_13 = arith.constant 0 : index
    %17 = vector.load %arg3[%c2, %c0_12, %c0_13] : memref<9x256x64xbf16, #tpu.memory_space<vmem>>, vector<1x256x64xbf16>
    %18 = vector.shape_cast %17 : vector<1x256x64xbf16> to vector<256x64xbf16>
    %19 = vector.extract_strided_slice %5 {offsets = [0, 256], sizes = [64, 128], strides = [1, 1]} : vector<64x1152xbf16> to vector<64x128xbf16>
    %cst_14 = arith.constant dense<0.000000e+00> : vector<256x128xf32>
    %20 = tpu.matmul %18, %19, %cst_14 {dimension_numbers = #tpu.dot_dimension_numbers<[1], [0], [0], [1], [0, 0, 1, 1], [], []>} : vector<256x64xbf16>, vector<64x128xbf16>, vector<256x128xf32> -> vector<256x128xf32>
    %21 = arith.addf %16, %20 : vector<256x128xf32>
    %c3 = arith.constant 3 : index
    %c0_15 = arith.constant 0 : index
    %c0_16 = arith.constant 0 : index
    %22 = vector.load %arg3[%c3, %c0_15, %c0_16] : memref<9x256x64xbf16, #tpu.memory_space<vmem>>, vector<1x256x64xbf16>
    %23 = vector.shape_cast %22 : vector<1x256x64xbf16> to vector<256x64xbf16>
    %24 = vector.extract_strided_slice %5 {offsets = [0, 384], sizes = [64, 128], strides = [1, 1]} : vector<64x1152xbf16> to vector<64x128xbf16>
    %cst_17 = arith.constant dense<0.000000e+00> : vector<256x128xf32>
    %25 = tpu.matmul %23, %24, %cst_17 {dimension_numbers = #tpu.dot_dimension_numbers<[1], [0], [0], [1], [0, 0, 1, 1], [], []>} : vector<256x64xbf16>, vector<64x128xbf16>, vector<256x128xf32> -> vector<256x128xf32>
    %26 = arith.addf %21, %25 : vector<256x128xf32>
    %c4 = arith.constant 4 : index
    %c0_18 = arith.constant 0 : index
    %c0_19 = arith.constant 0 : index
    %27 = vector.load %arg3[%c4, %c0_18, %c0_19] : memref<9x256x64xbf16, #tpu.memory_space<vmem>>, vector<1x256x64xbf16>
    %28 = vector.shape_cast %27 : vector<1x256x64xbf16> to vector<256x64xbf16>
    %29 = vector.extract_strided_slice %5 {offsets = [0, 512], sizes = [64, 128], strides = [1, 1]} : vector<64x1152xbf16> to vector<64x128xbf16>
    %cst_20 = arith.constant dense<0.000000e+00> : vector<256x128xf32>
    %30 = tpu.matmul %28, %29, %cst_20 {dimension_numbers = #tpu.dot_dimension_numbers<[1], [0], [0], [1], [0, 0, 1, 1], [], []>} : vector<256x64xbf16>, vector<64x128xbf16>, vector<256x128xf32> -> vector<256x128xf32>
    %31 = arith.addf %26, %30 : vector<256x128xf32>
    %c5 = arith.constant 5 : index
    %c0_21 = arith.constant 0 : index
    %c0_22 = arith.constant 0 : index
    %32 = vector.load %arg3[%c5, %c0_21, %c0_22] : memref<9x256x64xbf16, #tpu.memory_space<vmem>>, vector<1x256x64xbf16>
    %33 = vector.shape_cast %32 : vector<1x256x64xbf16> to vector<256x64xbf16>
    %34 = vector.extract_strided_slice %5 {offsets = [0, 640], sizes = [64, 128], strides = [1, 1]} : vector<64x1152xbf16> to vector<64x128xbf16>
    %cst_23 = arith.constant dense<0.000000e+00> : vector<256x128xf32>
    %35 = tpu.matmul %33, %34, %cst_23 {dimension_numbers = #tpu.dot_dimension_numbers<[1], [0], [0], [1], [0, 0, 1, 1], [], []>} : vector<256x64xbf16>, vector<64x128xbf16>, vector<256x128xf32> -> vector<256x128xf32>
    %36 = arith.addf %31, %35 : vector<256x128xf32>
    %c6 = arith.constant 6 : index
    %c0_24 = arith.constant 0 : index
    %c0_25 = arith.constant 0 : index
    %37 = vector.load %arg3[%c6, %c0_24, %c0_25] : memref<9x256x64xbf16, #tpu.memory_space<vmem>>, vector<1x256x64xbf16>
    %38 = vector.shape_cast %37 : vector<1x256x64xbf16> to vector<256x64xbf16>
    %39 = vector.extract_strided_slice %5 {offsets = [0, 768], sizes = [64, 128], strides = [1, 1]} : vector<64x1152xbf16> to vector<64x128xbf16>
    %cst_26 = arith.constant dense<0.000000e+00> : vector<256x128xf32>
    %40 = tpu.matmul %38, %39, %cst_26 {dimension_numbers = #tpu.dot_dimension_numbers<[1], [0], [0], [1], [0, 0, 1, 1], [], []>} : vector<256x64xbf16>, vector<64x128xbf16>, vector<256x128xf32> -> vector<256x128xf32>
    %41 = arith.addf %36, %40 : vector<256x128xf32>
    %c7 = arith.constant 7 : index
    %c0_27 = arith.constant 0 : index
    %c0_28 = arith.constant 0 : index
    %42 = vector.load %arg3[%c7, %c0_27, %c0_28] : memref<9x256x64xbf16, #tpu.memory_space<vmem>>, vector<1x256x64xbf16>
    %43 = vector.shape_cast %42 : vector<1x256x64xbf16> to vector<256x64xbf16>
    %44 = vector.extract_strided_slice %5 {offsets = [0, 896], sizes = [64, 128], strides = [1, 1]} : vector<64x1152xbf16> to vector<64x128xbf16>
    %cst_29 = arith.constant dense<0.000000e+00> : vector<256x128xf32>
    %45 = tpu.matmul %43, %44, %cst_29 {dimension_numbers = #tpu.dot_dimension_numbers<[1], [0], [0], [1], [0, 0, 1, 1], [], []>} : vector<256x64xbf16>, vector<64x128xbf16>, vector<256x128xf32> -> vector<256x128xf32>
    %46 = arith.addf %41, %45 : vector<256x128xf32>
    %c8 = arith.constant 8 : index
    %c0_30 = arith.constant 0 : index
    %c0_31 = arith.constant 0 : index
    %47 = vector.load %arg3[%c8, %c0_30, %c0_31] : memref<9x256x64xbf16, #tpu.memory_space<vmem>>, vector<1x256x64xbf16>
    %48 = vector.shape_cast %47 : vector<1x256x64xbf16> to vector<256x64xbf16>
    %49 = vector.extract_strided_slice %5 {offsets = [0, 1024], sizes = [64, 128], strides = [1, 1]} : vector<64x1152xbf16> to vector<64x128xbf16>
    %cst_32 = arith.constant dense<0.000000e+00> : vector<256x128xf32>
    %50 = tpu.matmul %48, %49, %cst_32 {dimension_numbers = #tpu.dot_dimension_numbers<[1], [0], [0], [1], [0, 0, 1, 1], [], []>} : vector<256x64xbf16>, vector<64x128xbf16>, vector<256x128xf32> -> vector<256x128xf32>
    %51 = arith.addf %46, %50 : vector<256x128xf32>
    %c0_33 = arith.constant 0 : index
    %c0_34 = arith.constant 0 : index
    %52 = vector.load %arg5[%c0_33, %c0_34] : memref<1x128xf32, #tpu.memory_space<vmem>>, vector<1x128xf32>
    %53 = vector.broadcast %52 : vector<1x128xf32> to vector<256x128xf32>
    %54 = arith.mulf %51, %53 : vector<256x128xf32>
    %c0_35 = arith.constant 0 : index
    %c0_36 = arith.constant 0 : index
    %55 = vector.load %arg6[%c0_35, %c0_36] : memref<1x128xf32, #tpu.memory_space<vmem>>, vector<1x128xf32>
    %56 = vector.broadcast %55 : vector<1x128xf32> to vector<256x128xf32>
    %57 = arith.addf %54, %56 : vector<256x128xf32>
    %c0_37 = arith.constant 0 : index
    %c0_38 = arith.constant 0 : index
    %c0_39 = arith.constant 0 : index
    %58 = vector.load %arg2[%c0_37, %c0_38, %c0_39] : memref<1x256x64xf32, #tpu.memory_space<vmem>>, vector<1x256x64xf32>
    %59 = vector.shape_cast %58 : vector<1x256x64xf32> to vector<256x64xf32>
    %60 = arith.truncf %59 : vector<256x64xf32> to vector<256x64xbf16>
    %c0_40 = arith.constant 0 : index
    %c0_41 = arith.constant 0 : index
    %61 = vector.load %arg7[%c0_40, %c0_41] : memref<64x128xbf16, #tpu.memory_space<vmem>>, vector<64x128xbf16>
    %cst_42 = arith.constant dense<0.000000e+00> : vector<256x128xf32>
    %62 = tpu.matmul %60, %61, %cst_42 {dimension_numbers = #tpu.dot_dimension_numbers<[1], [0], [0], [1], [0, 0, 1, 1], [], []>} : vector<256x64xbf16>, vector<64x128xbf16>, vector<256x128xf32> -> vector<256x128xf32>
    %c0_43 = arith.constant 0 : index
    %c0_44 = arith.constant 0 : index
    %63 = vector.load %arg8[%c0_43, %c0_44] : memref<1x128xf32, #tpu.memory_space<vmem>>, vector<1x128xf32>
    %64 = vector.broadcast %63 : vector<1x128xf32> to vector<256x128xf32>
    %65 = arith.mulf %62, %64 : vector<256x128xf32>
    %c0_45 = arith.constant 0 : index
    %c0_46 = arith.constant 0 : index
    %66 = vector.load %arg9[%c0_45, %c0_46] : memref<1x128xf32, #tpu.memory_space<vmem>>, vector<1x128xf32>
    %67 = vector.broadcast %66 : vector<1x128xf32> to vector<256x128xf32>
    %68 = arith.addf %65, %67 : vector<256x128xf32>
    %69 = arith.addf %57, %68 : vector<256x128xf32>
    %cst_47 = arith.constant 0.000000e+00 : f32
    %70 = vector.broadcast %cst_47 : f32 to vector<256x128xf32>
    %71 = arith.maximumf %69, %70 : vector<256x128xf32>
    %c0_48 = arith.constant 0 : index
    %c0_49 = arith.constant 0 : index
    %c0_50 = arith.constant 0 : index
    %72 = vector.load %arg11[%c0_48, %c0_49, %c0_50] : memref<1x256x128xf32, #tpu.memory_space<vmem>>, vector<1x256x128xf32>
    %73 = vector.shape_cast %72 : vector<1x256x128xf32> to vector<256x128xf32>
    %74 = vector.shape_cast %71 : vector<256x128xf32> to vector<1x256x128xf32>
    tpu.vector_store %arg11[%c0_48, %c0_49, %c0_50], %74 {strides = array<i32>} : memref<1x256x128xf32, #tpu.memory_space<vmem>>, vector<1x256x128xf32>,
    %c0_51 = arith.constant 0 : index
    %c0_52 = arith.constant 0 : index
    %75 = vector.load %arg10[%c0_51, %c0_52] : memref<5x128xbf16, #tpu.memory_space<vmem>>, vector<5x128xbf16>
    %76 = arith.truncf %57 : vector<256x128xf32> to vector<256x128xbf16>
    "tpu.trace_start"() <{level = 10 : i32, message = "nk,mk->nm"}> : () -> ()
    %cst_53 = arith.constant dense<0.000000e+00> : vector<5x256xf32>
    %77 = tpu.matmul %75, %76, %cst_53 {dimension_numbers = #tpu.dot_dimension_numbers<[1], [1], [0], [0], [0, 0, 1, 0], [], []>} : vector<5x128xbf16>, vector<256x128xbf16>, vector<5x256xf32> -> vector<5x256xf32>
    "tpu.trace_stop"() : () -> ()
    %c0_54 = arith.constant 0 : index
    %c0_55 = arith.constant 0 : index
    %c0_56 = arith.constant 0 : index
    %78 = vector.load %arg12[%c0_54, %c0_55, %c0_56] : memref<1x5x256xf32, #tpu.memory_space<vmem>>, vector<1x5x256xf32>
    %79 = vector.shape_cast %78 : vector<1x5x256xf32> to vector<5x256xf32>
    %80 = vector.shape_cast %77 : vector<5x256xf32> to vector<1x5x256xf32>
    tpu.vector_store %arg12[%c0_54, %c0_55, %c0_56], %80 {strides = array<i32>} : memref<1x5x256xf32, #tpu.memory_space<vmem>>, vector<1x5x256xf32>,
    return
  }
  func.func @transform_0(%arg0: i32) -> (i32, i32, i32) {
    %c0_i32 = arith.constant 0 : i32
    %c0_i32_0 = arith.constant 0 : i32
    %c0_i32_1 = arith.constant 0 : i32
    return %arg0, %c0_i32, %c0_i32_0 : i32, i32, i32
  }
  func.func @transform_1(%arg0: i32) -> (i32, i32, i32) {
    %c0_i32 = arith.constant 0 : i32
    %c0_i32_0 = arith.constant 0 : i32
    %c0_i32_1 = arith.constant 0 : i32
    return %arg0, %c0_i32, %c0_i32_0 : i32, i32, i32
  }
  func.func @transform_2(%arg0: i32) -> (i32, i32, i32) {
    %c0_i32 = arith.constant 0 : i32
    %c0_i32_0 = arith.constant 0 : i32
    %c0_i32_1 = arith.constant 0 : i32
    %c0_i32_2 = arith.constant 0 : i32
    return %c0_i32, %c0_i32_0, %c0_i32_1 : i32, i32, i32
  }
  func.func @transform_3(%arg0: i32) -> (i32, i32) {
    %c0_i32 = arith.constant 0 : i32
    %c0_i32_0 = arith.constant 0 : i32
    %c0_i32_1 = arith.constant 0 : i32
    return %c0_i32, %c0_i32_0 : i32, i32
  }
  func.func @transform_4(%arg0: i32) -> (i32, i32) {
    %c0_i32 = arith.constant 0 : i32
    %c0_i32_0 = arith.constant 0 : i32
    %c0_i32_1 = arith.constant 0 : i32
    return %c0_i32, %c0_i32_0 : i32, i32
  }
  func.func @transform_5(%arg0: i32) -> (i32, i32) {
    %c0_i32 = arith.constant 0 : i32
    %c0_i32_0 = arith.constant 0 : i32
    %c0_i32_1 = arith.constant 0 : i32
    return %c0_i32, %c0_i32_0 : i32, i32
  }
  func.func @transform_6(%arg0: i32) -> (i32, i32) {
    %c0_i32 = arith.constant 0 : i32
    %c0_i32_0 = arith.constant 0 : i32
    %c0_i32_1 = arith.constant 0 : i32
    return %c0_i32, %c0_i32_0 : i32, i32
  }
  func.func @transform_7(%arg0: i32) -> (i32, i32) {
    %c0_i32 = arith.constant 0 : i32
    %c0_i32_0 = arith.constant 0 : i32
    %c0_i32_1 = arith.constant 0 : i32
    return %c0_i32, %c0_i32_0 : i32, i32
  }
  func.func @transform_8(%arg0: i32) -> (i32, i32) {
    %c0_i32 = arith.constant 0 : i32
    %c0_i32_0 = arith.constant 0 : i32
    %c0_i32_1 = arith.constant 0 : i32
    return %c0_i32, %c0_i32_0 : i32, i32
  }
  func.func @transform_9(%arg0: i32) -> (i32, i32) {
    %c0_i32 = arith.constant 0 : i32
    %c0_i32_0 = arith.constant 0 : i32
    %c0_i32_1 = arith.constant 0 : i32
    return %c0_i32, %c0_i32_0 : i32, i32
  }
  func.func @transform_10(%arg0: i32) -> (i32, i32, i32) {
    %c0_i32 = arith.constant 0 : i32
    %c0_i32_0 = arith.constant 0 : i32
    %c0_i32_1 = arith.constant 0 : i32
    return %arg0, %c0_i32, %c0_i32_0 : i32, i32, i32
  }
  func.func @transform_11(%arg0: i32) -> (i32, i32, i32) {
    %c0_i32 = arith.constant 0 : i32
    %c0_i32_0 = arith.constant 0 : i32
    %c0_i32_1 = arith.constant 0 : i32
    return %arg0, %c0_i32, %c0_i32_0 : i32, i32, i32
  }
}

module attributes {stable_mosaic.version = 11 : i64} {
  func.func @_head_tail_kernel(%arg0: i32, %arg1: memref<1x16x2048xf32, #tpu.memory_space<vmem>>, %arg2: memref<2048x80xbf16, #tpu.memory_space<vmem>>, %arg3: memref<32x16xbf16, #tpu.memory_space<vmem>>, %arg4: memref<80x160xbf16, #tpu.memory_space<vmem>>, %arg5: memref<128x32xbf16, #tpu.memory_space<vmem>>, %arg6: memref<160x640xbf16, #tpu.memory_space<vmem>>, %arg7: memref<1x5x32x32xf32, #tpu.memory_space<vmem>>, %arg8: memref<1x5x128x128xf32, #tpu.memory_space<vmem>>) attributes {dimension_semantics = [#tpu.dimension_semantics<parallel>], iteration_bounds = array<i64: 2>, scalar_prefetch = 0 : i64, scratch_operands = 0 : i64, tpu.core_type = #tpu.core_type<tc>, window_params = [{transform_indices = @transform_0, window_bounds = array<i64: 1, 16, 2048>}, {pipeline_mode = #tpu.pipeline_mode<synchronous>, transform_indices = @transform_1, window_bounds = array<i64: 2048, 80>}, {pipeline_mode = #tpu.pipeline_mode<synchronous>, transform_indices = @transform_2, window_bounds = array<i64: 32, 16>}, {pipeline_mode = #tpu.pipeline_mode<synchronous>, transform_indices = @transform_3, window_bounds = array<i64: 80, 160>}, {pipeline_mode = #tpu.pipeline_mode<synchronous>, transform_indices = @transform_4, window_bounds = array<i64: 128, 32>}, {pipeline_mode = #tpu.pipeline_mode<synchronous>, transform_indices = @transform_5, window_bounds = array<i64: 160, 640>}, {transform_indices = @transform_6, window_bounds = array<i64: 1, 5, 32, 32>}, {transform_indices = @transform_7, window_bounds = array<i64: 1, 5, 128, 128>}]} {
    %c0 = arith.constant 0 : index
    %c0_0 = arith.constant 0 : index
    %c0_1 = arith.constant 0 : index
    %0 = vector.load %arg1[%c0, %c0_0, %c0_1] : memref<1x16x2048xf32, #tpu.memory_space<vmem>>, vector<1x16x2048xf32>
    %1 = vector.shape_cast %0 : vector<1x16x2048xf32> to vector<16x2048xf32>
    %2 = arith.truncf %1 : vector<16x2048xf32> to vector<16x2048xbf16>
    %c0_2 = arith.constant 0 : index
    %c0_3 = arith.constant 0 : index
    %3 = vector.load %arg2[%c0_2, %c0_3] : memref<2048x80xbf16, #tpu.memory_space<vmem>>, vector<2048x80xbf16>
    %cst = arith.constant dense<0.000000e+00> : vector<16x80xf32>
    %4 = tpu.matmul %2, %3, %cst {dimension_numbers = #tpu.dot_dimension_numbers<[1], [0], [0], [1], [0, 0, 1, 1], [], []>} : vector<16x2048xbf16>, vector<2048x80xbf16>, vector<16x80xf32> -> vector<16x80xf32>
    %c0_4 = arith.constant 0 : index
    %c0_5 = arith.constant 0 : index
    %5 = vector.load %arg3[%c0_4, %c0_5] : memref<32x16xbf16, #tpu.memory_space<vmem>>, vector<32x16xbf16>
    %6 = arith.truncf %4 : vector<16x80xf32> to vector<16x80xbf16>
    %cst_6 = arith.constant dense<0.000000e+00> : vector<32x80xf32>
    %7 = tpu.matmul %5, %6, %cst_6 {dimension_numbers = #tpu.dot_dimension_numbers<[1], [0], [0], [1], [0, 0, 1, 1], [], []>} : vector<32x16xbf16>, vector<16x80xbf16>, vector<32x80xf32> -> vector<32x80xf32>
    %8 = arith.truncf %7 : vector<32x80xf32> to vector<32x80xbf16>
    %c0_7 = arith.constant 0 : index
    %c0_8 = arith.constant 0 : index
    %9 = vector.load %arg4[%c0_7, %c0_8] : memref<80x160xbf16, #tpu.memory_space<vmem>>, vector<80x160xbf16>
    %cst_9 = arith.constant dense<0.000000e+00> : vector<32x160xf32>
    %10 = tpu.matmul %8, %9, %cst_9 {dimension_numbers = #tpu.dot_dimension_numbers<[1], [0], [0], [1], [0, 0, 1, 1], [], []>} : vector<32x80xbf16>, vector<80x160xbf16>, vector<32x160xf32> -> vector<32x160xf32>
    %c0_10 = arith.constant 0 : index
    %c0_11 = arith.constant 0 : index
    %11 = vector.load %arg5[%c0_10, %c0_11] : memref<128x32xbf16, #tpu.memory_space<vmem>>, vector<128x32xbf16>
    %12 = arith.truncf %10 : vector<32x160xf32> to vector<32x160xbf16>
    %cst_12 = arith.constant dense<0.000000e+00> : vector<128x160xf32>
    %13 = tpu.matmul %11, %12, %cst_12 {dimension_numbers = #tpu.dot_dimension_numbers<[1], [0], [0], [1], [0, 0, 1, 1], [], []>} : vector<128x32xbf16>, vector<32x160xbf16>, vector<128x160xf32> -> vector<128x160xf32>
    %14 = arith.truncf %13 : vector<128x160xf32> to vector<128x160xbf16>
    %c0_13 = arith.constant 0 : index
    %c0_14 = arith.constant 0 : index
    %15 = vector.load %arg6[%c0_13, %c0_14] : memref<160x640xbf16, #tpu.memory_space<vmem>>, vector<160x640xbf16>
    %cst_15 = arith.constant dense<0.000000e+00> : vector<128x640xf32>
    %16 = tpu.matmul %14, %15, %cst_15 {dimension_numbers = #tpu.dot_dimension_numbers<[1], [0], [0], [1], [0, 0, 1, 1], [], []>} : vector<128x160xbf16>, vector<160x640xbf16>, vector<128x640xf32> -> vector<128x640xf32>
    %17 = vector.extract_strided_slice %10 {offsets = [0, 0], sizes = [32, 32], strides = [1, 1]} : vector<32x160xf32> to vector<32x32xf32>
    %c0_16 = arith.constant 0 : index
    %c0_17 = arith.constant 0 : index
    %c0_18 = arith.constant 0 : index
    %c0_19 = arith.constant 0 : index
    %18 = vector.load %arg7[%c0_16, %c0_17, %c0_18, %c0_19] : memref<1x5x32x32xf32, #tpu.memory_space<vmem>>, vector<1x1x32x32xf32>
    %19 = vector.shape_cast %18 : vector<1x1x32x32xf32> to vector<32x32xf32>
    %20 = vector.shape_cast %17 : vector<32x32xf32> to vector<1x1x32x32xf32>
    tpu.vector_store %arg7[%c0_16, %c0_17, %c0_18, %c0_19], %20 {strides = array<i32>} : memref<1x5x32x32xf32, #tpu.memory_space<vmem>>, vector<1x1x32x32xf32>,
    %21 = vector.extract_strided_slice %16 {offsets = [0, 0], sizes = [128, 128], strides = [1, 1]} : vector<128x640xf32> to vector<128x128xf32>
    %c0_20 = arith.constant 0 : index
    %c0_21 = arith.constant 0 : index
    %c0_22 = arith.constant 0 : index
    %c0_23 = arith.constant 0 : index
    %22 = vector.load %arg8[%c0_20, %c0_21, %c0_22, %c0_23] : memref<1x5x128x128xf32, #tpu.memory_space<vmem>>, vector<1x1x128x128xf32>
    %23 = vector.shape_cast %22 : vector<1x1x128x128xf32> to vector<128x128xf32>
    %24 = vector.shape_cast %21 : vector<128x128xf32> to vector<1x1x128x128xf32>
    tpu.vector_store %arg8[%c0_20, %c0_21, %c0_22, %c0_23], %24 {strides = array<i32>} : memref<1x5x128x128xf32, #tpu.memory_space<vmem>>, vector<1x1x128x128xf32>,
    %25 = vector.extract_strided_slice %10 {offsets = [0, 32], sizes = [32, 32], strides = [1, 1]} : vector<32x160xf32> to vector<32x32xf32>
    %c0_24 = arith.constant 0 : index
    %c1 = arith.constant 1 : index
    %c0_25 = arith.constant 0 : index
    %c0_26 = arith.constant 0 : index
    %26 = vector.load %arg7[%c0_24, %c1, %c0_25, %c0_26] : memref<1x5x32x32xf32, #tpu.memory_space<vmem>>, vector<1x1x32x32xf32>
    %27 = vector.shape_cast %26 : vector<1x1x32x32xf32> to vector<32x32xf32>
    %28 = vector.shape_cast %25 : vector<32x32xf32> to vector<1x1x32x32xf32>
    tpu.vector_store %arg7[%c0_24, %c1, %c0_25, %c0_26], %28 {strides = array<i32>} : memref<1x5x32x32xf32, #tpu.memory_space<vmem>>, vector<1x1x32x32xf32>,
    %29 = vector.extract_strided_slice %16 {offsets = [0, 128], sizes = [128, 128], strides = [1, 1]} : vector<128x640xf32> to vector<128x128xf32>
    %c0_27 = arith.constant 0 : index
    %c1_28 = arith.constant 1 : index
    %c0_29 = arith.constant 0 : index
    %c0_30 = arith.constant 0 : index
    %30 = vector.load %arg8[%c0_27, %c1_28, %c0_29, %c0_30] : memref<1x5x128x128xf32, #tpu.memory_space<vmem>>, vector<1x1x128x128xf32>
    %31 = vector.shape_cast %30 : vector<1x1x128x128xf32> to vector<128x128xf32>
    %32 = vector.shape_cast %29 : vector<128x128xf32> to vector<1x1x128x128xf32>
    tpu.vector_store %arg8[%c0_27, %c1_28, %c0_29, %c0_30], %32 {strides = array<i32>} : memref<1x5x128x128xf32, #tpu.memory_space<vmem>>, vector<1x1x128x128xf32>,
    %33 = vector.extract_strided_slice %10 {offsets = [0, 64], sizes = [32, 32], strides = [1, 1]} : vector<32x160xf32> to vector<32x32xf32>
    %c0_31 = arith.constant 0 : index
    %c2 = arith.constant 2 : index
    %c0_32 = arith.constant 0 : index
    %c0_33 = arith.constant 0 : index
    %34 = vector.load %arg7[%c0_31, %c2, %c0_32, %c0_33] : memref<1x5x32x32xf32, #tpu.memory_space<vmem>>, vector<1x1x32x32xf32>
    %35 = vector.shape_cast %34 : vector<1x1x32x32xf32> to vector<32x32xf32>
    %36 = vector.shape_cast %33 : vector<32x32xf32> to vector<1x1x32x32xf32>
    tpu.vector_store %arg7[%c0_31, %c2, %c0_32, %c0_33], %36 {strides = array<i32>} : memref<1x5x32x32xf32, #tpu.memory_space<vmem>>, vector<1x1x32x32xf32>,
    %37 = vector.extract_strided_slice %16 {offsets = [0, 256], sizes = [128, 128], strides = [1, 1]} : vector<128x640xf32> to vector<128x128xf32>
    %c0_34 = arith.constant 0 : index
    %c2_35 = arith.constant 2 : index
    %c0_36 = arith.constant 0 : index
    %c0_37 = arith.constant 0 : index
    %38 = vector.load %arg8[%c0_34, %c2_35, %c0_36, %c0_37] : memref<1x5x128x128xf32, #tpu.memory_space<vmem>>, vector<1x1x128x128xf32>
    %39 = vector.shape_cast %38 : vector<1x1x128x128xf32> to vector<128x128xf32>
    %40 = vector.shape_cast %37 : vector<128x128xf32> to vector<1x1x128x128xf32>
    tpu.vector_store %arg8[%c0_34, %c2_35, %c0_36, %c0_37], %40 {strides = array<i32>} : memref<1x5x128x128xf32, #tpu.memory_space<vmem>>, vector<1x1x128x128xf32>,
    %41 = vector.extract_strided_slice %10 {offsets = [0, 96], sizes = [32, 32], strides = [1, 1]} : vector<32x160xf32> to vector<32x32xf32>
    %c0_38 = arith.constant 0 : index
    %c3 = arith.constant 3 : index
    %c0_39 = arith.constant 0 : index
    %c0_40 = arith.constant 0 : index
    %42 = vector.load %arg7[%c0_38, %c3, %c0_39, %c0_40] : memref<1x5x32x32xf32, #tpu.memory_space<vmem>>, vector<1x1x32x32xf32>
    %43 = vector.shape_cast %42 : vector<1x1x32x32xf32> to vector<32x32xf32>
    %44 = vector.shape_cast %41 : vector<32x32xf32> to vector<1x1x32x32xf32>
    tpu.vector_store %arg7[%c0_38, %c3, %c0_39, %c0_40], %44 {strides = array<i32>} : memref<1x5x32x32xf32, #tpu.memory_space<vmem>>, vector<1x1x32x32xf32>,
    %45 = vector.extract_strided_slice %16 {offsets = [0, 384], sizes = [128, 128], strides = [1, 1]} : vector<128x640xf32> to vector<128x128xf32>
    %c0_41 = arith.constant 0 : index
    %c3_42 = arith.constant 3 : index
    %c0_43 = arith.constant 0 : index
    %c0_44 = arith.constant 0 : index
    %46 = vector.load %arg8[%c0_41, %c3_42, %c0_43, %c0_44] : memref<1x5x128x128xf32, #tpu.memory_space<vmem>>, vector<1x1x128x128xf32>
    %47 = vector.shape_cast %46 : vector<1x1x128x128xf32> to vector<128x128xf32>
    %48 = vector.shape_cast %45 : vector<128x128xf32> to vector<1x1x128x128xf32>
    tpu.vector_store %arg8[%c0_41, %c3_42, %c0_43, %c0_44], %48 {strides = array<i32>} : memref<1x5x128x128xf32, #tpu.memory_space<vmem>>, vector<1x1x128x128xf32>,
    %49 = vector.extract_strided_slice %10 {offsets = [0, 128], sizes = [32, 32], strides = [1, 1]} : vector<32x160xf32> to vector<32x32xf32>
    %c0_45 = arith.constant 0 : index
    %c4 = arith.constant 4 : index
    %c0_46 = arith.constant 0 : index
    %c0_47 = arith.constant 0 : index
    %50 = vector.load %arg7[%c0_45, %c4, %c0_46, %c0_47] : memref<1x5x32x32xf32, #tpu.memory_space<vmem>>, vector<1x1x32x32xf32>
    %51 = vector.shape_cast %50 : vector<1x1x32x32xf32> to vector<32x32xf32>
    %52 = vector.shape_cast %49 : vector<32x32xf32> to vector<1x1x32x32xf32>
    tpu.vector_store %arg7[%c0_45, %c4, %c0_46, %c0_47], %52 {strides = array<i32>} : memref<1x5x32x32xf32, #tpu.memory_space<vmem>>, vector<1x1x32x32xf32>,
    %53 = vector.extract_strided_slice %16 {offsets = [0, 512], sizes = [128, 128], strides = [1, 1]} : vector<128x640xf32> to vector<128x128xf32>
    %c0_48 = arith.constant 0 : index
    %c4_49 = arith.constant 4 : index
    %c0_50 = arith.constant 0 : index
    %c0_51 = arith.constant 0 : index
    %54 = vector.load %arg8[%c0_48, %c4_49, %c0_50, %c0_51] : memref<1x5x128x128xf32, #tpu.memory_space<vmem>>, vector<1x1x128x128xf32>
    %55 = vector.shape_cast %54 : vector<1x1x128x128xf32> to vector<128x128xf32>
    %56 = vector.shape_cast %53 : vector<128x128xf32> to vector<1x1x128x128xf32>
    tpu.vector_store %arg8[%c0_48, %c4_49, %c0_50, %c0_51], %56 {strides = array<i32>} : memref<1x5x128x128xf32, #tpu.memory_space<vmem>>, vector<1x1x128x128xf32>,
    return
  }
  func.func @transform_0(%arg0: i32) -> (i32, i32, i32) {
    %c0_i32 = arith.constant 0 : i32
    %c0_i32_0 = arith.constant 0 : i32
    %c0_i32_1 = arith.constant 0 : i32
    return %arg0, %c0_i32, %c0_i32_0 : i32, i32, i32
  }
  func.func @transform_1(%arg0: i32) -> (i32, i32) {
    %c0_i32 = arith.constant 0 : i32
    %c0_i32_0 = arith.constant 0 : i32
    %c0_i32_1 = arith.constant 0 : i32
    return %c0_i32, %c0_i32_0 : i32, i32
  }
  func.func @transform_2(%arg0: i32) -> (i32, i32) {
    %c0_i32 = arith.constant 0 : i32
    %c0_i32_0 = arith.constant 0 : i32
    %c0_i32_1 = arith.constant 0 : i32
    return %c0_i32, %c0_i32_0 : i32, i32
  }
  func.func @transform_3(%arg0: i32) -> (i32, i32) {
    %c0_i32 = arith.constant 0 : i32
    %c0_i32_0 = arith.constant 0 : i32
    %c0_i32_1 = arith.constant 0 : i32
    return %c0_i32, %c0_i32_0 : i32, i32
  }
  func.func @transform_4(%arg0: i32) -> (i32, i32) {
    %c0_i32 = arith.constant 0 : i32
    %c0_i32_0 = arith.constant 0 : i32
    %c0_i32_1 = arith.constant 0 : i32
    return %c0_i32, %c0_i32_0 : i32, i32
  }
  func.func @transform_5(%arg0: i32) -> (i32, i32) {
    %c0_i32 = arith.constant 0 : i32
    %c0_i32_0 = arith.constant 0 : i32
    %c0_i32_1 = arith.constant 0 : i32
    return %c0_i32, %c0_i32_0 : i32, i32
  }
  func.func @transform_6(%arg0: i32) -> (i32, i32, i32, i32) {
    %c0_i32 = arith.constant 0 : i32
    %c0_i32_0 = arith.constant 0 : i32
    %c0_i32_1 = arith.constant 0 : i32
    %c0_i32_2 = arith.constant 0 : i32
    return %arg0, %c0_i32, %c0_i32_0, %c0_i32_1 : i32, i32, i32, i32
  }
  func.func @transform_7(%arg0: i32) -> (i32, i32, i32, i32) {
    %c0_i32 = arith.constant 0 : i32
    %c0_i32_0 = arith.constant 0 : i32
    %c0_i32_1 = arith.constant 0 : i32
    %c0_i32_2 = arith.constant 0 : i32
    return %arg0, %c0_i32, %c0_i32_0, %c0_i32_1 : i32, i32, i32, i32
  }
}

</mosaic_0001>

<bundles_post_ra>
// kernel: ic_head_block.3
= control target key start
LH: loop header
LB: loop body
LE: loop exit
PB: predicated region body
PF: predicated region fallthrough
CT: control target
= control target key end

     0   :  { %s3892_s17 = smov 0   ;;  %s5138_s0 = inlined_call_operand.vmem [shape: f32[2,16,256], index: 0, kind: input, shape index: {}]   ;;  %s5139_s1 = inlined_call_operand.vmem [shape: f32[2,64,256], index: 1, kind: input, shape index: {}]   ;;  %s5140_s2 = inlined_call_operand.vmem [shape: bf16[9,64,16], index: 2, kind: input, shape index: {}]   ;;  %s5141_s3 = inlined_call_operand.vmem [shape: bf16[256,1152], index: 3, kind: input, shape index: {}]   ;;  %s5142_s4 = inlined_call_operand.vmem [shape: f32[1,128], index: 4, kind: input, shape index: {}]   ;;  %s5143_s5 = inlined_call_operand.vmem [shape: f32[1,128], index: 5, kind: input, shape index: {}]   ;;  %s5144_s6 = inlined_call_operand.vmem [shape: bf16[256,128], index: 6, kind: input, shape index: {}]   ;;  %s5145_s7 = inlined_call_operand.vmem [shape: f32[1,128], index: 7, kind: input, shape index: {}]   ;;  %s5146_s8 = inlined_call_operand.vmem [shape: f32[1,128], index: 8, kind: input, shape index: {}]   ;;  %s5147_s9 = inlined_call_operand.vmem [shape: bf16[5,128], index: 9, kind: input, shape index: {}]   ;;  %s5148_s10 = inlined_call_operand.vmem [shape: f32[2,64,128], index: 10, kind: output, shape index: {0}]   ;;  %s5149_s11 = inlined_call_operand.vmem [shape: f32[2,5,64], index: 11, kind: output, shape index: {1}]  }
   0x1 LB: > { %s2715_s18 = sadd.s32 4294967295, %s3830_s17   ;;  %p2719_p0 = scmp.ge.s32.totalorder %s3830_s17, 1  ;;  %s3830_s17 = sphi %s3892_s17, %s22_s17  }
   0x2   : > { %p350_p1 = scmp.lt.s32.totalorder %s3830_s17, 3 }
   0x4   : > { %p351_p2 = pnand %p2719_p0, %p350_p1 }
   0x5   : > { %p399_p3 = scmp.lt.s32.totalorder (!%p351_p2), %s2715_s18, 1 }
   0x6   : > { %354 = sbr.rel (%p351_p2) target bundleno = 712 (0x2c8), region = 60 }
   0xb   : > { %v2981_v0 = vld [vmem:[%s5141_s3 + $0x1f8] sm:$0xf]  ;;  %v3683_v1 = vld [vmem:[%s5141_s3 + $0x218] sm:$0xf0]  ;;  %v2945_v2 = vld [vmem:[%s5141_s3 + $0x1b0] sm:$0xf] }
   0xc   : > { %v2982_v3 = vor.u32 %v3683_v1, %v2981_v0  ;;  %v3674_v4 = vld [vmem:[%s5141_s3 + $0x1d0] sm:$0xf0]  ;;  %v3679_v5 = vld [vmem:[%s5141_s3 + $0x1fc] sm:$0xf]  ;;  %v2983_v7 = vld [vmem:[%s5141_s3 + $0x21c] sm:$0xf0] }
   0xd   : > { %v2946_v6 = vor.u32 %v3674_v4, %v2945_v2  ;;  %v3751_v8 = vld [vmem:[%s5141_s3 + $0x43c] sm:$0xf]  ;;  %v3271_v9 = vld [vmem:[%s5141_s3 + $0x45c] sm:$0xf0]  ;;  %v2909_v10 = vld [vmem:[%s5141_s3 + $0x168] sm:$0xf]  ;;  %v2986_v12 = vor.u32 %v3679_v5, %v2983_v7 }
   0xe   : > { %1321 = vmatpush.bf16.msra.mxu1 %v2982_v3  ;;  %v3665_v11 = vld [vmem:[%s5141_s3 + $0x188] sm:$0xf0]  ;;  %v3274_v13 = vor.u32 %v3751_v8, %v3271_v9  ;;  %v3670_v14 = vld [vmem:[%s5141_s3 + $0x1b4] sm:$0xf]  ;;  %v2947_v15 = vld [vmem:[%s5141_s3 + $0x1d4] sm:$0xf0] }
   0xf   : > { %v3742_v16 = vld [vmem:[%s5141_s3 + $0x3f4] sm:$0xf]  ;;  %v3235_v17 = vld [vmem:[%s5141_s3 + $0x414] sm:$0xf0]  ;;  %1349 = vmatpush.bf16.msra.mxu2 %v2986_v12  ;;  %v2950_v18 = vor.u32 %v3670_v14, %v2947_v15  ;;  %v3661_v20 = vld [vmem:[%s5141_s3 + $0x16c] sm:$0xf]  ;;  %v2910_v21 = vor.u32 %v3665_v11, %v2909_v10 }
  0x10   : > { %1363 = vmatpush.bf16.msra.mxu3 %v3274_v13  ;;  %v3238_v19 = vor.u32 %v3742_v16, %v3235_v17  ;;  %v2911_v22 = vld [vmem:[%s5141_s3 + $0x18c] sm:$0xf0]  ;;  %v3733_v23 = vld [vmem:[%s5141_s3 + $0x3ac] sm:$0xf]  ;;  %v2873_v25 = vld [vmem:[%s5141_s3 + $0x120] sm:$0xf] }
  0x11   : > { %v3199_v24 = vld [vmem:[%s5141_s3 + $0x3cc] sm:$0xf0]  ;;  %v3656_v26 = vld [vmem:[%s5141_s3 + $0x140] sm:$0xf0]  ;;  %v2914_v27 = vor.u32 %v3661_v20, %v2911_v22  ;;  %v2875_v31 = vld [vmem:[%s5141_s3 + $0x144] sm:$0xf0] }
  0x12   : > { %1322 = vmatpush.bf16.msra.mxu1 %v2946_v6  ;;  %v3202_v28 = vor.u32 %v3733_v23, %v3199_v24  ;;  %v3652_v29 = vld [vmem:[%s5141_s3 + $0x124] sm:$0xf]  ;;  %v2874_v30 = vor.u32 %v3656_v26, %v2873_v25  ;;  %v3163_v33 = vld [vmem:[%s5141_s3 + $0x384] sm:$0xf0]  ;;  %v2837_v34 = vld [vmem:[%s5141_s3 + $0xd8] sm:$0xf] }
  0x13   : > { %1350 = vmatpush.bf16.msra.mxu2 %v2950_v18  ;;  %v3724_v32 = vld [vmem:[%s5141_s3 + $0x364] sm:$0xf]  ;;  %v3647_v35 = vld [vmem:[%s5141_s3 + $0xf8] sm:$0xf0]  ;;  %v2878_v36 = vor.u32 %v3652_v29, %v2875_v31  ;;  %v2839_v40 = vld [vmem:[%s5141_s3 + $0xfc] sm:$0xf0] }
  0x14   : > { %1364 = vmatpush.bf16.msra.mxu3 %v3238_v19  ;;  %v3166_v37 = vor.u32 %v3724_v32, %v3163_v33  ;;  %v3643_v38 = vld [vmem:[%s5141_s3 + $0xdc] sm:$0xf]  ;;  %v2838_v39 = vor.u32 %v3647_v35, %v2837_v34  ;;  %v3127_v42 = vld [vmem:[%s5141_s3 + $0x33c] sm:$0xf0]  ;;  %v2801_v43 = vld [vmem:[%s5141_s3 + $0x90] sm:$0xf] }
  0x15   : > { %v3715_v41 = vld [vmem:[%s5141_s3 + $0x31c] sm:$0xf]  ;;  %v3638_v44 = vld [vmem:[%s5141_s3 + $0xb0] sm:$0xf0]  ;;  %v2842_v45 = vor.u32 %v3643_v38, %v2839_v40  ;;  %v2803_v49 = vld [vmem:[%s5141_s3 + $0xb4] sm:$0xf0] }
  0x16   : > { %1323 = vmatpush.bf16.msra.mxu1 %v2910_v21  ;;  %v3130_v46 = vor.u32 %v3715_v41, %v3127_v42  ;;  %v3634_v47 = vld [vmem:[%s5141_s3 + $0x94] sm:$0xf]  ;;  %v2802_v48 = vor.u32 %v3638_v44, %v2801_v43  ;;  %v3091_v51 = vld [vmem:[%s5141_s3 + $0x2f4] sm:$0xf0]  ;;  %v2765_v52 = vld [vmem:[%s5141_s3 + $0x48] sm:$0xf] }
  0x17   : > { %1351 = vmatpush.bf16.msra.mxu2 %v2914_v27  ;;  %v3706_v50 = vld [vmem:[%s5141_s3 + $0x2d4] sm:$0xf]  ;;  %v3629_v53 = vld [vmem:[%s5141_s3 + $0x68] sm:$0xf0]  ;;  %s5151_s18 = smov (!%p399_p3, %s2715_s18), 1  ;;  %v2806_v54 = vor.u32 %v3634_v47, %v2803_v49  ;;  %vm1626_vm0 = vcmask 130048  }
  0x18   : > { %1365 = vmatpush.bf16.msra.mxu3 %v3202_v28  ;;  %v3094_v55 = vor.u32 %v3706_v50, %v3091_v51  ;;  %v3625_v56 = vld [vmem:[%s5141_s3 + $0x4c] sm:$0xf]  ;;  %v2767_v57 = vld [vmem:[%s5141_s3 + $0x6c] sm:$0xf0]  ;;  %s3613_s12 = sshll.u32 %s5151_s18, 5  ;;  %v2766_v58 = vor.u32 %v3629_v53, %v2765_v52  ;;  %s3614_s22 = sshll.u32 %s5151_s18, 7 }
  0x19   : > { %v3697_v59 = vld [vmem:[%s5141_s3 + $0x28c] sm:$0xf]  ;;  %v3055_v60 = vld [vmem:[%s5141_s3 + $0x2ac] sm:$0xf0]  ;;  %v2989_v61 = vld [vmem:[%s5141_s3 + $0x200] sm:$0xf]  ;;  %s403_s19 = scalar_lea.vmem %s5138_s0, %s3613_s12  ;;  %v2770_v5 = vor.u32 %v3625_v56, %v2767_v57  ;;  %s4957_s26 = scalar_lea.vmem %s5139_s1, %s3614_s22 }
  0x1a   : > { %1324 = vmatpush.bf16.msra.mxu1 %v2874_v30  ;;  %v2729_v62 = vld [vmem:[%s5141_s3] sm:$0xf]  ;;  %v3620_v63 = vld [vmem:[%s5141_s3 + $0x20] sm:$0xf0]  ;;  %v3269_v1 = vld [vmem:[%s5141_s3 + $0x438] sm:$0xf]  ;;  %v3058_v6 = vor.u32 %v3697_v59, %v3055_v60 }
  0x1b   : > { %1352 = vmatpush.bf16.msra.mxu2 %v2878_v36  ;;  %v3684_v0 = vld [vmem:[%s5141_s3 + $0x220] sm:$0xf0]  ;;  %v3755_v2 = vld [vmem:[%s5141_s3 + $0x458] sm:$0xf0]  ;;  %v2731_v7 = vld [vmem:[%s5141_s3 + $0x24] sm:$0xf0]  ;;  %v2730_v10 = vor.u32 %v3620_v63, %v2729_v62 }
  0x1c   : > { %1366 = vmatpush.bf16.msra.mxu3 %v3166_v37  ;;  %v3616_v3 = vld [vmem:[%s5141_s3 + $0x4] sm:$0xf]  ;;  %v2990_v4 = vor.u32 %v3684_v0, %v2989_v61  ;;  %v3019_v9 = vld [vmem:[%s5141_s3 + $0x264] sm:$0xf0]  ;;  %v3233_v11 = vld [vmem:[%s5141_s3 + $0x3f0] sm:$0xf]  ;;  %v3270_v15 = vor.u32 %v3755_v2, %v3269_v1 }
  0x1d   : > { %v3688_v8 = vld [vmem:[%s5141_s3 + $0x244] sm:$0xf]  ;;  %v2991_v13 = vld [vmem:[%s5141_s3 + $0x224] sm:$0xf0]  ;;  %v2953_v14 = vld [vmem:[%s5141_s3 + $0x1b8] sm:$0xf]  ;;  %v2734_v23 = vor.u32 %v3616_v3, %v2731_v7 }
  0x1e   : > { %1325 = vmatpush.bf16.msra.mxu1 %v2838_v39  ;;  %v3680_v12 = vld [vmem:[%s5141_s3 + $0x204] sm:$0xf]  ;;  %1377 = vmatpush.bf16.msra.mxu0 %v2990_v4  ;;  %v421_v17 = vld [vmem:[%s403_s19 + $0x10] sm:$0xff]  ;;  %v3675_v18 = vld [vmem:[%s5141_s3 + $0x1d8] sm:$0xf0]  ;;  %v3022_v24 = vor.u32 %v3688_v8, %v3019_v9  ;;  %s3615_s20 = sshll.u32 %s5151_s18, 6 }
  0x1f   : > { %1353 = vmatpush.bf16.msra.mxu2 %v2842_v45  ;;  %v419_v16 = vld [vmem:[%s403_s19] sm:$0xff]  ;;  %v3746_v19 = vld [vmem:[%s5141_s3 + $0x410] sm:$0xf0]  ;;  %v3279_v21 = vld [vmem:[%s5141_s3 + $0x464] sm:$0xf0]  ;;  %v2954_v22 = vor.u32 %v3675_v18, %v2953_v14  ;;  %v2994_v28 = vor.u32 %v3680_v12, %v2991_v13  ;;  %s5075_s23 = scalar_lea.vmem %s5148_s10, %s3615_s20  ;;  %s2726_s12 = sshll.u32 %s5151_s18, 3 }
  0x20   : > { %1367 = vmatpush.bf16.msra.mxu3 %v3130_v46  ;;  %v3752_v20 = vld [vmem:[%s5141_s3 + $0x444] sm:$0xf]  ;;  %v420_v25 = vld [vmem:[%s403_s19 + $0x8] sm:$0xff]  ;;  %v422_v26 = vld [vmem:[%s403_s19 + $0x18] sm:$0xff]  ;;  %v4090_v27 = vpack.c.bf16 %v421_v17, %v419_v16  ;;  %v3234_v31 = vor.u32 %v3746_v19, %v3233_v11  ;;  %vm2615_vm1 = vcmask 520192  }
  0x21   : > { %v2917_v29 = vld [vmem:[%s5141_s3 + $0x170] sm:$0xf]  ;;  %v3666_v30 = vld [vmem:[%s5141_s3 + $0x190] sm:$0xf0]  ;;  %v3197_v32 = vld [vmem:[%s5141_s3 + $0x3a8] sm:$0xf]  ;;  %v3282_v33 = vor.u32 %v3752_v20, %v3279_v21  ;;  %v4116_v39 = vpack.c.bf16 %v422_v26, %v420_v25 }
  0x22   : > { %1326 = vmatpush.bf16.msra.mxu1 %v2802_v48  ;;  %1378 = vmatpush.bf16.msra.mxu0 %v2954_v22  ;;  %v3671_v34 = vld [vmem:[%s5141_s3 + $0x1bc] sm:$0xf]  ;;  %v2955_v35 = vld [vmem:[%s5141_s3 + $0x1dc] sm:$0xf0]  ;;  %v3737_v36 = vld [vmem:[%s5141_s3 + $0x3c8] sm:$0xf0]  ;;  %v2918_v40 = vor.u32 %v3666_v30, %v2917_v29 }
  0x23   : > { %1354 = vmatpush.bf16.msra.mxu2 %v2806_v54  ;;  %v3743_v37 = vld [vmem:[%s5141_s3 + $0x3fc] sm:$0xf]  ;;  %v3243_v38 = vld [vmem:[%s5141_s3 + $0x41c] sm:$0xf0]  ;;  %v2958_v41 = vor.u32 %v3671_v34, %v2955_v35  ;;  %v2881_v42 = vld [vmem:[%s5141_s3 + $0x128] sm:$0xf]  ;;  %v3198_v44 = vor.u32 %v3737_v36, %v3197_v32 }
  0x24   : > { %1368 = vmatpush.bf16.msra.mxu3 %v3094_v55  ;;  %v3657_v43 = vld [vmem:[%s5141_s3 + $0x148] sm:$0xf0]  ;;  %v3161_v45 = vld [vmem:[%s5141_s3 + $0x360] sm:$0xf]  ;;  %v3246_v46 = vor.u32 %v3743_v37, %v3243_v38  ;;  %v3662_v47 = vld [vmem:[%s5141_s3 + $0x174] sm:$0xf] }
  0x25   : > { %v2919_v48 = vld [vmem:[%s5141_s3 + $0x194] sm:$0xf0]  ;;  %v3728_v49 = vld [vmem:[%s5141_s3 + $0x380] sm:$0xf0]  ;;  %v3734_v50 = vld [vmem:[%s5141_s3 + $0x3b4] sm:$0xf]  ;;  %v2882_v54 = vor.u32 %v3657_v43, %v2881_v42 }
  0x26   : > { %1327 = vmatpush.bf16.msra.mxu1 %v2766_v58  ;;  %v3207_v51 = vld [vmem:[%s5141_s3 + $0x3d4] sm:$0xf0]  ;;  %v3653_v52 = vld [vmem:[%s5141_s3 + $0x12c] sm:$0xf]  ;;  %v2883_v53 = vld [vmem:[%s5141_s3 + $0x14c] sm:$0xf0]  ;;  %1379 = vmatpush.bf16.msra.mxu0 %v2918_v40  ;;  %v2922_v56 = vor.u32 %v3662_v47, %v2919_v48  ;;  %v3162_v59 = vor.u32 %v3728_v49, %v3161_v45 }
  0x27   : > { %1355 = vmatpush.bf16.msra.mxu2 %v2770_v5  ;;  %v3125_v55 = vld [vmem:[%s5141_s3 + $0x318] sm:$0xf]  ;;  %v2845_v57 = vld [vmem:[%s5141_s3 + $0xe0] sm:$0xf]  ;;  %v3648_v58 = vld [vmem:[%s5141_s3 + $0x100] sm:$0xf0]  ;;  %v3210_v60 = vor.u32 %v3734_v50, %v3207_v51  ;;  %v2886_v1 = vor.u32 %v3653_v52, %v2883_v53 }
  0x28   : > { %1369 = vmatpush.bf16.msra.mxu3 %v3058_v6  ;;  %v3719_v61 = vld [vmem:[%s5141_s3 + $0x338] sm:$0xf0]  ;;  %v3725_v62 = vld [vmem:[%s5141_s3 + $0x36c] sm:$0xf]  ;;  %v3171_v63 = vld [vmem:[%s5141_s3 + $0x38c] sm:$0xf0]  ;;  %v2846_v0 = vor.u32 %v3648_v58, %v2845_v57 }
  0x29   : > { %v2809_v2 = vld [vmem:[%s5141_s3 + $0x98] sm:$0xf]  ;;  %v3639_v3 = vld [vmem:[%s5141_s3 + $0xb8] sm:$0xf0]  ;;  %v3126_v4 = vor.u32 %v3719_v61, %v3125_v55  ;;  %v3089_v5 = vld [vmem:[%s5141_s3 + $0x2d0] sm:$0xf]  ;;  %v3174_v6 = vor.u32 %v3725_v62, %v3171_v63 }
  0x2a   : > { %1328 = vmatpush.bf16.msra.mxu1 %v2730_v10  ;;  %1380 = vmatpush.bf16.msra.mxu0 %v2882_v54  ;;  %v3644_v7 = vld [vmem:[%s5141_s3 + $0xe4] sm:$0xf]  ;;  %v2847_v8 = vld [vmem:[%s5141_s3 + $0x104] sm:$0xf0]  ;;  %v3710_v9 = vld [vmem:[%s5141_s3 + $0x2f0] sm:$0xf0]  ;;  %v2810_v12 = vor.u32 %v3639_v3, %v2809_v2 }
  0x2b   : > { %1356 = vmatpush.bf16.msra.mxu2 %v2734_v23  ;;  %v3716_v10 = vld [vmem:[%s5141_s3 + $0x324] sm:$0xf]  ;;  %v3135_v11 = vld [vmem:[%s5141_s3 + $0x344] sm:$0xf0]  ;;  %v2850_v13 = vor.u32 %v3644_v7, %v2847_v8  ;;  %v2773_v14 = vld [vmem:[%s5141_s3 + $0x50] sm:$0xf]  ;;  %v3090_v16 = vor.u32 %v3710_v9, %v3089_v5 }
  0x2c   : > { %1370 = vmatpush.bf16.msra.mxu3 %v3022_v24  ;;  %v3053_v17 = vld [vmem:[%s5141_s3 + $0x288] sm:$0xf]  ;;  %v3138_v18 = vor.u32 %v3716_v10, %v3135_v11  ;;  %v3635_v19 = vld [vmem:[%s5141_s3 + $0x9c] sm:$0xf]  ;;  %v2811_v20 = vld [vmem:[%s5141_s3 + $0xbc] sm:$0xf0] }
  0x2d   : > { %1329 = vmatmul.bf16.vlgmr.msra.gmra.mxu1 %v4090_v27  ;;  %v3701_v21 = vld [vmem:[%s5141_s3 + $0x2a8] sm:$0xf0]  ;;  %v3707_v22 = vld [vmem:[%s5141_s3 + $0x2dc] sm:$0xf]  ;;  %v3099_v23 = vld [vmem:[%s5141_s3 + $0x2fc] sm:$0xf0]  ;;  %v2814_v26 = vor.u32 %v3635_v19, %v2811_v20 }
  0x2e   : > { %1335 = vmatpush.bf16.msrb.mxu1 %v3270_v15  ;;  %1357 = vmatmul.bf16.vlgmr.msra.gmra.mxu2 %v4090_v27  ;;  %v3630_v15 = vld [vmem:[%s5141_s3 + $0x70] sm:$0xf0]  ;;  %v3017_v25 = vld [vmem:[%s5141_s3 + $0x240] sm:$0xf]  ;;  %v2737_v29 = vld [vmem:[%s5141_s3 + $0x8] sm:$0xf]  ;;  %v3102_v32 = vor.u32 %v3707_v22, %v3099_v23 }
  0x2f   : > { %1405 = vmatpush.bf16.msrb.mxu2 %v2994_v28  ;;  %1371 = vmatmul.bf16.vlgmr.msra.gmra.mxu3 %v4116_v39  ;;  %v2774_v24 = vor.u32 %v3630_v15, %v2773_v14  ;;  %v3626_v28 = vld [vmem:[%s5141_s3 + $0x54] sm:$0xf]  ;;  %v3621_v30 = vld [vmem:[%s5141_s3 + $0x28] sm:$0xf0]  ;;  %v2997_v34 = vld [vmem:[%s5141_s3 + $0x208] sm:$0xf] }
  0x30   : > { %1419 = vmatpush.bf16.msrb.mxu3 %v3282_v33  ;;  %1381 = vmatpush.bf16.msra.mxu0 %v2846_v0  ;;  %v2775_v33 = vld [vmem:[%s5141_s3 + $0x74] sm:$0xf0]  ;;  %v3685_v35 = vld [vmem:[%s5141_s3 + $0x228] sm:$0xf0]  ;;  %v3692_v36 = vld [vmem:[%s5141_s3 + $0x260] sm:$0xf0]  ;;  %v2738_v42 = vor.u32 %v3621_v30, %v2737_v29 }
  0x31   : > { %v3698_v37 = vld [vmem:[%s5141_s3 + $0x294] sm:$0xf]  ;;  %v3063_v38 = vld [vmem:[%s5141_s3 + $0x2b4] sm:$0xf0]  ;;  %v3277_v40 = vld [vmem:[%s5141_s3 + $0x440] sm:$0xf]  ;;  %v2778_v43 = vor.u32 %v3626_v28, %v2775_v33  ;;  %v3018_v45 = vor.u32 %v3692_v36, %v3017_v25 }
  0x32   : > { %1336 = vmatpush.bf16.msrb.mxu1 %v3234_v31  ;;  %v3054_v31 = vor.u32 %v3701_v21, %v3053_v17  ;;  %v3066_v47 = vor.u32 %v3698_v37, %v3063_v38  ;;  %v3617_v48 = vld [vmem:[%s5141_s3 + $0xc] sm:$0xf]  ;;  %v2739_v49 = vld [vmem:[%s5141_s3 + $0x2c] sm:$0xf0]  ;;  %v3747_v55 = vld [vmem:[%s5141_s3 + $0x418] sm:$0xf0] }
  0x33   : > { %1406 = vmatpush.bf16.msrb.mxu2 %v2958_v41  ;;  %v3756_v41 = vld [vmem:[%s5141_s3 + $0x460] sm:$0xf0]  ;;  %v3689_v50 = vld [vmem:[%s5141_s3 + $0x24c] sm:$0xf]  ;;  %v3027_v52 = vld [vmem:[%s5141_s3 + $0x26c] sm:$0xf0]  ;;  %v2742_v58 = vor.u32 %v3617_v48, %v2739_v49 }
  0x34   : > { %1420 = vmatpush.bf16.msrb.mxu3 %v3246_v46  ;;  %1382 = vmatpush.bf16.msra.mxu0 %v2810_v12  ;;  %v3241_v46 = vld [vmem:[%s5141_s3 + $0x3f8] sm:$0xf]  ;;  %v3278_v51 = vor.u32 %v3756_v41, %v3277_v40  ;;  %v3681_v53 = vld [vmem:[%s5141_s3 + $0x20c] sm:$0xf]  ;;  %v2999_v54 = vld [vmem:[%s5141_s3 + $0x22c] sm:$0xf0]  ;;  %v3030_v61 = vor.u32 %v3689_v50, %v3027_v52 }
  0x35   : > { %v3287_v57 = vld [vmem:[%s5141_s3 + $0x46c] sm:$0xf0]  ;;  %v3002_v62 = vor.u32 %v3681_v53, %v2999_v54  ;;  %v3242_v63 = vor.u32 %v3747_v55, %v3241_v46  ;;  %v3672_v2 = vld [vmem:[%s5141_s3 + $0x1c4] sm:$0xf]  ;;  %v2963_v3 = vld [vmem:[%s5141_s3 + $0x1e4] sm:$0xf0] }
  0x36   : > { %1337 = vmatpush.bf16.msrb.mxu1 %v3198_v44  ;;  %v2998_v44 = vor.u32 %v3685_v35, %v2997_v34  ;;  %v3205_v0 = vld [vmem:[%s5141_s3 + $0x3b0] sm:$0xf]  ;;  %v3744_v5 = vld [vmem:[%s5141_s3 + $0x404] sm:$0xf]  ;;  %v2925_v8 = vld [vmem:[%s5141_s3 + $0x178] sm:$0xf]  ;;  %v2966_v10 = vor.u32 %v3672_v2, %v2963_v3 }
  0x37   : > { %1407 = vmatpush.bf16.msrb.mxu2 %v2922_v56  ;;  %v3753_v56 = vld [vmem:[%s5141_s3 + $0x44c] sm:$0xf]  ;;  %v3667_v9 = vld [vmem:[%s5141_s3 + $0x198] sm:$0xf0]  ;;  %v3169_v12 = vld [vmem:[%s5141_s3 + $0x368] sm:$0xf] }
  0x38   : > { %1421 = vmatpush.bf16.msrb.mxu3 %v3210_v60  ;;  %1383 = vmatpush.bf16.msra.mxu0 %v2774_v24  ;;  %v3676_v60 = vld [vmem:[%s5141_s3 + $0x1e0] sm:$0xf0]  ;;  %v3663_v14 = vld [vmem:[%s5141_s3 + $0x17c] sm:$0xf]  ;;  %v2927_v15 = vld [vmem:[%s5141_s3 + $0x19c] sm:$0xf0]  ;;  %v2926_v19 = vor.u32 %v3667_v9, %v2925_v8 }
  0x39   : > { %v3735_v17 = vld [vmem:[%s5141_s3 + $0x3bc] sm:$0xf]  ;;  %v2889_v20 = vld [vmem:[%s5141_s3 + $0x130] sm:$0xf]  ;;  %v3658_v21 = vld [vmem:[%s5141_s3 + $0x150] sm:$0xf0]  ;;  %v2930_v22 = vor.u32 %v3663_v14, %v2927_v15 }
  0x3a   : > { %1338 = vmatpush.bf16.msrb.mxu1 %v3162_v59  ;;  %v2961_v59 = vld [vmem:[%s5141_s3 + $0x1c0] sm:$0xf]  ;;  %v2891_v28 = vld [vmem:[%s5141_s3 + $0x154] sm:$0xf0]  ;;  %v3720_v29 = vld [vmem:[%s5141_s3 + $0x340] sm:$0xf0] }
  0x3b   : > { %1408 = vmatpush.bf16.msrb.mxu2 %v2886_v1  ;;  %v3290_v1 = vor.u32 %v3753_v56, %v3287_v57  ;;  %v2962_v7 = vor.u32 %v3676_v60, %v2961_v59  ;;  %v3133_v24 = vld [vmem:[%s5141_s3 + $0x320] sm:$0xf]  ;;  %v3726_v30 = vld [vmem:[%s5141_s3 + $0x374] sm:$0xf]  ;;  %v2853_v33 = vld [vmem:[%s5141_s3 + $0xe8] sm:$0xf] }
  0x3c   : > { %1422 = vmatpush.bf16.msrb.mxu3 %v3174_v6  ;;  %1384 = vmatpush.bf16.msra.mxu0 %v2738_v42  ;;  %v3251_v6 = vld [vmem:[%s5141_s3 + $0x424] sm:$0xf0]  ;;  %v3649_v34 = vld [vmem:[%s5141_s3 + $0x108] sm:$0xf0]  ;;  %v3134_v36 = vor.u32 %v3720_v29, %v3133_v24  ;;  %v3097_v37 = vld [vmem:[%s5141_s3 + $0x2d8] sm:$0xf] }
  0x3d   : > { %v3645_v40 = vld [vmem:[%s5141_s3 + $0xec] sm:$0xf]  ;;  %v2855_v41 = vld [vmem:[%s5141_s3 + $0x10c] sm:$0xf0]  ;;  %v3711_v42 = vld [vmem:[%s5141_s3 + $0x2f8] sm:$0xf0] }
  0x3e   : > { %1339 = vmatpush.bf16.msrb.mxu1 %v3126_v4  ;;  %v3738_v4 = vld [vmem:[%s5141_s3 + $0x3d0] sm:$0xf0]  ;;  %v2817_v46 = vld [vmem:[%s5141_s3 + $0xa0] sm:$0xf]  ;;  %v2858_v48 = vor.u32 %v3645_v40, %v2855_v41  ;;  %v3098_v49 = vor.u32 %v3711_v42, %v3097_v37  ;;  %v3061_v50 = vld [vmem:[%s5141_s3 + $0x290] sm:$0xf] }
  0x3f   : > { %1409 = vmatpush.bf16.msrb.mxu2 %v2850_v13  ;;  %1385 = vmatmul.bf16.vlgmr.msra.gmra.mxu0 %v4090_v27  ;;  %v3206_v11 = vor.u32 %v3738_v4, %v3205_v0  ;;  %v3254_v13 = vor.u32 %v3744_v5, %v3251_v6  ;;  %v3636_v52 = vld [vmem:[%s5141_s3 + $0xa4] sm:$0xf]  ;;  %v2819_v53 = vld [vmem:[%s5141_s3 + $0xc4] sm:$0xf0]  ;;  %v3702_v54 = vld [vmem:[%s5141_s3 + $0x2b0] sm:$0xf0] }
  0x40   : > { %1423 = vmatpush.bf16.msrb.mxu3 %v3138_v18  ;;  %1433 = vmatpush.bf16.msrb.mxu0 %v2998_v44  ;;  %v3215_v18 = vld [vmem:[%s5141_s3 + $0x3dc] sm:$0xf0]  ;;  %v3143_v44 = vld [vmem:[%s5141_s3 + $0x34c] sm:$0xf0]  ;;  %v3708_v55 = vld [vmem:[%s5141_s3 + $0x2e4] sm:$0xf] }
  0x41   : > { %v3218_v25 = vor.u32 %v3735_v17, %v3215_v18  ;;  %v3107_v56 = vld [vmem:[%s5141_s3 + $0x304] sm:$0xf0]  ;;  %v3631_v59 = vld [vmem:[%s5141_s3 + $0x78] sm:$0xf0]  ;;  %v2783_v2 = vld [vmem:[%s5141_s3 + $0x7c] sm:$0xf0] }
  0x42   : > { %1340 = vmatpush.bf16.msrb.mxu1 %v3090_v16  ;;  %v3729_v16 = vld [vmem:[%s5141_s3 + $0x388] sm:$0xf0]  ;;  %v3025_v60 = vld [vmem:[%s5141_s3 + $0x248] sm:$0xf]  ;;  %v3110_v0 = vor.u32 %v3708_v55, %v3107_v56  ;;  %v3699_v4 = vld [vmem:[%s5141_s3 + $0x29c] sm:$0xf] }
  0x43   : > { %1410 = vmatpush.bf16.msrb.mxu2 %v2814_v26  ;;  %v3170_v23 = vor.u32 %v3729_v16, %v3169_v12  ;;  %v3654_v26 = vld [vmem:[%s5141_s3 + $0x134] sm:$0xf]  ;;  %v3285_v3 = vld [vmem:[%s5141_s3 + $0x448] sm:$0xf]  ;;  %v3071_v5 = vld [vmem:[%s5141_s3 + $0x2bc] sm:$0xf0] }
  0x44   : > { %1424 = vmatpush.bf16.msrb.mxu3 %v3102_v32  ;;  %1434 = vmatpush.bf16.msrb.mxu0 %v2962_v7  ;;  %v2890_v32 = vor.u32 %v3658_v21, %v2889_v20  ;;  %v2894_v35 = vor.u32 %v3654_v26, %v2891_v28  ;;  %v3757_v7 = vld [vmem:[%s5141_s3 + $0x468] sm:$0xf0]  ;;  %v2745_v8 = vld [vmem:[%s5141_s3 + $0x10] sm:$0xf]  ;;  %v3622_v9 = vld [vmem:[%s5141_s3 + $0x30] sm:$0xf0]  ;;  %v3074_v14 = vor.u32 %v3699_v4, %v3071_v5 }
  0x45   : > { %v3686_v12 = vld [vmem:[%s5141_s3 + $0x230] sm:$0xf0]  ;;  %v2747_v16 = vld [vmem:[%s5141_s3 + $0x34] sm:$0xf0]  ;;  %v3286_v17 = vor.u32 %v3757_v7, %v3285_v3  ;;  %v3249_v18 = vld [vmem:[%s5141_s3 + $0x400] sm:$0xf]  ;;  %v2746_v21 = vor.u32 %v3622_v9, %v2745_v8 }
  0x46   : > { %1341 = vmatpush.bf16.msrb.mxu1 %v3054_v31  ;;  %v3179_v31 = vld [vmem:[%s5141_s3 + $0x394] sm:$0xf0]  ;;  %v3618_v15 = vld [vmem:[%s5141_s3 + $0x14] sm:$0xf]  ;;  %v2971_v40 = vld [vmem:[%s5141_s3 + $0x1ec] sm:$0xf0] }
  0x47   : > { %1411 = vmatpush.bf16.msrb.mxu2 %v2778_v43  ;;  %v3182_v38 = vor.u32 %v3726_v30, %v3179_v31  ;;  %v3717_v43 = vld [vmem:[%s5141_s3 + $0x32c] sm:$0xf]  ;;  %v3035_v20 = vld [vmem:[%s5141_s3 + $0x274] sm:$0xf0]  ;;  %v3682_v24 = vld [vmem:[%s5141_s3 + $0x214] sm:$0xf]  ;;  %v2750_v26 = vor.u32 %v3618_v15, %v2747_v16 }
  0x48   : > { %1425 = vmatpush.bf16.msrb.mxu3 %v3066_v47  ;;  %1435 = vmatpush.bf16.msrb.mxu0 %v2926_v19  ;;  %v3640_v47 = vld [vmem:[%s5141_s3 + $0xc0] sm:$0xf0]  ;;  %v3690_v19 = vld [vmem:[%s5141_s3 + $0x254] sm:$0xf]  ;;  %v3295_v29 = vld [vmem:[%s5141_s3 + $0x474] sm:$0xf0] }
  0x49   : > { %v2818_v57 = vor.u32 %v3640_v47, %v2817_v46  ;;  %v3754_v28 = vld [vmem:[%s5141_s3 + $0x454] sm:$0xf]  ;;  %v3038_v30 = vor.u32 %v3690_v19, %v3035_v20  ;;  %v2969_v31 = vld [vmem:[%s5141_s3 + $0x1c8] sm:$0xf]  ;;  %v3745_v42 = vld [vmem:[%s5141_s3 + $0x40c] sm:$0xf] }
  0x4a   : > { %1342 = vmatpush.bf16.msrb.mxu1 %v3018_v45  ;;  %v2854_v45 = vor.u32 %v3649_v34, %v2853_v33  ;;  %v3213_v34 = vld [vmem:[%s5141_s3 + $0x3b8] sm:$0xf]  ;;  %v3298_v37 = vor.u32 %v3754_v28, %v3295_v29  ;;  %v3177_v47 = vld [vmem:[%s5141_s3 + $0x370] sm:$0xf]  ;;  %v3223_v55 = vld [vmem:[%s5141_s3 + $0x3e4] sm:$0xf0] }
  0x4b   : > { %1412 = vmatpush.bf16.msrb.mxu2 %v2742_v58  ;;  %v2781_v58 = vld [vmem:[%s5141_s3 + $0x58] sm:$0xf]  ;;  %v3187_v3 = vld [vmem:[%s5141_s3 + $0x39c] sm:$0xf0]  ;;  %v2861_v4 = vld [vmem:[%s5141_s3 + $0xf0] sm:$0xf] }
  0x4c   : > { %1426 = vmatpush.bf16.msrb.mxu3 %v3030_v61  ;;  %1436 = vmatpush.bf16.msrb.mxu0 %v2890_v32  ;;  %v2822_v61 = vor.u32 %v3636_v52, %v2819_v53  ;;  %v2782_v6 = vor.u32 %v3631_v59, %v2781_v58  ;;  %v3677_v32 = vld [vmem:[%s5141_s3 + $0x1e8] sm:$0xf0]  ;;  %v2935_v52 = vld [vmem:[%s5141_s3 + $0x1a4] sm:$0xf0]  ;;  %v2897_v56 = vld [vmem:[%s5141_s3 + $0x138] sm:$0xf] }
  0x4d   : > { %1343 = vmatmul.bf16.vlgmr.msrb.gmra.mxu1 %v4116_v39  ;;  %v2970_v41 = vor.u32 %v3677_v32, %v2969_v31  ;;  %v3141_v59 = vld [vmem:[%s5141_s3 + $0x328] sm:$0xf]  ;;  %v3650_v5 = vld [vmem:[%s5141_s3 + $0x110] sm:$0xf0]  ;;  %v3105_v7 = vld [vmem:[%s5141_s3 + $0x2e0] sm:$0xf] }
  0x4e   : > { %1391 = vmatpush.bf16.msra.mxu1 %v3278_v51  ;;  %1413 = vmatmul.bf16.vlgmr.msrb.gmra.mxu2 %v4090_v27  ;;  %v3146_v51 = vor.u32 %v3717_v43, %v3143_v44  ;;  %v3259_v43 = vld [vmem:[%s5141_s3 + $0x42c] sm:$0xf0]  ;;  %v2933_v44 = vld [vmem:[%s5141_s3 + $0x180] sm:$0xf]  ;;  %v3712_v9 = vld [vmem:[%s5141_s3 + $0x300] sm:$0xf0] }
  0x4f   : > { %1461 = vmatpush.bf16.msra.mxu2 %v3002_v62  ;;  %1427 = vmatmul.bf16.vlgmr.msrb.gmra.mxu3 %v4116_v39  ;;  %v3062_v62 = vor.u32 %v3702_v54, %v3061_v50  ;;  %v3262_v50 = vor.u32 %v3745_v42, %v3259_v43  ;;  %v3736_v54 = vld [vmem:[%s5141_s3 + $0x3c4] sm:$0xf]  ;;  %v3151_v15 = vld [vmem:[%s5141_s3 + $0x354] sm:$0xf0]  ;;  %v2825_v16 = vld [vmem:[%s5141_s3 + $0xa8] sm:$0xf] }
  0x50   : > { %1475 = vmatpush.bf16.msra.mxu3 %v3290_v1  ;;  %1437 = vmatpush.bf16.msrb.mxu0 %v2854_v45  ;;  %v3627_v1 = vld [vmem:[%s5141_s3 + $0x5c] sm:$0xf]  ;;  %v3668_v45 = vld [vmem:[%s5141_s3 + $0x1a0] sm:$0xf0]  ;;  %v3069_v19 = vld [vmem:[%s5141_s3 + $0x298] sm:$0xf] }
  0x51   : > { %v2934_v53 = vor.u32 %v3668_v45, %v2933_v44  ;;  %v3115_v28 = vld [vmem:[%s5141_s3 + $0x30c] sm:$0xf0]  ;;  %v2789_v29 = vld [vmem:[%s5141_s3 + $0x60] sm:$0xf]  ;;  %v3700_v42 = vld [vmem:[%s5141_s3 + $0x2a4] sm:$0xf] }
  0x52   : > { %1392 = vmatpush.bf16.msra.mxu1 %v3242_v63  ;;  %v3693_v63 = vld [vmem:[%s5141_s3 + $0x268] sm:$0xf0]  ;;  %v3033_v32 = vld [vmem:[%s5141_s3 + $0x250] sm:$0xf]  ;;  %v3079_v43 = vld [vmem:[%s5141_s3 + $0x2c4] sm:$0xf0] }
  0x53   : > { %1462 = vmatpush.bf16.msra.mxu2 %v2966_v10  ;;  %v2786_v10 = vor.u32 %v3627_v1, %v2783_v2  ;;  %v3727_v2 = vld [vmem:[%s5141_s3 + $0x37c] sm:$0xf]  ;;  %v2753_v44 = vld [vmem:[%s5141_s3 + $0x18] sm:$0xf] }
  0x54   : > { %1476 = vmatpush.bf16.msra.mxu3 %v3254_v13  ;;  %1438 = vmatpush.bf16.msrb.mxu0 %v2818_v57  ;;  %v3026_v13 = vor.u32 %v3693_v63, %v3025_v60  ;;  %v3659_v57 = vld [vmem:[%s5141_s3 + $0x158] sm:$0xf0] }
  0x55   : > { %v3655_v63 = vld [vmem:[%s5141_s3 + $0x13c] sm:$0xf]  ;;  %v2898_v1 = vor.u32 %v3659_v57, %v2897_v56 }
  0x56   : > { %1393 = vmatpush.bf16.msra.mxu1 %v3206_v11  ;;  %v3005_v11 = vld [vmem:[%s5141_s3 + $0x210] sm:$0xf]  ;;  %v3623_v45 = vld [vmem:[%s5141_s3 + $0x38] sm:$0xf0] }
  0x57   : > { %1463 = vmatpush.bf16.msra.mxu2 %v2930_v22  ;;  %v3748_v22 = vld [vmem:[%s5141_s3 + $0x420] sm:$0xf0]  ;;  %v2754_v56 = vor.u32 %v3623_v45, %v2753_v44  ;;  %v3691_v57 = vld [vmem:[%s5141_s3 + $0x25c] sm:$0xf] }
  0x58   : > { %1477 = vmatpush.bf16.msra.mxu3 %v3218_v25  ;;  %1439 = vmatpush.bf16.msrb.mxu0 %v2782_v6  ;;  %v3007_v25 = vld [vmem:[%s5141_s3 + $0x234] sm:$0xf0]  ;;  %v3250_v33 = vor.u32 %v3748_v22, %v3249_v18  ;;  %v3106_v18 = vor.u32 %v3712_v9, %v3105_v7 }
  0x59   : > { %v3185_v7 = vld [vmem:[%s5141_s3 + $0x378] sm:$0xf] }
  0x5a   : > { %1394 = vmatpush.bf16.msra.mxu1 %v3170_v23  ;;  %v3006_v23 = vor.u32 %v3686_v12, %v3005_v11  ;;  %v3646_v11 = vld [vmem:[%s5141_s3 + $0xf4] sm:$0xf]  ;;  %v2863_v12 = vld [vmem:[%s5141_s3 + $0x114] sm:$0xf0] }
  0x5b   : > { %1464 = vmatpush.bf16.msra.mxu2 %v2894_v35  ;;  %v3010_v35 = vor.u32 %v3682_v24, %v3007_v25  ;;  %v2866_v20 = vor.u32 %v3646_v11, %v2863_v12  ;;  %v2827_v24 = vld [vmem:[%s5141_s3 + $0xcc] sm:$0xf0]  ;;  %v3660_v11 = vld [vmem:[%s5141_s3 + $0x160] sm:$0xf0] }
  0x5c   : > { %1478 = vmatpush.bf16.msra.mxu3 %v3182_v38  ;;  %1440 = vmatpush.bf16.msrb.mxu0 %v2746_v21  ;;  %v3673_v38 = vld [vmem:[%s5141_s3 + $0x1cc] sm:$0xf]  ;;  %v3703_v21 = vld [vmem:[%s5141_s3 + $0x2b8] sm:$0xf0] }
  0x5d   : > { %v3070_v31 = vor.u32 %v3703_v21, %v3069_v19  ;;  %v3113_v19 = vld [vmem:[%s5141_s3 + $0x2e8] sm:$0xf] }
  0x5e   : > { %1395 = vmatpush.bf16.msra.mxu1 %v3134_v36  ;;  %v3739_v36 = vld [vmem:[%s5141_s3 + $0x3d8] sm:$0xf0] }
  0x5f   : > { %1465 = vmatpush.bf16.msra.mxu2 %v2858_v48  ;;  %1441 = vmatmul.bf16.vlgmr.msrb.gmra.mxu0 %v4090_v27  ;;  %v3214_v46 = vor.u32 %v3739_v36, %v3213_v34  ;;  %v2974_v48 = vor.u32 %v3673_v38, %v2971_v40  ;;  %v2791_v38 = vld [vmem:[%s5141_s3 + $0x84] sm:$0xf0]  ;;  %v3758_v40 = vld [vmem:[%s5141_s3 + $0x470] sm:$0xf0] }
  0x60   : > { %1479 = vmatpush.bf16.msra.mxu3 %v3146_v51  ;;  %1489 = vmatpush.bf16.msra.mxu0 %v3006_v23  ;;  %v3664_v51 = vld [vmem:[%s5141_s3 + $0x184] sm:$0xf]  ;;  %v3637_v23 = vld [vmem:[%s5141_s3 + $0xac] sm:$0xf] }
  0x61   : > { %v2938_v60 = vor.u32 %v3664_v51, %v2935_v52  ;;  %v2830_v34 = vor.u32 %v3637_v23, %v2827_v24  ;;  %v3257_v51 = vld [vmem:[%s5141_s3 + $0x408] sm:$0xf]  ;;  %v3082_v52 = vor.u32 %v3700_v42, %v3079_v43  ;;  %v3642_v23 = vld [vmem:[%s5141_s3 + $0xd0] sm:$0xf0]  ;;  %v3265_v42 = vld [vmem:[%s5141_s3 + $0x410] sm:$0xf] }
  0x62   : > { %1396 = vmatpush.bf16.msra.mxu1 %v3098_v49  ;;  %v3730_v49 = vld [vmem:[%s5141_s3 + $0x390] sm:$0xf0] }
  0x63   : > { %1466 = vmatpush.bf16.msra.mxu2 %v2822_v61  ;;  %v3178_v58 = vor.u32 %v3730_v49, %v3177_v47  ;;  %v3721_v61 = vld [vmem:[%s5141_s3 + $0x348] sm:$0xf0]  ;;  %v3687_v49 = vld [vmem:[%s5141_s3 + $0x238] sm:$0xf0]  ;;  %v3750_v43 = vld [vmem:[%s5141_s3 + $0x430] sm:$0xf0] }
  0x64   : > { %1480 = vmatpush.bf16.msra.mxu3 %v3110_v0  ;;  %1490 = vmatpush.bf16.msra.mxu0 %v2970_v41  ;;  %v2899_v0 = vld [vmem:[%s5141_s3 + $0x15c] sm:$0xf0]  ;;  %v3142_v6 = vor.u32 %v3721_v61, %v3141_v59  ;;  %v2977_v61 = vld [vmem:[%s5141_s3 + $0x1d0] sm:$0xf]  ;;  %v3266_v45 = vor.u32 %v3750_v43, %v3265_v42 }
  0x65   : > { %v2902_v8 = vor.u32 %v3655_v63, %v2899_v0 }
  0x66   : > { %1397 = vmatpush.bf16.msra.mxu1 %v3062_v62  ;;  %v3226_v62 = vor.u32 %v3736_v54, %v3223_v55  ;;  %v2755_v54 = vld [vmem:[%s5141_s3 + $0x3c] sm:$0xf0]  ;;  %v3749_v55 = vld [vmem:[%s5141_s3 + $0x428] sm:$0xf0] }
  0x67   : > { %1467 = vmatpush.bf16.msra.mxu2 %v2786_v10  ;;  %v3190_v10 = vor.u32 %v3727_v2, %v3187_v3  ;;  %v3258_v63 = vor.u32 %v3749_v55, %v3257_v51  ;;  %v3740_v2 = vld [vmem:[%s5141_s3 + $0x3e0] sm:$0xf0]  ;;  %v3714_v55 = vld [vmem:[%s5141_s3 + $0x310] sm:$0xf0] }
  0x68   : > { %1481 = vmatpush.bf16.msra.mxu3 %v3074_v14  ;;  %1491 = vmatpush.bf16.msra.mxu0 %v2934_v53  ;;  %v3718_v14 = vld [vmem:[%s5141_s3 + $0x334] sm:$0xf]  ;;  %v3619_v53 = vld [vmem:[%s5141_s3 + $0x1c] sm:$0xf] }
  0x69   : > { %v3154_v22 = vor.u32 %v3718_v14, %v3151_v15  ;;  %v3722_v14 = vld [vmem:[%s5141_s3 + $0x350] sm:$0xf0] }
  0x6a   : > { %1398 = vmatpush.bf16.msra.mxu1 %v3026_v13  ;;  %v2862_v13 = vor.u32 %v3650_v5, %v2861_v4  ;;  %v2941_v4 = vld [vmem:[%s5141_s3 + $0x188] sm:$0xf]  ;;  %v3669_v5 = vld [vmem:[%s5141_s3 + $0x1a8] sm:$0xf0] }
  0x6b   : > { %1468 = vmatpush.bf16.msra.mxu2 %v2750_v26  ;;  %v3709_v26 = vld [vmem:[%s5141_s3 + $0x2ec] sm:$0xf]  ;;  %v2942_v9 = vor.u32 %v3669_v5, %v2941_v4 }
  0x6c   : > { %1482 = vmatpush.bf16.msra.mxu3 %v3038_v30  ;;  %1492 = vmatpush.bf16.msra.mxu0 %v2898_v1  ;;  %v3632_v30 = vld [vmem:[%s5141_s3 + $0x80] sm:$0xf0]  ;;  %v3118_v36 = vor.u32 %v3709_v26, %v3115_v28  ;;  %v3221_v1 = vld [vmem:[%s5141_s3 + $0x3c0] sm:$0xf] }
  0x6d   : > { %1399 = vmatmul.bf16.vlgmr.msra.gmra.mxu1 %v4116_v39  ;;  %v2790_v41 = vor.u32 %v3632_v30, %v2789_v29  ;;  %v3704_v26 = vld [vmem:[%s5141_s3 + $0x2c0] sm:$0xf0]  ;;  %v2797_v29 = vld [vmem:[%s5141_s3 + $0x68] sm:$0xf]  ;;  %v3633_v30 = vld [vmem:[%s5141_s3 + $0x88] sm:$0xf0] }
  0x6e   : > { %1447 = vmatpush.bf16.msrb.mxu1 %v3286_v17  ;;  %1469 = vmatmul.bf16.vlgmr.msra.gmra.mxu2 %v4090_v27  ;;  %v3641_v17 = vld [vmem:[%s5141_s3 + $0xc8] sm:$0xf0] }
  0x6f   : > { %1517 = vmatpush.bf16.msrb.mxu2 %v3010_v35  ;;  %1483 = vmatmul.bf16.vlgmr.msra.gmra.mxu3 %v4116_v39  ;;  %v2826_v25 = vor.u32 %v3641_v17, %v2825_v16  ;;  %v3293_v35 = vld [vmem:[%s5141_s3 + $0x450] sm:$0xf]  ;;  %v2869_v16 = vld [vmem:[%s5141_s3 + $0xf8] sm:$0xf]  ;;  %v3651_v17 = vld [vmem:[%s5141_s3 + $0x118] sm:$0xf0] }
  0x70   : > { %1531 = vmatpush.bf16.msrb.mxu3 %v3298_v37  ;;  %1493 = vmatpush.bf16.msra.mxu0 %v2862_v13  ;;  %v3628_v37 = vld [vmem:[%s5141_s3 + $0x64] sm:$0xf]  ;;  %v3149_v13 = vld [vmem:[%s5141_s3 + $0x330] sm:$0xf]  ;;  %v2870_v21 = vor.u32 %v3651_v17, %v2869_v16 }
  0x71   : > { %v2794_v47 = vor.u32 %v3628_v37, %v2791_v38  ;;  %v2761_v37 = vld [vmem:[%s5141_s3 + $0x20] sm:$0xf]  ;;  %v3624_v38 = vld [vmem:[%s5141_s3 + $0x40] sm:$0xf0] }
  0x72   : > { %1448 = vmatpush.bf16.msrb.mxu1 %v3250_v33  ;;  %v3694_v33 = vld [vmem:[%s5141_s3 + $0x270] sm:$0xf0]  ;;  %v2762_v44 = vor.u32 %v3624_v38, %v2761_v37 }
  0x73   : > { %1518 = vmatpush.bf16.msrb.mxu2 %v2974_v48  ;;  %v3013_v48 = vld [vmem:[%s5141_s3 + $0x218] sm:$0xf] }
  0x74   : > { %1532 = vmatpush.bf16.msrb.mxu3 %v3262_v50  ;;  %1494 = vmatpush.bf16.msra.mxu0 %v2826_v25  ;;  %v3294_v50 = vor.u32 %v3758_v40, %v3293_v35  ;;  %v3014_v59 = vor.u32 %v3687_v49, %v3013_v48  ;;  %v3077_v25 = vld [vmem:[%s5141_s3 + $0x2a0] sm:$0xf]  ;;  %v3759_v35 = vld [vmem:[%s5141_s3 + $0x478] sm:$0xf0] }
  0x75   : > { %v3193_v49 = vld [vmem:[%s5141_s3 + $0x380] sm:$0xf] }
  0x76   : > { %1449 = vmatpush.bf16.msrb.mxu1 %v3214_v46  ;;  %v3034_v46 = vor.u32 %v3694_v33, %v3033_v32  ;;  %v3041_v32 = vld [vmem:[%s5141_s3 + $0x258] sm:$0xf]  ;;  %v3695_v33 = vld [vmem:[%s5141_s3 + $0x278] sm:$0xf0] }
  0x77   : > { %1519 = vmatpush.bf16.msrb.mxu2 %v2938_v60  ;;  %v2758_v60 = vor.u32 %v3619_v53, %v2755_v54  ;;  %v3042_v40 = vor.u32 %v3695_v33, %v3041_v32  ;;  %v3723_v53 = vld [vmem:[%s5141_s3 + $0x358] sm:$0xf0]  ;;  %v3121_v54 = vld [vmem:[%s5141_s3 + $0x2f0] sm:$0xf] }
  0x78   : > { %1533 = vmatpush.bf16.msrb.mxu3 %v3226_v62  ;;  %1495 = vmatpush.bf16.msra.mxu0 %v2790_v41  ;;  %v3678_v62 = vld [vmem:[%s5141_s3 + $0x1f0] sm:$0xf0] }
  0x79   : > { %v2978_v3 = vor.u32 %v3678_v62, %v2977_v61  ;;  %v3696_v61 = vld [vmem:[%s5141_s3 + $0x280] sm:$0xf0] }
  0x7a   : > { %1450 = vmatpush.bf16.msrb.mxu1 %v3178_v58  ;;  %v3043_v58 = vld [vmem:[%s5141_s3 + $0x27c] sm:$0xf0] }
  0x7b   : > { %1520 = vmatpush.bf16.msrb.mxu2 %v2902_v8  ;;  %v3046_v0 = vor.u32 %v3691_v57, %v3043_v58  ;;  %v3731_v8 = vld [vmem:[%s5141_s3 + $0x398] sm:$0xf0]  ;;  %v3085_v57 = vld [vmem:[%s5141_s3 + $0x2a8] sm:$0xf]  ;;  %v3705_v58 = vld [vmem:[%s5141_s3 + $0x2c8] sm:$0xf0] }
  0x7c   : > { %1534 = vmatpush.bf16.msrb.mxu3 %v3190_v10  ;;  %1496 = vmatpush.bf16.msra.mxu0 %v2754_v56  ;;  %v2905_v10 = vld [vmem:[%s5141_s3 + $0x140] sm:$0xf]  ;;  %v3186_v12 = vor.u32 %v3731_v8, %v3185_v7  ;;  %v3122_v56 = vor.u32 %v3714_v55, %v3121_v54 }
  0x7d   : > { %v2906_v15 = vor.u32 %v3660_v11, %v2905_v10 }
  0x7e   : > { %1451 = vmatpush.bf16.msrb.mxu1 %v3142_v6  ;;  %v3222_v6 = vor.u32 %v3740_v2, %v3221_v1 }
  0x7f   : > { %1521 = vmatpush.bf16.msrb.mxu2 %v2866_v20  ;;  %1497 = vmatmul.bf16.vlgmr.msra.gmra.mxu0 %v4090_v27  ;;  %v3713_v20 = vld [vmem:[%s5141_s3 + $0x308] sm:$0xf0] }
  0x80   : > { %1535 = vmatpush.bf16.msrb.mxu3 %v3154_v22  ;;  %1545 = vmatpush.bf16.msrb.mxu0 %v3014_v59  ;;  %v2833_v22 = vld [vmem:[%s5141_s3 + $0xb0] sm:$0xf]  ;;  %v3114_v24 = vor.u32 %v3713_v20, %v3113_v19  ;;  %v3086_v59 = vor.u32 %v3705_v58, %v3085_v57  ;;  %v3760_v19 = vld [vmem:[%s5140_s2] sm:$0xff]  ;;  %v3767_v57 = vld [vmem:[%s5140_s2 + $0x38] sm:$0xff] }
  0x81   : > { %v2834_v28 = vor.u32 %v3642_v23, %v2833_v22  ;;  %v3763_v58 = vld [vmem:[%s5140_s2 + $0x18] sm:$0xff] }
  0x82   : > { %1452 = vmatpush.bf16.msrb.mxu1 %v3106_v18  ;;  %v3150_v18 = vor.u32 %v3722_v14, %v3149_v13 }
  0x83   : > { %1522 = vmatpush.bf16.msrb.mxu2 %v2830_v34  ;;  %v3301_v34 = vld [vmem:[%s5141_s3 + $0x458] sm:$0xf] }
  0x84   : > { %1536 = vmatpush.bf16.msrb.mxu3 %v3118_v36  ;;  %1546 = vmatpush.bf16.msrb.mxu0 %v2978_v3  ;;  %v2798_v36 = vor.u32 %v3633_v30, %v2797_v29  ;;  %v3302_v41 = vor.u32 %v3759_v35, %v3301_v34 }
  0x86   : > { %1453 = vmatpush.bf16.msrb.mxu1 %v3070_v31  ;;  %v3078_v31 = vor.u32 %v3704_v26, %v3077_v25  ;;  %v3765_v26 = vld [vmem:[%s5140_s2 + $0x28] sm:$0xff] }
  0x87   : > { %1523 = vmatpush.bf16.msrb.mxu2 %v2794_v47  ;;  %v3741_v47 = vld [vmem:[%s5141_s3 + $0x3e8] sm:$0xf0] }
  0x88   : > { %1537 = vmatpush.bf16.msrb.mxu3 %v3082_v52  ;;  %1547 = vmatpush.bf16.msrb.mxu0 %v2942_v9  ;;  %v3157_v52 = vld [vmem:[%s5141_s3 + $0x338] sm:$0xf] }
  0x8a   : > { %1454 = vmatpush.bf16.msrb.mxu1 %v3034_v46  ;;  %v3229_v46 = vld [vmem:[%s5141_s3 + $0x3c8] sm:$0xf] }
  0x8b   : > { %1524 = vmatpush.bf16.msrb.mxu2 %v2758_v60  ;;  %v3230_v48 = vor.u32 %v3741_v47, %v3229_v46  ;;  %v3049_v60 = vld [vmem:[%s5141_s3 + $0x260] sm:$0xf]  ;;  %v3766_v46 = vld [vmem:[%s5140_s2 + $0x30] sm:$0xff] }
  0x8c   : > { %1538 = vmatpush.bf16.msrb.mxu3 %v3046_v0  ;;  %1548 = vmatpush.bf16.msrb.mxu0 %v2906_v15  ;;  %v3762_v47 = vld [vmem:[%s5140_s2 + $0x10] sm:$0xff] }
  0x8d   : > { %1455 = vmatmul.bf16.vlgmr.msrb.gmra.mxu1 %v4116_v39 }
  0x8e   : > { %1503 = vmatpush.bf16.msra.mxu1 %v3294_v50  ;;  %1525 = vmatmul.bf16.vlgmr.msrb.gmra.mxu2 %v4090_v27  ;;  %v3732_v50 = vld [vmem:[%s5141_s3 + $0x3a0] sm:$0xf0] }
  0x8f   : > { %1539 = vmatmul.bf16.vlgmr.msrb.gmra.mxu3 %v4116_v39  ;;  %v3194_v51 = vor.u32 %v3732_v50, %v3193_v49 }
  0x90   : > { %1549 = vmatpush.bf16.msrb.mxu0 %v2870_v21 }
  0x92   : > { %1504 = vmatpush.bf16.msra.mxu1 %v3258_v63  ;;  %v3050_v63 = vor.u32 %v3696_v61, %v3049_v60 }
  0x94   : > { %1550 = vmatpush.bf16.msrb.mxu0 %v2834_v28  ;;  %v3761_v28 = vld [vmem:[%s5140_s2 + $0x8] sm:$0xff] }
  0x96   : > { %1505 = vmatpush.bf16.msra.mxu1 %v3222_v6 }
  0x98   : > { %1551 = vmatpush.bf16.msrb.mxu0 %v2798_v36 }
  0x9a   : > { %1506 = vmatpush.bf16.msra.mxu1 %v3186_v12 }
  0x9c   : > { %1552 = vmatpush.bf16.msrb.mxu0 %v2762_v44  ;;  %v3768_v44 = vld [vmem:[%s5140_s2 + $0x40] sm:$0xff] }
  0x9e   : > { %1507 = vmatpush.bf16.msra.mxu1 %v3150_v18 }
  0x9f   : > { %1553 = vmatmul.bf16.vlgmr.msrb.gmra.mxu0 %v4090_v27  ;;  %v3158_v27 = vor.u32 %v3723_v53, %v3157_v52  ;;  %v3769_v52 = vld [vmem:[%s5140_s2 + $0x48] sm:$0xff] }
  0xa0   : > { %v3773_v53 = vld [vmem:[%s5140_s2 + $0x68] sm:$0xff] }
  0xa2   : > { %1508 = vmatpush.bf16.msra.mxu1 %v3114_v24 }
  0xa6   : > { %1509 = vmatpush.bf16.msra.mxu1 %v3078_v31 }
  0xaa   : > { %1510 = vmatpush.bf16.msra.mxu1 %v3042_v40  ;;  %v1330_v62 = vpop.f32.mrf.mxu1 }
  0xad   : > { %1511 = vmatmul.bf16.vlgmr.msra.gmra.mxu1 %v4116_v39 }
  0xae   : > { %1559 = vmatpush.bf16.msrb.mxu1 %v3302_v41 }
  0xb1   : > { %v1358_v1 = vpop.f32.mrf.mxu2 }
  0xb2   : > { %1560 = vmatpush.bf16.msrb.mxu1 %v3266_v45  ;;  %v1332_v0 = vpop.f32.mrf.mxu1  ;;  %v1372_v2 = vpop.f32.mrf.mxu3  ;;  %v3772_v45 = vld [vmem:[%s5140_s2 + $0x60] sm:$0xff] }
  0xb3   : > { %v1373_v5 = vadd.f32 %v1372_v2, %v1358_v1 }
  0xb6   : > { %1561 = vmatpush.bf16.msrb.mxu1 %v3230_v48 }
  0xb9   : > { %v1360_v6 = vpop.f32.mrf.mxu2 }
  0xba   : > { %1562 = vmatpush.bf16.msrb.mxu1 %v3194_v51  ;;  %v1374_v7 = vpop.f32.mrf.mxu3 }
  0xbb   : > { %v1375_v11 = vadd.f32 %v1374_v7, %v1360_v6  ;;  %v3770_v7 = vld [vmem:[%s5140_s2 + $0x50] sm:$0xff] }
  0xbc   : > { %v1386_v22 = vpop.f32.mrf.mxu0 }
  0xbe   : > { %1563 = vmatpush.bf16.msrb.mxu1 %v3158_v27 }
  0xc2   : > { %1564 = vmatpush.bf16.msrb.mxu1 %v3122_v56 }
  0xc4   : > { %v1388_v31 = vpop.f32.mrf.mxu0 }
  0xc6   : > { %1565 = vmatpush.bf16.msrb.mxu1 %v3086_v59 }
  0xca   : > { %1566 = vmatpush.bf16.msrb.mxu1 %v3050_v63  ;;  %v1344_v3 = vpop.f32.mrf.mxu1 }
  0xcb   : > { %v1345_v4 = vadd.f32 %v1344_v3, %v1330_v62 }
  0xcd   : > { %1567 = vmatmul.bf16.vlgmr.msrb.gmra.mxu1 %v4116_v39  ;;  %v1573_v9 = vpack.c.bf16 %v1373_v5, %v1345_v4  ;;  %v3764_v39 = vld [vmem:[%s5140_s2 + $0x20] sm:$0xff] }
  0xcf   : > { %v1622_v13 = vunpack.c.h.b16 %v1573_v9  ;;  %v1688_v14 = vunpack.c.l.b16 %v1573_v9  ;;  %v3776_v9 = vld [vmem:[%s5140_s2 + $0x80] sm:$0xff] }
  0xd1   : > { %v1414_v20 = vpop.f32.mrf.mxu2 }
  0xd2   : > { %v1346_v8 = vpop.f32.mrf.mxu1  ;;  %v1428_v21 = vpop.f32.mrf.mxu3 }
  0xd3   : > { %v1347_v10 = vadd.f32 %v1346_v8, %v1332_v0  ;;  %v1429_v25 = vadd.f32 %v1428_v21, %v1414_v20  ;;  %v3774_v8 = vld [vmem:[%s5140_s2 + $0x70] sm:$0xff] }
  0xd5   : > { %v1578_v12 = vpack.c.bf16 %v1375_v11, %v1347_v10  ;;  %v3780_v10 = vld [vmem:[%s5140_s2 + $0xa0] sm:$0xff] }
  0xd7   : > { %v1623_v15 = vunpack.c.h.b16 %v1578_v12  ;;  %v1689_v16 = vunpack.c.l.b16 %v1578_v12 }
  0xd9   : > { %v1624_v17 = vpack.c.b16 %v1623_v15, %v1622_v13  ;;  %v1690_v18 = vpack.c.b16 %v1689_v16, %v1688_v14  ;;  %v1416_v29 = vpop.f32.mrf.mxu2 }
  0xda   : > { %v1430_v30 = vpop.f32.mrf.mxu3 }
  0xdb   : > { %1646 = vmatpush.bf16.msra.mxu2 %v1624_v17  ;;  %1711 = vmatpush.bf16.msra.mxu3 %v1690_v18  ;;  %v1431_v33 = vadd.f32 %v1430_v30, %v1416_v29 }
  0xdc   : > { %v1442_v50 = vpop.f32.mrf.mxu0 }
  0xde   : > { %3327 = vmatmul.msk.bf16.vlgmr.msra.gmra.mxu2 %vm1626_vm0, %v3764_v39  ;;  %3347 = vmatmul.msk.bf16.vlgmr.msra.gmra.mxu3 %vm1626_vm0, %v3760_v19  ;;  %v3771_v39 = vld [vmem:[%s5140_s2 + $0x58] sm:$0xff] }
  0xdf   : > { %v3775_v19 = vld [vmem:[%s5140_s2 + $0x78] sm:$0xff] }
  0xe4   : > { %v1444_v59 = vpop.f32.mrf.mxu0 }
  0xea   : > { %v1400_v23 = vpop.f32.mrf.mxu1 }
  0xeb   : > { %v1401_v24 = vadd.f32 %v1400_v23, %v1386_v22 }
  0xed   : > { %v1574_v32 = vpack.c.bf16 %v1429_v25, %v1401_v24  ;;  %v3777_v24 = vld [vmem:[%s5140_s2 + $0x88] sm:$0xff] }
  0xee   : > { %3328 = vmatmul.msk.bf16.gmra.mxu2 %vm1626_vm0, %v3765_v26  ;;  %3348 = vmatmul.msk.bf16.gmra.mxu3 %vm1626_vm0, %v3761_v28  ;;  %v3781_v26 = vld [vmem:[%s5140_s2 + $0xa8] sm:$0xff] }
  0xef   : > { %v1764_v36 = vunpack.c.l.b16 %v1574_v32  ;;  %v1846_v37 = vunpack.c.h.b16 %v1574_v32 }
  0xf1   : > { %v1470_v48 = vpop.f32.mrf.mxu2 }
  0xf2   : > { %v1402_v34 = vpop.f32.mrf.mxu1  ;;  %v1484_v49 = vpop.f32.mrf.mxu3 }
  0xf3   : > { %v1403_v35 = vadd.f32 %v1402_v34, %v1388_v31  ;;  %v1485_v27 = vadd.f32 %v1484_v49, %v1470_v48  ;;  %v3809_v49 = vld [vmem:[%s5144_s6 + $0x68] sm:$0xff] }
  0xf5   : > { %v1579_v38 = vpack.c.bf16 %v1431_v33, %v1403_v35  ;;  %v3803_v33 = vld [vmem:[%s5144_s6 + $0x38] sm:$0xff] }
  0xf7   : > { %v1765_v40 = vunpack.c.l.b16 %v1579_v38  ;;  %v1847_v41 = vunpack.c.h.b16 %v1579_v38  ;;  %v3788_v38 = vld [vmem:[%s5140_s2 + $0xe0] sm:$0xff] }
  0xf9   : > { %v1766_v42 = vpack.c.b16 %v1765_v40, %v1764_v36  ;;  %v1848_v43 = vpack.c.b16 %v1847_v41, %v1846_v37  ;;  %v1472_v55 = vpop.f32.mrf.mxu2  ;;  %v3802_v36 = vld [vmem:[%s5144_s6 + $0x30] sm:$0xff]  ;;  %v3784_v37 = vld [vmem:[%s5140_s2 + $0xc0] sm:$0xff] }
  0xfa   : > { %v1486_v56 = vpop.f32.mrf.mxu3  ;;  %v3778_v41 = vld [vmem:[%s5140_s2 + $0x90] sm:$0xff] }
  0xfb   : > { %1787 = vmatpush.bf16.msra.mxu0 %v1766_v42  ;;  %1869 = vmatpush.bf16.msra.mxu1 %v1848_v43  ;;  %v1487_v62 = vadd.f32 %v1486_v56, %v1472_v55  ;;  %v3782_v42 = vld [vmem:[%s5140_s2 + $0xb0] sm:$0xff]  ;;  %v3811_v43 = vld [vmem:[%s5144_s6 + $0x78] sm:$0xff]  ;;  %v3785_v55 = vld [vmem:[%s5140_s2 + $0xc8] sm:$0xff] }
  0xfc   : > { %v1498_v13 = vpop.f32.mrf.mxu0  ;;  %v3789_v56 = vld [vmem:[%s5140_s2 + $0xe8] sm:$0xff] }
  0xfe   : > { %3375 = vmatmul.msk.bf16.vlgmr.msra.gmra.mxu0 %vm1626_vm0, %v3768_v44  ;;  %3403 = vmatmul.msk.bf16.vlgmr.msra.gmra.mxu1 %vm1626_vm0, %v3772_v45  ;;  %v3801_v44 = vld [vmem:[%s5144_s6 + $0x28] sm:$0xff] }
  0xff   : > { %3329 = vmatmul.msk.bf16.gmra.mxu2 %vm1626_vm0, %v3766_v46  ;;  %3349 = vmatmul.msk.bf16.gmra.mxu3 %vm1626_vm0, %v3762_v47  ;;  %v3810_v46 = vld [vmem:[%s5144_s6 + $0x70] sm:$0xff]  ;;  %v3800_v47 = vld [vmem:[%s5144_s6 + $0x20] sm:$0xff] }
 0x104   : > { %v1500_v20 = vpop.f32.mrf.mxu0 }
 0x10a   : > { %v1456_v51 = vpop.f32.mrf.mxu1 }
 0x10b   : > { %v1457_v54 = vadd.f32 %v1456_v51, %v1442_v50  ;;  %v3799_v50 = vld [vmem:[%s5144_s6 + $0x18] sm:$0xff] }
 0x10d   : > { %v1575_v61 = vpack.c.bf16 %v1485_v27, %v1457_v54 }
 0x10e   : > { %3376 = vmatmul.msk.bf16.gmra.mxu0 %vm1626_vm0, %v3769_v52  ;;  %3404 = vmatmul.msk.bf16.gmra.mxu1 %vm1626_vm0, %v3773_v53  ;;  %v3808_v52 = vld [vmem:[%s5144_s6 + $0x60] sm:$0xff] }
 0x10f   : > { %3330 = vmatmul.msk.bf16.gmra.mxu2 %vm1626_vm0, %v3767_v57  ;;  %3350 = vmatmul.msk.bf16.gmra.mxu3 %vm1626_vm0, %v3763_v58  ;;  %v1930_v1 = vunpack.c.l.b16 %v1575_v61  ;;  %v2012_v2 = vunpack.c.h.b16 %v1575_v61  ;;  %v3798_v57 = vld [vmem:[%s5144_s6 + $0x10] sm:$0xff]  ;;  %v3783_v61 = vld [vmem:[%s5140_s2 + $0xb8] sm:$0xff] }
 0x111   : > { %v1526_v11 = vpop.f32.mrf.mxu2 }
 0x112   : > { %v1458_v60 = vpop.f32.mrf.mxu1  ;;  %v1540_v12 = vpop.f32.mrf.mxu3 }
 0x113   : > { %v1459_v63 = vadd.f32 %v1458_v60, %v1444_v59  ;;  %v1541_v16 = vadd.f32 %v1540_v12, %v1526_v11  ;;  %v3779_v60 = vld [vmem:[%s5140_s2 + $0x98] sm:$0xff] }
 0x115   : > { %v1580_v0 = vpack.c.bf16 %v1487_v62, %v1459_v63  ;;  %v3807_v62 = vld [vmem:[%s5144_s6 + $0x58] sm:$0xff] }
 0x117   : > { %v1931_v3 = vunpack.c.l.b16 %v1580_v0  ;;  %v2013_v4 = vunpack.c.h.b16 %v1580_v0  ;;  %v3797_v0 = vld [vmem:[%s5144_s6 + $0x8] sm:$0xff] }
 0x119   : > { %v1932_v5 = vpack.c.b16 %v1931_v3, %v1930_v1  ;;  %v2014_v6 = vpack.c.b16 %v2013_v4, %v2012_v2  ;;  %v1528_v17 = vpop.f32.mrf.mxu2  ;;  %v3806_v2 = vld [vmem:[%s5144_s6 + $0x50] sm:$0xff]  ;;  %v3796_v3 = vld [vmem:[%s5144_s6] sm:$0xff]  ;;  %v3805_v4 = vld [vmem:[%s5144_s6 + $0x48] sm:$0xff] }
 0x11a   : > { %v1542_v18 = vpop.f32.mrf.mxu3 }
 0x11b   : > { %1953 = vmatpush.bf16.msrb.mxu2 %v1932_v5  ;;  %2035 = vmatpush.bf16.msrb.mxu3 %v2014_v6  ;;  %v1543_v22 = vadd.f32 %v1542_v18, %v1528_v17  ;;  %v3786_v5 = vld [vmem:[%s5140_s2 + $0xd0] sm:$0xff]  ;;  %v3804_v6 = vld [vmem:[%s5144_s6 + $0x40] sm:$0xff] }
 0x11c   : > { %v1554_v40 = vpop.f32.mrf.mxu0  ;;  %v2343_v17 = vld [vmem:[%s4957_s26 + $0x20] sm:$0xff]  ;;  %v2345_v18 = vld [vmem:[%s4957_s26 + $0x30] sm:$0xff] }
 0x11e   : > { %3377 = vmatmul.msk.bf16.gmra.mxu0 %vm1626_vm0, %v3770_v7  ;;  %3405 = vmatmul.msk.bf16.gmra.mxu1 %vm1626_vm0, %v3774_v8  ;;  %v3790_v7 = vld [vmem:[%s5140_s2 + $0xf0] sm:$0xff]  ;;  %v2339_v8 = vld [vmem:[%s4957_s26] sm:$0xff] }
 0x11f   : > { %3431 = vmatmul.msk.bf16.vlgmr.msrb.gmra.mxu2 %vm1626_vm0, %v3776_v9  ;;  %3459 = vmatmul.msk.bf16.vlgmr.msrb.gmra.mxu3 %vm1626_vm0, %v3780_v10  ;;  %v2341_v9 = vld [vmem:[%s4957_s26 + $0x10] sm:$0xff]  ;;  %v3792_v10 = vld [vmem:[%s5140_s2 + $0x100] sm:$0xff] }
 0x120   : > { %2491 = vmatpush.bf16.msra.mxu3 %v3803_v33  ;;  %v2355_v11 = vpack.c.bf16 %v2341_v9, %v2339_v8 }
 0x124   : > { %2492 = vmatpush.bf16.msra.mxu3 %v3802_v36  ;;  %v1556_v51 = vpop.f32.mrf.mxu0 }
 0x128   : > { %2493 = vmatpush.bf16.msra.mxu3 %v3801_v44 }
 0x12a   : > { %v1512_v14 = vpop.f32.mrf.mxu1 }
 0x12b   : > { %v1513_v15 = vadd.f32 %v1512_v14, %v1498_v13 }
 0x12c   : > { %2494 = vmatpush.bf16.msra.mxu3 %v3800_v47 }
 0x12d   : > { %v1576_v21 = vpack.c.bf16 %v1541_v16, %v1513_v15  ;;  %v3787_v15 = vld [vmem:[%s5140_s2 + $0xd8] sm:$0xff] }
 0x12e   : > { %3378 = vmatmul.msk.bf16.gmra.mxu0 %vm1626_vm0, %v3771_v39  ;;  %3406 = vmatmul.msk.bf16.gmra.mxu1 %vm1626_vm0, %v3775_v19  ;;  %v3791_v16 = vld [vmem:[%s5140_s2 + $0xf8] sm:$0xff] }
 0x12f   : > { %v2096_v28 = vunpack.c.l.b16 %v1576_v21  ;;  %v2178_v29 = vunpack.c.h.b16 %v1576_v21  ;;  %3432 = vmatmul.msk.bf16.gmra.mxu2 %vm1626_vm0, %v3777_v24  ;;  %3460 = vmatmul.msk.bf16.gmra.mxu3 %vm1626_vm0, %v3781_v26  ;;  %v3793_v21 = vld [vmem:[%s5140_s2 + $0x108] sm:$0xff] }
 0x130   : > { %2495 = vmatpush.bf16.msra.mxu3 %v3799_v50  ;;  %v2340_v26 = vld [vmem:[%s4957_s26 + $0x8] sm:$0xff]  ;;  %v2346_v50 = vld [vmem:[%s4957_s26 + $0x38] sm:$0xff] }
 0x132   : > { %v1514_v23 = vpop.f32.mrf.mxu1 }
 0x133   : > { %v1515_v25 = vadd.f32 %v1514_v23, %v1500_v20 }
 0x134   : > { %2496 = vmatpush.bf16.msra.mxu3 %v3798_v57 }
 0x135   : > { %v1581_v30 = vpack.c.bf16 %v1543_v22, %v1515_v25  ;;  %v2357_v22 = vpack.c.bf16 %v2345_v18, %v2343_v17 }
 0x137   : > { %v2097_v31 = vunpack.c.l.b16 %v1581_v30  ;;  %v2179_v32 = vunpack.c.h.b16 %v1581_v30  ;;  %v2347_v30 = vld [vmem:[%s4957_s26 + $0x40] sm:$0xff] }
 0x138   : > { %2497 = vmatpush.bf16.msra.mxu3 %v3797_v0 }
 0x139   : > { %v2098_v34 = vpack.c.b16 %v2097_v31, %v2096_v28  ;;  %v2180_v35 = vpack.c.b16 %v2179_v32, %v2178_v29  ;;  %v2342_v28 = vld [vmem:[%s4957_s26 + $0x18] sm:$0xff]  ;;  %v2349_v31 = vld [vmem:[%s4957_s26 + $0x50] sm:$0xff] }
 0x13a   : > { %v2356_v29 = vpack.c.bf16 %v2342_v28, %v2340_v26 }
 0x13b   : > { %2119 = vmatpush.bf16.msrb.mxu0 %v2098_v34  ;;  %2201 = vmatpush.bf16.msrb.mxu1 %v2180_v35 }
 0x13c   : > { %2498 = vmatpush.bf16.msra.mxu3 %v3796_v3 }
 0x13e   : > { %3487 = vmatmul.msk.bf16.vlgmr.msrb.gmra.mxu0 %vm1626_vm0, %v3784_v37  ;;  %3515 = vmatmul.msk.bf16.vlgmr.msrb.gmra.mxu1 %vm1626_vm0, %v3788_v38  ;;  %v3794_v38 = vld [vmem:[%s5140_s2 + $0x110] sm:$0xff] }
 0x13f   : > { %2520 = vmatpush.bf16.msra.mxu0 %v3811_v43  ;;  %3433 = vmatmul.msk.bf16.gmra.mxu2 %vm1626_vm0, %v3778_v41 }
 0x140   : > { %3461 = vmatmul.msk.bf16.gmra.mxu3 %vm1626_vm0, %v3782_v42 }
 0x143   : > { %2521 = vmatpush.bf16.msra.mxu0 %v3810_v46 }
 0x147   : > { %2522 = vmatpush.bf16.msra.mxu0 %v3809_v49  ;;  %v2344_v49 = vld [vmem:[%s4957_s26 + $0x28] sm:$0xff] }
 0x14a   : > { %v1568_v45 = vpop.f32.mrf.mxu1 }
 0x14b   : > { %v1569_v48 = vadd.f32 %v1568_v45, %v1554_v40  ;;  %2523 = vmatpush.bf16.msra.mxu0 %v3808_v52  ;;  %v2359_v40 = vpack.c.bf16 %v2349_v31, %v2347_v30  ;;  %v2351_v52 = vld [vmem:[%s4957_s26 + $0x60] sm:$0xff] }
 0x14d   : > { %v1577_v53 = vpack.c.bf16 %v1569_v48, %v1569_v48 }
 0x14e   : > { %3488 = vmatmul.msk.bf16.gmra.mxu0 %vm1626_vm0, %v3785_v55  ;;  %3516 = vmatmul.msk.bf16.gmra.mxu1 %vm1626_vm0, %v3789_v56 }
 0x14f   : > { %v2262_v58 = vunpack.c.l.b16 %v1577_v53  ;;  %2524 = vmatpush.bf16.msra.mxu0 %v3807_v62  ;;  %3434 = vmatmul.msk.bf16.gmra.mxu2 %vm1626_vm0, %v3779_v60  ;;  %v2353_v53 = vld [vmem:[%s4957_s26 + $0x70] sm:$0xff] }
 0x150   : > { %3462 = vmatmul.msk.bf16.gmra.mxu3 %vm1626_vm0, %v3783_v61  ;;  %v2361_v60 = vpack.c.bf16 %v2353_v53, %v2351_v52 }
 0x152   : > { %v1570_v27 = vpop.f32.mrf.mxu1 }
 0x153   : > { %v1571_v54 = vadd.f32 %v1570_v27, %v1556_v51  ;;  %2525 = vmatpush.bf16.msra.mxu0 %v3806_v2  ;;  %v2358_v51 = vpack.c.bf16 %v2346_v50, %v2344_v49 }
 0x155   : > { %v1582_v59 = vpack.c.bf16 %v1571_v54, %v1571_v54 }
 0x157   : > { %v2263_v63 = vunpack.c.l.b16 %v1582_v59  ;;  %2526 = vmatpush.bf16.msra.mxu0 %v3805_v4  ;;  %v3795_v59 = vld [vmem:[%s5140_s2 + $0x118] sm:$0xff] }
 0x159   : > { %v2264_v1 = vpack.c.b16 %v2263_v63, %v2262_v58 }
 0x15b   : > { %2285 = vmatpush.bf16.msra.mxu2 %v2264_v1  ;;  %2527 = vmatpush.bf16.msra.mxu0 %v3804_v6  ;;  %v2350_v6 = vld [vmem:[%s4957_s26 + $0x58] sm:$0xff] }
 0x15e   : > { %3489 = vmatmul.msk.bf16.gmra.mxu0 %vm1626_vm0, %v3786_v5  ;;  %3517 = vmatmul.msk.bf16.gmra.mxu1 %vm1626_vm0, %v3790_v7  ;;  %v2348_v5 = vld [vmem:[%s4957_s26 + $0x48] sm:$0xff] }
 0x15f   : > { %3543 = vmatmul.msk.bf16.vlgmr.msra.gmra.mxu2 %vm1626_vm0, %v3792_v10  ;;  %v2360_v7 = vpack.c.bf16 %v2350_v6, %v2348_v5 }
 0x160   : > { %2499 = vmatmul.bf16.vlgmr.msra.gmra.mxu3 %v2355_v11 }
 0x161   : > { %v1648_v12 = vpop.f32.mrf.mxu2  ;;  %v1713_v13 = vpop.f32.mrf.mxu3 }
 0x162   : > { %v1714_v14 = vadd.f32 %v1713_v13, %v1648_v12 }
 0x169   : > { %v1650_v39 = vpop.f32.mrf.mxu2  ;;  %v1715_v19 = vpop.f32.mrf.mxu3 }
 0x16a   : > { %v1716_v20 = vadd.f32 %v1715_v19, %v1650_v39 }
 0x16e   : > { %3490 = vmatmul.msk.bf16.gmra.mxu0 %vm1626_vm0, %v3787_v15  ;;  %3518 = vmatmul.msk.bf16.gmra.mxu1 %vm1626_vm0, %v3791_v16 }
 0x16f   : > { %3544 = vmatmul.msk.bf16.gmra.mxu2 %vm1626_vm0, %v3793_v21  ;;  %v2352_v21 = vld [vmem:[%s4957_s26 + $0x68] sm:$0xff] }
 0x170   : > { %2504 = vmatmul.bf16.gmra.mxu3 %v2357_v22  ;;  %v2354_v22 = vld [vmem:[%s4957_s26 + $0x78] sm:$0xff]  ;;  %s417_s26 = scalar_lea.vmem %s5149_s11, %s2726_s12 }
 0x171   : > { %v1653_v23 = vpop.f32.mrf.mxu2  ;;  %v1718_v24 = vpop.f32.mrf.mxu3 }
 0x172   : > { %v1719_v25 = vadd.f32 %v1718_v24, %v1653_v23  ;;  %v2362_v23 = vpack.c.bf16 %v2354_v22, %v2352_v21 }
 0x179   : > { %v1655_v35 = vpop.f32.mrf.mxu2  ;;  %v1720_v36 = vpop.f32.mrf.mxu3 }
 0x17a   : > { %v1721_v37 = vadd.f32 %v1720_v36, %v1655_v35 }
 0x17b   : > { %v1789_v32 = vpop.f32.mrf.mxu0  ;;  %v1871_v33 = vpop.f32.mrf.mxu1 }
 0x17c   : > { %v1809_v34 = vadd.f32 %v1789_v32, %v1714_v14 }
 0x17e   : > { %v1891_v41 = vadd.f32 %v1871_v33, %v1809_v34  ;;  %2528 = vmatmul.bf16.vlgmr.msra.gmra.mxu0 %v2356_v29 }
 0x17f   : > { %3545 = vmatmul.msk.bf16.gmra.mxu2 %vm1626_vm0, %v3794_v38 }
 0x180   : > { %2509 = vmatmul.bf16.gmra.mxu3 %v2359_v40 }
 0x182   : > { %v1658_v45 = vpop.f32.mrf.mxu2  ;;  %v1723_v46 = vpop.f32.mrf.mxu3 }
 0x183   : > { %v1791_v42 = vpop.f32.mrf.mxu0  ;;  %v1873_v43 = vpop.f32.mrf.mxu1  ;;  %v1724_v47 = vadd.f32 %v1723_v46, %v1658_v45 }
 0x184   : > { %v1810_v44 = vadd.f32 %v1791_v42, %v1716_v20 }
 0x186   : > { %v1892_v48 = vadd.f32 %v1873_v43, %v1810_v44 }
 0x18a   : > { %v1660_v56 = vpop.f32.mrf.mxu2  ;;  %v1725_v57 = vpop.f32.mrf.mxu3 }
 0x18b   : > { %v1794_v27 = vpop.f32.mrf.mxu0  ;;  %v1876_v54 = vpop.f32.mrf.mxu1  ;;  %v1726_v58 = vadd.f32 %v1725_v57, %v1660_v56 }
 0x18c   : > { %v1811_v55 = vadd.f32 %v1794_v27, %v1719_v25 }
 0x18e   : > { %v1893_v61 = vadd.f32 %v1876_v54, %v1811_v55  ;;  %2533 = vmatmul.bf16.gmra.mxu0 %v2358_v51 }
 0x18f   : > { %3546 = vmatmul.msk.bf16.gmra.mxu2 %vm1626_vm0, %v3795_v59 }
 0x190   : > { %2514 = vmatmul.bf16.gmra.mxu3 %v2361_v60 }
 0x192   : > { %v1663_v1 = vpop.f32.mrf.mxu2  ;;  %v1728_v2 = vpop.f32.mrf.mxu3 }
 0x193   : > { %v1796_v62 = vpop.f32.mrf.mxu0  ;;  %v1878_v63 = vpop.f32.mrf.mxu1  ;;  %v1729_v3 = vadd.f32 %v1728_v2, %v1663_v1 }
 0x194   : > { %v1812_v0 = vadd.f32 %v1796_v62, %v1721_v37 }
 0x196   : > { %v1894_v4 = vadd.f32 %v1878_v63, %v1812_v0 }
 0x19a   : > { %v1665_v11 = vpop.f32.mrf.mxu2  ;;  %v1730_v12 = vpop.f32.mrf.mxu3 }
 0x19b   : > { %v1799_v8 = vpop.f32.mrf.mxu0  ;;  %v1881_v9 = vpop.f32.mrf.mxu1  ;;  %v1731_v13 = vadd.f32 %v1730_v12, %v1665_v11 }
 0x19c   : > { %v1813_v10 = vadd.f32 %v1799_v8, %v1724_v47 }
 0x19e   : > { %v1895_v14 = vadd.f32 %v1881_v9, %v1813_v10  ;;  %2538 = vmatmul.bf16.gmra.mxu0 %v2360_v7  ;;  %v5037_v10 = vld [vmem:[%s5143_s5] ss:$0 sm:$0xff] }
 0x1a2   : > { %v1955_v18 = vpop.f32.mrf.mxu2  ;;  %v2037_v39 = vpop.f32.mrf.mxu3 }
 0x1a3   : > { %v1801_v15 = vpop.f32.mrf.mxu0  ;;  %v1883_v16 = vpop.f32.mrf.mxu1  ;;  %v1975_v19 = vadd.f32 %v1955_v18, %v1891_v41 }
 0x1a4   : > { %v1814_v17 = vadd.f32 %v1801_v15, %v1726_v58 }
 0x1a5   : > { %v2057_v58 = vadd.f32 %v2037_v39, %v1975_v19 }
 0x1a6   : > { %v1896_v20 = vadd.f32 %v1883_v16, %v1814_v17 }
 0x1aa   : > { %v1957_v28 = vpop.f32.mrf.mxu2  ;;  %v2039_v29 = vpop.f32.mrf.mxu3 }
 0x1ab   : > { %v1804_v24 = vpop.f32.mrf.mxu0  ;;  %v1886_v25 = vpop.f32.mrf.mxu1  ;;  %v1976_v30 = vadd.f32 %v1957_v28, %v1892_v48 }
 0x1ac   : > { %v1815_v26 = vadd.f32 %v1804_v24, %v1729_v3 }
 0x1ad   : > { %v2058_v63 = vadd.f32 %v2039_v29, %v1976_v30 }
 0x1ae   : > { %v1897_v31 = vadd.f32 %v1886_v25, %v1815_v26  ;;  %2543 = vmatmul.bf16.gmra.mxu0 %v2362_v23  ;;  %v5053_v26 = vld [vmem:[%s5145_s7] ss:$0 sm:$0xff] }
 0x1b2   : > { %v1960_v34 = vpop.f32.mrf.mxu2  ;;  %v2042_v35 = vpop.f32.mrf.mxu3 }
 0x1b3   : > { %v1806_v32 = vpop.f32.mrf.mxu0  ;;  %v1977_v36 = vadd.f32 %v1960_v34, %v1893_v61  ;;  %v5012_v46 = vpop.f32.mrf.mxu1 }
 0x1b4   : > { %v5010_v33 = vadd.f32 %v1806_v32, %v1731_v13 }
 0x1ba   : > { %v1962_v38 = vpop.f32.mrf.mxu2  ;;  %v2044_v40 = vpop.f32.mrf.mxu3 }
 0x1bb   : > { %v2121_v37 = vpop.f32.mrf.mxu0  ;;  %v1978_v41 = vadd.f32 %v1962_v38, %v1894_v4  ;;  %v2203_v51 = vpop.f32.mrf.mxu1  ;;  %v5029_v4 = vld [vmem:[%s5142_s4] ss:$0 sm:$0xff] }
 0x1bc   : > { %v2141_v59 = vadd.f32 %v2121_v37, %v2057_v58 }
 0x1be   : > { %v2223_v1 = vadd.f32 %v2203_v51, %v2141_v59 }
 0x1c2   : > { %v1965_v43 = vpop.f32.mrf.mxu2 }
 0x1c3   : > { %v2123_v42 = vpop.f32.mrf.mxu0  ;;  %v1979_v44 = vadd.f32 %v1965_v43, %v1895_v14  ;;  %v2047_v45 = vpop.f32.mrf.mxu3  ;;  %v2059_v14 = vadd.f32 %v2042_v35, %v1977_v36 }
 0x1c4   : > { %v2205_v56 = vpop.f32.mrf.mxu1  ;;  %v2142_v2 = vadd.f32 %v2123_v42, %v2058_v63 }
 0x1c6   : > { %v2224_v5 = vadd.f32 %v2205_v56, %v2142_v2 }
 0x1ca   : > { %v1967_v48 = vpop.f32.mrf.mxu2 }
 0x1cb   : > { %v2126_v47 = vpop.f32.mrf.mxu0  ;;  %v5014_v49 = vadd.f32 %v1967_v48, %v1896_v20  ;;  %v5016_v50 = vpop.f32.mrf.mxu3  ;;  %v2060_v20 = vadd.f32 %v2044_v40, %v1978_v41  ;;  %v2061_v41 = vadd.f32 %v2047_v45, %v1979_v44 }
 0x1cc   : > { %v2208_v0 = vpop.f32.mrf.mxu1  ;;  %v2143_v17 = vadd.f32 %v2126_v47, %v2059_v14 }
 0x1cd   : > { %v2062_v58 = vadd.f32 %v5016_v50, %v5014_v49 }
 0x1ce   : > { %v2225_v22 = vadd.f32 %v2208_v0, %v2143_v17 }
 0x1d2   : > { %v1970_v53 = vpop.f32.mrf.mxu2 }
 0x1d3   : > { %v2128_v52 = vpop.f32.mrf.mxu0  ;;  %v5018_v27 = vadd.f32 %v1970_v53, %v1897_v31  ;;  %v5020_v54 = vpop.f32.mrf.mxu3  ;;  %v5058_v31 = vld [vmem:[%s5146_s8] ss:$0 sm:$0xff] }
 0x1d4   : > { %v2210_v13 = vpop.f32.mrf.mxu1  ;;  %v2144_v23 = vadd.f32 %v2128_v52, %v2060_v20 }
 0x1d5   : > { %v2063_v17 = vadd.f32 %v5020_v54, %v5018_v27 }
 0x1d6   : > { %v2226_v28 = vadd.f32 %v2210_v13, %v2144_v23 }
 0x1da   : > { %v5022_v57 = vpop.f32.mrf.mxu2 }
 0x1db   : > { %v2131_v55 = vpop.f32.mrf.mxu0  ;;  %v5024_v60 = vpop.f32.mrf.mxu3 }
 0x1dc   : > { %v2213_v25 = vpop.f32.mrf.mxu1  ;;  %v2145_v48 = vadd.f32 %v2131_v55, %v2061_v41 }
 0x1de   : > { %v2227_v59 = vadd.f32 %v2213_v25, %v2145_v48 }
 0x1e2   : > { %v2287_v62 = vpop.f32.mrf.mxu2 }
 0x1e3   : > { %v2133_v61 = vpop.f32.mrf.mxu0  ;;  %v2307_v3 = vadd.f32 %v2287_v62, %v2223_v1  ;;  %v2500_v7 = vpop.f32.mrf.mxu3 }
 0x1e4   : > { %v2215_v44 = vpop.f32.mrf.mxu1  ;;  %v2146_v62 = vadd.f32 %v2133_v61, %v2062_v58  ;;  %v1898_v61 = vadd.f32 %v5012_v46, %v5010_v33 }
 0x1e5   : > { %v2319_v9 = vmul.f32 %v5029_v4, %v2307_v3 }
 0x1e6   : > { %v2228_v3 = vadd.f32 %v2215_v44, %v2146_v62 }
 0x1e7   : > { %v5041_v15 = vadd.f32 %v5037_v10, %v2319_v9 }
 0x1ea   : > { %v2289_v8 = vpop.f32.mrf.mxu2 }
 0x1eb   : > { %v5031_v6 = vpop.f32.mrf.mxu0  ;;  %v2308_v11 = vadd.f32 %v2289_v8, %v2224_v5  ;;  %v2502_v21 = vpop.f32.mrf.mxu3 }
 0x1ec   : > { %v2218_v50 = vpop.f32.mrf.mxu1  ;;  %v2147_v23 = vadd.f32 %v5031_v6, %v2063_v17  ;;  %v2597_v17 = vld [vmem:[%s5147_s9] sm:$0x7] }
 0x1ed   : > { %v2320_v12 = vmul.f32 %v5029_v4, %v2308_v11 }
 0x1ee   : > { %v2229_v54 = vadd.f32 %v2218_v50, %v2147_v23 }
 0x1ef   : > { %v5044_v16 = vadd.f32 %v5037_v10, %v2320_v12 }
 0x1f1   : > { %v2598_v39 = vpack.c.bf16 %v5044_v16, %v5041_v15 }
 0x1f2   : > { %v2292_v19 = vpop.f32.mrf.mxu2 }
 0x1f3   : > { %v5046_v18 = vpop.f32.mrf.mxu0  ;;  %v2309_v24 = vadd.f32 %v2292_v19, %v2225_v22  ;;  %v2505_v38 = vpop.f32.mrf.mxu3  ;;  %v1982_v19 = vadd.f32 %v5022_v57, %v1898_v61 }
 0x1f5   : > { %v2321_v34 = vmul.f32 %v5029_v4, %v2309_v24 }
 0x1f7   : > { %v5066_v42 = vadd.f32 %v5037_v10, %v2321_v34 }
 0x1fa   : > { %v2294_v32 = vpop.f32.mrf.mxu2 }
 0x1fb   : > { %v2529_v29 = vpop.f32.mrf.mxu0  ;;  %v2310_v35 = vadd.f32 %v2294_v32, %v2226_v28  ;;  %v2507_v1 = vpop.f32.mrf.mxu3 }
 0x1fc   : > { %v2530_v30 = vadd.f32 %v2529_v29, %v2500_v7  ;;  %v2220_v32 = vpop.f32.mrf.mxu1 }
 0x1fd   : > { %v2322_v37 = vmul.f32 %v5029_v4, %v2310_v35 }
 0x1fe   : > { %v2553_v36 = vmul.f32 %v5053_v26, %v2530_v30  ;;  %v2064_v30 = vadd.f32 %v5024_v60, %v1982_v19 }
 0x1ff   : > { %v5069_v43 = vadd.f32 %v5037_v10, %v2322_v37 }
 0x200   : > { %v2565_v40 = vadd.f32 %v5058_v31, %v2553_v36  ;;  %v2148_v57 = vadd.f32 %v5046_v18, %v2064_v30 }
 0x201   : > { %v2599_v52 = vpack.c.bf16 %v5069_v43, %v5066_v42 }
 0x202   : > { %v2573_v47 = vadd.f32 %v2565_v40, %v5041_v15  ;;  %v2297_v56 = vpop.f32.mrf.mxu2  ;;  %v2230_v36 = vadd.f32 %v2220_v32, %v2148_v57 }
 0x203   : > { %v2531_v51 = vpop.f32.mrf.mxu0  ;;  %v2311_v0 = vadd.f32 %v2297_v56, %v2227_v59  ;;  %v2510_v33 = vpop.f32.mrf.mxu3 }
 0x204   : > { %v2581_v45 = vmax.f32 %v2573_v47, 0.0  ;;  %v2532_v53 = vadd.f32 %v2531_v51, %v2502_v21 }
 0x205   : > { %v2323_v11 = vmul.f32 %v5029_v4, %v2311_v0 }
 0x206   : > { %2589 = vst [vmem:[%s5075_s23] sm:$0xff] %v2581_v45  ;;  %v2554_v55 = vmul.f32 %v5053_v26, %v2532_v53 }
 0x207   : > { %v2335_v20 = vadd.f32 %v5037_v10, %v2323_v11 }
 0x208   : > { %v2566_v63 = vadd.f32 %v5058_v31, %v2554_v55 }
 0x20a   : > { %v2574_v2 = vadd.f32 %v2566_v63, %v5044_v16  ;;  %v2299_v9 = vpop.f32.mrf.mxu2 }
 0x20b   : > { %v2534_v5 = vpop.f32.mrf.mxu0  ;;  %v2312_v49 = vadd.f32 %v2299_v9, %v2228_v3  ;;  %v2512_v48 = vpop.f32.mrf.mxu3 }
 0x20c   : > { %v2582_v7 = vmax.f32 %v2574_v2, 0.0  ;;  %v2535_v8 = vadd.f32 %v2534_v5, %v2505_v38 }
 0x20d   : > { %v2324_v13 = vmul.f32 %v5029_v4, %v2312_v49 }
 0x20e   : > { %2590 = vst [vmem:[%s5075_s23 + $0x8] sm:$0xff] %v2582_v7  ;;  %v2555_v12 = vmul.f32 %v5053_v26, %v2535_v8 }
 0x20f   : > { %v2336_v21 = vadd.f32 %v5037_v10, %v2324_v13 }
 0x210   : > { %v2567_v14 = vadd.f32 %v5058_v31, %v2555_v12 }
 0x211   : > { %v2600_v46 = vpack.c.bf16 %v2336_v21, %v2335_v20 }
 0x212   : > { %v2575_v22 = vadd.f32 %v2567_v14, %v5066_v42  ;;  %v2302_v29 = vpop.f32.mrf.mxu2 }
 0x213   : > { %v2536_v24 = vpop.f32.mrf.mxu0  ;;  %v2313_v35 = vadd.f32 %v2302_v29, %v2229_v54  ;;  %v2515_v0 = vpop.f32.mrf.mxu3 }
 0x214   : > { %v2583_v25 = vmax.f32 %v2575_v22, 0.0  ;;  %v2537_v28 = vadd.f32 %v2536_v24, %v2507_v1 }
 0x215   : > { %v2325_v60 = vmul.f32 %v5029_v4, %v2313_v35 }
 0x216   : > { %2591 = vst [vmem:[%s5075_s23 + $0x10] sm:$0xff] %v2583_v25  ;;  %v2556_v27 = vmul.f32 %v5053_v26, %v2537_v28 }
 0x217   : > { %v2337_v45 = vadd.f32 %v5037_v10, %v2325_v60 }
 0x218   : > { %v2568_v34 = vadd.f32 %v5058_v31, %v2556_v27 }
 0x21a   : > { %v2576_v6 = vadd.f32 %v2568_v34, %v5069_v43  ;;  %v2304_v41 = vpop.f32.mrf.mxu2 }
 0x21b   : > { %v2539_v37 = vpop.f32.mrf.mxu0  ;;  %v2314_v47 = vadd.f32 %v2304_v41, %v2230_v36  ;;  %v2517_v8 = vpop.f32.mrf.mxu3 }
 0x21c   : > { %v2584_v38 = vmax.f32 %v2576_v6, 0.0  ;;  %v2540_v40 = vadd.f32 %v2539_v37, %v2510_v33 }
 0x21d   : > { %v2326_v18 = vmul.f32 %v5029_v4, %v2314_v47 }
 0x21e   : > { %2592 = vst [vmem:[%s5075_s23 + $0x18] sm:$0xff] %v2584_v38  ;;  %v2557_v51 = vmul.f32 %v5053_v26, %v2540_v40 }
 0x21f   : > { %v2338_v53 = vadd.f32 %v5037_v10, %v2326_v18 }
 0x220   : > { %v2569_v44 = vadd.f32 %v5058_v31, %v2557_v51 }
 0x221   : > { %v2601_v58 = vpack.c.bf16 %v2338_v53, %v2337_v45 }
 0x222   : > { %v2577_v56 = vadd.f32 %v2569_v44, %v2335_v20 }
 0x223   : > { %v2541_v55 = vpop.f32.mrf.mxu0  ;;  %2606 = vmatpush.bf16.xpose.msra.mxu1 %v2601_v58 }
 0x224   : > { %v2585_v59 = vmax.f32 %v2577_v56, 0.0  ;;  %v2542_v62 = vadd.f32 %v2541_v55, %v2512_v48 }
 0x226   : > { %2593 = vst [vmem:[%s5075_s23 + $0x20] sm:$0xff] %v2585_v59  ;;  %v2558_v63 = vmul.f32 %v5053_v26, %v2542_v62 }
 0x228   : > { %v2570_v4 = vadd.f32 %v5058_v31, %v2558_v63 }
 0x22a   : > { %v2578_v1 = vadd.f32 %v2570_v4, %v2336_v21 }
 0x22b   : > { %v2544_v2 = vpop.f32.mrf.mxu0  ;;  %2607 = vmatpush.bf16.xpose.msra.mxu1 %v2600_v46 }
 0x22c   : > { %v2586_v3 = vmax.f32 %v2578_v1, 0.0  ;;  %v2545_v5 = vadd.f32 %v2544_v2, %v2515_v0 }
 0x22e   : > { %2594 = vst [vmem:[%s5075_s23 + $0x28] sm:$0xff] %v2586_v3  ;;  %v2559_v10 = vmul.f32 %v5053_v26, %v2545_v5 }
 0x230   : > { %v2571_v7 = vadd.f32 %v5058_v31, %v2559_v10 }
 0x232   : > { %v2579_v9 = vadd.f32 %v2571_v7, %v2337_v45 }
 0x233   : > { %v2546_v11 = vpop.f32.mrf.mxu0  ;;  %2608 = vmatpush.bf16.xpose.msra.mxu1 %v2599_v52 }
 0x234   : > { %v2587_v49 = vmax.f32 %v2579_v9, 0.0  ;;  %v2547_v50 = vadd.f32 %v2546_v11, %v2517_v8 }
 0x236   : > { %2595 = vst [vmem:[%s5075_s23 + $0x30] sm:$0xff] %v2587_v49  ;;  %v2560_v12 = vmul.f32 %v5053_v26, %v2547_v50 }
 0x238   : > { %v2572_v61 = vadd.f32 %v5058_v31, %v2560_v12 }
 0x23a   : > { %v2580_v13 = vadd.f32 %v2572_v61, %v2338_v53 }
 0x23b   : > { %2609 = vmatpush.bf16.xpose.msra.mxu1 %v2598_v39 }
 0x23c   : > { %v2588_v14 = vmax.f32 %v2580_v13, 0.0 }
 0x23e   : > { %2596 = vst [vmem:[%s5075_s23 + $0x38] sm:$0xff] %v2588_v14 }
 0x242   : > { %2610 = vmatmul.bf16.vlgmr.msra.gmra.mxu1 %v2597_v17 }
 0x2bf   : > { %v2611_v26 = vpop.f32.mrf.mxu1 }
 0x2c0   : > { %2616 = vst.msk [vmem:[%s417_s26] sm:$0x1f] %vm2615_vm1, %v2611_v26 }
 0x2c7   : > { %v2613_v31 = vpop.f32.mrf.mxu1 }
 0x2c8 PF: > { %s22_s17 = sadd.s32 1, %s3830_s17  }
 0x2c9   : > { %p19_p4 = scmp.ge.s32.totalorder %s22_s17, 4  }
 0x2cb   :  { %21 = sbr.rel (!%p19_p4) target bundleno = 1 (0x1), region = 113 }

// kernel: ic_head_block.4
= control target key start
LH: loop header
LB: loop body
LE: loop exit
PB: predicated region body
PF: predicated region fallthrough
CT: control target
= control target key end

     0   :  { %s6073_s17 = smov 0   ;;  %s8098_s0 = inlined_call_operand.vmem [shape: f32[2,64,128], index: 0, kind: input, shape index: {}]   ;;  %s8099_s1 = inlined_call_operand.vmem [shape: f32[2,256,64], index: 1, kind: input, shape index: {}]   ;;  %s8100_s2 = inlined_call_operand.vmem [shape: bf16[9,256,64], index: 2, kind: input, shape index: {}]   ;;  %s8101_s3 = inlined_call_operand.vmem [shape: bf16[128,1152], index: 3, kind: input, shape index: {}]   ;;  %s8102_s4 = inlined_call_operand.vmem [shape: f32[1,128], index: 4, kind: input, shape index: {}]   ;;  %s8103_s5 = inlined_call_operand.vmem [shape: f32[1,128], index: 5, kind: input, shape index: {}]   ;;  %s8104_s6 = inlined_call_operand.vmem [shape: bf16[64,128], index: 6, kind: input, shape index: {}]   ;;  %s8105_s7 = inlined_call_operand.vmem [shape: f32[1,128], index: 7, kind: input, shape index: {}]   ;;  %s8106_s8 = inlined_call_operand.vmem [shape: f32[1,128], index: 8, kind: input, shape index: {}]   ;;  %s8107_s9 = inlined_call_operand.vmem [shape: bf16[5,128], index: 9, kind: input, shape index: {}]   ;;  %s8108_s10 = inlined_call_operand.vmem [shape: f32[2,256,128], index: 10, kind: output, shape index: {0}]   ;;  %s8109_s11 = inlined_call_operand.vmem [shape: f32[2,5,256], index: 11, kind: output, shape index: {1}]  }
   0x1 LB: > { %s4442_s18 = sadd.s32 4294967295, %s6011_s17   ;;  %p4446_p0 = scmp.ge.s32.totalorder %s6011_s17, 1  ;;  %s6011_s17 = sphi %s6073_s17, %s22_s17  }
   0x2   : > { %p350_p1 = scmp.lt.s32.totalorder %s6011_s17, 3 }
   0x4   : > { %p351_p2 = pnand %p4446_p0, %p350_p1 }
   0x5   : > { %p400_p3 = scmp.lt.s32.totalorder (!%p351_p2), %s4442_s18, 1 }
   0x6   : > { %354 = sbr.rel (%p351_p2) target bundleno = 1244 (0x4dc), region = 60 }
   0xb   : > { %v4709_v0 = vld [vmem:[%s8101_s3 + $0x1f8] sm:$0xf]  ;;  %v5824_v1 = vld [vmem:[%s8101_s3 + $0x218] sm:$0xf0]  ;;  %v4711_v4 = vld [vmem:[%s8101_s3 + $0x21c] sm:$0xf0] }
   0xc   : > { %v5820_v2 = vld [vmem:[%s8101_s3 + $0x1fc] sm:$0xf]  ;;  %v4710_v3 = vor.u32 %v5824_v1, %v4709_v0  ;;  %v4673_v5 = vld [vmem:[%s8101_s3 + $0x1b0] sm:$0xf]  ;;  %v5815_v6 = vld [vmem:[%s8101_s3 + $0x1d0] sm:$0xf0] }
   0xd   : > { %v4714_v7 = vor.u32 %v5820_v2, %v4711_v4  ;;  %v5811_v8 = vld [vmem:[%s8101_s3 + $0x1b4] sm:$0xf]  ;;  %v4675_v9 = vld [vmem:[%s8101_s3 + $0x1d4] sm:$0xf0]  ;;  %v4674_v10 = vor.u32 %v5815_v6, %v4673_v5  ;;  %v4637_v12 = vld [vmem:[%s8101_s3 + $0x168] sm:$0xf] }
   0xe   : > { %881 = vmatpush.bf16.msra.mxu0 %v4710_v3  ;;  %5977 = vmatpush.bf16.msra.mxu3 %v4710_v3  ;;  %v4678_v11 = vor.u32 %v5811_v8, %v4675_v9  ;;  %v5806_v13 = vld [vmem:[%s8101_s3 + $0x188] sm:$0xf0]  ;;  %v4639_v15 = vld [vmem:[%s8101_s3 + $0x18c] sm:$0xf0]  ;;  %v4601_v18 = vld [vmem:[%s8101_s3 + $0x120] sm:$0xf] }
   0xf   : > { %910 = vmatpush.bf16.msra.mxu1 %v4714_v7  ;;  %v5802_v14 = vld [vmem:[%s8101_s3 + $0x16c] sm:$0xf]  ;;  %v4638_v16 = vor.u32 %v5806_v13, %v4637_v12  ;;  %v5797_v19 = vld [vmem:[%s8101_s3 + $0x140] sm:$0xf0]  ;;  %v4603_v21 = vld [vmem:[%s8101_s3 + $0x144] sm:$0xf0] }
  0x10   : > { %v4642_v17 = vor.u32 %v5802_v14, %v4639_v15  ;;  %v5793_v20 = vld [vmem:[%s8101_s3 + $0x124] sm:$0xf]  ;;  %v4565_v22 = vld [vmem:[%s8101_s3 + $0xd8] sm:$0xf]  ;;  %v4602_v23 = vor.u32 %v5797_v19, %v4601_v18  ;;  %v5788_v25 = vld [vmem:[%s8101_s3 + $0xf8] sm:$0xf0] }
  0x11   : > { %v4606_v24 = vor.u32 %v5793_v20, %v4603_v21  ;;  %v5784_v26 = vld [vmem:[%s8101_s3 + $0xdc] sm:$0xf]  ;;  %v4567_v27 = vld [vmem:[%s8101_s3 + $0xfc] sm:$0xf0]  ;;  %v4566_v28 = vor.u32 %v5788_v25, %v4565_v22  ;;  %v4529_v30 = vld [vmem:[%s8101_s3 + $0x90] sm:$0xf] }
  0x12   : > { %882 = vmatpush.bf16.msra.mxu0 %v4674_v10  ;;  %5978 = vmatpush.bf16.msra.mxu3 %v4674_v10  ;;  %v4570_v29 = vor.u32 %v5784_v26, %v4567_v27  ;;  %v5779_v31 = vld [vmem:[%s8101_s3 + $0xb0] sm:$0xf0]  ;;  %s8112_s18 = smov (!%p400_p3, %s4442_s18), 1  ;;  %v4531_v33 = vld [vmem:[%s8101_s3 + $0xb4] sm:$0xf0]  ;;  %vm1351_vm0 = vcmask 523264  }
  0x13   : > { %911 = vmatpush.bf16.msra.mxu1 %v4678_v11  ;;  %v5775_v32 = vld [vmem:[%s8101_s3 + $0x94] sm:$0xf]  ;;  %v4530_v34 = vor.u32 %v5779_v31, %v4529_v30  ;;  %v4717_v35 = vld [vmem:[%s8101_s3 + $0x200] sm:$0xf]  ;;  %v5825_v36 = vld [vmem:[%s8101_s3 + $0x220] sm:$0xf0] }
  0x14   : > { %v4534_v37 = vor.u32 %v5775_v32, %v4531_v33  ;;  %v4493_v38 = vld [vmem:[%s8101_s3 + $0x48] sm:$0xf]  ;;  %v5770_v39 = vld [vmem:[%s8101_s3 + $0x68] sm:$0xf0]  ;;  %s5753_s24 = sshll.u32 %s8112_s18, 6  ;;  %v4718_v40 = vor.u32 %v5825_v36, %v4717_v35  ;;  %s5754_s20 = sshll.u32 %s8112_s18, 8 }
  0x15   : > { %v5766_v41 = vld [vmem:[%s8101_s3 + $0x4c] sm:$0xf]  ;;  %v4495_v42 = vld [vmem:[%s8101_s3 + $0x6c] sm:$0xf0]  ;;  %v4494_v43 = vor.u32 %v5770_v39, %v4493_v38  ;;  %s6181_s12 = scalar_lea.vmem %s8098_s0, %s5753_s24  ;;  %v4457_v45 = vld [vmem:[%s8101_s3] sm:$0xf]  ;;  %s7344_s23 = scalar_lea.vmem %s8099_s1, %s5754_s20 }
  0x16   : > { %883 = vmatpush.bf16.msra.mxu0 %v4638_v16  ;;  %5979 = vmatpush.bf16.msra.mxu3 %v4638_v16  ;;  %v4498_v44 = vor.u32 %v5766_v41, %v4495_v42  ;;  %v5761_v46 = vld [vmem:[%s8101_s3 + $0x20] sm:$0xf0]  ;;  %v4459_v48 = vld [vmem:[%s8101_s3 + $0x24] sm:$0xf0]  ;;  %v4681_v60 = vld [vmem:[%s8101_s3 + $0x1b8] sm:$0xf]  ;;  %s7633_s27 = scalar_lea.vmem %s8108_s10, %s5754_s20 }
  0x17   : > { %912 = vmatpush.bf16.msra.mxu1 %v4642_v17  ;;  %939 = vmatpush.bf16.msra.mxu2 %v4718_v40  ;;  %v5757_v47 = vld [vmem:[%s8101_s3 + $0x4] sm:$0xf]  ;;  %v4719_v50 = vld [vmem:[%s8101_s3 + $0x224] sm:$0xf0]  ;;  %v4458_v52 = vor.u32 %v5761_v46, %v4457_v45  ;;  %v5816_v61 = vld [vmem:[%s8101_s3 + $0x1d8] sm:$0xf0] }
  0x18   : > { %v5821_v49 = vld [vmem:[%s8101_s3 + $0x204] sm:$0xf]  ;;  %v422_v53 = vld [vmem:[%s6181_s12 + $0x8] sm:$0xff]  ;;  %v4462_v56 = vor.u32 %v5757_v47, %v4459_v48  ;;  %v5812_v62 = vld [vmem:[%s8101_s3 + $0x1bc] sm:$0xf]  ;;  %v4682_v0 = vor.u32 %v5816_v61, %v4681_v60 }
  0x19   : > { %v421_v51 = vld [vmem:[%s6181_s12] sm:$0xff]  ;;  %v426_v55 = vld [vmem:[%s6181_s12 + $0x28] sm:$0xff]  ;;  %v4722_v57 = vor.u32 %v5821_v49, %v4719_v50  ;;  %v4645_v2 = vld [vmem:[%s8101_s3 + $0x170] sm:$0xf] }
  0x1a   : > { %884 = vmatpush.bf16.msra.mxu0 %v4602_v23  ;;  %5980 = vmatpush.bf16.msra.mxu3 %v4602_v23  ;;  %v425_v54 = vld [vmem:[%s6181_s12 + $0x20] sm:$0xff]  ;;  %v6205_v58 = vpack.c.bf16 %v422_v53, %v421_v51  ;;  %v5807_v3 = vld [vmem:[%s8101_s3 + $0x190] sm:$0xf0]  ;;  %v4647_v5 = vld [vmem:[%s8101_s3 + $0x194] sm:$0xf0] }
  0x1b   : > { %913 = vmatpush.bf16.msra.mxu1 %v4606_v24  ;;  %v6207_v59 = vpack.c.bf16 %v426_v55, %v425_v54  ;;  %v4683_v63 = vld [vmem:[%s8101_s3 + $0x1dc] sm:$0xf0]  ;;  %v5803_v4 = vld [vmem:[%s8101_s3 + $0x174] sm:$0xf]  ;;  %v4725_v6 = vld [vmem:[%s8101_s3 + $0x208] sm:$0xf]  ;;  %940 = vmatpush.bf16.msra.mxu2 %v4682_v0  ;;  %v4646_v8 = vor.u32 %v5807_v3, %v4645_v2 }
  0x1c   : > { %v4686_v1 = vor.u32 %v5812_v62, %v4683_v63  ;;  %v5826_v7 = vld [vmem:[%s8101_s3 + $0x228] sm:$0xf0]  ;;  %v4650_v9 = vor.u32 %v5803_v4, %v4647_v5  ;;  %v4727_v12 = vld [vmem:[%s8101_s3 + $0x22c] sm:$0xf0]  ;;  %v4609_v13 = vld [vmem:[%s8101_s3 + $0x128] sm:$0xf] }
  0x1d   : > { %v4726_v10 = vor.u32 %v5826_v7, %v4725_v6  ;;  %v5822_v11 = vld [vmem:[%s8101_s3 + $0x20c] sm:$0xf]  ;;  %v4611_v17 = vld [vmem:[%s8101_s3 + $0x14c] sm:$0xf0]  ;;  %v4689_v18 = vld [vmem:[%s8101_s3 + $0x1c0] sm:$0xf] }
  0x1e   : > { %885 = vmatpush.bf16.msra.mxu0 %v4566_v28  ;;  %5981 = vmatpush.bf16.msra.mxu3 %v4566_v28  ;;  %v4730_v14 = vor.u32 %v5822_v11, %v4727_v12  ;;  %v5798_v15 = vld [vmem:[%s8101_s3 + $0x148] sm:$0xf0]  ;;  %v5817_v19 = vld [vmem:[%s8101_s3 + $0x1e0] sm:$0xf0]  ;;  %v423_v21 = vld [vmem:[%s6181_s12 + $0x10] sm:$0xff] }
  0x1f   : > { %914 = vmatpush.bf16.msra.mxu1 %v4570_v29  ;;  %v5794_v16 = vld [vmem:[%s8101_s3 + $0x12c] sm:$0xf]  ;;  %v5813_v20 = vld [vmem:[%s8101_s3 + $0x1c4] sm:$0xf]  ;;  %v424_v22 = vld [vmem:[%s6181_s12 + $0x18] sm:$0xff]  ;;  %v4690_v23 = vor.u32 %v5817_v19, %v4689_v18  ;;  %941 = vmatpush.bf16.msra.mxu2 %v4646_v8  ;;  %v4610_v27 = vor.u32 %v5798_v15, %v4609_v13 }
  0x20   : > { %v4691_v24 = vld [vmem:[%s8101_s3 + $0x1e4] sm:$0xf0]  ;;  %v427_v25 = vld [vmem:[%s6181_s12 + $0x30] sm:$0xff]  ;;  %v428_v26 = vld [vmem:[%s6181_s12 + $0x38] sm:$0xff]  ;;  %v4614_v28 = vor.u32 %v5794_v16, %v4611_v17  ;;  %v6300_v40 = vpack.c.bf16 %v424_v22, %v423_v21 }
  0x21   : > { %v4694_v29 = vor.u32 %v5813_v20, %v4691_v24  ;;  %v4653_v30 = vld [vmem:[%s8101_s3 + $0x178] sm:$0xf]  ;;  %v5808_v31 = vld [vmem:[%s8101_s3 + $0x198] sm:$0xf0]  ;;  %v4655_v33 = vld [vmem:[%s8101_s3 + $0x19c] sm:$0xf0]  ;;  %v6302_v41 = vpack.c.bf16 %v428_v26, %v427_v25 }
  0x22   : > { %886 = vmatpush.bf16.msra.mxu0 %v4530_v34  ;;  %5982 = vmatpush.bf16.msra.mxu3 %v4530_v34  ;;  %v5804_v32 = vld [vmem:[%s8101_s3 + $0x17c] sm:$0xf]  ;;  %v4573_v34 = vld [vmem:[%s8101_s3 + $0xe0] sm:$0xf]  ;;  %v5789_v35 = vld [vmem:[%s8101_s3 + $0x100] sm:$0xf0]  ;;  %v4654_v36 = vor.u32 %v5808_v31, %v4653_v30 }
  0x23   : > { %915 = vmatpush.bf16.msra.mxu1 %v4534_v37  ;;  %v5785_v37 = vld [vmem:[%s8101_s3 + $0xe4] sm:$0xf]  ;;  %v4575_v38 = vld [vmem:[%s8101_s3 + $0x104] sm:$0xf0]  ;;  %v4658_v39 = vor.u32 %v5804_v32, %v4655_v33  ;;  %942 = vmatpush.bf16.msra.mxu2 %v4610_v27  ;;  %v4574_v42 = vor.u32 %v5789_v35, %v4573_v34  ;;  %v5780_v45 = vld [vmem:[%s8101_s3 + $0xb8] sm:$0xf0] }
  0x24   : > { %v5776_v46 = vld [vmem:[%s8101_s3 + $0x9c] sm:$0xf]  ;;  %v4539_v48 = vld [vmem:[%s8101_s3 + $0xbc] sm:$0xf0]  ;;  %v4617_v49 = vld [vmem:[%s8101_s3 + $0x130] sm:$0xf] }
  0x25   : > { %v5799_v50 = vld [vmem:[%s8101_s3 + $0x150] sm:$0xf0]  ;;  %v4542_v51 = vor.u32 %v5776_v46, %v4539_v48  ;;  %v4619_v54 = vld [vmem:[%s8101_s3 + $0x154] sm:$0xf0]  ;;  %v4501_v55 = vld [vmem:[%s8101_s3 + $0x50] sm:$0xf] }
  0x26   : > { %887 = vmatpush.bf16.msra.mxu0 %v4494_v43  ;;  %5983 = vmatpush.bf16.msra.mxu3 %v4494_v43  ;;  %v4578_v43 = vor.u32 %v5785_v37, %v4575_v38  ;;  %v5795_v53 = vld [vmem:[%s8101_s3 + $0x134] sm:$0xf]  ;;  %v4503_v61 = vld [vmem:[%s8101_s3 + $0x74] sm:$0xf0]  ;;  %v4581_v62 = vld [vmem:[%s8101_s3 + $0xe8] sm:$0xf] }
  0x27   : > { %916 = vmatpush.bf16.msra.mxu1 %v4498_v44  ;;  %v4537_v44 = vld [vmem:[%s8101_s3 + $0x98] sm:$0xf]  ;;  %943 = vmatpush.bf16.msra.mxu2 %v4574_v42  ;;  %v5767_v60 = vld [vmem:[%s8101_s3 + $0x54] sm:$0xf]  ;;  %v5790_v63 = vld [vmem:[%s8101_s3 + $0x108] sm:$0xf0] }
  0x28   : > { %v4538_v47 = vor.u32 %v5780_v45, %v4537_v44  ;;  %v5786_v0 = vld [vmem:[%s8101_s3 + $0xec] sm:$0xf]  ;;  %v4582_v2 = vor.u32 %v5790_v63, %v4581_v62  ;;  %v4583_v3 = vld [vmem:[%s8101_s3 + $0x10c] sm:$0xf0]  ;;  %v4465_v4 = vld [vmem:[%s8101_s3 + $0x8] sm:$0xf]  ;;  %v4506_v6 = vor.u32 %v5767_v60, %v4503_v61 }
  0x29   : > { %v5762_v5 = vld [vmem:[%s8101_s3 + $0x28] sm:$0xf0]  ;;  %v4586_v7 = vor.u32 %v5786_v0, %v4583_v3  ;;  %v5781_v11 = vld [vmem:[%s8101_s3 + $0xc0] sm:$0xf0]  ;;  %v4547_v13 = vld [vmem:[%s8101_s3 + $0xc4] sm:$0xf0] }
  0x2a   : > { %888 = vmatpush.bf16.msra.mxu0 %v4458_v52  ;;  %5984 = vmatpush.bf16.msra.mxu3 %v4458_v52  ;;  %v4618_v52 = vor.u32 %v5799_v50, %v4617_v49  ;;  %v5758_v8 = vld [vmem:[%s8101_s3 + $0xc] sm:$0xf]  ;;  %v5777_v12 = vld [vmem:[%s8101_s3 + $0xa4] sm:$0xf]  ;;  %v4466_v15 = vor.u32 %v5762_v5, %v4465_v4  ;;  %v4509_v17 = vld [vmem:[%s8101_s3 + $0x58] sm:$0xf] }
  0x2b   : > { %917 = vmatpush.bf16.msra.mxu1 %v4462_v56  ;;  %v4622_v56 = vor.u32 %v5795_v53, %v4619_v54  ;;  %944 = vmatpush.bf16.msra.mxu2 %v4538_v47  ;;  %v4550_v16 = vor.u32 %v5777_v12, %v4547_v13  ;;  %v5772_v18 = vld [vmem:[%s8101_s3 + $0x78] sm:$0xf0]  ;;  %v4511_v21 = vld [vmem:[%s8101_s3 + $0x7c] sm:$0xf0]  ;;  %v5763_v24 = vld [vmem:[%s8101_s3 + $0x30] sm:$0xf0] }
  0x2c   : > { %v5768_v20 = vld [vmem:[%s8101_s3 + $0x5c] sm:$0xf]  ;;  %v4510_v22 = vor.u32 %v5772_v18, %v4509_v17  ;;  %v5759_v26 = vld [vmem:[%s8101_s3 + $0x14] sm:$0xf]  ;;  %v4475_v27 = vld [vmem:[%s8101_s3 + $0x34] sm:$0xf0] }
  0x2d   : > { %889 = vmatmul.bf16.vlgmr.msra.gmra.mxu0 %v6205_v58  ;;  %899 = vmatmul.bf16.vlgmr.msra.gmra.mxu3 %v6207_v59  ;;  %v4514_v25 = vor.u32 %v5768_v20, %v4511_v21  ;;  %v4733_v30 = vld [vmem:[%s8101_s3 + $0x210] sm:$0xf]  ;;  %v5827_v31 = vld [vmem:[%s8101_s3 + $0x230] sm:$0xf0]  ;;  %v4735_v34 = vld [vmem:[%s8101_s3 + $0x234] sm:$0xf0] }
  0x2e   : > { %968 = vmatpush.bf16.msrb.mxu3 %v4722_v57  ;;  %918 = vmatmul.bf16.vlgmr.msra.gmra.mxu1 %v6205_v58  ;;  %v5771_v57 = vld [vmem:[%s8101_s3 + $0x70] sm:$0xf0]  ;;  %v4734_v33 = vor.u32 %v5827_v31, %v4733_v30  ;;  %v4697_v35 = vld [vmem:[%s8101_s3 + $0x1c8] sm:$0xf]  ;;  %v5814_v38 = vld [vmem:[%s8101_s3 + $0x1cc] sm:$0xf] }
  0x2f   : > { %997 = vmatpush.bf16.msrb.mxu0 %v4726_v10  ;;  %1026 = vmatpush.bf16.msrb.mxu1 %v4730_v14  ;;  %v4545_v10 = vld [vmem:[%s8101_s3 + $0xa0] sm:$0xf]  ;;  %v5823_v32 = vld [vmem:[%s8101_s3 + $0x214] sm:$0xf]  ;;  %v5809_v45 = vld [vmem:[%s8101_s3 + $0x1a0] sm:$0xf0] }
  0x30   : > { %v4546_v14 = vor.u32 %v5781_v11, %v4545_v10  ;;  %v4738_v37 = vor.u32 %v5823_v32, %v4735_v34  ;;  %v4661_v44 = vld [vmem:[%s8101_s3 + $0x180] sm:$0xf]  ;;  %v5805_v46 = vld [vmem:[%s8101_s3 + $0x184] sm:$0xf]  ;;  %v4663_v48 = vld [vmem:[%s8101_s3 + $0x1a4] sm:$0xf0] }
  0x31   : > { %v4662_v47 = vor.u32 %v5809_v45, %v4661_v44  ;;  %v4741_v49 = vld [vmem:[%s8101_s3 + $0x218] sm:$0xf]  ;;  %v5828_v50 = vld [vmem:[%s8101_s3 + $0x238] sm:$0xf0]  ;;  %v4705_v60 = vld [vmem:[%s8101_s3 + $0x1d0] sm:$0xf] }
  0x32   : > { %969 = vmatpush.bf16.msrb.mxu3 %v4686_v1  ;;  %v4502_v1 = vor.u32 %v5771_v57, %v4501_v55  ;;  %v4625_v53 = vld [vmem:[%s8101_s3 + $0x138] sm:$0xf]  ;;  %v5800_v54 = vld [vmem:[%s8101_s3 + $0x158] sm:$0xf0]  ;;  %v4627_v57 = vld [vmem:[%s8101_s3 + $0x15c] sm:$0xf0] }
  0x33   : > { %998 = vmatpush.bf16.msrb.mxu0 %v4690_v23  ;;  %1027 = vmatpush.bf16.msrb.mxu1 %v4694_v29  ;;  %v4473_v23 = vld [vmem:[%s8101_s3 + $0x10] sm:$0xf]  ;;  %v4478_v29 = vor.u32 %v5759_v26, %v4475_v27  ;;  %v5796_v55 = vld [vmem:[%s8101_s3 + $0x13c] sm:$0xf]  ;;  %v5819_v61 = vld [vmem:[%s8101_s3 + $0x1f0] sm:$0xf0] }
  0x34   : > { %945 = vmatpush.bf16.msra.mxu2 %v4502_v1  ;;  %v4630_v62 = vor.u32 %v5796_v55, %v4627_v57  ;;  %v4706_v63 = vor.u32 %v5819_v61, %v4705_v60  ;;  %v4589_v0 = vld [vmem:[%s8101_s3 + $0xf0] sm:$0xf]  ;;  %v5791_v1 = vld [vmem:[%s8101_s3 + $0x110] sm:$0xf0]  ;;  %v4591_v3 = vld [vmem:[%s8101_s3 + $0x114] sm:$0xf0] }
  0x35   : > { %v4669_v4 = vld [vmem:[%s8101_s3 + $0x188] sm:$0xf]  ;;  %v5810_v5 = vld [vmem:[%s8101_s3 + $0x1a8] sm:$0xf0]  ;;  %v4555_v12 = vld [vmem:[%s8101_s3 + $0xcc] sm:$0xf0] }
  0x36   : > { %970 = vmatpush.bf16.msrb.mxu3 %v4650_v9  ;;  %v4467_v9 = vld [vmem:[%s8101_s3 + $0x2c] sm:$0xf0]  ;;  %v5782_v10 = vld [vmem:[%s8101_s3 + $0xc8] sm:$0xf0]  ;;  %v4633_v13 = vld [vmem:[%s8101_s3 + $0x140] sm:$0xf] }
  0x37   : > { %999 = vmatpush.bf16.msrb.mxu0 %v4654_v36  ;;  %1028 = vmatpush.bf16.msrb.mxu1 %v4658_v39  ;;  %v4470_v19 = vor.u32 %v5758_v8, %v4467_v9  ;;  %v5818_v36 = vld [vmem:[%s8101_s3 + $0x1e8] sm:$0xf0]  ;;  %v4699_v39 = vld [vmem:[%s8101_s3 + $0x1ec] sm:$0xf0]  ;;  %v4670_v8 = vor.u32 %v5810_v5, %v4669_v4  ;;  %v4553_v9 = vld [vmem:[%s8101_s3 + $0xa8] sm:$0xf] }
  0x38   : > { %946 = vmatpush.bf16.msra.mxu2 %v4466_v15  ;;  %v4698_v42 = vor.u32 %v5818_v36, %v4697_v35  ;;  %v5778_v11 = vld [vmem:[%s8101_s3 + $0xac] sm:$0xf]  ;;  %v4554_v15 = vor.u32 %v5782_v10, %v4553_v9  ;;  %v4517_v18 = vld [vmem:[%s8101_s3 + $0x60] sm:$0xf]  ;;  %v5769_v20 = vld [vmem:[%s8101_s3 + $0x64] sm:$0xf] }
  0x39   : > { %v4481_v26 = vld [vmem:[%s8101_s3 + $0x18] sm:$0xf]  ;;  %v5764_v27 = vld [vmem:[%s8101_s3 + $0x38] sm:$0xf0]  ;;  %v4483_v30 = vld [vmem:[%s8101_s3 + $0x3c] sm:$0xf0] }
  0x3a   : > { %971 = vmatpush.bf16.msrb.mxu3 %v4614_v28  ;;  %v4474_v28 = vor.u32 %v5763_v24, %v4473_v23  ;;  %v4597_v23 = vld [vmem:[%s8101_s3 + $0xf8] sm:$0xf]  ;;  %v5792_v24 = vld [vmem:[%s8101_s3 + $0x118] sm:$0xf0]  ;;  %v4561_v31 = vld [vmem:[%s8101_s3 + $0xb0] sm:$0xf] }
  0x3b   : > { %1000 = vmatpush.bf16.msrb.mxu0 %v4618_v52  ;;  %1029 = vmatpush.bf16.msrb.mxu1 %v4622_v56  ;;  %v4742_v52 = vor.u32 %v5828_v50, %v4741_v49  ;;  %v4626_v56 = vor.u32 %v5800_v54, %v4625_v53  ;;  %v5783_v32 = vld [vmem:[%s8101_s3 + $0xd0] sm:$0xf0]  ;;  %v4525_v36 = vld [vmem:[%s8101_s3 + $0x68] sm:$0xf] }
  0x3c   : > { %947 = vmatmul.bf16.vlgmr.msra.gmra.mxu2 %v6205_v58  ;;  %v4562_v35 = vor.u32 %v5783_v32, %v4561_v31 }
  0x3d   : > { %894 = vmatmul.bf16.gmra.mxu0 %v6300_v40  ;;  %904 = vmatmul.bf16.gmra.mxu3 %v6302_v41 }
  0x3e   : > { %923 = vmatmul.bf16.gmra.mxu1 %v6300_v40  ;;  %972 = vmatpush.bf16.msrb.mxu3 %v4578_v43  ;;  %v4702_v43 = vor.u32 %v5814_v38, %v4699_v39  ;;  %v4489_v39 = vld [vmem:[%s8101_s3 + $0x20] sm:$0xf] }
  0x3f   : > { %1001 = vmatpush.bf16.msrb.mxu0 %v4582_v2  ;;  %1030 = vmatpush.bf16.msrb.mxu1 %v4586_v7  ;;  %v5787_v2 = vld [vmem:[%s8101_s3 + $0xf4] sm:$0xf] }
  0x40   : > { %1055 = vmatpush.bf16.msrb.mxu2 %v4734_v33  ;;  %v4594_v7 = vor.u32 %v5787_v2, %v4591_v3  ;;  %v4482_v33 = vor.u32 %v5764_v27, %v4481_v26 }
  0x42   : > { %973 = vmatpush.bf16.msrb.mxu3 %v4542_v51  ;;  %v4666_v51 = vor.u32 %v5805_v46, %v4663_v48 }
  0x43   : > { %1002 = vmatpush.bf16.msrb.mxu0 %v4546_v14  ;;  %1031 = vmatpush.bf16.msrb.mxu1 %v4550_v16  ;;  %v5801_v14 = vld [vmem:[%s8101_s3 + $0x160] sm:$0xf0]  ;;  %v4558_v16 = vor.u32 %v5778_v11, %v4555_v12 }
  0x44   : > { %1056 = vmatpush.bf16.msrb.mxu2 %v4698_v42  ;;  %v4634_v17 = vor.u32 %v5801_v14, %v4633_v13  ;;  %v5765_v42 = vld [vmem:[%s8101_s3 + $0x40] sm:$0xf0] }
  0x46   : > { %974 = vmatpush.bf16.msrb.mxu3 %v4506_v6  ;;  %v4590_v6 = vor.u32 %v5791_v1, %v4589_v0 }
  0x47   : > { %1003 = vmatpush.bf16.msrb.mxu0 %v4510_v22  ;;  %1032 = vmatpush.bf16.msrb.mxu1 %v4514_v25  ;;  %v4519_v22 = vld [vmem:[%s8101_s3 + $0x84] sm:$0xf0] }
  0x48   : > { %1057 = vmatpush.bf16.msrb.mxu2 %v4662_v47  ;;  %v4522_v25 = vor.u32 %v5769_v20, %v4519_v22 }
  0x4a   : > { %975 = vmatpush.bf16.msrb.mxu3 %v4470_v19  ;;  %v5773_v19 = vld [vmem:[%s8101_s3 + $0x80] sm:$0xf0] }
  0x4b   : > { %1004 = vmatpush.bf16.msrb.mxu0 %v4474_v28  ;;  %1033 = vmatpush.bf16.msrb.mxu1 %v4478_v29  ;;  %v4518_v21 = vor.u32 %v5773_v19, %v4517_v18  ;;  %v5760_v28 = vld [vmem:[%s8101_s3 + $0x1c] sm:$0xf]  ;;  %v4598_v29 = vor.u32 %v5792_v24, %v4597_v23 }
  0x4c   : > { %952 = vmatmul.bf16.gmra.mxu2 %v6300_v40  ;;  %v4486_v34 = vor.u32 %v5760_v28, %v4483_v30 }
  0x4d   : > { %976 = vmatmul.bf16.vlgmr.msrb.gmra.mxu3 %v6205_v58  ;;  %1058 = vmatpush.bf16.msrb.mxu2 %v4626_v56 }
  0x4e   : > { %928 = vmatmul.bf16.gmra.mxu1 %v6207_v59  ;;  %1005 = vmatmul.bf16.vlgmr.msrb.gmra.mxu0 %v6205_v58 }
  0x4f   : > { %1084 = vmatpush.bf16.msra.mxu3 %v4738_v37  ;;  %1113 = vmatpush.bf16.msra.mxu0 %v4742_v52  ;;  %v5774_v37 = vld [vmem:[%s8101_s3 + $0x88] sm:$0xf0] }
  0x50   : > { %v4526_v38 = vor.u32 %v5774_v37, %v4525_v36 }
  0x51   : > { %1059 = vmatpush.bf16.msrb.mxu2 %v4590_v6 }
  0x53   : > { %1085 = vmatpush.bf16.msra.mxu3 %v4702_v43  ;;  %1114 = vmatpush.bf16.msra.mxu0 %v4706_v63  ;;  %v4490_v43 = vor.u32 %v5765_v42, %v4489_v39 }
  0x55   : > { %1060 = vmatpush.bf16.msrb.mxu2 %v4554_v15 }
  0x57   : > { %1086 = vmatpush.bf16.msra.mxu3 %v4666_v51  ;;  %1115 = vmatpush.bf16.msra.mxu0 %v4670_v8 }
  0x59   : > { %1061 = vmatpush.bf16.msrb.mxu2 %v4518_v21 }
  0x5b   : > { %1087 = vmatpush.bf16.msra.mxu3 %v4630_v62  ;;  %1116 = vmatpush.bf16.msra.mxu0 %v4634_v17 }
  0x5c   : > { %957 = vmatmul.bf16.gmra.mxu2 %v6207_v59 }
  0x5d   : > { %981 = vmatmul.bf16.gmra.mxu3 %v6300_v40  ;;  %1062 = vmatpush.bf16.msrb.mxu2 %v4482_v33 }
  0x5e   : > { %933 = vmatmul.bf16.gmra.mxu1 %v6302_v41  ;;  %1010 = vmatmul.bf16.gmra.mxu0 %v6300_v40 }
  0x5f   : > { %1088 = vmatpush.bf16.msra.mxu3 %v4594_v7  ;;  %1117 = vmatpush.bf16.msra.mxu0 %v4598_v29 }
  0x63   : > { %1089 = vmatpush.bf16.msra.mxu3 %v4558_v16  ;;  %1118 = vmatpush.bf16.msra.mxu0 %v4562_v35 }
  0x67   : > { %1090 = vmatpush.bf16.msra.mxu3 %v4522_v25  ;;  %1119 = vmatpush.bf16.msra.mxu0 %v4526_v38 }
  0x6b   : > { %1091 = vmatpush.bf16.msra.mxu3 %v4486_v34  ;;  %1120 = vmatpush.bf16.msra.mxu0 %v4490_v43 }
  0x6c   : > { %962 = vmatmul.bf16.gmra.mxu2 %v6302_v41 }
  0x6d   : > { %986 = vmatmul.bf16.gmra.mxu3 %v6207_v59 }
  0x6e   : > { %1034 = vmatmul.bf16.vlgmr.msrb.gmra.mxu1 %v6205_v58  ;;  %1015 = vmatmul.bf16.gmra.mxu0 %v6207_v59 }
  0x7c   : > { %1063 = vmatmul.bf16.vlgmr.msrb.gmra.mxu2 %v6205_v58 }
  0x7d   : > { %991 = vmatmul.bf16.gmra.mxu3 %v6302_v41 }
  0x7e   : > { %1039 = vmatmul.bf16.gmra.mxu1 %v6300_v40  ;;  %1020 = vmatmul.bf16.gmra.mxu0 %v6302_v41 }
  0x8c   : > { %1068 = vmatmul.bf16.gmra.mxu2 %v6300_v40 }
  0x8d   : > { %1092 = vmatmul.bf16.vlgmr.msra.gmra.mxu3 %v6205_v58 }
  0x8e   : > { %1044 = vmatmul.bf16.gmra.mxu1 %v6207_v59  ;;  %1121 = vmatmul.bf16.vlgmr.msra.gmra.mxu0 %v6205_v58 }
  0x9c   : > { %1073 = vmatmul.bf16.gmra.mxu2 %v6207_v59 }
  0x9d   : > { %1097 = vmatmul.bf16.gmra.mxu3 %v6300_v40 }
  0x9e   : > { %1049 = vmatmul.bf16.gmra.mxu1 %v6302_v41  ;;  %1126 = vmatmul.bf16.gmra.mxu0 %v6300_v40 }
  0xaa   : > { %v890_v44 = vpop.f32.mrf.mxu0 }
  0xab   : > { %v919_v45 = vpop.f32.mrf.mxu1 }
  0xac   : > { %1078 = vmatmul.bf16.gmra.mxu2 %v6302_v41  ;;  %v1142_v30 = vpack.c.bf16 %v919_v45, %v890_v44 }
  0xad   : > { %1102 = vmatmul.bf16.gmra.mxu3 %v6207_v59 }
  0xae   : > { %1131 = vmatmul.bf16.gmra.mxu0 %v6207_v59  ;;  %v1335_v42 = vunpack.c.h.b16 %v1142_v30  ;;  %v1569_v43 = vunpack.c.l.b16 %v1142_v30 }
  0xb0   : > { %v900_v46 = vpop.f32.mrf.mxu3 }
  0xb2   : > { %v892_v48 = vpop.f32.mrf.mxu0 }
  0xb3   : > { %v921_v47 = vpop.f32.mrf.mxu1 }
  0xb4   : > { %v1147_v24 = vpack.c.bf16 %v921_v47, %v892_v48  ;;  %v5845_v47 = vld [vmem:[%s8100_s2 + $0x80] sm:$0xff]  ;;  %v5855_v48 = vld [vmem:[%s8100_s2 + $0xd0] sm:$0xff] }
  0xb6   : > { %v1336_v33 = vunpack.c.h.b16 %v1147_v24  ;;  %v1570_v36 = vunpack.c.l.b16 %v1147_v24 }
  0xb8   : > { %v902_v58 = vpop.f32.mrf.mxu3  ;;  %v1343_v45 = vpack.c.b16 %v1336_v33, %v1335_v42 }
  0xba   : > { %v895_v50 = vpop.f32.mrf.mxu0 }
  0xbb   : > { %v924_v49 = vpop.f32.mrf.mxu1 }
  0xbc   : > { %v1152_v20 = vpack.c.bf16 %v924_v49, %v895_v50  ;;  %v5835_v49 = vld [vmem:[%s8100_s2 + $0x30] sm:$0xff] }
  0xbd   : > { %1107 = vmatmul.bf16.gmra.mxu3 %v6302_v41 }
  0xbe   : > { %1136 = vmatmul.bf16.gmra.mxu0 %v6302_v41  ;;  %v1337_v31 = vunpack.c.h.b16 %v1152_v20  ;;  %v1571_v32 = vunpack.c.l.b16 %v1152_v20 }
  0xbf   : > { %v948_v55 = vpop.f32.mrf.mxu2 }
  0xc0   : > { %v905_v51 = vpop.f32.mrf.mxu3 }
  0xc2   : > { %v897_v52 = vpop.f32.mrf.mxu0 }
  0xc3   : > { %v926_v40 = vpop.f32.mrf.mxu1 }
  0xc4   : > { %v1157_v12 = vpack.c.bf16 %v926_v40, %v897_v52 }
  0xc6   : > { %v1338_v25 = vunpack.c.h.b16 %v1157_v12  ;;  %v1572_v28 = vunpack.c.l.b16 %v1157_v12 }
  0xc7   : > { %v6579_v61 = vpop.f32.mrf.mxu2 }
  0xc8   : > { %v907_v53 = vpop.f32.mrf.mxu3  ;;  %v1344_v34 = vpack.c.b16 %v1338_v25, %v1337_v31  ;;  %v1578_v37 = vpack.c.b16 %v1572_v28, %v1571_v32 }
  0xcb   : > { %v929_v54 = vpop.f32.mrf.mxu1  ;;  %v1006_v57 = vpop.f32.mrf.mxu0 }
  0xcc   : > { %v1162_v7 = vpack.c.bf16 %v929_v54, %v900_v46  ;;  %v1577_v46 = vpack.c.b16 %v1570_v36, %v1569_v43  ;;  %v5847_v43 = vld [vmem:[%s8100_s2 + $0x90] sm:$0xff] }
  0xce   : > { %v1339_v21 = vunpack.c.h.b16 %v1162_v7  ;;  %v1573_v22 = vunpack.c.l.b16 %v1162_v7 }
  0xcf   : > { %v6585_v1 = vpop.f32.mrf.mxu2 }
  0xd0   : > { %v977_v56 = vpop.f32.mrf.mxu3 }
  0xd1   : > { %v6577_v60 = vpack.c.bf16 %v977_v56, %v948_v55 }
  0xd3   : > { %v931_v59 = vpop.f32.mrf.mxu1  ;;  %v6583_v63 = vpop.f32.mrf.mxu0  ;;  %v1843_v36 = vunpack.c.l.b16 %v6577_v60 }
  0xd4   : > { %v1167_v5 = vpack.c.bf16 %v931_v59, %v902_v58  ;;  %v5829_v58 = vld [vmem:[%s8100_s2] sm:$0xff]  ;;  %v5856_v59 = vld [vmem:[%s8100_s2 + $0xd8] sm:$0xff] }
  0xd6   : > { %v1340_v13 = vunpack.c.h.b16 %v1167_v5  ;;  %v1574_v17 = vunpack.c.l.b16 %v1167_v5 }
  0xd7   : > { %v6591_v16 = vpop.f32.mrf.mxu2 }
  0xd8   : > { %v6581_v62 = vpop.f32.mrf.mxu3  ;;  %v1345_v26 = vpack.c.b16 %v1340_v13, %v1339_v21  ;;  %v1579_v29 = vpack.c.b16 %v1574_v17, %v1573_v22 }
  0xd9   : > { %v1148_v28 = vpack.c.bf16 %v6581_v62, %v6579_v61 }
  0xdb   : > { %v934_v0 = vpop.f32.mrf.mxu1  ;;  %v6589_v41 = vpop.f32.mrf.mxu0  ;;  %v2142_v42 = vunpack.c.h.b16 %v1148_v28 }
  0xdc   : > { %v1172_v3 = vpack.c.bf16 %v934_v0, %v905_v51  ;;  %v5830_v0 = vld [vmem:[%s8100_s2 + $0x8] sm:$0xff] }
  0xde   : > { %v1341_v8 = vunpack.c.h.b16 %v1172_v3  ;;  %v1575_v9 = vunpack.c.l.b16 %v1172_v3  ;;  %v5836_v3 = vld [vmem:[%s8100_s2 + $0x38] sm:$0xff] }
  0xdf   : > { %v958_v35 = vpop.f32.mrf.mxu2 }
  0xe0   : > { %v6587_v2 = vpop.f32.mrf.mxu3 }
  0xe1   : > { %v1153_v13 = vpack.c.bf16 %v6587_v2, %v6585_v1 }
  0xe3   : > { %v936_v4 = vpop.f32.mrf.mxu1  ;;  %v6595_v19 = vpop.f32.mrf.mxu0  ;;  %v2143_v30 = vunpack.c.h.b16 %v1153_v13 }
  0xe4   : > { %v1177_v6 = vpack.c.bf16 %v936_v4, %v907_v53 }
  0xe6   : > { %v1342_v10 = vunpack.c.h.b16 %v1177_v6  ;;  %v1576_v11 = vunpack.c.l.b16 %v1177_v6 }
  0xe7   : > { %v960_v50 = vpop.f32.mrf.mxu2 }
  0xe8   : > { %v1346_v14 = vpack.c.b16 %v1342_v10, %v1341_v8  ;;  %v1580_v15 = vpack.c.b16 %v1576_v11, %v1575_v9  ;;  %v6593_v18 = vpop.f32.mrf.mxu3 }
  0xea   : > { %1404 = vmatpush.bf16.msra.mxu1 %v1346_v14  ;;  %5985 = vmatpush.bf16.msrb.mxu3 %v1346_v14  ;;  %v1158_v14 = vpack.c.bf16 %v6593_v18, %v6591_v16 }
  0xeb   : > { %1637 = vmatpush.bf16.msrb.mxu0 %v1580_v15  ;;  %5989 = vmatpush.bf16.msra.mxu2 %v1580_v15  ;;  %v1035_v23 = vpop.f32.mrf.mxu1  ;;  %v6599_v39 = vpop.f32.mrf.mxu0 }
  0xec   : > { %v6597_v27 = vpack.c.bf16 %v1035_v23, %v1006_v57  ;;  %v5846_v57 = vld [vmem:[%s8100_s2 + $0x88] sm:$0xff]  ;;  %v1846_v31 = vunpack.c.l.b16 %v1158_v14  ;;  %v2144_v32 = vunpack.c.h.b16 %v1158_v14 }
  0xee   : > { %1405 = vmatpush.bf16.msra.mxu1 %v1345_v26  ;;  %5986 = vmatpush.bf16.msrb.mxu3 %v1345_v26  ;;  %v2150_v62 = vpack.c.b16 %v2144_v32, %v2143_v30  ;;  %v2745_v30 = vunpack.c.h.b16 %v6597_v27 }
  0xef   : > { %1638 = vmatpush.bf16.msrb.mxu0 %v1579_v29  ;;  %5990 = vmatpush.bf16.msra.mxu2 %v1579_v29  ;;  %v963_v53 = vpop.f32.mrf.mxu2  ;;  %v1845_v29 = vunpack.c.l.b16 %v1153_v13 }
  0xf0   : > { %v987_v38 = vpop.f32.mrf.mxu3 }
  0xf1   : > { %v1163_v5 = vpack.c.bf16 %v987_v38, %v958_v35  ;;  %v1852_v61 = vpack.c.b16 %v1846_v31, %v1845_v29  ;;  %v2141_v38 = vunpack.c.h.b16 %v6577_v60  ;;  %v2447_v29 = vunpack.c.l.b16 %v6597_v27  ;;  %v5859_v27 = vld [vmem:[%s8100_s2 + $0xf0] sm:$0xff] }
  0xf2   : > { %1406 = vmatpush.bf16.msra.mxu1 %v1344_v34  ;;  %5987 = vmatpush.bf16.msrb.mxu3 %v1344_v34 }
  0xf3   : > { %1639 = vmatpush.bf16.msrb.mxu0 %v1578_v37  ;;  %5991 = vmatpush.bf16.msra.mxu2 %v1578_v37  ;;  %v6601_v44 = vpop.f32.mrf.mxu1  ;;  %v6617_v40 = vpop.f32.mrf.mxu0  ;;  %v1847_v15 = vunpack.c.l.b16 %v1163_v5  ;;  %v2145_v17 = vunpack.c.h.b16 %v1163_v5  ;;  %v1844_v37 = vunpack.c.l.b16 %v1148_v28 }
  0xf6   : > { %1407 = vmatpush.bf16.msra.mxu1 %v1343_v45  ;;  %5988 = vmatpush.bf16.msrb.mxu3 %v1343_v45  ;;  %v5857_v45 = vld [vmem:[%s8100_s2 + $0xe0] sm:$0xff] }
  0xf7   : > { %1640 = vmatpush.bf16.msrb.mxu0 %v1577_v46  ;;  %5992 = vmatpush.bf16.msra.mxu2 %v1577_v46  ;;  %v965_v7 = vpop.f32.mrf.mxu2  ;;  %v5831_v46 = vld [vmem:[%s8100_s2 + $0x10] sm:$0xff] }
  0xf8   : > { %v989_v51 = vpop.f32.mrf.mxu3 }
  0xf9   : > { %4839 = vmatmul.msk.bf16.vlgmr.msra.gmra.mxu1 %vm1351_vm0, %v5845_v47  ;;  %4849 = vmatmul.msk.bf16.vlgmr.msrb.gmra.mxu3 %vm1351_vm0, %v5855_v48  ;;  %v1168_v6 = vpack.c.bf16 %v989_v51, %v960_v50  ;;  %v5837_v47 = vld [vmem:[%s8100_s2 + $0x40] sm:$0xff]  ;;  %v1851_v48 = vpack.c.b16 %v1844_v37, %v1843_v36  ;;  %v2149_v50 = vpack.c.b16 %v2142_v42, %v2141_v38 }
  0xfa   : > { %4919 = vmatmul.msk.bf16.vlgmr.msrb.gmra.mxu0 %vm1351_vm0, %v5829_v58  ;;  %4925 = vmatmul.msk.bf16.vlgmr.msra.gmra.mxu2 %vm1351_vm0, %v5835_v49  ;;  %v5849_v36 = vld [vmem:[%s8100_s2 + $0xa0] sm:$0xff] }
  0xfb   : > { %v6621_v52 = vpop.f32.mrf.mxu1  ;;  %v6623_v55 = vpop.f32.mrf.mxu0  ;;  %v1848_v21 = vunpack.c.l.b16 %v1168_v6  ;;  %v2146_v22 = vunpack.c.h.b16 %v1168_v6  ;;  %v5833_v37 = vld [vmem:[%s8100_s2 + $0x20] sm:$0xff] }
  0xfd   : > { %v1853_v2 = vpack.c.b16 %v1848_v21, %v1847_v15  ;;  %v2151_v16 = vpack.c.b16 %v2146_v22, %v2145_v17 }
  0xff   : > { %v1064_v1 = vpop.f32.mrf.mxu2 }
 0x100   : > { %v992_v54 = vpop.f32.mrf.mxu3 }
 0x101   : > { %v1173_v4 = vpack.c.bf16 %v992_v54, %v963_v53 }
 0x103   : > { %v6625_v56 = vpop.f32.mrf.mxu1  ;;  %v6641_v9 = vpop.f32.mrf.mxu0  ;;  %v1849_v10 = vunpack.c.l.b16 %v1173_v4  ;;  %v2147_v11 = vunpack.c.h.b16 %v1173_v4 }
 0x107   : > { %v6669_v60 = vpop.f32.mrf.mxu2 }
 0x108   : > { %v994_v8 = vpop.f32.mrf.mxu3 }
 0x109   : > { %4840 = vmatmul.msk.bf16.gmra.mxu1 %vm1351_vm0, %v5846_v57  ;;  %4850 = vmatmul.msk.bf16.gmra.mxu3 %vm1351_vm0, %v5856_v59  ;;  %v1178_v12 = vpack.c.bf16 %v994_v8, %v965_v7  ;;  %v5848_v8 = vld [vmem:[%s8100_s2 + $0x98] sm:$0xff] }
 0x10a   : > { %4920 = vmatmul.msk.bf16.gmra.mxu0 %vm1351_vm0, %v5830_v0  ;;  %4926 = vmatmul.msk.bf16.gmra.mxu2 %vm1351_vm0, %v5836_v3 }
 0x10b   : > { %v1045_v20 = vpop.f32.mrf.mxu1  ;;  %v1850_v23 = vunpack.c.l.b16 %v1178_v12  ;;  %v2148_v24 = vunpack.c.h.b16 %v1178_v12  ;;  %v6651_v33 = vpop.f32.mrf.mxu0  ;;  %v5838_v12 = vld [vmem:[%s8100_s2 + $0x48] sm:$0xff] }
 0x10c   : > { %v1164_v0 = vpack.c.bf16 %v1045_v20, %v6599_v39  ;;  %v1159_v39 = vpack.c.bf16 %v6625_v56, %v6595_v19  ;;  %v1149_v56 = vpack.c.bf16 %v6601_v44, %v6583_v63 }
 0x10d   : > { %v1854_v25 = vpack.c.b16 %v1850_v23, %v1849_v10  ;;  %v2152_v26 = vpack.c.b16 %v2148_v24, %v2147_v11  ;;  %v1154_v10 = vpack.c.bf16 %v6621_v52, %v6589_v41 }
 0x10e   : > { %v2451_v13 = vunpack.c.l.b16 %v1164_v0  ;;  %v2749_v14 = vunpack.c.h.b16 %v1164_v0  ;;  %v2450_v24 = vunpack.c.l.b16 %v1159_v39  ;;  %v2448_v31 = vunpack.c.l.b16 %v1149_v56 }
 0x10f   : > { %1911 = vmatpush.bf16.msra.mxu3 %v1854_v25  ;;  %2209 = vmatpush.bf16.msra.mxu0 %v2152_v26  ;;  %v6680_v54 = vpop.f32.mrf.mxu2  ;;  %v2449_v22 = vunpack.c.l.b16 %v1154_v10  ;;  %v2747_v23 = vunpack.c.h.b16 %v1154_v10  ;;  %v2748_v25 = vunpack.c.h.b16 %v1159_v39  ;;  %v2746_v32 = vunpack.c.h.b16 %v1149_v56 }
 0x110   : > { %v1093_v18 = vpop.f32.mrf.mxu3 }
 0x111   : > { %v6653_v34 = vpack.c.bf16 %v1093_v18, %v1064_v1  ;;  %v2456_v63 = vpack.c.b16 %v2450_v24, %v2449_v22  ;;  %v2754_v44 = vpack.c.b16 %v2748_v25, %v2747_v23  ;;  %v2455_v18 = vpack.c.b16 %v2448_v31, %v2447_v29 }
 0x113   : > { %v1047_v35 = vpop.f32.mrf.mxu1  ;;  %1912 = vmatpush.bf16.msra.mxu3 %v1853_v2  ;;  %2210 = vmatpush.bf16.msra.mxu0 %v2151_v16  ;;  %v6675_v49 = vpop.f32.mrf.mxu0 }
 0x114   : > { %v1169_v3 = vpack.c.bf16 %v1047_v35, %v6617_v40  ;;  %v2753_v35 = vpack.c.b16 %v2746_v32, %v2745_v30 }
 0x116   : > { %v2452_v15 = vunpack.c.l.b16 %v1169_v3  ;;  %v2750_v17 = vunpack.c.h.b16 %v1169_v3 }
 0x117   : > { %1913 = vmatpush.bf16.msra.mxu3 %v1852_v61  ;;  %2211 = vmatpush.bf16.msra.mxu0 %v2150_v62  ;;  %v6705_v41 = vpop.f32.mrf.mxu2  ;;  %v5839_v61 = vld [vmem:[%s8100_s2 + $0x50] sm:$0xff] }
 0x118   : > { %v6673_v58 = vpop.f32.mrf.mxu3  ;;  %v2457_v26 = vpack.c.b16 %v2452_v15, %v2451_v13  ;;  %v2755_v28 = vpack.c.b16 %v2750_v17, %v2749_v14 }
 0x119   : > { %4841 = vmatmul.msk.bf16.gmra.mxu1 %vm1351_vm0, %v5847_v43  ;;  %4851 = vmatmul.msk.bf16.gmra.mxu3 %vm1351_vm0, %v5857_v45  ;;  %v1150_v23 = vpack.c.bf16 %v6673_v58, %v6669_v60  ;;  %v3051_v60 = vunpack.c.l.b16 %v6653_v34  ;;  %v1146_v58 = vpack.c.bf16 %v6651_v33, %v6651_v33  ;;  %v5861_v33 = vld [vmem:[%s8100_s2 + $0x100] sm:$0xff] }
 0x11a   : > { %4921 = vmatmul.msk.bf16.gmra.mxu0 %vm1351_vm0, %v5831_v46  ;;  %4927 = vmatmul.msk.bf16.gmra.mxu2 %vm1351_vm0, %v5837_v47  ;;  %v5850_v47 = vld [vmem:[%s8100_s2 + $0xa8] sm:$0xff] }
 0x11b   : > { %v1050_v51 = vpop.f32.mrf.mxu1  ;;  %1914 = vmatpush.bf16.msra.mxu3 %v1851_v48  ;;  %2212 = vmatpush.bf16.msra.mxu0 %v2149_v50  ;;  %v6684_v59 = vpop.f32.mrf.mxu0  ;;  %v5860_v48 = vld [vmem:[%s8100_s2 + $0xf8] sm:$0xff] }
 0x11c   : > { %v1174_v53 = vpack.c.bf16 %v1050_v51, %v6623_v55  ;;  %v5858_v55 = vld [vmem:[%s8100_s2 + $0xe8] sm:$0xff] }
 0x11d   : > { %v5834_v51 = vld [vmem:[%s8100_s2 + $0x28] sm:$0xff] }
 0x11e   : > { %v2453_v5 = vunpack.c.l.b16 %v1174_v53  ;;  %v2751_v6 = vunpack.c.h.b16 %v1174_v53  ;;  %v5840_v53 = vld [vmem:[%s8100_s2 + $0x58] sm:$0xff] }
 0x11f   : > { %v1074_v1 = vpop.f32.mrf.mxu2 }
 0x120   : > { %v6682_v57 = vpop.f32.mrf.mxu3 }
 0x123   : > { %v1052_v4 = vpop.f32.mrf.mxu1  ;;  %v6711_v52 = vpop.f32.mrf.mxu0 }
 0x124   : > { %v1179_v7 = vpack.c.bf16 %v1052_v4, %v6641_v9  ;;  %v5832_v9 = vld [vmem:[%s8100_s2 + $0x18] sm:$0xff] }
 0x126   : > { %v2454_v40 = vunpack.c.l.b16 %v1179_v7  ;;  %v2752_v11 = vunpack.c.h.b16 %v1179_v7 }
 0x127   : > { %v1076_v62 = vpop.f32.mrf.mxu2 }
 0x128   : > { %v2458_v20 = vpack.c.b16 %v2454_v40, %v2453_v5  ;;  %v2756_v21 = vpack.c.b16 %v2752_v11, %v2751_v6  ;;  %v6709_v19 = vpop.f32.mrf.mxu3  ;;  %v1155_v6 = vpack.c.bf16 %v6682_v57, %v6680_v54 }
 0x129   : > { %4842 = vmatmul.msk.bf16.gmra.mxu1 %vm1351_vm0, %v5848_v8  ;;  %4852 = vmatmul.msk.bf16.gmra.mxu3 %vm1351_vm0, %v5858_v55  ;;  %v1160_v54 = vpack.c.bf16 %v6709_v19, %v6705_v41  ;;  %v1156_v41 = vpack.c.bf16 %v6684_v59, %v6684_v59  ;;  %v1161_v19 = vpack.c.bf16 %v6711_v52, %v6711_v52 }
 0x12a   : > { %4922 = vmatmul.msk.bf16.gmra.mxu0 %vm1351_vm0, %v5832_v9  ;;  %4928 = vmatmul.msk.bf16.gmra.mxu2 %vm1351_vm0, %v5838_v12  ;;  %v3351_v29 = vunpack.c.h.b16 %v1155_v6  ;;  %v1151_v59 = vpack.c.bf16 %v6675_v49, %v6675_v49  ;;  %v5877_v49 = vld [vmem:[%s8100_s2 + $0x180] sm:$0xff] }
 0x12b   : > { %2515 = vmatpush.bf16.msrb.mxu1 %v2458_v20  ;;  %2813 = vmatpush.bf16.msrb.mxu2 %v2756_v21  ;;  %v1132_v16 = vpop.f32.mrf.mxu0  ;;  %v3054_v30 = vunpack.c.l.b16 %v1160_v54  ;;  %v3352_v31 = vunpack.c.h.b16 %v1160_v54  ;;  %v3658_v52 = vunpack.c.l.b16 %v1161_v19  ;;  %v5844_v54 = vld [vmem:[%s8100_s2 + $0x78] sm:$0xff] }
 0x12c   : > { %v1166_v7 = vpack.c.bf16 %v1132_v16, %v1132_v16  ;;  %v3052_v16 = vunpack.c.l.b16 %v1150_v23 }
 0x12e   : > { %v3659_v56 = vunpack.c.l.b16 %v1166_v7 }
 0x12f   : > { %2516 = vmatpush.bf16.msrb.mxu1 %v2457_v26  ;;  %2814 = vmatpush.bf16.msrb.mxu2 %v2755_v28  ;;  %v1079_v43 = vpop.f32.mrf.mxu2  ;;  %v3053_v28 = vunpack.c.l.b16 %v1155_v6 }
 0x130   : > { %v1103_v2 = vpop.f32.mrf.mxu3 }
 0x131   : > { %v1165_v3 = vpack.c.bf16 %v1103_v2, %v1074_v1  ;;  %v3349_v1 = vunpack.c.h.b16 %v6653_v34  ;;  %v3657_v2 = vunpack.c.l.b16 %v1156_v41  ;;  %v5841_v34 = vld [vmem:[%s8100_s2 + $0x60] sm:$0xff] }
 0x133   : > { %2517 = vmatpush.bf16.msrb.mxu1 %v2456_v63  ;;  %2815 = vmatpush.bf16.msrb.mxu2 %v2754_v44  ;;  %v1134_v42 = vpop.f32.mrf.mxu0  ;;  %v3055_v57 = vunpack.c.l.b16 %v1165_v3  ;;  %v3353_v13 = vunpack.c.h.b16 %v1165_v3  ;;  %v5879_v3 = vld [vmem:[%s8100_s2 + $0x190] sm:$0xff] }
 0x134   : > { %v1171_v8 = vpack.c.bf16 %v1134_v42, %v1134_v42 }
 0x136   : > { %v3660_v22 = vunpack.c.l.b16 %v1171_v8 }
 0x137   : > { %2518 = vmatpush.bf16.msrb.mxu1 %v2455_v18  ;;  %2816 = vmatpush.bf16.msrb.mxu2 %v2753_v35  ;;  %v1081_v5 = vpop.f32.mrf.mxu2  ;;  %v3350_v18 = vunpack.c.h.b16 %v1150_v23  ;;  %v3060_v35 = vpack.c.b16 %v3054_v30, %v3053_v28  ;;  %v5909_v28 = vld [vmem:[%s8100_s2 + $0x280] sm:$0xff] }
 0x138   : > { %v1105_v38 = vpop.f32.mrf.mxu3  ;;  %v3665_v44 = vpack.c.b16 %v3660_v22, %v3659_v56 }
 0x139   : > { %4843 = vmatmul.msk.bf16.gmra.mxu1 %vm1351_vm0, %v5849_v36  ;;  %4853 = vmatmul.msk.bf16.gmra.mxu3 %vm1351_vm0, %v5859_v27  ;;  %v1170_v4 = vpack.c.bf16 %v1105_v38, %v1076_v62  ;;  %v3358_v36 = vpack.c.b16 %v3352_v31, %v3351_v29  ;;  %v5851_v27 = vld [vmem:[%s8100_s2 + $0xb0] sm:$0xff]  ;;  %v3664_v62 = vpack.c.b16 %v3658_v52, %v3657_v2  ;;  %v5881_v29 = vld [vmem:[%s8100_s2 + $0x1a0] sm:$0xff]  ;;  %v5910_v52 = vld [vmem:[%s8100_s2 + $0x288] sm:$0xff] }
 0x13a   : > { %4923 = vmatmul.msk.bf16.gmra.mxu0 %vm1351_vm0, %v5833_v37  ;;  %4929 = vmatmul.msk.bf16.gmra.mxu2 %vm1351_vm0, %v5839_v61  ;;  %v3655_v37 = vunpack.c.l.b16 %v1146_v58  ;;  %v3656_v61 = vunpack.c.l.b16 %v1151_v59  ;;  %v3059_v38 = vpack.c.b16 %v3052_v16, %v3051_v60  ;;  %v3357_v42 = vpack.c.b16 %v3350_v18, %v3349_v1  ;;  %v5866_v1 = vld [vmem:[%s8100_s2 + $0x128] sm:$0xff] }
 0x13b   : > { %v1137_v46 = vpop.f32.mrf.mxu0  ;;  %v3056_v14 = vunpack.c.l.b16 %v1170_v4  ;;  %v3354_v15 = vunpack.c.h.b16 %v1170_v4  ;;  %v5894_v59 = vld [vmem:[%s8100_s2 + $0x208] sm:$0xff] }
 0x13c   : > { %v1176_v0 = vpack.c.bf16 %v1137_v46, %v1137_v46  ;;  %v5862_v46 = vld [vmem:[%s8100_s2 + $0x108] sm:$0xff] }
 0x13d   : > { %v3061_v32 = vpack.c.b16 %v3056_v14, %v3055_v57  ;;  %v3359_v63 = vpack.c.b16 %v3354_v15, %v3353_v13  ;;  %v5880_v57 = vld [vmem:[%s8100_s2 + $0x198] sm:$0xff]  ;;  %v5882_v16 = vld [vmem:[%s8100_s2 + $0x1a8] sm:$0xff] }
 0x13e   : > { %v3661_v11 = vunpack.c.l.b16 %v1176_v0  ;;  %v5843_v0 = vld [vmem:[%s8100_s2 + $0x70] sm:$0xff] }
 0x140   : > { %v1108_v45 = vpop.f32.mrf.mxu3 }
 0x141   : > { %v1175_v50 = vpack.c.bf16 %v1108_v45, %v1079_v43  ;;  %v3663_v43 = vpack.c.b16 %v3656_v61, %v3655_v37  ;;  %v5852_v45 = vld [vmem:[%s8100_s2 + $0xb8] sm:$0xff] }
 0x143   : > { %v3057_v55 = vunpack.c.l.b16 %v1175_v50  ;;  %v1139_v39 = vpop.f32.mrf.mxu0  ;;  %v3355_v40 = vunpack.c.h.b16 %v1175_v50  ;;  %v5853_v50 = vld [vmem:[%s8100_s2 + $0xc0] sm:$0xff] }
 0x144   : > { %v1181_v12 = vpack.c.bf16 %v1139_v39, %v1139_v39 }
 0x146   : > { %v3662_v21 = vunpack.c.l.b16 %v1181_v12 }
 0x148   : > { %v1110_v10 = vpop.f32.mrf.mxu3  ;;  %v3666_v26 = vpack.c.b16 %v3662_v21, %v3661_v11  ;;  %v5854_v11 = vld [vmem:[%s8100_s2 + $0xc8] sm:$0xff] }
 0x149   : > { %4844 = vmatmul.msk.bf16.gmra.mxu1 %vm1351_vm0, %v5850_v47  ;;  %4854 = vmatmul.msk.bf16.gmra.mxu3 %vm1351_vm0, %v5860_v48  ;;  %v1180_v9 = vpack.c.bf16 %v1110_v10, %v1081_v5  ;;  %v5842_v47 = vld [vmem:[%s8100_s2 + $0x68] sm:$0xff] }
 0x14a   : > { %4924 = vmatmul.msk.bf16.gmra.mxu0 %vm1351_vm0, %v5834_v51  ;;  %4930 = vmatmul.msk.bf16.gmra.mxu2 %vm1351_vm0, %v5840_v53  ;;  %v5878_v48 = vld [vmem:[%s8100_s2 + $0x188] sm:$0xff]  ;;  %v5863_v51 = vld [vmem:[%s8100_s2 + $0x110] sm:$0xff] }
 0x14b   : > { %v3058_v17 = vunpack.c.l.b16 %v1180_v9  ;;  %v3356_v20 = vunpack.c.h.b16 %v1180_v9  ;;  %3723 = vmatpush.bf16.msra.mxu1 %v3666_v26  ;;  %v5864_v9 = vld [vmem:[%s8100_s2 + $0x118] sm:$0xff] }
 0x14d   : > { %v3062_v24 = vpack.c.b16 %v3058_v17, %v3057_v55  ;;  %v3360_v25 = vpack.c.b16 %v3356_v20, %v3355_v40 }
 0x14f   : > { %3119 = vmatpush.bf16.msrb.mxu3 %v3062_v24  ;;  %3417 = vmatpush.bf16.msrb.mxu0 %v3360_v25  ;;  %v5865_v24 = vld [vmem:[%s8100_s2 + $0x120] sm:$0xff] }
 0x150   : > { %3724 = vmatpush.bf16.msra.mxu1 %v3665_v44  ;;  %v5893_v25 = vld [vmem:[%s8100_s2 + $0x200] sm:$0xff] }
 0x153   : > { %3120 = vmatpush.bf16.msrb.mxu3 %v3061_v32  ;;  %3418 = vmatpush.bf16.msrb.mxu0 %v3359_v63 }
 0x154   : > { %3725 = vmatpush.bf16.msra.mxu1 %v3664_v62  ;;  %v5867_v62 = vld [vmem:[%s8100_s2 + $0x130] sm:$0xff] }
 0x157   : > { %3121 = vmatpush.bf16.msrb.mxu3 %v3060_v35  ;;  %3419 = vmatpush.bf16.msrb.mxu0 %v3358_v36 }
 0x158   : > { %3726 = vmatpush.bf16.msra.mxu1 %v3663_v43  ;;  %v5911_v43 = vld [vmem:[%s8100_s2 + $0x290] sm:$0xff] }
 0x159   : > { %4845 = vmatmul.msk.bf16.gmra.mxu1 %vm1351_vm0, %v5851_v27  ;;  %5031 = vmatmul.msk.bf16.vlgmr.msra.gmra.mxu3 %vm1351_vm0, %v5861_v33 }
 0x15a   : > { %4931 = vmatmul.msk.bf16.gmra.mxu2 %vm1351_vm0, %v5841_v34  ;;  %5143 = vmatmul.msk.bf16.vlgmr.msra.gmra.mxu0 %vm1351_vm0, %v5877_v49 }
 0x15b   : > { %3122 = vmatpush.bf16.msrb.mxu3 %v3059_v38  ;;  %3420 = vmatpush.bf16.msrb.mxu0 %v3357_v42  ;;  %v5895_v38 = vld [vmem:[%s8100_s2 + $0x210] sm:$0xff] }
 0x169   : > { %4846 = vmatmul.msk.bf16.gmra.mxu1 %vm1351_vm0, %v5852_v45  ;;  %5032 = vmatmul.msk.bf16.gmra.mxu3 %vm1351_vm0, %v5862_v46  ;;  %v5883_v45 = vld [vmem:[%s8100_s2 + $0x1b0] sm:$0xff] }
 0x16a   : > { %4932 = vmatmul.msk.bf16.gmra.mxu2 %vm1351_vm0, %v5842_v47  ;;  %5144 = vmatmul.msk.bf16.gmra.mxu0 %vm1351_vm0, %v5878_v48 }
 0x176   : > { %v1409_v53 = vpop.f32.mrf.mxu1 }
 0x177   : > { %v1642_v4 = vpop.f32.mrf.mxu0 }
 0x178   : > { %v6811_v5 = vadd.f32 %v1642_v4, %v1409_v53 }
 0x179   : > { %4847 = vmatmul.msk.bf16.gmra.mxu1 %vm1351_vm0, %v5853_v50  ;;  %5033 = vmatmul.msk.bf16.gmra.mxu3 %vm1351_vm0, %v5863_v51 }
 0x17a   : > { %4933 = vmatmul.msk.bf16.gmra.mxu2 %vm1351_vm0, %v5843_v0  ;;  %5145 = vmatmul.msk.bf16.gmra.mxu0 %vm1351_vm0, %v5879_v3 }
 0x17c   : > { %v6817_v6 = vpop.f32.mrf.mxu3 }
 0x17d   : > { %v6819_v7 = vpop.f32.mrf.mxu2 }
 0x17e   : > { %v1411_v8 = vpop.f32.mrf.mxu1 }
 0x17f   : > { %v1644_v55 = vpop.f32.mrf.mxu0 }
 0x180   : > { %v6821_v10 = vadd.f32 %v1644_v55, %v1411_v8  ;;  %v5868_v55 = vld [vmem:[%s8100_s2 + $0x138] sm:$0xff] }
 0x184   : > { %v6823_v39 = vpop.f32.mrf.mxu3 }
 0x185   : > { %v6825_v40 = vpop.f32.mrf.mxu2 }
 0x186   : > { %v1414_v12 = vpop.f32.mrf.mxu1 }
 0x187   : > { %v1647_v13 = vpop.f32.mrf.mxu0 }
 0x188   : > { %v6839_v14 = vadd.f32 %v1647_v13, %v1414_v12  ;;  %v5912_v12 = vld [vmem:[%s8100_s2 + $0x298] sm:$0xff] }
 0x189   : > { %4848 = vmatmul.msk.bf16.gmra.mxu1 %vm1351_vm0, %v5854_v11  ;;  %5034 = vmatmul.msk.bf16.gmra.mxu3 %vm1351_vm0, %v5864_v9  ;;  %v5896_v11 = vld [vmem:[%s8100_s2 + $0x218] sm:$0xff] }
 0x18a   : > { %4934 = vmatmul.msk.bf16.gmra.mxu2 %vm1351_vm0, %v5844_v54  ;;  %5146 = vmatmul.msk.bf16.gmra.mxu0 %vm1351_vm0, %v5880_v57  ;;  %v5884_v54 = vld [vmem:[%s8100_s2 + $0x1b8] sm:$0xff] }
 0x18c   : > { %v6845_v15 = vpop.f32.mrf.mxu3 }
 0x18d   : > { %v6847_v17 = vpop.f32.mrf.mxu2 }
 0x18e   : > { %v1416_v20 = vpop.f32.mrf.mxu1 }
 0x18f   : > { %v1649_v21 = vpop.f32.mrf.mxu0 }
 0x190   : > { %v6849_v56 = vadd.f32 %v1649_v21, %v1416_v20 }
 0x194   : > { %v6851_v22 = vpop.f32.mrf.mxu3 }
 0x195   : > { %v6853_v23 = vpop.f32.mrf.mxu2 }
 0x196   : > { %v1419_v26 = vpop.f32.mrf.mxu1 }
 0x197   : > { %v1652_v41 = vpop.f32.mrf.mxu0 }
 0x198   : > { %v6867_v19 = vadd.f32 %v1652_v41, %v1419_v26  ;;  %v5869_v41 = vld [vmem:[%s8100_s2 + $0x140] sm:$0xff] }
 0x199   : > { %5035 = vmatmul.msk.bf16.gmra.mxu3 %vm1351_vm0, %v5865_v24  ;;  %5255 = vmatmul.msk.bf16.vlgmr.msrb.gmra.mxu1 %vm1351_vm0, %v5893_v25 }
 0x19a   : > { %5367 = vmatmul.msk.bf16.vlgmr.msrb.gmra.mxu2 %vm1351_vm0, %v5909_v28  ;;  %5147 = vmatmul.msk.bf16.gmra.mxu0 %vm1351_vm0, %v5881_v29 }
 0x19c   : > { %v6873_v30 = vpop.f32.mrf.mxu3 }
 0x19d   : > { %v6875_v31 = vpop.f32.mrf.mxu2 }
 0x19e   : > { %v1421_v32 = vpop.f32.mrf.mxu1 }
 0x19f   : > { %v1654_v63 = vpop.f32.mrf.mxu0 }
 0x1a0   : > { %v6877_v44 = vadd.f32 %v1654_v63, %v1421_v32  ;;  %v5897_v32 = vld [vmem:[%s8100_s2 + $0x220] sm:$0xff] }
 0x1a4   : > { %v6879_v60 = vpop.f32.mrf.mxu3 }
 0x1a5   : > { %v6881_v58 = vpop.f32.mrf.mxu2 }
 0x1a6   : > { %v1424_v2 = vpop.f32.mrf.mxu1 }
 0x1a7   : > { %v1657_v18 = vpop.f32.mrf.mxu0 }
 0x1a8   : > { %v6895_v35 = vadd.f32 %v1657_v18, %v1424_v2 }
 0x1a9   : > { %5036 = vmatmul.msk.bf16.gmra.mxu3 %vm1351_vm0, %v5866_v1  ;;  %5256 = vmatmul.msk.bf16.gmra.mxu1 %vm1351_vm0, %v5894_v59  ;;  %v5913_v1 = vld [vmem:[%s8100_s2 + $0x2a0] sm:$0xff] }
 0x1aa   : > { %5368 = vmatmul.msk.bf16.gmra.mxu2 %vm1351_vm0, %v5910_v52  ;;  %5148 = vmatmul.msk.bf16.gmra.mxu0 %vm1351_vm0, %v5882_v16  ;;  %v5885_v59 = vld [vmem:[%s8100_s2 + $0x1c0] sm:$0xff] }
 0x1ac   : > { %v6901_v36 = vpop.f32.mrf.mxu3 }
 0x1ad   : > { %v6903_v27 = vpop.f32.mrf.mxu2 }
 0x1ae   : > { %v1426_v33 = vpop.f32.mrf.mxu1 }
 0x1af   : > { %v1659_v34 = vpop.f32.mrf.mxu0 }
 0x1b0   : > { %v6905_v49 = vadd.f32 %v1659_v34, %v1426_v33 }
 0x1b4   : > { %v6907_v37 = vpop.f32.mrf.mxu3 }
 0x1b5   : > { %v6909_v61 = vpop.f32.mrf.mxu2 }
 0x1b6   : > { %v1429_v42 = vpop.f32.mrf.mxu1 }
 0x1b7   : > { %v1662_v46 = vpop.f32.mrf.mxu0 }
 0x1b8   : > { %v6923_v47 = vadd.f32 %v1662_v46, %v1429_v42 }
 0x1b9   : > { %5037 = vmatmul.msk.bf16.gmra.mxu3 %vm1351_vm0, %v5867_v62  ;;  %5257 = vmatmul.msk.bf16.gmra.mxu1 %vm1351_vm0, %v5895_v38 }
 0x1ba   : > { %5369 = vmatmul.msk.bf16.gmra.mxu2 %vm1351_vm0, %v5911_v43  ;;  %5149 = vmatmul.msk.bf16.gmra.mxu0 %vm1351_vm0, %v5883_v45  ;;  %v5870_v45 = vld [vmem:[%s8100_s2 + $0x148] sm:$0xff] }
 0x1bc   : > { %v6929_v48 = vpop.f32.mrf.mxu3 }
 0x1bd   : > { %v1692_v50 = vpop.f32.mrf.mxu2 }
 0x1be   : > { %v6932_v51 = vadd.f32 %v1692_v50, %v6817_v6  ;;  %v1431_v53 = vpop.f32.mrf.mxu1  ;;  %v5914_v50 = vld [vmem:[%s8100_s2 + $0x2a8] sm:$0xff] }
 0x1bf   : > { %v1664_v0 = vpop.f32.mrf.mxu0 }
 0x1c0   : > { %v6934_v3 = vadd.f32 %v1664_v0, %v1431_v53 }
 0x1c4   : > { %v6936_v4 = vpop.f32.mrf.mxu3 }
 0x1c5   : > { %v1694_v8 = vpop.f32.mrf.mxu2 }
 0x1c6   : > { %v6945_v9 = vadd.f32 %v1694_v8, %v6823_v39  ;;  %v1434_v6 = vpop.f32.mrf.mxu1 }
 0x1c7   : > { %v1667_v57 = vpop.f32.mrf.mxu0 }
 0x1c8   : > { %v6953_v13 = vadd.f32 %v1667_v57, %v1434_v6 }
 0x1c9   : > { %5038 = vmatmul.msk.bf16.gmra.mxu3 %vm1351_vm0, %v5868_v55  ;;  %5258 = vmatmul.msk.bf16.gmra.mxu1 %vm1351_vm0, %v5896_v11 }
 0x1ca   : > { %5370 = vmatmul.msk.bf16.gmra.mxu2 %vm1351_vm0, %v5912_v12  ;;  %5150 = vmatmul.msk.bf16.gmra.mxu0 %vm1351_vm0, %v5884_v54 }
 0x1cc   : > { %v6959_v39 = vpop.f32.mrf.mxu3 }
 0x1cd   : > { %v1697_v20 = vpop.f32.mrf.mxu2 }
 0x1ce   : > { %v6962_v21 = vadd.f32 %v1697_v20, %v6845_v15  ;;  %v1436_v24 = vpop.f32.mrf.mxu1 }
 0x1cf   : > { %v1669_v25 = vpop.f32.mrf.mxu0 }
 0x1d0   : > { %v6964_v26 = vadd.f32 %v1669_v25, %v1436_v24  ;;  %v5871_v25 = vld [vmem:[%s8100_s2 + $0x150] sm:$0xff] }
 0x1d4   : > { %v6966_v28 = vpop.f32.mrf.mxu3 }
 0x1d5   : > { %v1699_v29 = vpop.f32.mrf.mxu2 }
 0x1d6   : > { %v6975_v63 = vadd.f32 %v1699_v29, %v6851_v22  ;;  %v6977_v15 = vpop.f32.mrf.mxu1 }
 0x1d7   : > { %v2214_v2 = vpop.f32.mrf.mxu0 }
 0x1d9   : > { %5039 = vmatmul.msk.bf16.gmra.mxu3 %vm1351_vm0, %v5869_v41  ;;  %5259 = vmatmul.msk.bf16.gmra.mxu1 %vm1351_vm0, %v5897_v32  ;;  %v5915_v41 = vld [vmem:[%s8100_s2 + $0x2b0] sm:$0xff] }
 0x1da   : > { %5371 = vmatmul.msk.bf16.gmra.mxu2 %vm1351_vm0, %v5913_v1  ;;  %5151 = vmatmul.msk.bf16.gmra.mxu0 %vm1351_vm0, %v5885_v59 }
 0x1dc   : > { %v1916_v22 = vpop.f32.mrf.mxu3 }
 0x1dd   : > { %v1702_v52 = vpop.f32.mrf.mxu2  ;;  %v1996_v16 = vadd.f32 %v1916_v22, %v6811_v5  ;;  %v5898_v5 = vld [vmem:[%s8100_s2 + $0x228] sm:$0xff] }
 0x1de   : > { %v6991_v18 = vadd.f32 %v1702_v52, %v6873_v30  ;;  %v6993_v33 = vpop.f32.mrf.mxu1 }
 0x1df   : > { %v6995_v34 = vadd.f32 %v2214_v2, %v1996_v16  ;;  %v2216_v62 = vpop.f32.mrf.mxu0 }
 0x1e4   : > { %v1918_v38 = vpop.f32.mrf.mxu3 }
 0x1e5   : > { %v1704_v42 = vpop.f32.mrf.mxu2  ;;  %v1997_v43 = vadd.f32 %v1918_v38, %v6821_v10  ;;  %v5886_v10 = vld [vmem:[%s8100_s2 + $0x1c8] sm:$0xff] }
 0x1e6   : > { %v7005_v30 = vadd.f32 %v1704_v42, %v6879_v60  ;;  %v7007_v46 = vpop.f32.mrf.mxu1 }
 0x1e7   : > { %v7015_v53 = vadd.f32 %v2216_v62, %v1997_v43  ;;  %v2219_v0 = vpop.f32.mrf.mxu0 }
 0x1e9   : > { %5040 = vmatmul.msk.bf16.gmra.mxu3 %vm1351_vm0, %v5870_v45  ;;  %5260 = vmatmul.msk.bf16.gmra.mxu1 %vm1351_vm0, %v5898_v5  ;;  %v5872_v45 = vld [vmem:[%s8100_s2 + $0x158] sm:$0xff] }
 0x1ea   : > { %5372 = vmatmul.msk.bf16.gmra.mxu2 %vm1351_vm0, %v5914_v50  ;;  %5152 = vmatmul.msk.bf16.gmra.mxu0 %vm1351_vm0, %v5886_v10  ;;  %v5916_v50 = vld [vmem:[%s8100_s2 + $0x2b8] sm:$0xff] }
 0x1ec   : > { %v1921_v60 = vpop.f32.mrf.mxu3 }
 0x1ed   : > { %v1707_v8 = vpop.f32.mrf.mxu2  ;;  %v1998_v55 = vadd.f32 %v1921_v60, %v6839_v14  ;;  %v5899_v14 = vld [vmem:[%s8100_s2 + $0x230] sm:$0xff] }
 0x1ee   : > { %v7023_v11 = vadd.f32 %v1707_v8, %v6901_v36  ;;  %v7025_v6 = vpop.f32.mrf.mxu1 }
 0x1ef   : > { %v7027_v12 = vadd.f32 %v2219_v0, %v1998_v55  ;;  %v2221_v54 = vpop.f32.mrf.mxu0 }
 0x1f4   : > { %v1923_v57 = vpop.f32.mrf.mxu3 }
 0x1f5   : > { %v1709_v20 = vpop.f32.mrf.mxu2  ;;  %v1999_v24 = vadd.f32 %v1923_v57, %v6849_v56  ;;  %v5887_v56 = vld [vmem:[%s8100_s2 + $0x1d0] sm:$0xff] }
 0x1f6   : > { %v7037_v36 = vadd.f32 %v1709_v20, %v6907_v37  ;;  %v7039_v29 = vpop.f32.mrf.mxu1 }
 0x1f7   : > { %v7047_v32 = vadd.f32 %v2221_v54, %v1999_v24  ;;  %v2224_v1 = vpop.f32.mrf.mxu0 }
 0x1f9   : > { %5041 = vmatmul.msk.bf16.gmra.mxu3 %vm1351_vm0, %v5871_v25  ;;  %5261 = vmatmul.msk.bf16.gmra.mxu1 %vm1351_vm0, %v5899_v14 }
 0x1fa   : > { %5373 = vmatmul.msk.bf16.gmra.mxu2 %vm1351_vm0, %v5915_v41  ;;  %5153 = vmatmul.msk.bf16.gmra.mxu0 %vm1351_vm0, %v5887_v56  ;;  %v5873_v41 = vld [vmem:[%s8100_s2 + $0x160] sm:$0xff] }
 0x1fc   : > { %v1926_v37 = vpop.f32.mrf.mxu3 }
 0x1fd   : > { %v1712_v59 = vpop.f32.mrf.mxu2  ;;  %v2000_v2 = vadd.f32 %v1926_v37, %v6867_v19  ;;  %v5900_v19 = vld [vmem:[%s8100_s2 + $0x238] sm:$0xff] }
 0x1fe   : > { %v7055_v22 = vadd.f32 %v1712_v59, %v6929_v48  ;;  %v7057_v52 = vpop.f32.mrf.mxu1 }
 0x1ff   : > { %v7059_v16 = vadd.f32 %v2224_v1, %v2000_v2  ;;  %v2226_v62 = vpop.f32.mrf.mxu0  ;;  %v5917_v1 = vld [vmem:[%s8100_s2 + $0x2c0] sm:$0xff] }
 0x204   : > { %v1928_v38 = vpop.f32.mrf.mxu3 }
 0x205   : > { %v1714_v42 = vpop.f32.mrf.mxu2  ;;  %v2001_v43 = vadd.f32 %v1928_v38, %v6877_v44  ;;  %v5888_v44 = vld [vmem:[%s8100_s2 + $0x1d8] sm:$0xff] }
 0x206   : > { %v7069_v48 = vadd.f32 %v1714_v42, %v6936_v4  ;;  %v7071_v5 = vpop.f32.mrf.mxu1 }
 0x207   : > { %v7079_v10 = vadd.f32 %v2226_v62, %v2001_v43  ;;  %v2229_v0 = vpop.f32.mrf.mxu0 }
 0x209   : > { %5042 = vmatmul.msk.bf16.gmra.mxu3 %vm1351_vm0, %v5872_v45  ;;  %5262 = vmatmul.msk.bf16.gmra.mxu1 %vm1351_vm0, %v5900_v19 }
 0x20a   : > { %5374 = vmatmul.msk.bf16.gmra.mxu2 %vm1351_vm0, %v5916_v50  ;;  %5154 = vmatmul.msk.bf16.gmra.mxu0 %vm1351_vm0, %v5888_v44 }
 0x20c   : > { %v1931_v4 = vpop.f32.mrf.mxu3 }
 0x20d   : > { %v1717_v60 = vpop.f32.mrf.mxu2  ;;  %v2002_v8 = vadd.f32 %v1931_v4, %v6895_v35  ;;  %v5901_v35 = vld [vmem:[%s8100_s2 + $0x240] sm:$0xff]  ;;  %v5874_v4 = vld [vmem:[%s8100_s2 + $0x168] sm:$0xff] }
 0x20e   : > { %v7087_v55 = vadd.f32 %v1717_v60, %v6959_v39  ;;  %v7089_v54 = vpop.f32.mrf.mxu1 }
 0x20f   : > { %v7091_v57 = vadd.f32 %v2229_v0, %v2002_v8  ;;  %v2231_v20 = vpop.f32.mrf.mxu0 }
 0x214   : > { %v1933_v24 = vpop.f32.mrf.mxu3 }
 0x215   : > { %v1719_v25 = vpop.f32.mrf.mxu2  ;;  %v2003_v14 = vadd.f32 %v1933_v24, %v6905_v49  ;;  %v5889_v49 = vld [vmem:[%s8100_s2 + $0x1e0] sm:$0xff] }
 0x216   : > { %v7101_v39 = vadd.f32 %v1719_v25, %v6966_v28  ;;  %v2520_v56 = vpop.f32.mrf.mxu1 }
 0x217   : > { %v7109_v37 = vadd.f32 %v2231_v20, %v2003_v14  ;;  %v2600_v59 = vadd.f32 %v2520_v56, %v6995_v34  ;;  %v2234_v2 = vpop.f32.mrf.mxu0 }
 0x219   : > { %5043 = vmatmul.msk.bf16.gmra.mxu3 %vm1351_vm0, %v5873_v41  ;;  %5263 = vmatmul.msk.bf16.gmra.mxu1 %vm1351_vm0, %v5901_v35 }
 0x21a   : > { %5375 = vmatmul.msk.bf16.gmra.mxu2 %vm1351_vm0, %v5917_v1  ;;  %5155 = vmatmul.msk.bf16.gmra.mxu0 %vm1351_vm0, %v5889_v49 }
 0x21c   : > { %v1936_v28 = vpop.f32.mrf.mxu3 }
 0x21d   : > { %v2004_v62 = vadd.f32 %v1936_v28, %v6923_v47  ;;  %v2818_v38 = vpop.f32.mrf.mxu2  ;;  %v5902_v47 = vld [vmem:[%s8100_s2 + $0x248] sm:$0xff] }
 0x21e   : > { %v7117_v42 = vadd.f32 %v2818_v38, %v2600_v59  ;;  %v2522_v43 = vpop.f32.mrf.mxu1  ;;  %v5875_v38 = vld [vmem:[%s8100_s2 + $0x170] sm:$0xff] }
 0x21f   : > { %v7119_v45 = vadd.f32 %v2234_v2, %v2004_v62  ;;  %v2601_v34 = vadd.f32 %v2522_v43, %v7015_v53  ;;  %v2236_v19 = vpop.f32.mrf.mxu0  ;;  %v5918_v53 = vld [vmem:[%s8100_s2 + $0x2c8] sm:$0xff] }
 0x224   : > { %v1938_v50 = vpop.f32.mrf.mxu3 }
 0x225   : > { %v2005_v44 = vadd.f32 %v1938_v50, %v6934_v3  ;;  %v2820_v0 = vpop.f32.mrf.mxu2  ;;  %v5890_v3 = vld [vmem:[%s8100_s2 + $0x1e8] sm:$0xff] }
 0x226   : > { %v7129_v60 = vadd.f32 %v2820_v0, %v2601_v34  ;;  %v2525_v8 = vpop.f32.mrf.mxu1  ;;  %v1673_v0 = vadd.f32 %v6819_v7, %v6977_v15  ;;  %v5876_v7 = vld [vmem:[%s8100_s2 + $0x178] sm:$0xff] }
 0x227   : > { %v7137_v20 = vadd.f32 %v2236_v19, %v2005_v44  ;;  %v2602_v24 = vadd.f32 %v2525_v8, %v7027_v12  ;;  %v2239_v25 = vpop.f32.mrf.mxu0  ;;  %v5904_v15 = vld [vmem:[%s8100_s2 + $0x258] sm:$0xff] }
 0x229   : > { %5044 = vmatmul.msk.bf16.gmra.mxu3 %vm1351_vm0, %v5874_v4  ;;  %5264 = vmatmul.msk.bf16.gmra.mxu1 %vm1351_vm0, %v5902_v47 }
 0x22a   : > { %5376 = vmatmul.msk.bf16.gmra.mxu2 %vm1351_vm0, %v5918_v53  ;;  %5156 = vmatmul.msk.bf16.gmra.mxu0 %vm1351_vm0, %v5890_v3 }
 0x22c   : > { %v1941_v14 = vpop.f32.mrf.mxu3 }
 0x22d   : > { %v2006_v41 = vadd.f32 %v1941_v14, %v6953_v13  ;;  %v2823_v35 = vpop.f32.mrf.mxu2  ;;  %v5903_v13 = vld [vmem:[%s8100_s2 + $0x250] sm:$0xff]  ;;  %v1675_v14 = vadd.f32 %v6825_v40, %v6993_v33  ;;  %v5892_v40 = vld [vmem:[%s8100_s2 + $0x1f8] sm:$0xff] }
 0x22e   : > { %v7145_v56 = vadd.f32 %v2823_v35, %v2602_v24  ;;  %v2527_v1 = vpop.f32.mrf.mxu1 }
 0x22f   : > { %v7147_v49 = vadd.f32 %v2239_v25, %v2006_v41  ;;  %v2603_v12 = vadd.f32 %v2527_v1, %v7047_v32  ;;  %v2241_v59 = vpop.f32.mrf.mxu0  ;;  %v5919_v32 = vld [vmem:[%s8100_s2 + $0x2d0] sm:$0xff] }
 0x234   : > { %v1943_v2 = vpop.f32.mrf.mxu3 }
 0x235   : > { %v2007_v28 = vadd.f32 %v1943_v2, %v6964_v26  ;;  %v2825_v62 = vpop.f32.mrf.mxu2  ;;  %v5891_v26 = vld [vmem:[%s8100_s2 + $0x1f0] sm:$0xff] }
 0x236   : > { %v7157_v43 = vadd.f32 %v2825_v62, %v2603_v12  ;;  %v2530_v34 = vpop.f32.mrf.mxu1  ;;  %v1678_v62 = vadd.f32 %v6847_v17, %v7007_v46  ;;  %v5905_v17 = vld [vmem:[%s8100_s2 + $0x260] sm:$0xff] }
 0x237   : > { %v7165_v19 = vadd.f32 %v2241_v59, %v2007_v28  ;;  %v2604_v50 = vadd.f32 %v2530_v34, %v7059_v16  ;;  %v2244_v44 = vpop.f32.mrf.mxu0  ;;  %v5925_v46 = vld [vmem:[%s8100_s2 + $0x300] sm:$0xff] }
 0x239   : > { %5045 = vmatmul.msk.bf16.gmra.mxu3 %vm1351_vm0, %v5875_v38  ;;  %5265 = vmatmul.msk.bf16.gmra.mxu1 %vm1351_vm0, %v5903_v13 }
 0x23a   : > { %5377 = vmatmul.msk.bf16.gmra.mxu2 %vm1351_vm0, %v5919_v32  ;;  %5157 = vmatmul.msk.bf16.gmra.mxu0 %vm1351_vm0, %v5891_v26 }
 0x23c   : > { %v1946_v4 = vpop.f32.mrf.mxu3 }
 0x23d   : > { %v2008_v47 = vadd.f32 %v1946_v4, %v1673_v0  ;;  %v2828_v8 = vpop.f32.mrf.mxu2  ;;  %v1680_v0 = vadd.f32 %v6853_v23, %v7025_v6  ;;  %v5941_v23 = vld [vmem:[%s8100_s2 + $0x380] sm:$0xff] }
 0x23e   : > { %v7174_v53 = vadd.f32 %v2828_v8, %v2604_v50  ;;  %v2532_v3 = vpop.f32.mrf.mxu1 }
 0x23f   : > { %v7176_v24 = vadd.f32 %v2244_v44, %v2008_v47  ;;  %v2605_v16 = vadd.f32 %v2532_v3, %v7079_v10  ;;  %v2246_v25 = vpop.f32.mrf.mxu0  ;;  %v5920_v10 = vld [vmem:[%s8100_s2 + $0x2d8] sm:$0xff] }
 0x244   : > { %v1948_v41 = vpop.f32.mrf.mxu3 }
 0x245   : > { %v2009_v35 = vadd.f32 %v1948_v41, %v1675_v14  ;;  %v2830_v1 = vpop.f32.mrf.mxu2  ;;  %v1683_v41 = vadd.f32 %v6875_v31, %v7039_v29  ;;  %v5906_v31 = vld [vmem:[%s8100_s2 + $0x268] sm:$0xff] }
 0x246   : > { %v7187_v12 = vadd.f32 %v2830_v1, %v2605_v16  ;;  %v2535_v59 = vpop.f32.mrf.mxu1  ;;  %v5926_v29 = vld [vmem:[%s8100_s2 + $0x308] sm:$0xff] }
 0x247   : > { %v7195_v33 = vadd.f32 %v2246_v25, %v2009_v35  ;;  %v2606_v2 = vadd.f32 %v2535_v59, %v7091_v57  ;;  %v2249_v28 = vpop.f32.mrf.mxu0 }
 0x249   : > { %5046 = vmatmul.msk.bf16.gmra.mxu3 %vm1351_vm0, %v5876_v7  ;;  %5266 = vmatmul.msk.bf16.gmra.mxu1 %vm1351_vm0, %v5904_v15 }
 0x24a   : > { %5378 = vmatmul.msk.bf16.gmra.mxu2 %vm1351_vm0, %v5920_v10  ;;  %5158 = vmatmul.msk.bf16.gmra.mxu0 %vm1351_vm0, %v5892_v40 }
 0x24c   : > { %v1951_v38 = vpop.f32.mrf.mxu3 }
 0x24d   : > { %v2010_v13 = vadd.f32 %v1951_v38, %v1678_v62  ;;  %v2833_v34 = vpop.f32.mrf.mxu2 }
 0x24e   : > { %v7204_v32 = vadd.f32 %v2833_v34, %v2606_v2  ;;  %v2537_v26 = vpop.f32.mrf.mxu1  ;;  %v1685_v2 = vadd.f32 %v6881_v58, %v7057_v52  ;;  %v5942_v58 = vld [vmem:[%s8100_s2 + $0x388] sm:$0xff] }
 0x24f   : > { %v7206_v50 = vadd.f32 %v2249_v28, %v2010_v13  ;;  %v2607_v57 = vadd.f32 %v2537_v26, %v7109_v37  ;;  %v2251_v44 = vpop.f32.mrf.mxu0  ;;  %v5921_v37 = vld [vmem:[%s8100_s2 + $0x2e0] sm:$0xff] }
 0x254   : > { %v1953_v4 = vpop.f32.mrf.mxu3 }
 0x255   : > { %v2011_v47 = vadd.f32 %v1953_v4, %v1680_v0  ;;  %v2835_v8 = vpop.f32.mrf.mxu2  ;;  %v1688_v0 = vadd.f32 %v6903_v27, %v7071_v5  ;;  %v5974_v27 = vld [vmem:[%s8104_s6 + $0x8] sm:$0xff]  ;;  %v1690_v5 = vadd.f32 %v6909_v61, %v7089_v54  ;;  %v5923_v61 = vld [vmem:[%s8100_s2 + $0x2f0] sm:$0xff] }
 0x256   : > { %v7217_v3 = vadd.f32 %v2835_v8, %v2607_v57  ;;  %v2540_v16 = vpop.f32.mrf.mxu1  ;;  %v5975_v8 = vld [vmem:[%s8104_s6 + $0x10] sm:$0xff] }
 0x257   : > { %v7225_v6 = vadd.f32 %v2251_v44, %v2011_v47  ;;  %v2608_v25 = vadd.f32 %v2540_v16, %v7119_v45  ;;  %v2254_v14 = vpop.f32.mrf.mxu0  ;;  %v5976_v44 = vld [vmem:[%s8104_s6 + $0x18] sm:$0xff]  ;;  %v5943_v54 = vld [vmem:[%s8100_s2 + $0x390] sm:$0xff] }
 0x258   : > { %4044 = vmatpush.bf16.msra.mxu2 %v5976_v44  ;;  %v5908_v44 = vld [vmem:[%s8100_s2 + $0x278] sm:$0xff] }
 0x259   : > { %5267 = vmatmul.msk.bf16.gmra.mxu1 %vm1351_vm0, %v5905_v17  ;;  %5479 = vmatmul.msk.bf16.vlgmr.msrb.gmra.mxu3 %vm1351_vm0, %v5925_v46 }
 0x25a   : > { %5379 = vmatmul.msk.bf16.gmra.mxu2 %vm1351_vm0, %v5921_v37  ;;  %5591 = vmatmul.msk.bf16.vlgmr.msrb.gmra.mxu0 %vm1351_vm0, %v5941_v23 }
 0x25c   : > { %v1956_v35 = vpop.f32.mrf.mxu3  ;;  %4045 = vmatpush.bf16.msra.mxu2 %v5975_v8 }
 0x25d   : > { %v2012_v1 = vadd.f32 %v1956_v35, %v1683_v41  ;;  %v2838_v7 = vpop.f32.mrf.mxu2  ;;  %v5907_v35 = vld [vmem:[%s8100_s2 + $0x270] sm:$0xff] }
 0x25e   : > { %v7234_v15 = vadd.f32 %v2838_v7, %v2608_v25  ;;  %v2542_v59 = vpop.f32.mrf.mxu1 }
 0x25f   : > { %v7236_v10 = vadd.f32 %v2254_v14, %v2012_v1  ;;  %v2609_v45 = vadd.f32 %v2542_v59, %v7137_v20  ;;  %v2256_v40 = vpop.f32.mrf.mxu0  ;;  %v5922_v20 = vld [vmem:[%s8100_s2 + $0x2e8] sm:$0xff]  ;;  %v5973_v1 = vld [vmem:[%s8104_s6] sm:$0xff] }
 0x260   : > { %4046 = vmatpush.bf16.msra.mxu2 %v5974_v27 }
 0x264   : > { %v1958_v28 = vpop.f32.mrf.mxu3  ;;  %4047 = vmatpush.bf16.msra.mxu2 %v5973_v1 }
 0x265   : > { %v2013_v62 = vadd.f32 %v1958_v28, %v1685_v2  ;;  %v2840_v38 = vpop.f32.mrf.mxu2 }
 0x266   : > { %v7247_v13 = vadd.f32 %v2840_v38, %v2609_v45  ;;  %v2545_v34 = vpop.f32.mrf.mxu1 }
 0x267   : > { %v7255_v52 = vadd.f32 %v2256_v40, %v2013_v62  ;;  %v2610_v26 = vadd.f32 %v2545_v34, %v7147_v49  ;;  %v2259_v57 = vpop.f32.mrf.mxu0 }
 0x269   : > { %5268 = vmatmul.msk.bf16.gmra.mxu1 %vm1351_vm0, %v5906_v31  ;;  %5480 = vmatmul.msk.bf16.gmra.mxu3 %vm1351_vm0, %v5926_v29 }
 0x26a   : > { %5380 = vmatmul.msk.bf16.gmra.mxu2 %vm1351_vm0, %v5922_v20  ;;  %5592 = vmatmul.msk.bf16.gmra.mxu0 %vm1351_vm0, %v5942_v58 }
 0x26c   : > { %v1961_v4 = vpop.f32.mrf.mxu3 }
 0x26d   : > { %v2014_v47 = vadd.f32 %v1961_v4, %v1688_v0  ;;  %v2843_v49 = vpop.f32.mrf.mxu2 }
 0x26e   : > { %v7270_v17 = vadd.f32 %v2843_v49, %v2610_v26  ;;  %v2547_v46 = vpop.f32.mrf.mxu1 }
 0x26f   : > { %v7272_v16 = vadd.f32 %v2259_v57, %v2014_v47  ;;  %v2611_v37 = vadd.f32 %v2547_v46, %v7165_v19  ;;  %v2261_v23 = vpop.f32.mrf.mxu0  ;;  %v5927_v19 = vld [vmem:[%s8100_s2 + $0x310] sm:$0xff] }
 0x274   : > { %v1963_v25 = vpop.f32.mrf.mxu3 }
 0x275   : > { %v2015_v14 = vadd.f32 %v1963_v25, %v1690_v5  ;;  %v2845_v41 = vpop.f32.mrf.mxu2 }
 0x276   : > { %v7289_v7 = vadd.f32 %v2845_v41, %v2611_v37  ;;  %v2550_v59 = vpop.f32.mrf.mxu1  ;;  %v3912_v41 = vld [vmem:[%s7344_s23] sm:$0xff] }
 0x277   : > { %v7297_v45 = vadd.f32 %v2261_v23, %v2015_v14  ;;  %v2612_v40 = vadd.f32 %v2550_v59, %v7176_v24  ;;  %v2264_v2 = vpop.f32.mrf.mxu0  ;;  %v5929_v59 = vld [vmem:[%s8100_s2 + $0x320] sm:$0xff] }
 0x279   : > { %5269 = vmatmul.msk.bf16.gmra.mxu1 %vm1351_vm0, %v5907_v35  ;;  %5481 = vmatmul.msk.bf16.gmra.mxu3 %vm1351_vm0, %v5927_v19  ;;  %v3913_v35 = vld [vmem:[%s7344_s23 + $0x8] sm:$0xff] }
 0x27a   : > { %5381 = vmatmul.msk.bf16.gmra.mxu2 %vm1351_vm0, %v5923_v61  ;;  %5593 = vmatmul.msk.bf16.gmra.mxu0 %vm1351_vm0, %v5943_v54 }
 0x27c   : > { %v1966_v28 = vpop.f32.mrf.mxu3 }
 0x27d   : > { %v2016_v62 = vadd.f32 %v1966_v28, %v6932_v51  ;;  %v2848_v38 = vpop.f32.mrf.mxu2  ;;  %v5928_v51 = vld [vmem:[%s8100_s2 + $0x318] sm:$0xff] }
 0x27e   : > { %v7305_v31 = vadd.f32 %v2848_v38, %v2612_v40  ;;  %v2552_v29 = vpop.f32.mrf.mxu1  ;;  %v3944_v40 = vpack.c.bf16 %v3913_v35, %v3912_v41 }
 0x27f   : > { %v7307_v34 = vadd.f32 %v2264_v2, %v2016_v62  ;;  %v2613_v24 = vadd.f32 %v2552_v29, %v7195_v33  ;;  %v2266_v20 = vpop.f32.mrf.mxu0  ;;  %v5924_v33 = vld [vmem:[%s8100_s2 + $0x2f8] sm:$0xff]  ;;  %v5945_v2 = vld [vmem:[%s8100_s2 + $0x3a0] sm:$0xff] }
 0x284   : > { %v1968_v58 = vpop.f32.mrf.mxu3 }
 0x285   : > { %v2017_v26 = vadd.f32 %v1968_v58, %v6945_v9  ;;  %v2850_v57 = vpop.f32.mrf.mxu2  ;;  %v5944_v9 = vld [vmem:[%s8100_s2 + $0x398] sm:$0xff] }
 0x286   : > { %v7317_v0 = vadd.f32 %v2850_v57, %v2613_v24  ;;  %v2555_v4 = vpop.f32.mrf.mxu1 }
 0x287   : > { %v7325_v47 = vadd.f32 %v2266_v20, %v2017_v26  ;;  %v2614_v49 = vadd.f32 %v2555_v4, %v7206_v50  ;;  %v2269_v8 = vpop.f32.mrf.mxu0 }
 0x289   : > { %5270 = vmatmul.msk.bf16.gmra.mxu1 %vm1351_vm0, %v5908_v44  ;;  %5482 = vmatmul.msk.bf16.gmra.mxu3 %vm1351_vm0, %v5928_v51  ;;  %v3914_v44 = vld [vmem:[%s7344_s23 + $0x10] sm:$0xff]  ;;  %v3915_v51 = vld [vmem:[%s7344_s23 + $0x18] sm:$0xff] }
 0x28a   : > { %5382 = vmatmul.msk.bf16.gmra.mxu2 %vm1351_vm0, %v5924_v33  ;;  %5594 = vmatmul.msk.bf16.gmra.mxu0 %vm1351_vm0, %v5944_v9 }
 0x28c   : > { %v1971_v46 = vpop.f32.mrf.mxu3 }
 0x28d   : > { %v2018_v37 = vadd.f32 %v1971_v46, %v6962_v21  ;;  %v2853_v23 = vpop.f32.mrf.mxu2 }
 0x28e   : > { %v7334_v27 = vadd.f32 %v2853_v23, %v2614_v49  ;;  %v2557_v5 = vpop.f32.mrf.mxu1  ;;  %v5930_v49 = vld [vmem:[%s8100_s2 + $0x328] sm:$0xff] }
 0x28f   : > { %v7336_v25 = vadd.f32 %v2269_v8, %v2018_v37  ;;  %v2615_v50 = vadd.f32 %v2557_v5, %v7225_v6  ;;  %v2271_v14 = vpop.f32.mrf.mxu0  ;;  %v5957_v6 = vld [vmem:[%s8100_s2 + $0x400] sm:$0xff]  ;;  %v3945_v37 = vpack.c.bf16 %v3915_v51, %v3914_v44 }
 0x294   : > { %v1973_v21 = vpop.f32.mrf.mxu3 }
 0x295   : > { %v2019_v19 = vadd.f32 %v1973_v21, %v6975_v63  ;;  %v2855_v1 = vpop.f32.mrf.mxu2 }
 0x296   : > { %v7355_v61 = vadd.f32 %v2855_v1, %v2615_v50  ;;  %v2560_v54 = vpop.f32.mrf.mxu1 }
 0x297   : > { %v7360_v28 = vadd.f32 %v2271_v14, %v2019_v19  ;;  %v2616_v63 = vadd.f32 %v2560_v54, %v7236_v10  ;;  %v2274_v62 = vpop.f32.mrf.mxu0 }
 0x299   : > { %5483 = vmatmul.msk.bf16.gmra.mxu3 %vm1351_vm0, %v5929_v59  ;;  %5703 = vmatmul.msk.bf16.vlgmr.msra.gmra.mxu1 %vm1351_vm0, %v5957_v6  ;;  %v3916_v59 = vld [vmem:[%s7344_s23 + $0x20] sm:$0xff]  ;;  %v3917_v6 = vld [vmem:[%s7344_s23 + $0x28] sm:$0xff] }
 0x29a   : > { %5735 = vmatmul.msk.bf16.vlgmr.msra.gmra.mxu2 %vm1351_vm0, %v3944_v40  ;;  %5595 = vmatmul.msk.bf16.gmra.mxu0 %vm1351_vm0, %v5945_v2 }
 0x29c   : > { %v1976_v38 = vpop.f32.mrf.mxu3 }
 0x29d   : > { %v2020_v29 = vadd.f32 %v1976_v38, %v6991_v18  ;;  %v2858_v24 = vpop.f32.mrf.mxu2  ;;  %v5958_v18 = vld [vmem:[%s8100_s2 + $0x408] sm:$0xff] }
 0x29e   : > { %v7368_v20 = vadd.f32 %v2858_v24, %v2616_v63  ;;  %v2562_v58 = vpop.f32.mrf.mxu1  ;;  %v5931_v63 = vld [vmem:[%s8100_s2 + $0x330] sm:$0xff] }
 0x29f   : > { %v7370_v26 = vadd.f32 %v2274_v62, %v2020_v29  ;;  %v2617_v10 = vadd.f32 %v2562_v58, %v7255_v52  ;;  %v2276_v57 = vpop.f32.mrf.mxu0  ;;  %v5946_v52 = vld [vmem:[%s8100_s2 + $0x3a8] sm:$0xff]  ;;  %v3946_v29 = vpack.c.bf16 %v3917_v6, %v3916_v59 }
 0x2a4   : > { %v1978_v4 = vpop.f32.mrf.mxu3 }
 0x2a5   : > { %v2021_v33 = vadd.f32 %v1978_v4, %v7005_v30  ;;  %v2860_v9 = vpop.f32.mrf.mxu2 }
 0x2a6   : > { %v7382_v8 = vadd.f32 %v2860_v9, %v2617_v10  ;;  %v2565_v46 = vpop.f32.mrf.mxu1 }
 0x2a7   : > { %v7387_v23 = vadd.f32 %v2276_v57, %v2021_v33  ;;  %v2618_v30 = vadd.f32 %v2565_v46, %v7272_v16  ;;  %v2279_v5 = vpop.f32.mrf.mxu0 }
 0x2a9   : > { %5484 = vmatmul.msk.bf16.gmra.mxu3 %vm1351_vm0, %v5930_v49  ;;  %5704 = vmatmul.msk.bf16.gmra.mxu1 %vm1351_vm0, %v5958_v18  ;;  %v3918_v49 = vld [vmem:[%s7344_s23 + $0x30] sm:$0xff]  ;;  %v3919_v18 = vld [vmem:[%s7344_s23 + $0x38] sm:$0xff] }
 0x2aa   : > { %5736 = vmatmul.msk.bf16.gmra.mxu2 %vm1351_vm0, %v3945_v37  ;;  %5596 = vmatmul.msk.bf16.gmra.mxu0 %vm1351_vm0, %v5946_v52 }
 0x2ac   : > { %v1981_v50 = vpop.f32.mrf.mxu3 }
 0x2ad   : > { %v2022_v14 = vadd.f32 %v1981_v50, %v7023_v11  ;;  %v2863_v41 = vpop.f32.mrf.mxu2  ;;  %v5959_v11 = vld [vmem:[%s8100_s2 + $0x410] sm:$0xff] }
 0x2ae   : > { %v7395_v35 = vadd.f32 %v2863_v41, %v2618_v30  ;;  %v2567_v21 = vpop.f32.mrf.mxu1  ;;  %v5932_v30 = vld [vmem:[%s8100_s2 + $0x338] sm:$0xff] }
 0x2af   : > { %v7397_v19 = vadd.f32 %v2279_v5, %v2022_v14  ;;  %v2619_v16 = vadd.f32 %v2567_v21, %v7297_v45  ;;  %v2281_v1 = vpop.f32.mrf.mxu0  ;;  %v5947_v45 = vld [vmem:[%s8100_s2 + $0x3b0] sm:$0xff]  ;;  %v3947_v14 = vpack.c.bf16 %v3919_v18, %v3918_v49 }
 0x2b4   : > { %v1983_v54 = vpop.f32.mrf.mxu3 }
 0x2b5   : > { %v2023_v40 = vadd.f32 %v1983_v54, %v7037_v36  ;;  %v2865_v2 = vpop.f32.mrf.mxu2 }
 0x2b6   : > { %v7409_v62 = vadd.f32 %v2865_v2, %v2619_v16  ;;  %v2570_v38 = vpop.f32.mrf.mxu1 }
 0x2b7   : > { %v7414_v24 = vadd.f32 %v2281_v1, %v2023_v40  ;;  %v2620_v36 = vadd.f32 %v2570_v38, %v7307_v34  ;;  %v2284_v58 = vpop.f32.mrf.mxu0 }
 0x2b9   : > { %5485 = vmatmul.msk.bf16.gmra.mxu3 %vm1351_vm0, %v5931_v63  ;;  %5705 = vmatmul.msk.bf16.gmra.mxu1 %vm1351_vm0, %v5959_v11  ;;  %v3920_v63 = vld [vmem:[%s7344_s23 + $0x40] sm:$0xff]  ;;  %v3921_v11 = vld [vmem:[%s7344_s23 + $0x48] sm:$0xff] }
 0x2ba   : > { %5737 = vmatmul.msk.bf16.gmra.mxu2 %vm1351_vm0, %v3946_v29  ;;  %5597 = vmatmul.msk.bf16.gmra.mxu0 %vm1351_vm0, %v5947_v45 }
 0x2bc   : > { %v1986_v10 = vpop.f32.mrf.mxu3 }
 0x2bd   : > { %v2024_v57 = vadd.f32 %v1986_v10, %v7055_v22  ;;  %v2868_v44 = vpop.f32.mrf.mxu2  ;;  %v5960_v22 = vld [vmem:[%s8100_s2 + $0x418] sm:$0xff] }
 0x2be   : > { %v7422_v51 = vadd.f32 %v2868_v44, %v2620_v36  ;;  %v2572_v4 = vpop.f32.mrf.mxu1  ;;  %v5933_v36 = vld [vmem:[%s8100_s2 + $0x340] sm:$0xff] }
 0x2bf   : > { %v7424_v33 = vadd.f32 %v2284_v58, %v2024_v57  ;;  %v2621_v34 = vadd.f32 %v2572_v4, %v7325_v47  ;;  %v2286_v9 = vpop.f32.mrf.mxu0  ;;  %v5948_v47 = vld [vmem:[%s8100_s2 + $0x3b8] sm:$0xff]  ;;  %v5949_v57 = vld [vmem:[%s8100_s2 + $0x3c0] sm:$0xff] }
 0x2c4   : > { %v1988_v46 = vpop.f32.mrf.mxu3 }
 0x2c5   : > { %v2025_v37 = vadd.f32 %v1988_v46, %v7069_v48  ;;  %v2870_v52 = vpop.f32.mrf.mxu2 }
 0x2c6   : > { %v7436_v5 = vadd.f32 %v2870_v52, %v2621_v34  ;;  %v2575_v50 = vpop.f32.mrf.mxu1  ;;  %v3923_v52 = vld [vmem:[%s7344_s23 + $0x58] sm:$0xff] }
 0x2c7   : > { %v7441_v41 = vadd.f32 %v2286_v9, %v2025_v37  ;;  %v2622_v48 = vadd.f32 %v2575_v50, %v7336_v25  ;;  %v2289_v21 = vpop.f32.mrf.mxu0  ;;  %v5934_v50 = vld [vmem:[%s8100_s2 + $0x348] sm:$0xff] }
 0x2c9   : > { %5486 = vmatmul.msk.bf16.gmra.mxu3 %vm1351_vm0, %v5932_v30  ;;  %5706 = vmatmul.msk.bf16.gmra.mxu1 %vm1351_vm0, %v5960_v22 }
 0x2ca   : > { %5738 = vmatmul.msk.bf16.gmra.mxu2 %vm1351_vm0, %v3947_v14  ;;  %5598 = vmatmul.msk.bf16.gmra.mxu0 %vm1351_vm0, %v5948_v47  ;;  %v5962_v14 = vld [vmem:[%s8100_s2 + $0x428] sm:$0xff] }
 0x2cc   : > { %v1991_v16 = vpop.f32.mrf.mxu3 }
 0x2cd   : > { %v2026_v1 = vadd.f32 %v1991_v16, %v7087_v55  ;;  %v2873_v59 = vpop.f32.mrf.mxu2  ;;  %v5961_v55 = vld [vmem:[%s8100_s2 + $0x420] sm:$0xff] }
 0x2ce   : > { %v7449_v6 = vadd.f32 %v2873_v59, %v2622_v48  ;;  %v2577_v54 = vpop.f32.mrf.mxu1 }
 0x2cf   : > { %v7451_v40 = vadd.f32 %v2289_v21, %v2026_v1  ;;  %v2623_v25 = vadd.f32 %v2577_v54, %v7360_v28  ;;  %v2291_v2 = vpop.f32.mrf.mxu0  ;;  %v3948_v28 = vpack.c.bf16 %v3921_v11, %v3920_v63  ;;  %v5950_v21 = vld [vmem:[%s8100_s2 + $0x3c8] sm:$0xff] }
 0x2d4   : > { %v1993_v38 = vpop.f32.mrf.mxu3 }
 0x2d5   : > { %v2027_v29 = vadd.f32 %v1993_v38, %v7101_v39  ;;  %v2875_v45 = vpop.f32.mrf.mxu2  ;;  %v3925_v38 = vld [vmem:[%s7344_s23 + $0x68] sm:$0xff] }
 0x2d6   : > { %v7463_v58 = vadd.f32 %v2875_v45, %v2623_v25  ;;  %v2580_v10 = vpop.f32.mrf.mxu1 }
 0x2d7   : > { %v7468_v39 = vadd.f32 %v2291_v2, %v2027_v29  ;;  %v2624_v44 = vadd.f32 %v2580_v10, %v7370_v26  ;;  %v7471_v4 = vpop.f32.mrf.mxu0  ;;  %v3922_v26 = vld [vmem:[%s7344_s23 + $0x50] sm:$0xff] }
 0x2d9   : > { %5487 = vmatmul.msk.bf16.gmra.mxu3 %vm1351_vm0, %v5933_v36  ;;  %5707 = vmatmul.msk.bf16.gmra.mxu1 %vm1351_vm0, %v5961_v55  ;;  %v5935_v36 = vld [vmem:[%s8100_s2 + $0x350] sm:$0xff] }
 0x2da   : > { %5739 = vmatmul.msk.bf16.gmra.mxu2 %vm1351_vm0, %v3948_v28  ;;  %5599 = vmatmul.msk.bf16.gmra.mxu0 %vm1351_vm0, %v5949_v57  ;;  %v5963_v55 = vld [vmem:[%s8100_s2 + $0x430] sm:$0xff] }
 0x2db   : > { %v5951_v57 = vld [vmem:[%s8100_s2 + $0x3d0] sm:$0xff] }
 0x2dc   : > { %v7477_v34 = vpop.f32.mrf.mxu3 }
 0x2dd   : > { %v2878_v9 = vpop.f32.mrf.mxu2 }
 0x2de   : > { %v7479_v49 = vadd.f32 %v2878_v9, %v2624_v44  ;;  %v2582_v18 = vpop.f32.mrf.mxu1 }
 0x2df   : > { %v2625_v46 = vadd.f32 %v2582_v18, %v7387_v23  ;;  %v7482_v37 = vpop.f32.mrf.mxu0  ;;  %v3949_v23 = vpack.c.bf16 %v3923_v52, %v3922_v26 }
 0x2e4   : > { %v7486_v30 = vpop.f32.mrf.mxu3 }
 0x2e5   : > { %v2880_v22 = vpop.f32.mrf.mxu2 }
 0x2e6   : > { %v7494_v47 = vadd.f32 %v2880_v22, %v2625_v46  ;;  %v2585_v48 = vpop.f32.mrf.mxu1 }
 0x2e7   : > { %v2626_v16 = vadd.f32 %v2585_v48, %v7397_v19  ;;  %v7500_v1 = vpop.f32.mrf.mxu0  ;;  %v3924_v19 = vld [vmem:[%s7344_s23 + $0x60] sm:$0xff] }
 0x2e8   : > { %v3950_v28 = vpack.c.bf16 %v3925_v38, %v3924_v19 }
 0x2e9   : > { %5488 = vmatmul.msk.bf16.gmra.mxu3 %vm1351_vm0, %v5934_v50  ;;  %5708 = vmatmul.msk.bf16.gmra.mxu1 %vm1351_vm0, %v5962_v14  ;;  %v3926_v50 = vld [vmem:[%s7344_s23 + $0x70] sm:$0xff] }
 0x2ea   : > { %5740 = vmatmul.msk.bf16.gmra.mxu2 %vm1351_vm0, %v3949_v23  ;;  %5600 = vmatmul.msk.bf16.gmra.mxu0 %vm1351_vm0, %v5950_v21  ;;  %v5936_v23 = vld [vmem:[%s8100_s2 + $0x358] sm:$0xff] }
 0x2eb   : > { %v5964_v21 = vld [vmem:[%s8100_s2 + $0x438] sm:$0xff] }
 0x2ec   : > { %v7506_v59 = vpop.f32.mrf.mxu3 }
 0x2ed   : > { %v2883_v54 = vpop.f32.mrf.mxu2 }
 0x2ee   : > { %v7508_v25 = vadd.f32 %v2883_v54, %v2626_v16  ;;  %v2587_v2 = vpop.f32.mrf.mxu1 }
 0x2ef   : > { %v2627_v63 = vadd.f32 %v2587_v2, %v7414_v24  ;;  %v7511_v11 = vpop.f32.mrf.mxu0 }
 0x2f4   : > { %v7515_v29 = vpop.f32.mrf.mxu3 }
 0x2f5   : > { %v2885_v45 = vpop.f32.mrf.mxu2 }
 0x2f6   : > { %v7523_v10 = vadd.f32 %v2885_v45, %v2627_v63  ;;  %v2590_v24 = vpop.f32.mrf.mxu1  ;;  %v5952_v63 = vld [vmem:[%s8100_s2 + $0x3d8] sm:$0xff] }
 0x2f7   : > { %v2628_v44 = vadd.f32 %v2590_v24, %v7424_v33  ;;  %v7535_v18 = vpop.f32.mrf.mxu0  ;;  %v3927_v33 = vld [vmem:[%s7344_s23 + $0x78] sm:$0xff] }
 0x2f9   : > { %5489 = vmatmul.msk.bf16.gmra.mxu3 %vm1351_vm0, %v5935_v36  ;;  %5709 = vmatmul.msk.bf16.gmra.mxu1 %vm1351_vm0, %v5963_v55 }
 0x2fa   : > { %5741 = vmatmul.msk.bf16.gmra.mxu2 %vm1351_vm0, %v3950_v28  ;;  %5601 = vmatmul.msk.bf16.gmra.mxu0 %vm1351_vm0, %v5951_v57  ;;  %v3928_v57 = vld [vmem:[%s7344_s23 + $0x80] sm:$0xff] }
 0x2fc   : > { %v7533_v9 = vpop.f32.mrf.mxu3 }
 0x2fd   : > { %v2888_v46 = vpop.f32.mrf.mxu2 }
 0x2fe   : > { %v7537_v26 = vadd.f32 %v2888_v46, %v2628_v44  ;;  %v2592_v52 = vpop.f32.mrf.mxu1  ;;  %v3929_v44 = vld [vmem:[%s7344_s23 + $0x88] sm:$0xff] }
 0x2ff   : > { %v2629_v22 = vadd.f32 %v2592_v52, %v7441_v41  ;;  %v7552_v2 = vpop.f32.mrf.mxu0  ;;  %v3951_v41 = vpack.c.bf16 %v3927_v33, %v3926_v50  ;;  %v5937_v52 = vld [vmem:[%s8100_s2 + $0x360] sm:$0xff] }
 0x304   : > { %v7542_v14 = vpop.f32.mrf.mxu3 }
 0x305   : > { %v2890_v48 = vpop.f32.mrf.mxu2 }
 0x306   : > { %v7550_v16 = vadd.f32 %v2890_v48, %v2629_v22  ;;  %v2595_v54 = vpop.f32.mrf.mxu1  ;;  %v5965_v22 = vld [vmem:[%s8100_s2 + $0x440] sm:$0xff] }
 0x307   : > { %v2630_v19 = vadd.f32 %v2595_v54, %v7451_v40  ;;  %v7567_v28 = vpop.f32.mrf.mxu0  ;;  %v3204_v40 = vadd.f32 %v7477_v34, %v7117_v42  ;;  %v5953_v42 = vld [vmem:[%s8100_s2 + $0x3e0] sm:$0xff]  ;;  %v3205_v54 = vadd.f32 %v7486_v30, %v7129_v60 }
 0x308   : > { %v7609_v60 = vld [vmem:[%s8103_s5] ss:$0 sm:$0xff] }
 0x309   : > { %5490 = vmatmul.msk.bf16.gmra.mxu3 %vm1351_vm0, %v5936_v23  ;;  %5710 = vmatmul.msk.bf16.gmra.mxu1 %vm1351_vm0, %v5964_v21  ;;  %v3502_v50 = vadd.f32 %v7471_v4, %v3204_v40  ;;  %v3952_v23 = vpack.c.bf16 %v3929_v44, %v3928_v57  ;;  %v7590_v21 = vld [vmem:[%s8102_s4] ss:$0 sm:$0xff] }
 0x30a   : > { %5742 = vmatmul.msk.bf16.gmra.mxu2 %vm1351_vm0, %v3951_v41  ;;  %5602 = vmatmul.msk.bf16.gmra.mxu0 %vm1351_vm0, %v5952_v63  ;;  %v7602_v41 = vld [vmem:[%s8105_s7] ss:$0 sm:$0xff] }
 0x30b   : > { %v7614_v30 = vld [vmem:[%s8106_s8] ss:$0 sm:$0xff] }
 0x30c   : > { %v7562_v38 = vpop.f32.mrf.mxu3 }
 0x30d   : > { %v2893_v45 = vpop.f32.mrf.mxu2 }
 0x30e   : > { %v7564_v36 = vadd.f32 %v2893_v45, %v2630_v19  ;;  %v2597_v55 = vpop.f32.mrf.mxu1  ;;  %v3503_v19 = vadd.f32 %v7482_v37, %v3205_v54 }
 0x30f   : > { %v2631_v24 = vadd.f32 %v2597_v55, %v7468_v39  ;;  %v7596_v4 = vpop.f32.mrf.mxu0 }
 0x314   : > { %v7582_v39 = vpop.f32.mrf.mxu3 }
 0x315   : > { %v2895_v46 = vpop.f32.mrf.mxu2 }
 0x316   : > { %v7580_v33 = vadd.f32 %v2895_v46, %v2631_v24  ;;  %v3728_v48 = vpop.f32.mrf.mxu1 }
 0x317   : > { %v3808_v34 = vadd.f32 %v3728_v48, %v3502_v50  ;;  %v3930_v48 = vld [vmem:[%s7344_s23 + $0x90] sm:$0xff] }
 0x319   : > { %5491 = vmatmul.msk.bf16.gmra.mxu3 %vm1351_vm0, %v5937_v52  ;;  %5711 = vmatmul.msk.bf16.gmra.mxu1 %vm1351_vm0, %v5965_v22  ;;  %v3844_v63 = vmul.f32 %v7590_v21, %v3808_v34  ;;  %v3206_v22 = vadd.f32 %v7506_v59, %v7145_v56  ;;  %v7640_v34 = vpop.f32.mrf.mxu0  ;;  %v5938_v56 = vld [vmem:[%s8100_s2 + $0x368] sm:$0xff] }
 0x31a   : > { %5743 = vmatmul.msk.bf16.gmra.mxu2 %vm1351_vm0, %v3952_v23  ;;  %5603 = vmatmul.msk.bf16.gmra.mxu0 %vm1351_vm0, %v5953_v42  ;;  %v3931_v23 = vld [vmem:[%s7344_s23 + $0x98] sm:$0xff]  ;;  %v5966_v59 = vld [vmem:[%s8100_s2 + $0x448] sm:$0xff] }
 0x31b   : > { %v7619_v57 = vadd.f32 %v7609_v60, %v3844_v63  ;;  %v3209_v63 = vadd.f32 %v7542_v14, %v7187_v12 }
 0x31c   : > { %v7621_v44 = vpop.f32.mrf.mxu3 }
 0x31d   : > { %v4049_v45 = vpop.f32.mrf.mxu2 }
 0x31e   : > { %v4133_v55 = vmul.f32 %v7602_v41, %v4049_v45  ;;  %v3730_v24 = vpop.f32.mrf.mxu1 }
 0x31f   : > { %v3809_v40 = vadd.f32 %v3730_v24, %v3503_v19  ;;  %v3504_v19 = vadd.f32 %v7500_v1, %v3206_v22  ;;  %v3953_v24 = vpack.c.bf16 %v3931_v23, %v3930_v48 }
 0x320   : > { %v4169_v46 = vadd.f32 %v7614_v30, %v4133_v55 }
 0x321   : > { %v3845_v52 = vmul.f32 %v7590_v21, %v3809_v40  ;;  %v5954_v40 = vld [vmem:[%s8100_s2 + $0x3e8] sm:$0xff] }
 0x322   : > { %v4201_v50 = vadd.f32 %v4169_v46, %v7619_v57 }
 0x323   : > { %v7636_v37 = vadd.f32 %v7609_v60, %v3845_v52 }
 0x324   : > { %v4233_v42 = vmax.f32 %v4201_v50, 0.0  ;;  %v3207_v50 = vadd.f32 %v7515_v29, %v7157_v43  ;;  %v7661_v1 = vpop.f32.mrf.mxu3  ;;  %v7669_v29 = vpop.f32.mrf.mxu0 }
 0x325   : > { %v4051_v54 = vpop.f32.mrf.mxu2 }
 0x326   : > { %4265 = vst [vmem:[%s7633_s27] sm:$0xff] %v4233_v42  ;;  %v4134_v45 = vmul.f32 %v7602_v41, %v4051_v54  ;;  %v3733_v55 = vpop.f32.mrf.mxu1  ;;  %v3505_v42 = vadd.f32 %v7511_v11, %v3207_v50 }
 0x327   : > { %v3810_v52 = vadd.f32 %v3733_v55, %v3504_v19 }
 0x328   : > { %v4170_v46 = vadd.f32 %v7614_v30, %v4134_v45 }
 0x329   : > { %5492 = vmatmul.msk.bf16.gmra.mxu3 %vm1351_vm0, %v5938_v56  ;;  %5712 = vmatmul.msk.bf16.gmra.mxu1 %vm1351_vm0, %v5966_v59  ;;  %v3846_v23 = vmul.f32 %v7590_v21, %v3810_v52  ;;  %v3933_v52 = vld [vmem:[%s7344_s23 + $0xa8] sm:$0xff] }
 0x32a   : > { %v4202_v22 = vadd.f32 %v4170_v46, %v7636_v37  ;;  %5744 = vmatmul.msk.bf16.gmra.mxu2 %vm1351_vm0, %v3953_v24  ;;  %5604 = vmatmul.msk.bf16.gmra.mxu0 %vm1351_vm0, %v5954_v40  ;;  %v3208_v24 = vadd.f32 %v7533_v9, %v7174_v53  ;;  %v3932_v46 = vld [vmem:[%s7344_s23 + $0xa0] sm:$0xff] }
 0x32b   : > { %v7673_v19 = vadd.f32 %v7609_v60, %v3846_v23  ;;  %v5939_v23 = vld [vmem:[%s8100_s2 + $0x370] sm:$0xff] }
 0x32c   : > { %v4234_v48 = vmax.f32 %v4202_v22, 0.0  ;;  %v7685_v50 = vpop.f32.mrf.mxu3  ;;  %v3506_v9 = vadd.f32 %v7535_v18, %v3208_v24 }
 0x32d   : > { %v4054_v43 = vpop.f32.mrf.mxu2 }
 0x32e   : > { %4266 = vst [vmem:[%s7633_s27 + $0x8] sm:$0xff] %v4234_v48  ;;  %v4135_v54 = vmul.f32 %v7602_v41, %v4054_v43  ;;  %v3735_v56 = vpop.f32.mrf.mxu1 }
 0x32f   : > { %v3811_v59 = vadd.f32 %v3735_v56, %v3505_v42  ;;  %v5967_v42 = vld [vmem:[%s8100_s2 + $0x450] sm:$0xff]  ;;  %v3954_v56 = vpack.c.bf16 %v3933_v52, %v3932_v46  ;;  %v3507_v52 = vadd.f32 %v7552_v2, %v3209_v63 }
 0x330   : > { %v4171_v45 = vadd.f32 %v7614_v30, %v4135_v54 }
 0x331   : > { %v3847_v55 = vmul.f32 %v7590_v21, %v3811_v59  ;;  %v5955_v59 = vld [vmem:[%s8100_s2 + $0x3f0] sm:$0xff] }
 0x332   : > { %v4203_v11 = vadd.f32 %v4171_v45, %v7673_v19  ;;  %v7701_v45 = vpop.f32.mrf.mxu0 }
 0x333   : > { %v7681_v40 = vadd.f32 %v7609_v60, %v3847_v55 }
 0x334   : > { %v4235_v22 = vmax.f32 %v4203_v11, 0.0 }
 0x335   : > { %v4056_v48 = vpop.f32.mrf.mxu2  ;;  %v4299_v53 = vpack.c.bf16 %v7681_v40, %v7673_v19 }
 0x336   : > { %4267 = vst [vmem:[%s7633_s27 + $0x10] sm:$0xff] %v4235_v22  ;;  %v4136_v43 = vmul.f32 %v7602_v41, %v4056_v48  ;;  %v3738_v54 = vpop.f32.mrf.mxu1  ;;  %v7713_v48 = vpop.f32.mrf.mxu3 }
 0x337   : > { %v3812_v11 = vadd.f32 %v3738_v54, %v3506_v9  ;;  %v3210_v54 = vadd.f32 %v7562_v38, %v7204_v32 }
 0x338   : > { %v4172_v55 = vadd.f32 %v7614_v30, %v4136_v43 }
 0x339   : > { %5493 = vmatmul.msk.bf16.gmra.mxu3 %vm1351_vm0, %v5939_v23  ;;  %5713 = vmatmul.msk.bf16.gmra.mxu1 %vm1351_vm0, %v5967_v42  ;;  %v3848_v46 = vmul.f32 %v7590_v21, %v3812_v11  ;;  %v3508_v38 = vadd.f32 %v7567_v28, %v3210_v54 }
 0x33a   : > { %v4204_v18 = vadd.f32 %v4172_v55, %v7681_v40  ;;  %5745 = vmatmul.msk.bf16.gmra.mxu2 %vm1351_vm0, %v3954_v56  ;;  %5605 = vmatmul.msk.bf16.gmra.mxu0 %vm1351_vm0, %v5955_v59  ;;  %v7724_v2 = vpop.f32.mrf.mxu0  ;;  %v3934_v59 = vld [vmem:[%s7344_s23 + $0xb0] sm:$0xff]  ;;  %v3935_v55 = vld [vmem:[%s7344_s23 + $0xb8] sm:$0xff] }
 0x33b   : > { %v7718_v42 = vadd.f32 %v7609_v60, %v3848_v46  ;;  %v5968_v46 = vld [vmem:[%s8100_s2 + $0x458] sm:$0xff] }
 0x33c   : > { %v4236_v24 = vmax.f32 %v4204_v18, 0.0 }
 0x33d   : > { %v4059_v22 = vpop.f32.mrf.mxu2 }
 0x33e   : > { %4268 = vst [vmem:[%s7633_s27 + $0x18] sm:$0xff] %v4236_v24  ;;  %v4137_v12 = vmul.f32 %v7602_v41, %v4059_v22  ;;  %v3740_v14 = vpop.f32.mrf.mxu1  ;;  %v5940_v24 = vld [vmem:[%s8100_s2 + $0x378] sm:$0xff] }
 0x33f   : > { %v3813_v23 = vadd.f32 %v3740_v14, %v3507_v52  ;;  %v5956_v14 = vld [vmem:[%s8100_s2 + $0x3f8] sm:$0xff] }
 0x340   : > { %v4173_v9 = vadd.f32 %v7614_v30, %v4137_v12  ;;  %v3955_v12 = vpack.c.bf16 %v3935_v55, %v3934_v59 }
 0x341   : > { %v3849_v43 = vmul.f32 %v7590_v21, %v3813_v23  ;;  %v7746_v23 = vpop.f32.mrf.mxu3 }
 0x342   : > { %v4205_v63 = vadd.f32 %v4173_v9, %v7718_v42  ;;  %v7756_v54 = vpop.f32.mrf.mxu0 }
 0x343   : > { %v7728_v56 = vadd.f32 %v7609_v60, %v3849_v43 }
 0x344   : > { %v4237_v11 = vmax.f32 %v4205_v63, 0.0  ;;  %v3211_v63 = vadd.f32 %v7582_v39, %v7217_v3 }
 0x345   : > { %v4061_v18 = vpop.f32.mrf.mxu2  ;;  %v4300_v32 = vpack.c.bf16 %v7728_v56, %v7718_v42 }
 0x346   : > { %4269 = vst [vmem:[%s7633_s27 + $0x20] sm:$0xff] %v4237_v11  ;;  %v4138_v52 = vmul.f32 %v7602_v41, %v4061_v18  ;;  %v3743_v22 = vpop.f32.mrf.mxu1  ;;  %v3509_v11 = vadd.f32 %v7596_v4, %v3211_v63 }
 0x347   : > { %v3814_v43 = vadd.f32 %v3743_v22, %v3508_v38  ;;  %v3212_v22 = vadd.f32 %v7621_v44, %v7234_v15 }
 0x348   : > { %v4174_v9 = vadd.f32 %v7614_v30, %v4138_v52 }
 0x349   : > { %5494 = vmatmul.msk.bf16.gmra.mxu3 %vm1351_vm0, %v5940_v24  ;;  %5714 = vmatmul.msk.bf16.gmra.mxu1 %vm1351_vm0, %v5968_v46  ;;  %v3850_v55 = vmul.f32 %v7590_v21, %v3814_v43  ;;  %v3937_v43 = vld [vmem:[%s7344_s23 + $0xc8] sm:$0xff]  ;;  %v3510_v15 = vadd.f32 %v7640_v34, %v3212_v22 }
 0x34a   : > { %v4206_v28 = vadd.f32 %v4174_v9, %v7728_v56  ;;  %5746 = vmatmul.msk.bf16.gmra.mxu2 %vm1351_vm0, %v3955_v12  ;;  %5606 = vmatmul.msk.bf16.gmra.mxu0 %vm1351_vm0, %v5956_v14  ;;  %v7769_v12 = vpop.f32.mrf.mxu3  ;;  %v3936_v9 = vld [vmem:[%s7344_s23 + $0xc0] sm:$0xff]  ;;  %v7783_v44 = vpop.f32.mrf.mxu0 }
 0x34b   : > { %v7763_v46 = vadd.f32 %v7609_v60, %v3850_v55 }
 0x34c   : > { %v4238_v59 = vmax.f32 %v4206_v28, 0.0 }
 0x34d   : > { %v4064_v3 = vpop.f32.mrf.mxu2 }
 0x34e   : > { %4270 = vst [vmem:[%s7633_s27 + $0x28] sm:$0xff] %v4238_v59  ;;  %v4139_v39 = vmul.f32 %v7602_v41, %v4064_v3  ;;  %v3745_v18 = vpop.f32.mrf.mxu1  ;;  %v5969_v59 = vld [vmem:[%s8100_s2 + $0x460] sm:$0xff] }
 0x34f   : > { %v3815_v24 = vadd.f32 %v3745_v18, %v3509_v11 }
 0x350   : > { %v4175_v38 = vadd.f32 %v7614_v30, %v4139_v39  ;;  %v3956_v39 = vpack.c.bf16 %v3937_v43, %v3936_v9 }
 0x351   : > { %v3851_v52 = vmul.f32 %v7590_v21, %v3815_v24 }
 0x352   : > { %v4207_v4 = vadd.f32 %v4175_v38, %v7763_v46  ;;  %v3213_v38 = vadd.f32 %v7661_v1, %v7247_v13  ;;  %v7793_v34 = vpop.f32.mrf.mxu3 }
 0x353   : > { %v7773_v14 = vadd.f32 %v7609_v60, %v3851_v52 }
 0x354   : > { %v4239_v63 = vmax.f32 %v4207_v4, 0.0  ;;  %v3511_v9 = vadd.f32 %v7669_v29, %v3213_v38 }
 0x355   : > { %v4066_v28 = vpop.f32.mrf.mxu2  ;;  %v4301_v55 = vpack.c.bf16 %v7773_v14, %v7763_v46 }
 0x356   : > { %4271 = vst [vmem:[%s7633_s27 + $0x30] sm:$0xff] %v4239_v63  ;;  %v4140_v11 = vmul.f32 %v7602_v41, %v4066_v28  ;;  %v3748_v3 = vpop.f32.mrf.mxu1  ;;  %v7799_v28 = vpop.f32.mrf.mxu0 }
 0x357   : > { %v3816_v24 = vadd.f32 %v3748_v3, %v3510_v15  ;;  %v3214_v3 = vadd.f32 %v7685_v50, %v7270_v17 }
 0x358   : > { %v4176_v18 = vadd.f32 %v7614_v30, %v4140_v11 }
 0x359   : > { %5715 = vmatmul.msk.bf16.gmra.mxu1 %vm1351_vm0, %v5969_v59  ;;  %v3852_v4 = vmul.f32 %v7590_v21, %v3816_v24  ;;  %v3939_v24 = vld [vmem:[%s7344_s23 + $0xd8] sm:$0xff] }
 0x35a   : > { %v4208_v52 = vadd.f32 %v4176_v18, %v7773_v14  ;;  %5747 = vmatmul.msk.bf16.gmra.mxu2 %vm1351_vm0, %v3956_v39  ;;  %v3938_v18 = vld [vmem:[%s7344_s23 + $0xd0] sm:$0xff] }
 0x35b   : > { %v7802_v59 = vadd.f32 %v7609_v60, %v3852_v4 }
 0x35c   : > { %v4240_v22 = vmax.f32 %v4208_v52, 0.0 }
 0x35d   : > { %v4069_v43 = vpop.f32.mrf.mxu2 }
 0x35e   : > { %4272 = vst [vmem:[%s7633_s27 + $0x38] sm:$0xff] %v4240_v22  ;;  %v4141_v63 = vmul.f32 %v7602_v41, %v4069_v43  ;;  %v3750_v13 = vpop.f32.mrf.mxu1  ;;  %v5970_v22 = vld [vmem:[%s8100_s2 + $0x468] sm:$0xff]  ;;  %v7820_v43 = vpop.f32.mrf.mxu3 }
 0x35f   : > { %v3817_v1 = vadd.f32 %v3750_v13, %v3511_v9  ;;  %v3512_v9 = vadd.f32 %v7701_v45, %v3214_v3 }
 0x360   : > { %v4177_v15 = vadd.f32 %v7614_v30, %v4141_v63  ;;  %v3957_v63 = vpack.c.bf16 %v3939_v24, %v3938_v18 }
 0x361   : > { %v3853_v11 = vmul.f32 %v7590_v21, %v3817_v1 }
 0x362   : > { %v4209_v29 = vadd.f32 %v4177_v15, %v7802_v59  ;;  %v3215_v15 = vadd.f32 %v7713_v48, %v7289_v7 }
 0x363   : > { %v7810_v39 = vadd.f32 %v7609_v60, %v3853_v11  ;;  %v7828_v11 = vpop.f32.mrf.mxu0 }
 0x364   : > { %v4241_v38 = vmax.f32 %v4209_v29, 0.0  ;;  %v3513_v18 = vadd.f32 %v7724_v2, %v3215_v15 }
 0x365   : > { %v4071_v52 = vpop.f32.mrf.mxu2  ;;  %v4302_v4 = vpack.c.bf16 %v7810_v39, %v7802_v59 }
 0x366   : > { %4273 = vst [vmem:[%s7633_s27 + $0x40] sm:$0xff] %v4241_v38  ;;  %v4142_v17 = vmul.f32 %v7602_v41, %v4071_v52  ;;  %v3753_v50 = vpop.f32.mrf.mxu1  ;;  %v7836_v52 = vpop.f32.mrf.mxu3 }
 0x367   : > { %v3818_v1 = vadd.f32 %v3753_v50, %v3512_v9  ;;  %v3216_v50 = vadd.f32 %v7746_v23, %v7305_v31 }
 0x368   : > { %v4178_v13 = vadd.f32 %v7614_v30, %v4142_v17 }
 0x369   : > { %5716 = vmatmul.msk.bf16.gmra.mxu1 %vm1351_vm0, %v5970_v22  ;;  %v3854_v29 = vmul.f32 %v7590_v21, %v3818_v1  ;;  %v3941_v1 = vld [vmem:[%s7344_s23 + $0xe8] sm:$0xff]  ;;  %v3514_v31 = vadd.f32 %v7756_v54, %v3216_v50 }
 0x36a   : > { %v4210_v45 = vadd.f32 %v4178_v13, %v7810_v39  ;;  %5748 = vmatmul.msk.bf16.gmra.mxu2 %vm1351_vm0, %v3957_v63  ;;  %v3940_v13 = vld [vmem:[%s7344_s23 + $0xe0] sm:$0xff] }
 0x36b   : > { %v7839_v22 = vadd.f32 %v7609_v60, %v3854_v29  ;;  %v7851_v15 = vpop.f32.mrf.mxu0  ;;  %v5971_v29 = vld [vmem:[%s8100_s2 + $0x470] sm:$0xff] }
 0x36c   : > { %v4242_v3 = vmax.f32 %v4210_v45, 0.0 }
 0x36d   : > { %v4074_v24 = vpop.f32.mrf.mxu2 }
 0x36e   : > { %4274 = vst [vmem:[%s7633_s27 + $0x48] sm:$0xff] %v4242_v3  ;;  %v4143_v38 = vmul.f32 %v7602_v41, %v4074_v24  ;;  %v3755_v7 = vpop.f32.mrf.mxu1 }
 0x36f   : > { %v3819_v48 = vadd.f32 %v3755_v7, %v3513_v18 }
 0x370   : > { %v4179_v9 = vadd.f32 %v7614_v30, %v4143_v38  ;;  %v3958_v38 = vpack.c.bf16 %v3941_v1, %v3940_v13 }
 0x371   : > { %v3855_v17 = vmul.f32 %v7590_v21, %v3819_v48 }
 0x372   : > { %v4211_v2 = vadd.f32 %v4179_v9, %v7839_v22  ;;  %v3217_v9 = vadd.f32 %v7769_v12, %v7317_v0 }
 0x373   : > { %v7847_v63 = vadd.f32 %v7609_v60, %v3855_v17  ;;  %v7865_v17 = vpop.f32.mrf.mxu3 }
 0x374   : > { %v4243_v45 = vmax.f32 %v4211_v2, 0.0  ;;  %v3515_v13 = vadd.f32 %v7783_v44, %v3217_v9 }
 0x375   : > { %v4076_v3 = vpop.f32.mrf.mxu2  ;;  %v4303_v18 = vpack.c.bf16 %v7847_v63, %v7839_v22 }
 0x376   : > { %4275 = vst [vmem:[%s7633_s27 + $0x50] sm:$0xff] %v4243_v45  ;;  %v4144_v23 = vmul.f32 %v7602_v41, %v4076_v3  ;;  %v3758_v24 = vpop.f32.mrf.mxu1  ;;  %v3464_v45 = vpop.f32.mrf.mxu0 }
 0x377   : > { %v3820_v48 = vadd.f32 %v3758_v24, %v3514_v31  ;;  %v3218_v24 = vadd.f32 %v7793_v34, %v7334_v27 }
 0x378   : > { %v4180_v7 = vadd.f32 %v7614_v30, %v4144_v23 }
 0x379   : > { %5717 = vmatmul.msk.bf16.gmra.mxu1 %vm1351_vm0, %v5971_v29  ;;  %v3856_v50 = vmul.f32 %v7590_v21, %v3820_v48  ;;  %v3943_v48 = vld [vmem:[%s7344_s23 + $0xf8] sm:$0xff] }
 0x37a   : > { %v4212_v2 = vadd.f32 %v4180_v7, %v7847_v63  ;;  %5749 = vmatmul.msk.bf16.gmra.mxu2 %vm1351_vm0, %v3958_v38  ;;  %v3942_v7 = vld [vmem:[%s7344_s23 + $0xf0] sm:$0xff] }
 0x37b   : > { %v7874_v29 = vadd.f32 %v7609_v60, %v3856_v50  ;;  %v3169_v9 = vpop.f32.mrf.mxu3  ;;  %v5972_v50 = vld [vmem:[%s8100_s2 + $0x478] sm:$0xff] }
 0x37c   : > { %v4244_v54 = vmax.f32 %v4212_v2, 0.0 }
 0x37d   : > { %v4079_v1 = vpop.f32.mrf.mxu2 }
 0x37e   : > { %4276 = vst [vmem:[%s7633_s27 + $0x58] sm:$0xff] %v4244_v54  ;;  %v4145_v0 = vmul.f32 %v7602_v41, %v4079_v1  ;;  %v3760_v12 = vpop.f32.mrf.mxu1  ;;  %v3516_v1 = vadd.f32 %v7799_v28, %v3218_v24 }
 0x37f   : > { %v3821_v3 = vadd.f32 %v3760_v12, %v3515_v13  ;;  %v3467_v12 = vpop.f32.mrf.mxu0 }
 0x380   : > { %v4181_v31 = vadd.f32 %v7614_v30, %v4145_v0  ;;  %v3959_v0 = vpack.c.bf16 %v3943_v48, %v3942_v7 }
 0x381   : > { %v3857_v23 = vmul.f32 %v7590_v21, %v3821_v3 }
 0x382   : > { %v4213_v44 = vadd.f32 %v4181_v31, %v7874_v29 }
 0x383   : > { %v3893_v38 = vadd.f32 %v7609_v60, %v3857_v23  ;;  %v3219_v23 = vadd.f32 %v7820_v43, %v7355_v61 }
 0x384   : > { %v4245_v2 = vmax.f32 %v4213_v44, 0.0 }
 0x385   : > { %v4081_v54 = vpop.f32.mrf.mxu2  ;;  %v4304_v13 = vpack.c.bf16 %v3893_v38, %v7874_v29  ;;  %v3517_v24 = vadd.f32 %v7828_v11, %v3219_v23 }
 0x386   : > { %4277 = vst [vmem:[%s7633_s27 + $0x60] sm:$0xff] %v4245_v2  ;;  %v4146_v27 = vmul.f32 %v7602_v41, %v4081_v54  ;;  %v3763_v34 = vpop.f32.mrf.mxu1  ;;  %v3171_v54 = vpop.f32.mrf.mxu3 }
 0x387   : > { %v3822_v31 = vadd.f32 %v3763_v34, %v3516_v1 }
 0x388   : > { %v4182_v3 = vadd.f32 %v7614_v30, %v4146_v27  ;;  %v3469_v27 = vpop.f32.mrf.mxu0 }
 0x389   : > { %5718 = vmatmul.msk.bf16.gmra.mxu1 %vm1351_vm0, %v5972_v50  ;;  %v3858_v28 = vmul.f32 %v7590_v21, %v3822_v31  ;;  %v3220_v50 = vadd.f32 %v7836_v52, %v7368_v20  ;;  %v3221_v20 = vadd.f32 %v7865_v17, %v7382_v8  ;;  %v3222_v17 = vadd.f32 %v3169_v9, %v7395_v35 }
 0x38a   : > { %v4214_v44 = vadd.f32 %v4182_v3, %v3893_v38  ;;  %5750 = vmatmul.msk.bf16.gmra.mxu2 %vm1351_vm0, %v3959_v0 }
 0x38b   : > { %v3894_v61 = vadd.f32 %v7609_v60, %v3858_v28  ;;  %v3518_v23 = vadd.f32 %v7851_v15, %v3220_v50 }
 0x38c   : > { %v4246_v29 = vmax.f32 %v4214_v44, 0.0 }
 0x38d   : > { %v4084_v2 = vpop.f32.mrf.mxu2 }
 0x38e   : > { %4278 = vst [vmem:[%s7633_s27 + $0x68] sm:$0xff] %v4246_v29  ;;  %v4147_v7 = vmul.f32 %v7602_v41, %v4084_v2  ;;  %v3765_v48 = vpop.f32.mrf.mxu1  ;;  %v3174_v28 = vpop.f32.mrf.mxu3 }
 0x38f   : > { %v3823_v1 = vadd.f32 %v3765_v48, %v3517_v24 }
 0x390   : > { %v4183_v43 = vadd.f32 %v7614_v30, %v4147_v7  ;;  %v3472_v7 = vpop.f32.mrf.mxu0 }
 0x391   : > { %v3859_v38 = vmul.f32 %v7590_v21, %v3823_v1 }
 0x392   : > { %v4215_v34 = vadd.f32 %v4183_v43, %v3894_v61 }
 0x393   : > { %v3895_v11 = vadd.f32 %v7609_v60, %v3859_v38 }
 0x394   : > { %v4247_v0 = vmax.f32 %v4215_v34, 0.0 }
 0x395   : > { %v4305_v3 = vpack.c.bf16 %v3895_v11, %v3894_v61  ;;  %v4086_v31 = vpop.f32.mrf.mxu2  ;;  %v3519_v61 = vadd.f32 %v3464_v45, %v3221_v20  ;;  %v3223_v20 = vadd.f32 %v3171_v54, %v7409_v62 }
 0x396   : > { %4279 = vst [vmem:[%s7633_s27 + $0x70] sm:$0xff] %v4247_v0  ;;  %v4148_v44 = vmul.f32 %v7602_v41, %v4086_v31  ;;  %v3768_v29 = vpop.f32.mrf.mxu1 }
 0x397   : > { %4314 = vmatpush.bf16.xpose.msra.mxu3 %v4305_v3  ;;  %v3824_v2 = vadd.f32 %v3768_v29, %v3518_v23 }
 0x398   : > { %v4184_v24 = vadd.f32 %v7614_v30, %v4148_v44  ;;  %v3520_v44 = vadd.f32 %v3467_v12, %v3222_v17  ;;  %v3474_v29 = vpop.f32.mrf.mxu0 }
 0x399   : > { %v3860_v1 = vmul.f32 %v7590_v21, %v3824_v2 }
 0x39a   : > { %v4216_v52 = vadd.f32 %v4184_v24, %v3895_v11  ;;  %v3176_v11 = vpop.f32.mrf.mxu3 }
 0x39b   : > { %v7916_v34 = vadd.f32 %v7609_v60, %v3860_v1 }
 0x39c   : > { %v4248_v48 = vmax.f32 %v4216_v52, 0.0 }
 0x39d   : > { %v4089_v43 = vpop.f32.mrf.mxu2 }
 0x39e   : > { %4280 = vst [vmem:[%s7633_s27 + $0x78] sm:$0xff] %v4248_v48  ;;  %v4149_v15 = vmul.f32 %v7602_v41, %v4089_v43  ;;  %v3770_v38 = vpop.f32.mrf.mxu1 }
 0x39f   : > { %v3825_v50 = vadd.f32 %v3770_v38, %v3519_v61  ;;  %4315 = vmatpush.bf16.xpose.msra.mxu3 %v4304_v13  ;;  %v3521_v61 = vadd.f32 %v3469_v27, %v3223_v20  ;;  %v3224_v27 = vadd.f32 %v3174_v28, %v7422_v51 }
 0x3a0   : > { %v4185_v0 = vadd.f32 %v7614_v30, %v4149_v15  ;;  %v3477_v63 = vpop.f32.mrf.mxu0 }
 0x3a1   : > { %v3861_v8 = vmul.f32 %v7590_v21, %v3825_v50  ;;  %v3522_v39 = vadd.f32 %v3472_v7, %v3224_v27 }
 0x3a2   : > { %v4217_v45 = vadd.f32 %v4185_v0, %v7916_v34  ;;  %v3179_v48 = vpop.f32.mrf.mxu3 }
 0x3a3   : > { %v7923_v3 = vadd.f32 %v7609_v60, %v3861_v8 }
 0x3a4   : > { %v4249_v31 = vmax.f32 %v4217_v45, 0.0 }
 0x3a5   : > { %v4091_v23 = vpop.f32.mrf.mxu2  ;;  %v4306_v13 = vpack.c.bf16 %v7923_v3, %v7916_v34 }
 0x3a6   : > { %4281 = vst [vmem:[%s7633_s27 + $0x80] sm:$0xff] %v4249_v31  ;;  %v4150_v24 = vmul.f32 %v7602_v41, %v4091_v23  ;;  %v3773_v2 = vpop.f32.mrf.mxu1  ;;  %v3225_v23 = vadd.f32 %v3176_v11, %v7436_v5 }
 0x3a7   : > { %4316 = vmatpush.bf16.xpose.msra.mxu3 %v4303_v18  ;;  %v3826_v9 = vadd.f32 %v3773_v2, %v3520_v44 }
 0x3a8   : > { %v4186_v35 = vadd.f32 %v7614_v30, %v4150_v24  ;;  %v3479_v44 = vpop.f32.mrf.mxu0 }
 0x3a9   : > { %v3862_v12 = vmul.f32 %v7590_v21, %v3826_v9 }
 0x3aa   : > { %v4218_v52 = vadd.f32 %v4186_v35, %v7923_v3  ;;  %v3523_v35 = vadd.f32 %v3474_v29, %v3225_v23  ;;  %v3226_v29 = vadd.f32 %v3179_v48, %v7449_v6 }
 0x3ab   : > { %v7942_v62 = vadd.f32 %v7609_v60, %v3862_v12 }
 0x3ac   : > { %v4250_v1 = vmax.f32 %v4218_v52, 0.0  ;;  %v3524_v56 = vadd.f32 %v3477_v63, %v3226_v29 }
 0x3ad   : > { %v4094_v43 = vpop.f32.mrf.mxu2 }
 0x3ae   : > { %4282 = vst [vmem:[%s7633_s27 + $0x88] sm:$0xff] %v4250_v1  ;;  %v4151_v15 = vmul.f32 %v7602_v41, %v4094_v43  ;;  %v3775_v38 = vpop.f32.mrf.mxu1 }
 0x3af   : > { %v3827_v22 = vadd.f32 %v3775_v38, %v3521_v61  ;;  %4317 = vmatpush.bf16.xpose.msra.mxu3 %v4302_v4  ;;  %v3181_v4 = vpop.f32.mrf.mxu3 }
 0x3b0   : > { %v4187_v18 = vadd.f32 %v7614_v30, %v4151_v15  ;;  %v3482_v61 = vpop.f32.mrf.mxu0 }
 0x3b1   : > { %v3863_v54 = vmul.f32 %v7590_v21, %v3827_v22  ;;  %v3227_v22 = vadd.f32 %v3181_v4, %v7463_v58 }
 0x3b2   : > { %v4219_v50 = vadd.f32 %v4187_v18, %v7942_v62 }
 0x3b3   : > { %v7949_v0 = vadd.f32 %v7609_v60, %v3863_v54  ;;  %v3525_v63 = vadd.f32 %v3479_v44, %v3227_v22 }
 0x3b4   : > { %v4251_v8 = vmax.f32 %v4219_v50, 0.0 }
 0x3b5   : > { %v4096_v17 = vpop.f32.mrf.mxu2  ;;  %v4307_v59 = vpack.c.bf16 %v7949_v0, %v7942_v62 }
 0x3b6   : > { %4283 = vst [vmem:[%s7633_s27 + $0x90] sm:$0xff] %v4251_v8  ;;  %v4152_v45 = vmul.f32 %v7602_v41, %v4096_v17  ;;  %v3778_v31 = vpop.f32.mrf.mxu1 }
 0x3b7   : > { %4318 = vmatpush.bf16.xpose.msra.mxu3 %v4301_v55  ;;  %v3828_v28 = vadd.f32 %v3778_v31, %v3522_v39  ;;  %v3184_v14 = vpop.f32.mrf.mxu3 }
 0x3b8   : > { %v4188_v51 = vadd.f32 %v7614_v30, %v4152_v45  ;;  %v3484_v17 = vpop.f32.mrf.mxu0  ;;  %v3228_v31 = vadd.f32 %v3184_v14, %v7479_v49 }
 0x3b9   : > { %v3864_v7 = vmul.f32 %v7590_v21, %v3828_v28 }
 0x3ba   : > { %v4220_v24 = vadd.f32 %v4188_v51, %v7949_v0 }
 0x3bb   : > { %v7968_v5 = vadd.f32 %v7609_v60, %v3864_v7 }
 0x3bc   : > { %v4252_v2 = vmax.f32 %v4220_v24, 0.0 }
 0x3bd   : > { %v4099_v9 = vpop.f32.mrf.mxu2 }
 0x3be   : > { %4284 = vst [vmem:[%s7633_s27 + $0x98] sm:$0xff] %v4252_v2  ;;  %v4153_v20 = vmul.f32 %v7602_v41, %v4099_v9  ;;  %v3780_v52 = vpop.f32.mrf.mxu1 }
 0x3bf   : > { %v3829_v46 = vadd.f32 %v3780_v52, %v3523_v35  ;;  %4319 = vmatpush.bf16.xpose.msra.mxu3 %v4300_v32  ;;  %v3186_v18 = vpop.f32.mrf.mxu3 }
 0x3c0   : > { %v4189_v55 = vadd.f32 %v7614_v30, %v4153_v20  ;;  %v3487_v35 = vpop.f32.mrf.mxu0  ;;  %v3229_v20 = vadd.f32 %v3186_v18, %v7494_v47 }
 0x3c1   : > { %v3865_v11 = vmul.f32 %v7590_v21, %v3829_v46 }
 0x3c2   : > { %v4221_v1 = vadd.f32 %v4189_v55, %v7968_v5  ;;  %v3527_v55 = vadd.f32 %v3484_v17, %v3229_v20 }
 0x3c3   : > { %v7975_v12 = vadd.f32 %v7609_v60, %v3865_v11 }
 0x3c4   : > { %v4253_v43 = vmax.f32 %v4221_v1, 0.0 }
 0x3c5   : > { %v4101_v15 = vpop.f32.mrf.mxu2  ;;  %v4308_v42 = vpack.c.bf16 %v7975_v12, %v7968_v5 }
 0x3c6   : > { %4285 = vst [vmem:[%s7633_s27 + $0xa0] sm:$0xff] %v4253_v43  ;;  %v4154_v32 = vmul.f32 %v7602_v41, %v4101_v15  ;;  %v3783_v38 = vpop.f32.mrf.mxu1 }
 0x3c7   : > { %4320 = vmatpush.bf16.xpose.msra.mxu3 %v4299_v53  ;;  %v3830_v48 = vadd.f32 %v3783_v38, %v3524_v56  ;;  %v8110_v53 = vpack.c.bf16 %v7636_v37, %v7619_v57  ;;  %v3189_v23 = vpop.f32.mrf.mxu3  ;;  %v3526_v37 = vadd.f32 %v3482_v61, %v3228_v31 }
 0x3c8   : > { %v4190_v6 = vadd.f32 %v7614_v30, %v4154_v32  ;;  %v3230_v32 = vadd.f32 %v3189_v23, %v7508_v25  ;;  %v3489_v38 = vpop.f32.mrf.mxu0 }
 0x3c9   : > { %v3866_v50 = vmul.f32 %v7590_v21, %v3830_v48 }
 0x3ca   : > { %v4222_v54 = vadd.f32 %v4190_v6, %v7975_v12 }
 0x3cb   : > { %v7994_v58 = vadd.f32 %v7609_v60, %v3866_v50 }
 0x3cc   : > { %v4254_v27 = vmax.f32 %v4222_v54, 0.0 }
 0x3cd   : > { %v4104_v8 = vpop.f32.mrf.mxu2 }
 0x3ce   : > { %4286 = vst [vmem:[%s7633_s27 + $0xa8] sm:$0xff] %v4254_v27  ;;  %v4155_v39 = vmul.f32 %v7602_v41, %v4104_v8  ;;  %v3785_v19 = vpop.f32.mrf.mxu1  ;;  %v3528_v27 = vadd.f32 %v3487_v35, %v3230_v32 }
 0x3cf   : > { %v3831_v40 = vadd.f32 %v3785_v19, %v3525_v63  ;;  %4321 = vmatpush.bf16.xpose.msra.mxu3 %v8110_v53  ;;  %v3191_v29 = vpop.f32.mrf.mxu3 }
 0x3d0   : > { %v4191_v4 = vadd.f32 %v7614_v30, %v4155_v39  ;;  %v3231_v39 = vadd.f32 %v3191_v29, %v7523_v10 }
 0x3d1   : > { %v3867_v45 = vmul.f32 %v7590_v21, %v3831_v40  ;;  %v3492_v40 = vpop.f32.mrf.mxu0 }
 0x3d2   : > { %v4223_v51 = vadd.f32 %v4191_v4, %v7994_v58 }
 0x3d3   : > { %v8001_v28 = vadd.f32 %v7609_v60, %v3867_v45  ;;  %v3529_v45 = vadd.f32 %v3489_v38, %v3231_v39 }
 0x3d4   : > { %v4255_v44 = vmax.f32 %v4223_v51, 0.0 }
 0x3d5   : > { %v4106_v24 = vpop.f32.mrf.mxu2  ;;  %v4309_v57 = vpack.c.bf16 %v8001_v28, %v7994_v58 }
 0x3d6   : > { %4287 = vst [vmem:[%s7633_s27 + $0xb0] sm:$0xff] %v4255_v44  ;;  %v4156_v2 = vmul.f32 %v7602_v41, %v4106_v24  ;;  %v3788_v7 = vpop.f32.mrf.mxu1 }
 0x3d7   : > { %v3832_v9 = vadd.f32 %v3788_v7, %v3526_v37  ;;  %v3194_v8 = vpop.f32.mrf.mxu3 }
 0x3d8   : > { %v4192_v49 = vadd.f32 %v7614_v30, %v4156_v2  ;;  %v3232_v2 = vadd.f32 %v3194_v8, %v7537_v26 }
 0x3d9   : > { %v3868_v14 = vmul.f32 %v7590_v21, %v3832_v9 }
 0x3da   : > { %v4224_v52 = vadd.f32 %v4192_v49, %v8001_v28 }
 0x3db   : > { %v8014_v15 = vadd.f32 %v7609_v60, %v3868_v14  ;;  %v3494_v14 = vpop.f32.mrf.mxu0 }
 0x3dc   : > { %v4256_v46 = vmax.f32 %v4224_v52, 0.0 }
 0x3dd   : > { %v4109_v11 = vpop.f32.mrf.mxu2 }
 0x3de   : > { %4288 = vst [vmem:[%s7633_s27 + $0xb8] sm:$0xff] %v4256_v46  ;;  %v4157_v1 = vmul.f32 %v7602_v41, %v4109_v11  ;;  %v3790_v61 = vpop.f32.mrf.mxu1  ;;  %v3530_v46 = vadd.f32 %v3492_v40, %v3232_v2 }
 0x3df   : > { %v3833_v43 = vadd.f32 %v3790_v61, %v3527_v55  ;;  %v3196_v7 = vpop.f32.mrf.mxu3 }
 0x3e0   : > { %v4193_v56 = vadd.f32 %v7614_v30, %v4157_v1  ;;  %v3233_v1 = vadd.f32 %v3196_v7, %v7550_v16 }
 0x3e1   : > { %v3869_v47 = vmul.f32 %v7590_v21, %v3833_v43 }
 0x3e2   : > { %v4225_v6 = vadd.f32 %v4193_v56, %v8014_v15  ;;  %v3531_v32 = vadd.f32 %v3494_v14, %v3233_v1 }
 0x3e3   : > { %v8021_v48 = vadd.f32 %v7609_v60, %v3869_v47 }
 0x3e4   : > { %v4257_v22 = vmax.f32 %v4225_v6, 0.0 }
 0x3e5   : > { %v4111_v18 = vpop.f32.mrf.mxu2  ;;  %v4310_v54 = vpack.c.bf16 %v8021_v48, %v8014_v15 }
 0x3e6   : > { %4289 = vst [vmem:[%s7633_s27 + $0xc0] sm:$0xff] %v4257_v22  ;;  %v4158_v50 = vmul.f32 %v7602_v41, %v4111_v18  ;;  %v3793_v63 = vpop.f32.mrf.mxu1 }
 0x3e7   : > { %v3834_v17 = vadd.f32 %v3793_v63, %v3528_v27  ;;  %v3199_v43 = vpop.f32.mrf.mxu3  ;;  %v3497_v27 = vpop.f32.mrf.mxu0 }
 0x3e8   : > { %v4194_v25 = vadd.f32 %v7614_v30, %v4158_v50  ;;  %v3234_v8 = vadd.f32 %v3199_v43, %v7564_v36 }
 0x3e9   : > { %v3870_v4 = vmul.f32 %v7590_v21, %v3834_v17 }
 0x3ea   : > { %v4226_v19 = vadd.f32 %v4194_v25, %v8021_v48 }
 0x3eb   : > { %v8034_v24 = vadd.f32 %v7609_v60, %v3870_v4 }
 0x3ec   : > { %v4258_v53 = vmax.f32 %v4226_v19, 0.0 }
 0x3ed   : > { %v4114_v31 = vpop.f32.mrf.mxu2 }
 0x3ee   : > { %4290 = vst [vmem:[%s7633_s27 + $0xc8] sm:$0xff] %v4258_v53  ;;  %v4159_v51 = vmul.f32 %v7602_v41, %v4114_v31  ;;  %v3795_v23 = vpop.f32.mrf.mxu1  ;;  %v3532_v53 = vadd.f32 %v3497_v27, %v3234_v8 }
 0x3ef   : > { %v3835_v44 = vadd.f32 %v3795_v23, %v3529_v45  ;;  %v3201_v4 = vpop.f32.mrf.mxu3 }
 0x3f0   : > { %v4195_v37 = vadd.f32 %v7614_v30, %v4159_v51 }
 0x3f1   : > { %v3871_v10 = vmul.f32 %v7590_v21, %v3835_v44  ;;  %v3235_v44 = vadd.f32 %v3201_v4, %v7580_v33 }
 0x3f2   : > { %v4227_v35 = vadd.f32 %v4195_v37, %v8034_v24 }
 0x3f3   : > { %v8041_v49 = vadd.f32 %v7609_v60, %v3871_v10 }
 0x3f4   : > { %v4259_v9 = vmax.f32 %v4227_v35, 0.0 }
 0x3f5   : > { %v4116_v20 = vpop.f32.mrf.mxu2  ;;  %v4311_v52 = vpack.c.bf16 %v8041_v49, %v8034_v24  ;;  %v3499_v24 = vpop.f32.mrf.mxu0 }
 0x3f6   : > { %4291 = vst [vmem:[%s7633_s27 + $0xd0] sm:$0xff] %v4259_v9  ;;  %v4160_v55 = vmul.f32 %v7602_v41, %v4116_v20  ;;  %v3798_v11 = vpop.f32.mrf.mxu1  ;;  %v3533_v2 = vadd.f32 %v3499_v24, %v3235_v44 }
 0x3f7   : > { %v3836_v29 = vadd.f32 %v3798_v11, %v3530_v46 }
 0x3f8   : > { %v4196_v26 = vadd.f32 %v7614_v30, %v4160_v55 }
 0x3f9   : > { %v3872_v47 = vmul.f32 %v7590_v21, %v3836_v29 }
 0x3fa   : > { %v4228_v61 = vadd.f32 %v4196_v26, %v8041_v49 }
 0x3fb   : > { %v3908_v50 = vadd.f32 %v7609_v60, %v3872_v47 }
 0x3fc   : > { %v4260_v56 = vmax.f32 %v4228_v61, 0.0 }
 0x3fd   : > { %v4119_v38 = vpop.f32.mrf.mxu2 }
 0x3fe   : > { %4292 = vst [vmem:[%s7633_s27 + $0xd8] sm:$0xff] %v4260_v56  ;;  %v4161_v6 = vmul.f32 %v7602_v41, %v4119_v38  ;;  %v3800_v22 = vpop.f32.mrf.mxu1 }
 0x3ff   : > { %v3837_v18 = vadd.f32 %v3800_v22, %v3531_v32 }
 0x400   : > { %v4197_v63 = vadd.f32 %v7614_v30, %v4161_v6 }
 0x401   : > { %v3873_v16 = vmul.f32 %v7590_v21, %v3837_v18 }
 0x402   : > { %v4229_v25 = vadd.f32 %v4197_v63, %v3908_v50 }
 0x403   : > { %v3909_v17 = vadd.f32 %v7609_v60, %v3873_v16 }
 0x404   : > { %v4261_v39 = vmax.f32 %v4229_v25, 0.0 }
 0x405   : > { %v4121_v19 = vpop.f32.mrf.mxu2  ;;  %v4312_v40 = vpack.c.bf16 %v3909_v17, %v3908_v50 }
 0x406   : > { %4293 = vst [vmem:[%s7633_s27 + $0xe0] sm:$0xff] %v4261_v39  ;;  %v4162_v45 = vmul.f32 %v7602_v41, %v4121_v19  ;;  %v3803_v31 = vpop.f32.mrf.mxu1 }
 0x407   : > { %v3838_v23 = vadd.f32 %v3803_v31, %v3532_v53 }
 0x408   : > { %v4198_v51 = vadd.f32 %v7614_v30, %v4162_v45 }
 0x409   : > { %v3874_v10 = vmul.f32 %v7590_v21, %v3838_v23 }
 0x40a   : > { %v4230_v36 = vadd.f32 %v4198_v51, %v3909_v17 }
 0x40b   : > { %v3910_v20 = vadd.f32 %v7609_v60, %v3874_v10 }
 0x40c   : > { %v4262_v37 = vmax.f32 %v4230_v36, 0.0 }
 0x40d   : > { %v4124_v7 = vpop.f32.mrf.mxu2 }
 0x40e   : > { %4294 = vst [vmem:[%s7633_s27 + $0xe8] sm:$0xff] %v4262_v37  ;;  %v4163_v35 = vmul.f32 %v7602_v41, %v4124_v7  ;;  %v3805_v49 = vpop.f32.mrf.mxu1 }
 0x40f   : > { %v3839_v9 = vadd.f32 %v3805_v49, %v3533_v2 }
 0x410   : > { %v4199_v46 = vadd.f32 %v7614_v30, %v4163_v35 }
 0x411   : > { %v3875_v33 = vmul.f32 %v7590_v21, %v3839_v9  ;;  %v4297_v21 = vld [vmem:[%s8107_s9] sm:$0x7] }
 0x412   : > { %v4231_v14 = vadd.f32 %v4199_v46, %v3910_v20  ;;  %4322 = vmatmul.bf16.vlgmr.msra.gmra.mxu3 %v4297_v21 }
 0x413   : > { %v3911_v55 = vadd.f32 %v7609_v60, %v3875_v33 }
 0x414   : > { %v4263_v11 = vmax.f32 %v4231_v14, 0.0 }
 0x415   : > { %v4313_v26 = vpack.c.bf16 %v3911_v55, %v3910_v20  ;;  %v4126_v29 = vpop.f32.mrf.mxu2 }
 0x416   : > { %4295 = vst [vmem:[%s7633_s27 + $0xf0] sm:$0xff] %v4263_v11  ;;  %v4164_v1 = vmul.f32 %v7602_v41, %v4126_v29 }
 0x417   : > { %4327 = vmatpush.bf16.xpose.msra.mxu0 %v4313_v26 }
 0x418   : > { %v4200_v61 = vadd.f32 %v7614_v30, %v4164_v1 }
 0x41a   : > { %v4232_v43 = vadd.f32 %v4200_v61, %v3911_v55 }
 0x41c   : > { %v4264_v56 = vmax.f32 %v4232_v43, 0.0 }
 0x41e   : > { %4296 = vst [vmem:[%s7633_s27 + $0xf8] sm:$0xff] %v4264_v56  ;;  %s5756_s27 = sshll.u32 %s8112_s18, 4 }
 0x41f   : > { %4328 = vmatpush.bf16.xpose.msra.mxu0 %v4312_v40  ;;  %s419_s12 = scalar_lea.vmem %s8109_s11, %s5756_s27 }
 0x427   : > { %4329 = vmatpush.bf16.xpose.msra.mxu0 %v4311_v52 }
 0x42f   : > { %4330 = vmatpush.bf16.xpose.msra.mxu0 %v4310_v54 }
 0x437   : > { %4331 = vmatpush.bf16.xpose.msra.mxu0 %v4309_v57 }
 0x43f   : > { %4332 = vmatpush.bf16.xpose.msra.mxu0 %v4308_v42 }
 0x447   : > { %4333 = vmatpush.bf16.xpose.msra.mxu0 %v4307_v59 }
 0x44f   : > { %4334 = vmatpush.bf16.xpose.msra.mxu0 %v4306_v13 }
 0x456   : > { %4335 = vmatmul.bf16.vlgmr.msra.gmra.mxu0 %v4297_v21 }
 0x495   : > { %v4323_v41 = vpop.f32.mrf.mxu3 }
 0x496   : > { %4340 = vst [vmem:[%s419_s12] sm:$0x1f] %v4323_v41 }
 0x49d   : > { %v4325_v60 = vpop.f32.mrf.mxu3 }
 0x4d3   : > { %v4336_v30 = vpop.f32.mrf.mxu0 }
 0x4d4   : > { %4341 = vst [vmem:[%s419_s12 + $0x8] sm:$0x1f] %v4336_v30 }
 0x4db   : > { %v4338_v5 = vpop.f32.mrf.mxu0 }
 0x4dc PF: > { %s22_s17 = sadd.s32 1, %s6011_s17  }
 0x4dd   : > { %p19_p4 = scmp.ge.s32.totalorder %s22_s17, 4  }
 0x4df   :  { %21 = sbr.rel (!%p19_p4) target bundleno = 1 (0x1), region = 113 }

// kernel: ic_head_block.5
= control target key start
LH: loop header
LB: loop body
LE: loop exit
PB: predicated region body
PF: predicated region fallthrough
CT: control target
= control target key end

     0   :  { %s5605_s0 = inlined_call_operand.vmem [shape: f32[2,16,2048], index: 0, kind: input, shape index: {}]   ;;  %s5606_s1 = inlined_call_operand.vmem [shape: bf16[2048,80], index: 1, kind: input, shape index: {}]   ;;  %s5607_s2 = inlined_call_operand.vmem [shape: bf16[32,16], index: 2, kind: input, shape index: {}]   ;;  %s5608_s3 = inlined_call_operand.vmem [shape: bf16[80,160], index: 3, kind: input, shape index: {}]   ;;  %s5609_s4 = inlined_call_operand.vmem [shape: bf16[128,32], index: 4, kind: input, shape index: {}]   ;;  %s5610_s5 = inlined_call_operand.vmem [shape: bf16[160,640], index: 5, kind: input, shape index: {}]   ;;  %s5611_s6 = inlined_call_operand.hbm [shape: f32[2,5,32,32], index: 6, kind: output, shape index: {0}]   ;;  %s5612_s7 = inlined_call_operand.hbm [shape: f32[2,5,128,128], index: 7, kind: output, shape index: {1}]  }
   0x1   :  { %5613 = sst [smem:[#allocation8_spill]] %s5605_s0 }
   0x2   :  { %13 = vsyncpa [#allocation3], 0 }
   0x3   :  { %15 = vsyncpa [#allocation3 + $0x1], 0 }
   0x4   :  { %16 = vsyncpa [#allocation5], 0 }
   0x5   :  { %18 = vsyncpa [#allocation5 + $0x1], 0  ;;  %s4384_s24 = smov 0   ;;  %s4386_s25 = smov 0  }
   0x6   :  { %s4388_s26 = smov 0   ;;  %s4390_s27 = smov 0  }
   0x7 LB: > { %s4405_s28 = sadd.s32 4294967295, %s4337_s27   ;;  %s3047_s29 = sadd.s32 4294967294, %s4337_s27   ;;  %s4337_s27 = sphi %s4390_s27, %s5620_s27   ;;  %s4333_s26 = sphi %s4388_s26, %s5619_s26   ;;  %s4329_s25 = sphi %s4386_s25, %s5618_s25   ;;  %s4325_s24 = sphi %s4384_s24, %s5617_s24  }
   0x8   : > { %s4409_s30 = sadd.s32 1, %s4337_s27   ;;  %s162_s8 = sadd.s32 1, %s4333_s26 }
   0x9   : > { %s159_s9 = ssub.s32 %s4337_s27, %s4409_s30  ;;  %p172_p0 = scmp.ne.s32.totalorder %s4333_s26, %s4329_s25 }
   0xa   : > { %p160_p1 = scmp.eq.s32.totalorder %s159_s9, 0  ;;  %p173_p2 = scmp.eq.s32.totalorder %s4405_s28, 1 }
   0xb   : > { %p178_p3 = scmp.ne.s32.totalorder %s4329_s25, %s4325_s24  ;;  %p179_p4 = scmp.eq.s32.totalorder %s3047_s29, 1 }
   0xc   : > { %s4420_s10 = scalar_select %p160_p1, %s4333_s26, %s162_s8  }
   0xd   : > { %p4422_p5 = por %p173_p2, %p172_p0  ;;  %p4426_p6 = por %p179_p4, %p178_p3 }
   0xe   : > { %p3050_p7 = scmp.ge.s32.totalorder %s4337_s27, 1  ;;  %p246_p8 = scmp.lt.s32.totalorder %s4337_s27, 3 }
  0x10   : > { %p247_p9 = pnand %p3050_p7, %p246_p8 }
  0x11   : > { %p283_p10 = scmp.lt.s32.totalorder (!%p247_p9), %s4405_s28, 1  ;;  %s5616_s0 = sld [smem:[#allocation8_spill]] (!%p247_p9) }
  0x12   : > { %250 = sbr.rel (%p247_p9) target bundleno = 1280 (0x500), region = 44  ;;  %s4922_s8 = sand.u32 (!%p247_p9), 1, %s4329_s25  }
  0x13   : > { %s4339_s14 = smov (!%p247_p9), 64   ;;  %s4340_s15 = smov (!%p247_p9), 96  }
  0x14   : > { %s4341_s17 = smov (!%p247_p9), 32   ;;  %s4191_s18 = smul.u32 (!%p247_p9), 640, %s4922_s8 }
  0x15   : > { %s4192_s22 = smul.u32 (!%p247_p9), 160, %s4405_s28 }
  0x16   : > { %s5354_s23 = scalar_lea.vmem (!%p247_p9), [#allocation4], %s4191_s18 }
  0x17   : > { %v4007_v0 = vld [vmem:[%s5606_s1 + $0x78] sm:$0xff]  ;;  %v4006_v3 = vld [vmem:[%s5606_s1 + $0x70] sm:$0xff]  ;;  %v4005_v6 = vld [vmem:[%s5606_s1 + $0x68] sm:$0xff]  ;;  %s284_s21 = scalar_select %p283_p10, %s4405_s28, 1  ;;  %vm1600_vm0 = vcmask 130048   ;;  %vm1688_vm1 = vcmask 654336  }
  0x18   : > { %v4015_v1 = vld [vmem:[%s5606_s1 + $0xb8] sm:$0xff]  ;;  %1375 = vmatpush.bf16.msra.mxu3 %v4007_v0  ;;  %v4014_v4 = vld [vmem:[%s5606_s1 + $0xb0] sm:$0xff]  ;;  %v4013_v7 = vld [vmem:[%s5606_s1 + $0xa8] sm:$0xff]  ;;  %vm1793_vm2 = vcmask 261120  }
  0x19   : > { %v3999_v2 = vld [vmem:[%s5606_s1 + $0x38] sm:$0xff]  ;;  %1389 = vmatpush.bf16.msra.mxu2 %v4015_v1  ;;  %v3998_v5 = vld [vmem:[%s5606_s1 + $0x30] sm:$0xff]  ;;  %v3997_v8 = vld [vmem:[%s5606_s1 + $0x28] sm:$0xff]  ;;  %s3991_s16 = sshll.u32 %s284_s21, 8  ;;  %s4190_s21 = smul.u32 160, %s4922_s8 }
  0x1a   : > { %1361 = vmatpush.bf16.msra.mxu0 %v3999_v2  ;;  %v4039_v9 = vld [vmem:[%s5606_s1 + $0x178] sm:$0xff]  ;;  %v4004_v10 = vld [vmem:[%s5606_s1 + $0x60] sm:$0xff]  ;;  %v4038_v13 = vld [vmem:[%s5606_s1 + $0x170] sm:$0xff]  ;;  %s4512_s9 = scalar_lea.vmem %s5616_s0, %s3991_s16  ;;  %s4263_s0 = scalar_lea.hbm %s5611_s6, 320 }
  0x1b   : > { %v4012_v11 = vld [vmem:[%s5606_s1 + $0xa0] sm:$0xff]  ;;  %1431 = vmatpush.bf16.msra.mxu1 %v4039_v9  ;;  %v4003_v14 = vld [vmem:[%s5606_s1 + $0x58] sm:$0xff]  ;;  %v4037_v17 = vld [vmem:[%s5606_s1 + $0x168] sm:$0xff]  ;;  %s4925_s13 = scalar_lea.vmem [#allocation2], %s4190_s21  ;;  %s2931_s21 = scalar_lea.hbm %s5611_s6, %s4192_s22 }
  0x1c   : > { %1376 = vmatpush.bf16.msra.mxu3 %v4006_v3  ;;  %v3996_v12 = vld [vmem:[%s5606_s1 + $0x20] sm:$0xff]  ;;  %v4011_v15 = vld [vmem:[%s5606_s1 + $0x98] sm:$0xff]  ;;  %v4002_v18 = vld [vmem:[%s5606_s1 + $0x50] sm:$0xff] }
  0x1d   : > { %1390 = vmatpush.bf16.msra.mxu2 %v4014_v4  ;;  %v3995_v16 = vld [vmem:[%s5606_s1 + $0x18] sm:$0xff]  ;;  %v4010_v19 = vld [vmem:[%s5606_s1 + $0x90] sm:$0xff]  ;;  %v4036_v21 = vld [vmem:[%s5606_s1 + $0x160] sm:$0xff] }
  0x1e   : > { %1362 = vmatpush.bf16.msra.mxu0 %v3998_v5  ;;  %v3994_v20 = vld [vmem:[%s5606_s1 + $0x10] sm:$0xff]  ;;  %v4001_v22 = vld [vmem:[%s5606_s1 + $0x48] sm:$0xff]  ;;  %v4035_v25 = vld [vmem:[%s5606_s1 + $0x158] sm:$0xff] }
  0x1f   : > { %1432 = vmatpush.bf16.msra.mxu1 %v4038_v13  ;;  %v4009_v23 = vld [vmem:[%s5606_s1 + $0x88] sm:$0xff]  ;;  %v4000_v26 = vld [vmem:[%s5606_s1 + $0x40] sm:$0xff]  ;;  %v4023_v27 = vld [vmem:[%s5606_s1 + $0xf8] sm:$0xff] }
  0x20   : > { %1377 = vmatpush.bf16.msra.mxu3 %v4005_v6  ;;  %v3993_v24 = vld [vmem:[%s5606_s1 + $0x8] sm:$0xff]  ;;  %v4008_v28 = vld [vmem:[%s5606_s1 + $0x80] sm:$0xff]  ;;  %v4047_v31 = vld [vmem:[%s5606_s1 + $0x1b8] sm:$0xff] }
  0x21   : > { %1391 = vmatpush.bf16.msra.mxu2 %v4013_v7  ;;  %v290_v29 = vld [vmem:[%s4512_s9 + $0x8] sm:$0xff]  ;;  %v291_v32 = vld [vmem:[%s4512_s9 + $0x10] sm:$0xff]  ;;  %v3992_v34 = vld [vmem:[%s5606_s1] sm:$0xff] }
  0x22   : > { %1363 = vmatpush.bf16.msra.mxu0 %v3997_v8  ;;  %v306_v30 = vld [vmem:[%s4512_s9 + $0x88] sm:$0xff]  ;;  %v307_v33 = vld [vmem:[%s4512_s9 + $0x90] sm:$0xff]  ;;  %v4031_v36 = vld [vmem:[%s5606_s1 + $0x138] sm:$0xff] }
  0x23   : > { %1433 = vmatpush.bf16.msra.mxu1 %v4037_v17  ;;  %v4034_v35 = vld [vmem:[%s5606_s1 + $0x150] sm:$0xff]  ;;  %v322_v37 = vpack.c.bf16 %v306_v30, %v290_v29  ;;  %v289_v38 = vld [vmem:[%s4512_s9] sm:$0xff]  ;;  %v323_v40 = vpack.c.bf16 %v307_v33, %v291_v32  ;;  %v4033_v44 = vld [vmem:[%s5606_s1 + $0x148] sm:$0xff] }
  0x24   : > { %1378 = vmatpush.bf16.msra.mxu3 %v4004_v10  ;;  %v305_v39 = vld [vmem:[%s4512_s9 + $0x80] sm:$0xff]  ;;  %v4022_v41 = vld [vmem:[%s5606_s1 + $0xf0] sm:$0xff]  ;;  %v4021_v46 = vld [vmem:[%s5606_s1 + $0xe8] sm:$0xff] }
  0x25   : > { %1392 = vmatpush.bf16.msra.mxu2 %v4012_v11  ;;  %v4046_v42 = vld [vmem:[%s5606_s1 + $0x1b0] sm:$0xff]  ;;  %v321_v43 = vpack.c.bf16 %v305_v39, %v289_v38  ;;  %v4045_v47 = vld [vmem:[%s5606_s1 + $0x1a8] sm:$0xff]  ;;  %v4032_v49 = vld [vmem:[%s5606_s1 + $0x140] sm:$0xff] }
  0x26   : > { %1364 = vmatpush.bf16.msra.mxu0 %v3996_v12  ;;  %v4030_v45 = vld [vmem:[%s5606_s1 + $0x130] sm:$0xff]  ;;  %v4029_v48 = vld [vmem:[%s5606_s1 + $0x128] sm:$0xff]  ;;  %v4071_v50 = vld [vmem:[%s5606_s1 + $0x278] sm:$0xff] }
  0x27   : > { %1434 = vmatpush.bf16.msra.mxu1 %v4036_v21  ;;  %v294_v51 = vld [vmem:[%s4512_s9 + $0x28] sm:$0xff]  ;;  %v4020_v53 = vld [vmem:[%s5606_s1 + $0xe0] sm:$0xff]  ;;  %v4070_v57 = vld [vmem:[%s5606_s1 + $0x270] sm:$0xff] }
  0x28   : > { %1379 = vmatpush.bf16.msra.mxu3 %v4003_v14  ;;  %v310_v52 = vld [vmem:[%s4512_s9 + $0xa8] sm:$0xff]  ;;  %v4044_v54 = vld [vmem:[%s5606_s1 + $0x1a0] sm:$0xff]  ;;  %v4019_v58 = vld [vmem:[%s5606_s1 + $0xd8] sm:$0xff] }
  0x29   : > { %1393 = vmatpush.bf16.msra.mxu2 %v4011_v15  ;;  %v326_v55 = vpack.c.bf16 %v310_v52, %v294_v51  ;;  %v4028_v56 = vld [vmem:[%s5606_s1 + $0x120] sm:$0xff]  ;;  %v4043_v59 = vld [vmem:[%s5606_s1 + $0x198] sm:$0xff]  ;;  %v4069_v61 = vld [vmem:[%s5606_s1 + $0x268] sm:$0xff] }
  0x2a   : > { %1365 = vmatpush.bf16.msra.mxu0 %v3995_v16  ;;  %v4027_v60 = vld [vmem:[%s5606_s1 + $0x118] sm:$0xff]  ;;  %v4018_v62 = vld [vmem:[%s5606_s1 + $0xd0] sm:$0xff]  ;;  %v4068_v1 = vld [vmem:[%s5606_s1 + $0x260] sm:$0xff] }
  0x2b   : > { %1435 = vmatpush.bf16.msra.mxu1 %v4035_v25  ;;  %v4042_v63 = vld [vmem:[%s5606_s1 + $0x190] sm:$0xff]  ;;  %v4017_v2 = vld [vmem:[%s5606_s1 + $0xc8] sm:$0xff]  ;;  %v4067_v5 = vld [vmem:[%s5606_s1 + $0x258] sm:$0xff] }
  0x2c   : > { %1380 = vmatpush.bf16.msra.mxu3 %v4002_v18  ;;  %v4026_v0 = vld [vmem:[%s5606_s1 + $0x110] sm:$0xff]  ;;  %v4041_v3 = vld [vmem:[%s5606_s1 + $0x188] sm:$0xff]  ;;  %v4016_v6 = vld [vmem:[%s5606_s1 + $0xc0] sm:$0xff] }
  0x2d   : > { %1394 = vmatpush.bf16.msra.mxu2 %v4010_v19  ;;  %v4025_v4 = vld [vmem:[%s5606_s1 + $0x108] sm:$0xff]  ;;  %v292_v7 = vld [vmem:[%s4512_s9 + $0x18] sm:$0xff]  ;;  %v4040_v9 = vld [vmem:[%s5606_s1 + $0x180] sm:$0xff] }
  0x2e   : > { %1366 = vmatpush.bf16.msra.mxu0 %v3994_v20  ;;  %v308_v8 = vld [vmem:[%s4512_s9 + $0x98] sm:$0xff]  ;;  %v295_v10 = vld [vmem:[%s4512_s9 + $0x30] sm:$0xff]  ;;  %v4024_v14 = vld [vmem:[%s5606_s1 + $0x100] sm:$0xff] }
  0x2f   : > { %1436 = vmatpush.bf16.msra.mxu1 %v4034_v35  ;;  %v311_v11 = vld [vmem:[%s4512_s9 + $0xb0] sm:$0xff]  ;;  %v4055_v12 = vld [vmem:[%s5606_s1 + $0x1f8] sm:$0xff]  ;;  %v293_v15 = vld [vmem:[%s4512_s9 + $0x20] sm:$0xff]  ;;  %v324_v18 = vpack.c.bf16 %v308_v8, %v292_v7 }
  0x30   : > { %1381 = vmatpush.bf16.msra.mxu3 %v4001_v22  ;;  %v4079_v13 = vld [vmem:[%s5606_s1 + $0x2b8] sm:$0xff]  ;;  %v309_v16 = vld [vmem:[%s4512_s9 + $0xa0] sm:$0xff]  ;;  %v4066_v17 = vld [vmem:[%s5606_s1 + $0x250] sm:$0xff]  ;;  %v327_v19 = vpack.c.bf16 %v311_v11, %v295_v10 }
  0x31   : > { %1395 = vmatpush.bf16.msra.mxu2 %v4009_v23  ;;  %v4063_v20 = vld [vmem:[%s5606_s1 + $0x238] sm:$0xff]  ;;  %v4054_v21 = vld [vmem:[%s5606_s1 + $0x1f0] sm:$0xff]  ;;  %v325_v22 = vpack.c.bf16 %v309_v16, %v293_v15  ;;  %v298_v29 = vld [vmem:[%s4512_s9 + $0x48] sm:$0xff] }
  0x32   : > { %1367 = vmatpush.bf16.msra.mxu0 %v3993_v24  ;;  %v4078_v23 = vld [vmem:[%s5606_s1 + $0x2b0] sm:$0xff]  ;;  %v4065_v24 = vld [vmem:[%s5606_s1 + $0x248] sm:$0xff]  ;;  %v4103_v30 = vld [vmem:[%s5606_s1 + $0x378] sm:$0xff] }
  0x33   : > { %1437 = vmatpush.bf16.msra.mxu1 %v4033_v44  ;;  %v4062_v25 = vld [vmem:[%s5606_s1 + $0x230] sm:$0xff]  ;;  %v4061_v32 = vld [vmem:[%s5606_s1 + $0x228] sm:$0xff]  ;;  %v4052_v33 = vld [vmem:[%s5606_s1 + $0x1e0] sm:$0xff] }
  0x34   : > { %1382 = vmatpush.bf16.msra.mxu3 %v4000_v26  ;;  %v4053_v26 = vld [vmem:[%s5606_s1 + $0x1e8] sm:$0xff]  ;;  %v4076_v35 = vld [vmem:[%s5606_s1 + $0x2a0] sm:$0xff]  ;;  %v4051_v38 = vld [vmem:[%s5606_s1 + $0x1d8] sm:$0xff] }
  0x35   : > { %1396 = vmatpush.bf16.msra.mxu2 %v4008_v28  ;;  %v4064_v28 = vld [vmem:[%s5606_s1 + $0x240] sm:$0xff]  ;;  %v4075_v39 = vld [vmem:[%s5606_s1 + $0x298] sm:$0xff]  ;;  %v4109_v7 = vld [vmem:[%s5606_s1 + $0x3a8] sm:$0xff] }
  0x36   : > { %1368 = vmatpush.bf16.msra.mxu0 %v3992_v34  ;;  %v4100_v44 = vld [vmem:[%s5606_s1 + $0x360] sm:$0xff]  ;;  %v4087_v51 = vld [vmem:[%s5606_s1 + $0x2f8] sm:$0xff]  ;;  %v318_v10 = vld [vmem:[%s4512_s9 + $0xe8] sm:$0xff] }
  0x37   : > { %1383 = vmatmul.bf16.vlgmr.msra.gmra.mxu3 %v322_v37  ;;  %1438 = vmatpush.bf16.msra.mxu1 %v4032_v49  ;;  %v4060_v37 = vld [vmem:[%s5606_s1 + $0x220] sm:$0xff]  ;;  %v296_v52 = vld [vmem:[%s4512_s9 + $0x38] sm:$0xff]  ;;  %v4093_v11 = vld [vmem:[%s5606_s1 + $0x328] sm:$0xff] }
  0x38   : > { %1403 = vmatpush.bf16.msrb.mxu3 %v4023_v27  ;;  %1397 = vmatmul.bf16.vlgmr.msra.gmra.mxu2 %v323_v40  ;;  %v4077_v27 = vld [vmem:[%s5606_s1 + $0x2a8] sm:$0xff]  ;;  %v4048_v49 = vld [vmem:[%s5606_s1 + $0x1c0] sm:$0xff]  ;;  %v4083_v16 = vld [vmem:[%s5606_s1 + $0x2d8] sm:$0xff] }
  0x39   : > { %1445 = vmatpush.bf16.msrb.mxu2 %v4047_v31  ;;  %1369 = vmatmul.bf16.vlgmr.msra.gmra.mxu0 %v321_v43  ;;  %v314_v31 = vld [vmem:[%s4512_s9 + $0xc8] sm:$0xff]  ;;  %v4074_v43 = vld [vmem:[%s5606_s1 + $0x290] sm:$0xff]  ;;  %v4096_v8 = vld [vmem:[%s5606_s1 + $0x340] sm:$0xff] }
  0x3a   : > { %1417 = vmatpush.bf16.msrb.mxu0 %v4031_v36  ;;  %1439 = vmatmul.bf16.vlgmr.msra.gmra.mxu1 %v326_v55  ;;  %v330_v34 = vpack.c.bf16 %v314_v31, %v298_v29  ;;  %v4102_v36 = vld [vmem:[%s5606_s1 + $0x370] sm:$0xff]  ;;  %v4101_v40 = vld [vmem:[%s5606_s1 + $0x368] sm:$0xff]  ;;  %v4092_v15 = vld [vmem:[%s5606_s1 + $0x320] sm:$0xff] }
  0x3b   : > { %1487 = vmatpush.bf16.msrb.mxu1 %v4071_v50  ;;  %v4057_v50 = vld [vmem:[%s5606_s1 + $0x208] sm:$0xff]  ;;  %v299_v55 = vld [vmem:[%s4512_s9 + $0x50] sm:$0xff]  ;;  %v4104_v29 = vld [vmem:[%s5606_s1 + $0x380] sm:$0xff] }
  0x3c   : > { %1404 = vmatpush.bf16.msrb.mxu3 %v4022_v41  ;;  %v4059_v41 = vld [vmem:[%s5606_s1 + $0x218] sm:$0xff]  ;;  %v319_v31 = vld [vmem:[%s4512_s9 + $0xf0] sm:$0xff] }
  0x3d   : > { %1446 = vmatpush.bf16.msrb.mxu2 %v4046_v42  ;;  %v4050_v42 = vld [vmem:[%s5606_s1 + $0x1d0] sm:$0xff] }
  0x3e   : > { %1418 = vmatpush.bf16.msrb.mxu0 %v4030_v45  ;;  %v4058_v45 = vld [vmem:[%s5606_s1 + $0x210] sm:$0xff] }
  0x3f   : > { %1488 = vmatpush.bf16.msrb.mxu1 %v4070_v57  ;;  %v4111_v57 = vld [vmem:[%s5606_s1 + $0x3b8] sm:$0xff] }
  0x40   : > { %1405 = vmatpush.bf16.msrb.mxu3 %v4021_v46  ;;  %v4049_v46 = vld [vmem:[%s5606_s1 + $0x1c8] sm:$0xff] }
  0x41   : > { %1447 = vmatpush.bf16.msrb.mxu2 %v4045_v47  ;;  %v4073_v47 = vld [vmem:[%s5606_s1 + $0x288] sm:$0xff] }
  0x42   : > { %1419 = vmatpush.bf16.msrb.mxu0 %v4029_v48  ;;  %v4099_v48 = vld [vmem:[%s5606_s1 + $0x358] sm:$0xff] }
  0x43   : > { %1489 = vmatpush.bf16.msrb.mxu1 %v4069_v61  ;;  %v297_v61 = vld [vmem:[%s4512_s9 + $0x40] sm:$0xff] }
  0x44   : > { %1406 = vmatpush.bf16.msrb.mxu3 %v4020_v53  ;;  %v312_v53 = vld [vmem:[%s4512_s9 + $0xb8] sm:$0xff] }
  0x45   : > { %1448 = vmatpush.bf16.msrb.mxu2 %v4044_v54  ;;  %v4072_v54 = vld [vmem:[%s5606_s1 + $0x280] sm:$0xff] }
  0x46   : > { %1420 = vmatpush.bf16.msrb.mxu0 %v4028_v56  ;;  %v315_v56 = vld [vmem:[%s4512_s9 + $0xd0] sm:$0xff] }
  0x47   : > { %1490 = vmatpush.bf16.msrb.mxu1 %v4068_v1  ;;  %v4086_v1 = vld [vmem:[%s5606_s1 + $0x2f0] sm:$0xff] }
  0x48   : > { %1407 = vmatpush.bf16.msrb.mxu3 %v4019_v58  ;;  %v4098_v58 = vld [vmem:[%s5606_s1 + $0x350] sm:$0xff] }
  0x49   : > { %1449 = vmatpush.bf16.msrb.mxu2 %v4043_v59  ;;  %v328_v59 = vpack.c.bf16 %v312_v53, %v296_v52 }
  0x4a   : > { %1421 = vmatpush.bf16.msrb.mxu0 %v4027_v60  ;;  %v4056_v60 = vld [vmem:[%s5606_s1 + $0x200] sm:$0xff] }
  0x4b   : > { %1491 = vmatpush.bf16.msrb.mxu1 %v4067_v5  ;;  %v4094_v5 = vld [vmem:[%s5606_s1 + $0x330] sm:$0xff] }
  0x4c   : > { %1408 = vmatpush.bf16.msrb.mxu3 %v4018_v62  ;;  %v313_v62 = vld [vmem:[%s4512_s9 + $0xc0] sm:$0xff] }
  0x4d   : > { %1450 = vmatpush.bf16.msrb.mxu2 %v4042_v63  ;;  %v331_v63 = vpack.c.bf16 %v315_v56, %v299_v55 }
  0x4e   : > { %1422 = vmatpush.bf16.msrb.mxu0 %v4026_v0  ;;  %v4095_v0 = vld [vmem:[%s5606_s1 + $0x338] sm:$0xff] }
  0x4f   : > { %1492 = vmatpush.bf16.msrb.mxu1 %v4066_v17  ;;  %v4107_v17 = vld [vmem:[%s5606_s1 + $0x398] sm:$0xff] }
  0x50   : > { %1409 = vmatpush.bf16.msrb.mxu3 %v4017_v2  ;;  %v329_v2 = vpack.c.bf16 %v313_v62, %v297_v61 }
  0x51   : > { %1451 = vmatpush.bf16.msrb.mxu2 %v4041_v3  ;;  %v4110_v3 = vld [vmem:[%s5606_s1 + $0x3b0] sm:$0xff] }
  0x52   : > { %1423 = vmatpush.bf16.msrb.mxu0 %v4025_v4  ;;  %v4097_v4 = vld [vmem:[%s5606_s1 + $0x348] sm:$0xff] }
  0x53   : > { %1493 = vmatpush.bf16.msrb.mxu1 %v4065_v24  ;;  %v4080_v24 = vld [vmem:[%s5606_s1 + $0x2c0] sm:$0xff] }
  0x54   : > { %1410 = vmatpush.bf16.msrb.mxu3 %v4016_v6  ;;  %v4085_v6 = vld [vmem:[%s5606_s1 + $0x2e8] sm:$0xff] }
  0x55   : > { %1452 = vmatpush.bf16.msrb.mxu2 %v4040_v9  ;;  %v302_v9 = vld [vmem:[%s4512_s9 + $0x68] sm:$0xff] }
  0x56   : > { %1424 = vmatpush.bf16.msrb.mxu0 %v4024_v14  ;;  %v334_v14 = vpack.c.bf16 %v318_v10, %v302_v9 }
  0x57   : > { %1411 = vmatmul.bf16.vlgmr.msrb.gmra.mxu3 %v324_v18  ;;  %1494 = vmatpush.bf16.msrb.mxu1 %v4064_v28  ;;  %v4091_v18 = vld [vmem:[%s5606_s1 + $0x318] sm:$0xff] }
  0x58   : > { %1459 = vmatpush.bf16.msra.mxu3 %v4055_v12  ;;  %1453 = vmatmul.bf16.vlgmr.msrb.gmra.mxu2 %v327_v19  ;;  %v4084_v12 = vld [vmem:[%s5606_s1 + $0x2e0] sm:$0xff]  ;;  %v4082_v19 = vld [vmem:[%s5606_s1 + $0x2d0] sm:$0xff]  ;;  %v316_v28 = vld [vmem:[%s4512_s9 + $0xd8] sm:$0xff] }
  0x59   : > { %1501 = vmatpush.bf16.msra.mxu2 %v4079_v13  ;;  %1425 = vmatmul.bf16.vlgmr.msrb.gmra.mxu0 %v325_v22  ;;  %v4108_v13 = vld [vmem:[%s5606_s1 + $0x3a0] sm:$0xff]  ;;  %v4081_v22 = vld [vmem:[%s5606_s1 + $0x2c8] sm:$0xff] }
  0x5a   : > { %1473 = vmatpush.bf16.msra.mxu0 %v4063_v20  ;;  %1495 = vmatmul.bf16.vlgmr.msrb.gmra.mxu1 %v330_v34  ;;  %v4106_v20 = vld [vmem:[%s5606_s1 + $0x390] sm:$0xff]  ;;  %v301_v34 = vld [vmem:[%s4512_s9 + $0x60] sm:$0xff] }
  0x5b   : > { %1543 = vmatpush.bf16.msra.mxu1 %v4103_v30  ;;  %v303_v30 = vld [vmem:[%s4512_s9 + $0x70] sm:$0xff] }
  0x5c   : > { %1460 = vmatpush.bf16.msra.mxu3 %v4054_v21  ;;  %v4090_v21 = vld [vmem:[%s5606_s1 + $0x310] sm:$0xff] }
  0x5d   : > { %1502 = vmatpush.bf16.msra.mxu2 %v4078_v23  ;;  %v4105_v23 = vld [vmem:[%s5606_s1 + $0x388] sm:$0xff] }
  0x5e   : > { %1474 = vmatpush.bf16.msra.mxu0 %v4062_v25  ;;  %v4089_v25 = vld [vmem:[%s5606_s1 + $0x308] sm:$0xff] }
  0x5f   : > { %1544 = vmatpush.bf16.msra.mxu1 %v4102_v36  ;;  %v335_v36 = vpack.c.bf16 %v319_v31, %v303_v30 }
  0x60   : > { %1461 = vmatpush.bf16.msra.mxu3 %v4053_v26  ;;  %v4119_v26 = vld [vmem:[%s5606_s1 + $0x3f8] sm:$0xff] }
  0x61   : > { %1503 = vmatpush.bf16.msra.mxu2 %v4077_v27  ;;  %v300_v27 = vld [vmem:[%s4512_s9 + $0x58] sm:$0xff] }
  0x62   : > { %1475 = vmatpush.bf16.msra.mxu0 %v4061_v32  ;;  %v332_v32 = vpack.c.bf16 %v316_v28, %v300_v27 }
  0x63   : > { %1545 = vmatpush.bf16.msra.mxu1 %v4101_v40  ;;  %v4116_v40 = vld [vmem:[%s5606_s1 + $0x3e0] sm:$0xff] }
  0x64   : > { %1462 = vmatpush.bf16.msra.mxu3 %v4052_v33  ;;  %v4088_v33 = vld [vmem:[%s5606_s1 + $0x300] sm:$0xff] }
  0x65   : > { %1504 = vmatpush.bf16.msra.mxu2 %v4076_v35  ;;  %v317_v35 = vld [vmem:[%s4512_s9 + $0xe0] sm:$0xff] }
  0x66   : > { %1476 = vmatpush.bf16.msra.mxu0 %v4060_v37  ;;  %v4118_v37 = vld [vmem:[%s5606_s1 + $0x3f0] sm:$0xff] }
  0x67   : > { %1546 = vmatpush.bf16.msra.mxu1 %v4100_v44  ;;  %v4112_v44 = vld [vmem:[%s5606_s1 + $0x3c0] sm:$0xff] }
  0x68   : > { %1463 = vmatpush.bf16.msra.mxu3 %v4051_v38  ;;  %v333_v38 = vpack.c.bf16 %v317_v35, %v301_v34 }
  0x69   : > { %1505 = vmatpush.bf16.msra.mxu2 %v4075_v39  ;;  %v4117_v39 = vld [vmem:[%s5606_s1 + $0x3e8] sm:$0xff] }
  0x6a   : > { %1477 = vmatpush.bf16.msra.mxu0 %v4059_v41  ;;  %v4115_v41 = vld [vmem:[%s5606_s1 + $0x3d8] sm:$0xff] }
  0x6b   : > { %1547 = vmatpush.bf16.msra.mxu1 %v4099_v48 }
  0x6c   : > { %1464 = vmatpush.bf16.msra.mxu3 %v4050_v42  ;;  %v4114_v42 = vld [vmem:[%s5606_s1 + $0x3d0] sm:$0xff] }
  0x6d   : > { %1506 = vmatpush.bf16.msra.mxu2 %v4074_v43  ;;  %v4113_v43 = vld [vmem:[%s5606_s1 + $0x3c8] sm:$0xff] }
  0x6e   : > { %1478 = vmatpush.bf16.msra.mxu0 %v4058_v45  ;;  %v304_v45 = vld [vmem:[%s4512_s9 + $0x78] sm:$0xff] }
  0x6f   : > { %1548 = vmatpush.bf16.msra.mxu1 %v4098_v58 }
  0x70   : > { %1465 = vmatpush.bf16.msra.mxu3 %v4049_v46  ;;  %v320_v46 = vld [vmem:[%s4512_s9 + $0xf8] sm:$0xff] }
  0x71   : > { %1507 = vmatpush.bf16.msra.mxu2 %v4073_v47  ;;  %v336_v47 = vpack.c.bf16 %v320_v46, %v304_v45  ;;  %v4128_v46 = vld [vmem:[%s5608_s3 + $0x34] sm:$0xf] }
  0x72   : > { %1479 = vmatpush.bf16.msra.mxu0 %v4057_v50 }
  0x73   : > { %1549 = vmatpush.bf16.msra.mxu1 %v4097_v4 }
  0x74   : > { %1466 = vmatpush.bf16.msra.mxu3 %v4048_v49 }
  0x75   : > { %1508 = vmatpush.bf16.msra.mxu2 %v4072_v54 }
  0x76   : > { %1480 = vmatpush.bf16.msra.mxu0 %v4056_v60 }
  0x77   : > { %1467 = vmatmul.bf16.vlgmr.msra.gmra.mxu3 %v328_v59  ;;  %1550 = vmatpush.bf16.msra.mxu1 %v4096_v8 }
  0x78   : > { %1515 = vmatpush.bf16.msrb.mxu3 %v4087_v51  ;;  %1509 = vmatmul.bf16.vlgmr.msra.gmra.mxu2 %v331_v63 }
  0x79   : > { %1557 = vmatpush.bf16.msrb.mxu2 %v4111_v57  ;;  %1481 = vmatmul.bf16.vlgmr.msra.gmra.mxu0 %v329_v2 }
  0x7a   : > { %1529 = vmatpush.bf16.msrb.mxu0 %v4095_v0  ;;  %1551 = vmatmul.bf16.vlgmr.msra.gmra.mxu1 %v334_v14 }
  0x7c   : > { %1516 = vmatpush.bf16.msrb.mxu3 %v4086_v1 }
  0x7d   : > { %1558 = vmatpush.bf16.msrb.mxu2 %v4110_v3 }
  0x7e   : > { %1530 = vmatpush.bf16.msrb.mxu0 %v4094_v5 }
  0x80   : > { %1517 = vmatpush.bf16.msrb.mxu3 %v4085_v6 }
  0x81   : > { %1559 = vmatpush.bf16.msrb.mxu2 %v4109_v7 }
  0x82   : > { %1531 = vmatpush.bf16.msrb.mxu0 %v4093_v11 }
  0x84   : > { %1518 = vmatpush.bf16.msrb.mxu3 %v4084_v12 }
  0x85   : > { %1560 = vmatpush.bf16.msrb.mxu2 %v4108_v13 }
  0x86   : > { %1532 = vmatpush.bf16.msrb.mxu0 %v4092_v15 }
  0x88   : > { %1519 = vmatpush.bf16.msrb.mxu3 %v4083_v16 }
  0x89   : > { %1561 = vmatpush.bf16.msrb.mxu2 %v4107_v17 }
  0x8a   : > { %1533 = vmatpush.bf16.msrb.mxu0 %v4091_v18 }
  0x8c   : > { %1520 = vmatpush.bf16.msrb.mxu3 %v4082_v19 }
  0x8d   : > { %1562 = vmatpush.bf16.msrb.mxu2 %v4106_v20 }
  0x8e   : > { %1534 = vmatpush.bf16.msrb.mxu0 %v4090_v21 }
  0x90   : > { %1521 = vmatpush.bf16.msrb.mxu3 %v4081_v22 }
  0x91   : > { %1563 = vmatpush.bf16.msrb.mxu2 %v4105_v23 }
  0x92   : > { %1535 = vmatpush.bf16.msrb.mxu0 %v4089_v25 }
  0x94   : > { %1522 = vmatpush.bf16.msrb.mxu3 %v4080_v24 }
  0x95   : > { %1564 = vmatpush.bf16.msrb.mxu2 %v4104_v29 }
  0x96   : > { %1536 = vmatpush.bf16.msrb.mxu0 %v4088_v33 }
  0x97   : > { %1523 = vmatmul.bf16.vlgmr.msrb.gmra.mxu3 %v332_v32 }
  0x98   : > { %1571 = vmatpush.bf16.msra.mxu3 %v4119_v26  ;;  %1565 = vmatmul.bf16.vlgmr.msrb.gmra.mxu2 %v335_v36 }
  0x99   : > { %1537 = vmatmul.bf16.vlgmr.msrb.gmra.mxu0 %v333_v38  ;;  %v3609_v38 = vld [vmem:[%s5608_s3 + $0x40] sm:$0xf] }
  0x9c   : > { %1572 = vmatpush.bf16.msra.mxu3 %v4118_v37 }
  0xa0   : > { %1573 = vmatpush.bf16.msra.mxu3 %v4117_v39  ;;  %v4131_v39 = vld [vmem:[%s5608_s3 + $0x44] sm:$0xf0] }
  0xa4   : > { %1574 = vmatpush.bf16.msra.mxu3 %v4116_v40  ;;  %v4130_v40 = vld [vmem:[%s5608_s3 + $0x44] sm:$0xf] }
  0xa8   : > { %1575 = vmatpush.bf16.msra.mxu3 %v4115_v41  ;;  %v3610_v41 = vor.u32 %v4131_v39, %v3609_v38  ;;  %v4136_v38 = vld [vmem:[%s5609_s4 + $0x20] sm:$0xff] }
  0xaa   : > { %1698 = vmatpush.bf16.msrb.mxu1 %v3610_v41  ;;  %v3809_v41 = vld [vmem:[%s5610_s5 + $0x118] sm:$0xf] }
  0xac   : > { %1576 = vmatpush.bf16.msra.mxu3 %v4114_v42  ;;  %v3611_v42 = vld [vmem:[%s5608_s3 + $0x48] sm:$0xf0] }
  0xad   : > { %v3614_v45 = vor.u32 %v4130_v40, %v3611_v42  ;;  %v4177_v42 = vld [vmem:[%s5610_s5 + $0x128] sm:$0xf0] }
  0xaf   : > { %1717 = vmatpush.bf16.msra.mxu2 %v3614_v45  ;;  %v3810_v45 = vor.u32 %v4177_v42, %v3809_v41  ;;  %v3671_v41 = vld [vmem:[%s5610_s5 + $0x14] sm:$0xf0]  ;;  %v4180_v42 = vld [vmem:[%s5610_s5 + $0x144] sm:$0xf] }
  0xb0   : > { %1577 = vmatpush.bf16.msra.mxu3 %v4113_v43  ;;  %v3601_v43 = vld [vmem:[%s5608_s3 + $0x30] sm:$0xf] }
  0xb4   : > { %1578 = vmatpush.bf16.msra.mxu3 %v4112_v44  ;;  %v4129_v44 = vld [vmem:[%s5608_s3 + $0x34] sm:$0xf0] }
  0xb6   : > { %v1370_v49 = vpop.f32.mrf.mxu0 }
  0xb7   : > { %1579 = vmatmul.bf16.vlgmr.msra.gmra.mxu3 %v336_v47  ;;  %v1440_v56 = vpop.f32.mrf.mxu1  ;;  %v3603_v47 = vld [vmem:[%s5608_s3 + $0x38] sm:$0xf0] }
  0xba   : > { %v1384_v48 = vpop.f32.mrf.mxu3 }
  0xbb   : > { %v1398_v51 = vpop.f32.mrf.mxu2  ;;  %v1385_v59 = vadd.f32 %v1384_v48, %v1370_v49 }
  0xbd   : > { %v1399_v62 = vadd.f32 %v1398_v51, %v1385_v59  ;;  %v4120_v59 = vld [vmem:[%s5607_s2] sm:$0xff] }
  0xbe   : > { %v1372_v52 = vpop.f32.mrf.mxu0 }
  0xbf   : > { %v1442_v63 = vpop.f32.mrf.mxu1 }
  0xc2   : > { %v1386_v50 = vpop.f32.mrf.mxu3 }
  0xc3   : > { %v1400_v54 = vpop.f32.mrf.mxu2  ;;  %v1387_v61 = vadd.f32 %v1386_v50, %v1372_v52  ;;  %v3602_v50 = vor.u32 %v4129_v44, %v3601_v43  ;;  %v3606_v52 = vor.u32 %v4128_v46, %v3603_v47  ;;  %v4175_v43 = vld [vmem:[%s5610_s5 + $0x11c] sm:$0xf]  ;;  %v4137_v44 = vld [vmem:[%s5609_s4 + $0x28] sm:$0xff]  ;;  %v3811_v46 = vld [vmem:[%s5610_s5 + $0x12c] sm:$0xf0] }
  0xc4   : > { %v3814_v47 = vor.u32 %v4175_v43, %v3811_v46  ;;  %v4139_v43 = vld [vmem:[%s5609_s4 + $0x38] sm:$0xff] }
  0xc5   : > { %v1401_v1 = vadd.f32 %v1400_v54, %v1387_v61  ;;  %1699 = vmatpush.bf16.msrb.mxu1 %v3602_v50  ;;  %1718 = vmatpush.bf16.msra.mxu2 %v3606_v52  ;;  %v3593_v61 = vld [vmem:[%s5608_s3 + $0x20] sm:$0xf]  ;;  %v3789_v50 = vld [vmem:[%s5610_s5 + $0xf0] sm:$0xf]  ;;  %v4170_v52 = vld [vmem:[%s5610_s5 + $0xf4] sm:$0xf] }
  0xd6   : > { %v1426_v55 = vpop.f32.mrf.mxu0 }
  0xd7   : > { %v1496_v8 = vpop.f32.mrf.mxu1 }
  0xda   : > { %v1412_v53 = vpop.f32.mrf.mxu3 }
  0xdb   : > { %v1454_v58 = vpop.f32.mrf.mxu2  ;;  %v1413_v2 = vadd.f32 %v1412_v53, %v1399_v62  ;;  %v4127_v62 = vld [vmem:[%s5608_s3 + $0x24] sm:$0xf0] }
  0xdd   : > { %v1427_v6 = vadd.f32 %v1426_v55, %v1413_v2 }
  0xde   : > { %v1428_v60 = vpop.f32.mrf.mxu0 }
  0xdf   : > { %v1441_v10 = vadd.f32 %v1440_v56, %v1427_v6  ;;  %v1498_v18 = vpop.f32.mrf.mxu1 }
  0xe1   : > { %v1455_v14 = vadd.f32 %v1454_v58, %v1441_v10  ;;  %v4123_v10 = vld [vmem:[%s5608_s3 + $0x4] sm:$0xf0] }
  0xe2   : > { %v1414_v57 = vpop.f32.mrf.mxu3 }
  0xe3   : > { %v1415_v3 = vadd.f32 %v1414_v57, %v1401_v1  ;;  %v1456_v4 = vpop.f32.mrf.mxu2  ;;  %v3595_v1 = vld [vmem:[%s5608_s3 + $0x28] sm:$0xf0] }
  0xe5   : > { %v1429_v7 = vadd.f32 %v1428_v60, %v1415_v3  ;;  %v4121_v60 = vld [vmem:[%s5607_s2 + $0x8] sm:$0xff]  ;;  %v3585_v3 = vld [vmem:[%s5608_s3 + $0x10] sm:$0xf] }
  0xe7   : > { %v1443_v11 = vadd.f32 %v1442_v63, %v1429_v7  ;;  %v4126_v63 = vld [vmem:[%s5608_s3 + $0x24] sm:$0xf]  ;;  %v3587_v7 = vld [vmem:[%s5608_s3 + $0x18] sm:$0xf0] }
  0xe8   : > { %v3598_v2 = vor.u32 %v4126_v63, %v3595_v1  ;;  %v3749_v63 = vld [vmem:[%s5610_s5 + $0xa0] sm:$0xf]  ;;  %v4160_v1 = vld [vmem:[%s5610_s5 + $0xa4] sm:$0xf] }
  0xe9   : > { %v1457_v15 = vadd.f32 %v1456_v4, %v1443_v11  ;;  %v4125_v4 = vld [vmem:[%s5608_s3 + $0x14] sm:$0xf0]  ;;  %v4122_v11 = vld [vmem:[%s5608_s3 + $0x4] sm:$0xf] }
  0xea   : > { %1719 = vmatpush.bf16.msra.mxu2 %v3598_v2  ;;  %v3586_v6 = vor.u32 %v4125_v4, %v3585_v3  ;;  %v3751_v3 = vld [vmem:[%s5610_s5 + $0xb4] sm:$0xf0] }
  0xeb   : > { %v3754_v4 = vor.u32 %v4160_v1, %v3751_v3  ;;  %v3797_v3 = vld [vmem:[%s5610_s5 + $0xf8] sm:$0xf] }
  0xf6   : > { %v1482_v5 = vpop.f32.mrf.mxu0 }
  0xf7   : > { %v1552_v26 = vpop.f32.mrf.mxu1 }
  0xfa   : > { %v1468_v0 = vpop.f32.mrf.mxu3 }
  0xfb   : > { %v1510_v12 = vpop.f32.mrf.mxu2  ;;  %v1469_v16 = vadd.f32 %v1468_v0, %v1455_v14  ;;  %v3594_v0 = vor.u32 %v4127_v62, %v3593_v61 }
  0xfd   : > { %v1483_v20 = vadd.f32 %v1482_v5, %v1469_v16  ;;  %1700 = vmatpush.bf16.msrb.mxu1 %v3594_v0  ;;  %v4124_v5 = vld [vmem:[%s5608_s3 + $0x14] sm:$0xf] }
  0xfe   : > { %v1484_v13 = vpop.f32.mrf.mxu0  ;;  %v4162_v0 = vld [vmem:[%s5610_s5 + $0xb0] sm:$0xf0] }
  0xff   : > { %v1497_v24 = vadd.f32 %v1496_v8, %v1483_v20  ;;  %v1554_v36 = vpop.f32.mrf.mxu1  ;;  %v3590_v8 = vor.u32 %v4124_v5, %v3587_v7  ;;  %v3750_v2 = vor.u32 %v4162_v0, %v3749_v63  ;;  %v3729_v5 = vld [vmem:[%s5610_s5 + $0x78] sm:$0xf]  ;;  %v4155_v7 = vld [vmem:[%s5610_s5 + $0x7c] sm:$0xf] }
 0x101   : > { %v1511_v28 = vadd.f32 %v1510_v12, %v1497_v24  ;;  %1701 = vmatpush.bf16.msrb.mxu1 %v3586_v6  ;;  %1720 = vmatpush.bf16.msra.mxu2 %v3590_v8  ;;  %v4157_v6 = vld [vmem:[%s5610_s5 + $0x88] sm:$0xf0]  ;;  %v4138_v8 = vld [vmem:[%s5609_s4 + $0x30] sm:$0xff] }
 0x102   : > { %v1470_v9 = vpop.f32.mrf.mxu3 }
 0x103   : > { %v1471_v17 = vadd.f32 %v1470_v9, %v1457_v15  ;;  %v1512_v22 = vpop.f32.mrf.mxu2  ;;  %v3577_v9 = vld [vmem:[%s5608_s3] sm:$0xf] }
 0x104   : > { %v3578_v12 = vor.u32 %v4123_v10, %v3577_v9  ;;  %v3730_v9 = vor.u32 %v4157_v6, %v3729_v5  ;;  %v3731_v10 = vld [vmem:[%s5610_s5 + $0x8c] sm:$0xf0] }
 0x105   : > { %v1485_v21 = vadd.f32 %v1484_v13, %v1471_v17  ;;  %v3579_v13 = vld [vmem:[%s5608_s3 + $0x8] sm:$0xf0] }
 0x106   : > { %v3582_v14 = vor.u32 %v4122_v11, %v3579_v13  ;;  %1702 = vmatpush.bf16.msrb.mxu1 %v3578_v12  ;;  %v3734_v11 = vor.u32 %v4155_v7, %v3731_v10  ;;  %v3709_v13 = vld [vmem:[%s5610_s5 + $0x50] sm:$0xf] }
 0x107   : > { %v1499_v25 = vadd.f32 %v1498_v18, %v1485_v21 }
 0x108   : > { %1721 = vmatpush.bf16.msra.mxu2 %v3582_v14  ;;  %v4152_v14 = vld [vmem:[%s5610_s5 + $0x60] sm:$0xf0] }
 0x109   : > { %v1513_v29 = vadd.f32 %v1512_v22, %v1499_v25 }
 0x10a   : > { %2276 = vmatpush.bf16.msra.mxu1 %v3810_v45  ;;  %v3831_v45 = vld [vmem:[%s5610_s5 + $0x154] sm:$0xf0] }
 0x10b   : > { %v3834_v46 = vor.u32 %v4180_v42, %v3831_v45  ;;  %v3779_v45 = vld [vmem:[%s5610_s5 + $0xe4] sm:$0xf0] }
 0x116   : > { %v1538_v23 = vpop.f32.mrf.mxu0 }
 0x11a   : > { %v1524_v19 = vpop.f32.mrf.mxu3 }
 0x11b   : > { %v1566_v30 = vpop.f32.mrf.mxu2  ;;  %v1525_v31 = vadd.f32 %v1524_v19, %v1511_v28 }
 0x11d   : > { %v1539_v34 = vadd.f32 %v1538_v23, %v1525_v31  ;;  %v4132_v31 = vld [vmem:[%s5609_s4] sm:$0xff] }
 0x11e   : > { %v1540_v33 = vpop.f32.mrf.mxu0 }
 0x11f   : > { %v1553_v48 = vadd.f32 %v1552_v26, %v1539_v34  ;;  %v4133_v34 = vld [vmem:[%s5609_s4 + $0x8] sm:$0xff] }
 0x121   : > { %v1567_v53 = vadd.f32 %v1566_v30, %v1553_v48 }
 0x122   : > { %v1526_v27 = vpop.f32.mrf.mxu3 }
 0x123   : > { %v1527_v32 = vadd.f32 %v1526_v27, %v1513_v29  ;;  %v1568_v51 = vpop.f32.mrf.mxu2 }
 0x125   : > { %v1541_v35 = vadd.f32 %v1540_v33, %v1527_v32 }
 0x127   : > { %v1555_v49 = vadd.f32 %v1554_v36, %v1541_v35  ;;  %v4134_v35 = vld [vmem:[%s5609_s4 + $0x10] sm:$0xff]  ;;  %v4135_v36 = vld [vmem:[%s5609_s4 + $0x18] sm:$0xff] }
 0x129   : > { %v1569_v54 = vadd.f32 %v1568_v51, %v1555_v49  ;;  %v4172_v51 = vld [vmem:[%s5610_s5 + $0x100] sm:$0xf0] }
 0x13a   : > { %v1580_v37 = vpop.f32.mrf.mxu3 }
 0x13b   : > { %v1581_v56 = vadd.f32 %v1580_v37, %v1567_v53  ;;  %v3790_v53 = vor.u32 %v4172_v51, %v3789_v50  ;;  %v3857_v51 = vld [vmem:[%s5610_s5 + $0x170] sm:$0xf] }
 0x13d   : > { %2277 = vmatpush.bf16.msra.mxu1 %v3790_v53 }
 0x142   : > { %v1582_v55 = vpop.f32.mrf.mxu3 }
 0x143   : > { %v1583_v57 = vadd.f32 %v1582_v55, %v1569_v54  ;;  %v3791_v54 = vld [vmem:[%s5610_s5 + $0x104] sm:$0xf0] }
 0x144   : > { %v3794_v55 = vor.u32 %v4170_v52, %v3791_v54  ;;  %v4188_v52 = vld [vmem:[%s5610_s5 + $0x180] sm:$0xf0] }
 0x145   : > { %v1589_v58 = vpack.c.bf16 %v1583_v57, %v1581_v56  ;;  %v3769_v56 = vld [vmem:[%s5610_s5 + $0xc8] sm:$0xf]  ;;  %v4167_v57 = vld [vmem:[%s5610_s5 + $0xd8] sm:$0xf0]  ;;  %v3858_v53 = vor.u32 %v4188_v52, %v3857_v51 }
 0x147   : > { %1614 = vmatpush.bf16.msra.mxu0 %v1589_v58  ;;  %v4165_v58 = vld [vmem:[%s5610_s5 + $0xcc] sm:$0xf] }
 0x14a   : > { %3573 = vmatmul.msk.bf16.vlgmr.msra.gmra.mxu0 %vm1600_vm0, %v4120_v59  ;;  %v3770_v59 = vor.u32 %v4167_v57, %v3769_v56 }
 0x14c   : > { %2278 = vmatpush.bf16.msra.mxu1 %v3770_v59  ;;  %v4178_v59 = vld [vmem:[%s5610_s5 + $0x130] sm:$0xf0] }
 0x150   : > { %2279 = vmatpush.bf16.msra.mxu1 %v3750_v2 }
 0x154   : > { %2280 = vmatpush.bf16.msra.mxu1 %v3730_v9 }
 0x15a   : > { %3574 = vmatmul.msk.bf16.gmra.mxu0 %vm1600_vm0, %v4121_v60  ;;  %v3771_v60 = vld [vmem:[%s5610_s5 + $0xdc] sm:$0xf0] }
 0x15b   : > { %v3774_v61 = vor.u32 %v4165_v58, %v3771_v60  ;;  %v3817_v58 = vld [vmem:[%s5610_s5 + $0x120] sm:$0xf] }
 0x15c   : > { %v3818_v60 = vor.u32 %v4178_v59, %v3817_v58  ;;  %v4156_v59 = vld [vmem:[%s5610_s5 + $0x84] sm:$0xf] }
 0x1c7   : > { %v1616_v15 = vpop.f32.mrf.mxu0 }
 0x1cf   : > { %v1618_v16 = vpop.f32.mrf.mxu0 }
 0x1d0   : > { %v1626_v17 = vpack.c.bf16 %v1618_v16, %v1616_v15  ;;  %v4150_v15 = vld [vmem:[%s5610_s5 + $0x54] sm:$0xf] }
 0x1d2   : > { %3615 = vmatmul.msk.bf16.vlgmr.msrb.gmra.mxu1 %vm1688_vm1, %v1626_v17  ;;  %3617 = vmatmul.msk.bf16.vlgmr.msra.gmra.mxu2 %vm1688_vm1, %v1626_v17  ;;  %v3710_v17 = vor.u32 %v4152_v14, %v3709_v13  ;;  %v4168_v13 = vld [vmem:[%s5610_s5 + $0xe0] sm:$0xf0] }
 0x1d4   : > { %2281 = vmatpush.bf16.msra.mxu1 %v3710_v17 }
 0x1d7   : > { %v1621_v18 = vpop.f32.mrf.mxu0 }
 0x1df   : > { %v1623_v19 = vpop.f32.mrf.mxu0 }
 0x1e0   : > { %v1627_v20 = vpack.c.bf16 %v1623_v19, %v1621_v18  ;;  %v3711_v18 = vld [vmem:[%s5610_s5 + $0x64] sm:$0xf0] }
 0x1e1   : > { %v3714_v19 = vor.u32 %v4150_v15, %v3711_v18 }
 0x1e2   : > { %3616 = vmatmul.msk.bf16.gmra.mxu1 %vm1688_vm1, %v1627_v20  ;;  %3618 = vmatmul.msk.bf16.gmra.mxu2 %vm1688_vm1, %v1627_v20  ;;  %v3689_v20 = vld [vmem:[%s5610_s5 + $0x28] sm:$0xf] }
 0x24f   : > { %v1704_v21 = vpop.f32.mrf.mxu1 }
 0x250   : > { %2766 = vst.msk [vmem:[%s4925_s13] sm:$0xff] %vm1793_vm2, %v1704_v21  ;;  %2824 = vrot.lane.b32.xlu2 %v1704_v21, %s4339_s14  ;;  %2790 = vrot.lane.b32.xlu0 %v1704_v21, %s4340_s15 }
 0x255   : > { %v1723_v22 = vpop.f32.mrf.mxu2 }
 0x256   : > { %3967 = vst.msk [vmem:[%s4925_s13 + $0x80] sm:$0xff] %vm1793_vm2, %v1723_v22 }
 0x257   : > { %v1706_v23 = vpop.f32.mrf.mxu1 }
 0x258   : > { %2767 = vst.msk [vmem:[%s4925_s13 + $0x8] sm:$0xff] %vm1793_vm2, %v1706_v23  ;;  %2858 = vrot.lane.b32.xlu2 %v1704_v21, %s4341_s17  ;;  %2792 = vrot.lane.b32.xlu0 %v1706_v23, %s4340_s15  ;;  %v1749_v29 = vpack.c.bf16 %v1706_v23, %v1704_v21  ;;  %v4147_v21 = vld [vmem:[%s5610_s5 + $0x38] sm:$0xf0] }
 0x25d   : > { %v1725_v24 = vpop.f32.mrf.mxu2 }
 0x25e   : > { %3968 = vst.msk [vmem:[%s4925_s13 + $0x88] sm:$0xff] %vm1793_vm2, %v1725_v24  ;;  %v1750_v33 = vpack.c.bf16 %v1725_v24, %v1723_v22  ;;  %v3690_v22 = vor.u32 %v4147_v21, %v3689_v20  ;;  %v4187_v24 = vld [vmem:[%s5610_s5 + $0x178] sm:$0xf0]  ;;  %v3757_v21 = vld [vmem:[%s5610_s5 + $0xa8] sm:$0xf] }
 0x25f   : > { %v1709_v25 = vpop.f32.mrf.mxu1 }
 0x260   : > { %2768 = vst.msk [vmem:[%s4925_s13 + $0x10] sm:$0xff] %vm1793_vm2, %v1709_v25  ;;  %2826 = vrot.lane.b32.xlu2 %v1706_v23, %s4339_s14  ;;  %2828 = vrot.lane.b32.xlu0 %v1709_v25, %s4339_s14 }
 0x261   : > { %2794 = vrot.lane.b32.xlu1 %v1709_v25, %s4340_s15  ;;  %2282 = vmatpush.bf16.msra.mxu1 %v3690_v22  ;;  %v4163_v22 = vld [vmem:[%s5610_s5 + $0xb8] sm:$0xf0] }
 0x265   : > { %v1728_v26 = vpop.f32.mrf.mxu2 }
 0x266   : > { %3969 = vst.msk [vmem:[%s4925_s13 + $0x90] sm:$0xff] %vm1793_vm2, %v1728_v26 }
 0x267   : > { %v1711_v27 = vpop.f32.mrf.mxu1 }
 0x268   : > { %2769 = vst.msk [vmem:[%s4925_s13 + $0x18] sm:$0xff] %vm1793_vm2, %v1711_v27  ;;  %2860 = vrot.lane.b32.xlu0 %v1706_v23, %s4341_s17  ;;  %2864 = vrot.lane.b32.xlu2 %v1711_v27, %s4341_s17  ;;  %v1751_v28 = vpack.c.bf16 %v1711_v27, %v1709_v25  ;;  %v3849_v23 = vld [vmem:[%s5610_s5 + $0x168] sm:$0xf] }
 0x269   : > { %2796 = vrot.lane.b32.xlu1 %v1711_v27, %s4340_s15  ;;  %s2934_s15 = sshll.u32 %s2931_s21, 4  ;;  %s2935_s15 = int_to_ptr.hbm [resolvable:$true] %s2934_s15 }
 0x26a   : > { %1824 = vmatpush.bf16.msrb.mxu3 %v1751_v28  ;;  %v4185_v28 = vld [vmem:[%s5610_s5 + $0x16c] sm:$0xf]  ;;  %s4257_s18 = sshra.s32 %s2935_s15, 4  ;;  %s4258_s18 = int_to_ptr.hbm [resolvable:$true] %s4257_s18 }
 0x26b   : > { %s4259_s16 = scalar_lea.hbm %s4258_s18, 160  ;;  %p4264_p0 = scmp.lt.s32.totalorder %s4258_s18, %s5611_s6 }
 0x26c   : > { %p4260_p11 = scmp.ne.s32.totalorder %s4258_s18, %s4259_s16  ;;  %p4265_p1 = scmp.lt.s32.totalorder %s4263_s0, %s4259_s16 }
 0x26d   : > { %v1730_v30 = vpop.f32.mrf.mxu2 }
 0x26e   : > { %v1752_v32 = vpack.c.bf16 %v1730_v30, %v1728_v26  ;;  %3970 = vst.msk [vmem:[%s4925_s13 + $0x98] sm:$0xff] %vm1793_vm2, %v1730_v30  ;;  %1825 = vmatpush.bf16.msrb.mxu3 %v1749_v29  ;;  %v3850_v26 = vor.u32 %v4187_v24, %v3849_v23  ;;  %v3851_v29 = vld [vmem:[%s5610_s5 + $0x17c] sm:$0xf0]  ;;  %v3758_v23 = vor.u32 %v4163_v22, %v3757_v21  ;;  %p4261_p12 = pnand %p4260_p11, %p4422_p5  ;;  %p4266_p2 = por %p4265_p1, %p4264_p0 }
 0x26f   : > { %v3679_v22 = vld [vmem:[%s5610_s5 + $0x1c] sm:$0xf0] }
 0x270   : > { %1873 = vmatpush.bf16.msrb.mxu0 %v1752_v32  ;;  %2331 = vmatpush.bf16.msrb.mxu2 %v3850_v26  ;;  %v3837_v26 = vld [vmem:[%s5610_s5 + $0x148] sm:$0xf]  ;;  %p4262_p13 = pneg %p4261_p12 }
 0x271   : > { %2830 = vrot.lane.b32.xlu1 %v1711_v27, %s4339_s14  ;;  %3651 = vmatmul.msk.bf16.vlgmr.msrb.gmra.mxu3 %vm1793_vm2, %v4132_v31  ;;  %v3691_v27 = vld [vmem:[%s5610_s5 + $0x3c] sm:$0xf0]  ;;  %s2932_s14 = sshll.u32 %s4925_s13, 4  ;;  %s2933_s14 = int_to_ptr.vmem [resolvable:$true] %s2932_s14 }
 0x272   : > { %2374 = vmatpush.bf16.msra.mxu3 %v3814_v47  ;;  %p4267_p3 = pnand %p4266_p2, %p4262_p13 }
 0x274   : > { %1874 = vmatpush.bf16.msrb.mxu0 %v1750_v33  ;;  %v3669_v33 = vld [vmem:[%s5610_s5] sm:$0xf] }
 0x276   : > { %2375 = vmatpush.bf16.msra.mxu3 %v3794_v55 }
 0x277   : > { %3659 = vmatmul.msk.bf16.vlgmr.msrb.gmra.mxu0 %vm1793_vm2, %v4132_v31  ;;  %v3854_v31 = vor.u32 %v4185_v28, %v3851_v29 }
 0x279   : > { %2862 = vrot.lane.b32.xlu1 %v1709_v25, %s4341_s17  ;;  %v4145_v25 = vld [vmem:[%s5610_s5 + $0x2c] sm:$0xf]  ;;  %2429 = vmatpush.bf16.msra.mxu0 %v3854_v31  ;;  %s2915_s17 = scalar_lea.sflag [#allocation3], %s4922_s8 }
 0x27a   : > { %2376 = vmatpush.bf16.msra.mxu3 %v3774_v61  ;;  %v3694_v30 = vor.u32 %v4145_v25, %v3691_v27  ;;  %v4183_v27 = vld [vmem:[%s5610_s5 + $0x158] sm:$0xf0] }
 0x27b   : > { %v3838_v28 = vor.u32 %v4183_v27, %v3837_v26 }
 0x27d   : > { %2430 = vmatpush.bf16.msra.mxu0 %v3834_v46 }
 0x27e   : > { %2377 = vmatpush.bf16.msra.mxu3 %v3754_v4  ;;  %v4173_v4 = vld [vmem:[%s5610_s5 + $0x108] sm:$0xf0] }
 0x27f   : > { %v3798_v5 = vor.u32 %v4173_v4, %v3797_v3  ;;  %v4148_v4 = vld [vmem:[%s5610_s5 + $0x40] sm:$0xf0] }
 0x281   : > { %3652 = vmatmul.msk.bf16.gmra.mxu3 %vm1793_vm2, %v4133_v34 }
 0x282   : > { %2378 = vmatpush.bf16.msra.mxu3 %v3734_v11 }
 0x286   : > { %2379 = vmatpush.bf16.msra.mxu3 %v3714_v19 }
 0x287   : > { %3660 = vmatmul.msk.bf16.gmra.mxu0 %vm1793_vm2, %v4133_v34  ;;  %v4142_v34 = vld [vmem:[%s5610_s5 + $0x10] sm:$0xf0] }
 0x28a   : > { %2380 = vmatpush.bf16.msra.mxu3 %v3694_v30 }
 0x291   : > { %3653 = vmatmul.msk.bf16.gmra.mxu3 %vm1793_vm2, %v4134_v35 }
 0x297   : > { %3661 = vmatmul.msk.bf16.gmra.mxu0 %vm1793_vm2, %v4134_v35  ;;  %v3829_v35 = vld [vmem:[%s5610_s5 + $0x140] sm:$0xf] }
 0x2a1   : > { %3654 = vmatmul.msk.bf16.gmra.mxu3 %vm1793_vm2, %v4135_v36 }
 0x2a7   : > { %3662 = vmatmul.msk.bf16.gmra.mxu0 %vm1793_vm2, %v4135_v36 }
 0x2aa   : > { %v2825_v37 = vpop.permute.xlu2 %2824 }
 0x2ab   : > { %3927 = vst.msk [vmem:[%s4925_s13 + $0x40] sm:$0xff] %vm1793_vm2, %v2825_v37  ;;  %v3670_v37 = vor.u32 %v4142_v34, %v3669_v33  ;;  %v3737_v33 = vld [vmem:[%s5610_s5 + $0x80] sm:$0xf]  ;;  %v4158_v34 = vld [vmem:[%s5610_s5 + $0x90] sm:$0xf0] }
 0x2ad   : > { %2283 = vmatpush.bf16.msra.mxu1 %v3670_v37  ;;  %v3819_v37 = vld [vmem:[%s5610_s5 + $0x134] sm:$0xf0] }
 0x2b1   : > { %3655 = vmatmul.msk.bf16.gmra.mxu3 %vm1793_vm2, %v4136_v38  ;;  %2472 = vmatpush.bf16.msrb.mxu1 %v3818_v60  ;;  %v3739_v60 = vld [vmem:[%s5610_s5 + $0x94] sm:$0xf0] }
 0x2b2   : > { %v2859_v39 = vpop.permute.xlu2 %2858 }
 0x2b3   : > { %3947 = vst.msk [vmem:[%s4925_s13 + $0x60] sm:$0xff] %vm1793_vm2, %v2859_v39  ;;  %v4140_v39 = vld [vmem:[%s5610_s5 + $0x4] sm:$0xf] }
 0x2b5   : > { %2473 = vmatpush.bf16.msrb.mxu1 %v3798_v5  ;;  %v4146_v5 = vld [vmem:[%s5610_s5 + $0x34] sm:$0xf] }
 0x2b7   : > { %3663 = vmatmul.msk.bf16.gmra.mxu0 %vm1793_vm2, %v4136_v38  ;;  %v4182_v38 = vld [vmem:[%s5610_s5 + $0x150] sm:$0xf0] }
 0x2ba   : > { %v2827_v40 = vpop.permute.xlu2 %2826 }
 0x2bb   : > { %3928 = vst.msk [vmem:[%s4925_s13 + $0x48] sm:$0xff] %vm1793_vm2, %v2827_v40  ;;  %v3830_v40 = vor.u32 %v4182_v38, %v3829_v35  ;;  %v3738_v35 = vor.u32 %v4158_v34, %v3737_v33 }
 0x2bd   : > { %2332 = vmatpush.bf16.msrb.mxu2 %v3830_v40  ;;  %v3799_v40 = vld [vmem:[%s5610_s5 + $0x10c] sm:$0xf0] }
 0x2c1   : > { %3656 = vmatmul.msk.bf16.gmra.mxu3 %vm1793_vm2, %v4137_v44  ;;  %2527 = vmatpush.bf16.msra.mxu2 %v3858_v53 }
 0x2c2   : > { %v2791_v48 = vpop.permute.xlu0 %2790  ;;  %v2865_v49 = vpop.permute.xlu2 %2864 }
 0x2c3   : > { %3907 = vst.msk [vmem:[%s4925_s13 + $0x20] sm:$0xff] %vm1793_vm2, %v2791_v48 }
 0x2c4   : > { %3950 = vst.msk [vmem:[%s4925_s13 + $0x78] sm:$0xff] %vm1793_vm2, %v2865_v49 }
 0x2c5   : > { %2528 = vmatpush.bf16.msra.mxu2 %v3838_v28 }
 0x2c7   : > { %3664 = vmatmul.msk.bf16.gmra.mxu0 %vm1793_vm2, %v4137_v44  ;;  %v3674_v44 = vor.u32 %v4140_v39, %v3671_v41  ;;  %v4171_v39 = vld [vmem:[%s5610_s5 + $0xfc] sm:$0xf] }
 0x2c8   : > { %v3802_v41 = vor.u32 %v4171_v39, %v3799_v40  ;;  %v3865_v39 = vld [vmem:[%s5610_s5 + $0x178] sm:$0xf]  ;;  %v4189_v40 = vld [vmem:[%s5610_s5 + $0x188] sm:$0xf0] }
 0x2c9   : > { %2381 = vmatpush.bf16.msra.mxu3 %v3674_v44  ;;  %v4166_v44 = vld [vmem:[%s5610_s5 + $0xd4] sm:$0xf] }
 0x2ca   : > { %v2793_v62 = vpop.permute.xlu0 %2792  ;;  %v3782_v46 = vor.u32 %v4166_v44, %v3779_v45  ;;  %v3825_v44 = vld [vmem:[%s5610_s5 + $0x128] sm:$0xf]  ;;  %v4179_v45 = vld [vmem:[%s5610_s5 + $0x138] sm:$0xf0] }
 0x2cb   : > { %3908 = vst.msk [vmem:[%s4925_s13 + $0x28] sm:$0xff] %vm1793_vm2, %v2793_v62 }
 0x2d1   : > { %3657 = vmatmul.msk.bf16.gmra.mxu3 %vm1793_vm2, %v4138_v8 }
 0x2d2   : > { %v2829_v12 = vpop.permute.xlu0 %2828 }
 0x2d3   : > { %3929 = vst.msk [vmem:[%s4925_s13 + $0x50] sm:$0xff] %vm1793_vm2, %v2829_v12  ;;  %v2795_v16 = vpop.permute.xlu1 %2794  ;;  %v3777_v12 = vld [vmem:[%s5610_s5 + $0xd0] sm:$0xf] }
 0x2d4   : > { %3909 = vst.msk [vmem:[%s4925_s13 + $0x30] sm:$0xff] %vm1793_vm2, %v2795_v16  ;;  %v3778_v14 = vor.u32 %v4168_v13, %v3777_v12 }
 0x2d6   : > { %2474 = vmatpush.bf16.msrb.mxu1 %v3778_v14 }
 0x2d7   : > { %3665 = vmatmul.msk.bf16.gmra.mxu0 %vm1793_vm2, %v4138_v8 }
 0x2da   : > { %v2861_v32 = vpop.permute.xlu0 %2860  ;;  %2475 = vmatpush.bf16.msrb.mxu1 %v3758_v23  ;;  %v4181_v23 = vld [vmem:[%s5610_s5 + $0x14c] sm:$0xf] }
 0x2db   : > { %3948 = vst.msk [vmem:[%s4925_s13 + $0x68] sm:$0xff] %vm1793_vm2, %v2861_v32  ;;  %v2797_v36 = vpop.permute.xlu1 %2796 }
 0x2dc   : > { %3910 = vst.msk [vmem:[%s4925_s13 + $0x38] sm:$0xff] %vm1793_vm2, %v2797_v36  ;;  %v4176_v36 = vld [vmem:[%s5610_s5 + $0x124] sm:$0xf] }
 0x2dd   : > { %v3822_v38 = vor.u32 %v4176_v36, %v3819_v37 }
 0x2de   : > { %2476 = vmatpush.bf16.msrb.mxu1 %v3738_v35 }
 0x2df   : > { %2570 = vmatpush.bf16.msrb.mxu3 %v3822_v38 }
 0x2e1   : > { %3658 = vmatmul.msk.bf16.gmra.mxu3 %vm1793_vm2, %v4139_v43 }
 0x2e3   : > { %v2831_v47 = vpop.permute.xlu1 %2830  ;;  %2571 = vmatpush.bf16.msrb.mxu3 %v3802_v41  ;;  %v3866_v41 = vor.u32 %v4189_v40, %v3865_v39 }
 0x2e4   : > { %3930 = vst.msk [vmem:[%s4925_s13 + $0x58] sm:$0xff] %vm1793_vm2, %v2831_v47  ;;  %v4161_v47 = vld [vmem:[%s5610_s5 + $0xac] sm:$0xf] }
 0x2e7   : > { %3666 = vmatmul.msk.bf16.gmra.mxu0 %vm1793_vm2, %v4139_v43  ;;  %2572 = vmatpush.bf16.msrb.mxu3 %v3782_v46  ;;  %v3826_v46 = vor.u32 %v4179_v45, %v3825_v44 }
 0x2eb   : > { %v2863_v48 = vpop.permute.xlu1 %2862 }
 0x2ec   : > { %3949 = vst.msk [vmem:[%s4925_s13 + $0x70] sm:$0xff] %vm1793_vm2, %v2863_v48  ;;  %v3759_v48 = vld [vmem:[%s5610_s5 + $0xbc] sm:$0xf0] }
 0x2f4   : > { %v1827_v49 = vpop.f32.mrf.mxu3  ;;  %v1876_v50 = vpop.f32.mrf.mxu0 }
 0x2fc   : > { %v1829_v54 = vpop.f32.mrf.mxu3  ;;  %v1878_v55 = vpop.f32.mrf.mxu0 }
 0x2fd   : > { %v5141_v56 = vpack.c.bf16 %v1829_v54, %v1827_v49  ;;  %v5143_v57 = vpack.c.bf16 %v1878_v55, %v1876_v50  ;;  %v3762_v49 = vor.u32 %v4161_v47, %v3759_v48  ;;  %v3717_v54 = vld [vmem:[%s5610_s5 + $0x58] sm:$0xf]  ;;  %v4153_v55 = vld [vmem:[%s5610_s5 + $0x68] sm:$0xf0] }
 0x2fe   : > { %v3718_v58 = vor.u32 %v4153_v55, %v3717_v54 }
 0x2ff   : > { %2284 = vmatmul.bf16.vlgmr.msra.gmra.mxu1 %v5141_v56  ;;  %3867 = vmatmul.msk.bf16.vlgmr.msrb.gmra.mxu2 %vm1793_vm2, %v5143_v57 }
 0x300   : > { %2382 = vmatmul.bf16.vlgmr.msra.gmra.mxu3 %v5141_v56  ;;  %3875 = vmatmul.msk.bf16.vlgmr.msra.gmra.mxu0 %vm1793_vm2, %v5143_v57 }
 0x301   : > { %2573 = vmatpush.bf16.msrb.mxu3 %v3762_v49  ;;  %2477 = vmatpush.bf16.msrb.mxu1 %v3718_v58 }
 0x302   : > { %2723 = vmatpush.bf16.msrb.mxu2 %v3866_v41  ;;  %v3765_v41 = vld [vmem:[%s5610_s5 + $0xb0] sm:$0xf] }
 0x304   : > { %v1832_v61 = vpop.f32.mrf.mxu3  ;;  %v1881_v62 = vpop.f32.mrf.mxu0 }
 0x30c   : > { %v1834_v63 = vpop.f32.mrf.mxu3  ;;  %v1883_v0 = vpop.f32.mrf.mxu0 }
 0x30d   : > { %v5157_v1 = vpack.c.bf16 %v1834_v63, %v1832_v61  ;;  %v5159_v2 = vpack.c.bf16 %v1883_v0, %v1881_v62  ;;  %v3742_v61 = vor.u32 %v4156_v59, %v3739_v60  ;;  %v4151_v62 = vld [vmem:[%s5610_s5 + $0x5c] sm:$0xf]  ;;  %v3719_v63 = vld [vmem:[%s5610_s5 + $0x6c] sm:$0xf0] }
 0x30e   : > { %v3697_v0 = vld [vmem:[%s5610_s5 + $0x30] sm:$0xf]  ;;  %v3722_v3 = vor.u32 %v4151_v62, %v3719_v63  ;;  %v3805_v63 = vld [vmem:[%s5610_s5 + $0x100] sm:$0xf] }
 0x30f   : > { %2289 = vmatmul.bf16.gmra.mxu1 %v5157_v1  ;;  %3868 = vmatmul.msk.bf16.gmra.mxu2 %vm1793_vm2, %v5159_v2 }
 0x310   : > { %2387 = vmatmul.bf16.gmra.mxu3 %v5157_v1  ;;  %3876 = vmatmul.msk.bf16.gmra.mxu0 %vm1793_vm2, %v5159_v2 }
 0x311   : > { %2574 = vmatpush.bf16.msrb.mxu3 %v3742_v61 }
 0x314   : > { %v1837_v6 = vpop.f32.mrf.mxu3  ;;  %v1886_v7 = vpop.f32.mrf.mxu0 }
 0x315   : > { %2575 = vmatpush.bf16.msrb.mxu3 %v3722_v3 }
 0x31c   : > { %v1839_v8 = vpop.f32.mrf.mxu3  ;;  %v1888_v9 = vpop.f32.mrf.mxu0 }
 0x31d   : > { %v5173_v10 = vpack.c.bf16 %v1839_v8, %v1837_v6  ;;  %v5175_v11 = vpack.c.bf16 %v1888_v9, %v1886_v7  ;;  %v3698_v6 = vor.u32 %v4148_v4, %v3697_v0  ;;  %v3699_v7 = vld [vmem:[%s5610_s5 + $0x44] sm:$0xf0]  ;;  %v4186_v8 = vld [vmem:[%s5610_s5 + $0x174] sm:$0xf] }
 0x31e   : > { %v3859_v9 = vld [vmem:[%s5610_s5 + $0x184] sm:$0xf0]  ;;  %v4174_v0 = vld [vmem:[%s5610_s5 + $0x110] sm:$0xf0] }
 0x31f   : > { %2294 = vmatmul.bf16.gmra.mxu1 %v5173_v10  ;;  %3869 = vmatmul.msk.bf16.gmra.mxu2 %vm1793_vm2, %v5175_v11  ;;  %v3862_v12 = vor.u32 %v4186_v8, %v3859_v9  ;;  %v3806_v3 = vor.u32 %v4174_v0, %v3805_v63  ;;  %v3745_v63 = vld [vmem:[%s5610_s5 + $0x88] sm:$0xf]  ;;  %v4159_v0 = vld [vmem:[%s5610_s5 + $0x98] sm:$0xf0] }
 0x320   : > { %2392 = vmatmul.bf16.gmra.mxu3 %v5173_v10  ;;  %3877 = vmatmul.msk.bf16.gmra.mxu0 %vm1793_vm2, %v5175_v11 }
 0x321   : > { %2478 = vmatpush.bf16.msrb.mxu1 %v3698_v6  ;;  %2625 = vmatpush.bf16.msrb.mxu0 %v3862_v12 }
 0x324   : > { %v1842_v15 = vpop.f32.mrf.mxu3  ;;  %v1891_v16 = vpop.f32.mrf.mxu0 }
 0x32c   : > { %v1844_v17 = vpop.f32.mrf.mxu3  ;;  %v1893_v18 = vpop.f32.mrf.mxu0 }
 0x32d   : > { %v5189_v19 = vpack.c.bf16 %v1844_v17, %v1842_v15  ;;  %v5191_v20 = vpack.c.bf16 %v1893_v18, %v1891_v16  ;;  %v3702_v15 = vor.u32 %v4146_v5, %v3699_v7  ;;  %v3677_v16 = vld [vmem:[%s5610_s5 + $0x8] sm:$0xf]  ;;  %v4143_v17 = vld [vmem:[%s5610_s5 + $0x18] sm:$0xf0]  ;;  %v4141_v18 = vld [vmem:[%s5610_s5 + $0xc] sm:$0xf] }
 0x32e   : > { %v3678_v21 = vor.u32 %v4143_v17, %v3677_v16  ;;  %v3682_v27 = vor.u32 %v4141_v18, %v3679_v22  ;;  %v3785_v18 = vld [vmem:[%s5610_s5 + $0xd8] sm:$0xf] }
 0x32f   : > { %2299 = vmatmul.bf16.gmra.mxu1 %v5189_v19  ;;  %3870 = vmatmul.msk.bf16.gmra.mxu2 %vm1793_vm2, %v5191_v20 }
 0x330   : > { %2397 = vmatmul.bf16.gmra.mxu3 %v5189_v19  ;;  %3878 = vmatmul.msk.bf16.gmra.mxu0 %vm1793_vm2, %v5191_v20 }
 0x331   : > { %2576 = vmatpush.bf16.msrb.mxu3 %v3702_v15  ;;  %2479 = vmatpush.bf16.msrb.mxu1 %v3678_v21  ;;  %v4169_v21 = vld [vmem:[%s5610_s5 + $0xe8] sm:$0xf0] }
 0x332   : > { %v3786_v22 = vor.u32 %v4169_v21, %v3785_v18  ;;  %v3725_v18 = vld [vmem:[%s5610_s5 + $0x60] sm:$0xf]  ;;  %v4154_v21 = vld [vmem:[%s5610_s5 + $0x70] sm:$0xf0] }
 0x334   : > { %v1847_v24 = vpop.f32.mrf.mxu3  ;;  %v1896_v25 = vpop.f32.mrf.mxu0 }
 0x335   : > { %2577 = vmatpush.bf16.msrb.mxu3 %v3682_v27  ;;  %2668 = vmatpush.bf16.msra.mxu1 %v3826_v46 }
 0x339   : > { %2669 = vmatpush.bf16.msra.mxu1 %v3806_v3  ;;  %v3746_v3 = vor.u32 %v4159_v0, %v3745_v63 }
 0x33c   : > { %v1849_v29 = vpop.f32.mrf.mxu3  ;;  %v1898_v30 = vpop.f32.mrf.mxu0 }
 0x33d   : > { %v5211_v31 = vpack.c.bf16 %v1849_v29, %v1847_v24  ;;  %v5213_v32 = vpack.c.bf16 %v1898_v30, %v1896_v25  ;;  %v3839_v24 = vld [vmem:[%s5610_s5 + $0x15c] sm:$0xf0]  ;;  %2670 = vmatpush.bf16.msra.mxu1 %v3786_v22  ;;  %v3726_v22 = vor.u32 %v4154_v21, %v3725_v18 }
 0x33e   : > { %v3842_v28 = vor.u32 %v4181_v23, %v3839_v24 }
 0x33f   : > { %2304 = vmatmul.bf16.gmra.mxu1 %v5211_v31  ;;  %3871 = vmatmul.msk.bf16.gmra.mxu2 %vm1793_vm2, %v5213_v32 }
 0x340   : > { %2402 = vmatmul.bf16.gmra.mxu3 %v5211_v31  ;;  %3879 = vmatmul.msk.bf16.gmra.mxu0 %vm1793_vm2, %v5213_v32 }
 0x341   : > { %2626 = vmatpush.bf16.msrb.mxu0 %v3842_v28 }
 0x344   : > { %v1852_v42 = vpop.f32.mrf.mxu3  ;;  %v1901_v43 = vpop.f32.mrf.mxu0 }
 0x34c   : > { %v1854_v50 = vpop.f32.mrf.mxu3  ;;  %v1903_v51 = vpop.f32.mrf.mxu0 }
 0x34d   : > { %v5251_v52 = vpack.c.bf16 %v1854_v50, %v1852_v42  ;;  %v5253_v53 = vpack.c.bf16 %v1903_v51, %v1901_v43 }
 0x34f   : > { %2309 = vmatmul.bf16.gmra.mxu1 %v5251_v52  ;;  %3872 = vmatmul.msk.bf16.gmra.mxu2 %vm1793_vm2, %v5253_v53 }
 0x350   : > { %2407 = vmatmul.bf16.gmra.mxu3 %v5251_v52  ;;  %3880 = vmatmul.msk.bf16.gmra.mxu0 %vm1793_vm2, %v5253_v53 }
 0x354   : > { %v1857_v13 = vpop.f32.mrf.mxu3  ;;  %v1906_v14 = vpop.f32.mrf.mxu0 }
 0x35c   : > { %v1859_v25 = vpop.f32.mrf.mxu3  ;;  %v1908_v26 = vpop.f32.mrf.mxu0 }
 0x35d   : > { %v5315_v29 = vpack.c.bf16 %v1859_v25, %v1857_v13  ;;  %v5317_v30 = vpack.c.bf16 %v1908_v26, %v1906_v14 }
 0x35f   : > { %2314 = vmatmul.bf16.gmra.mxu1 %v5315_v29  ;;  %3873 = vmatmul.msk.bf16.gmra.mxu2 %vm1793_vm2, %v5317_v30 }
 0x360   : > { %2412 = vmatmul.bf16.gmra.mxu3 %v5315_v29  ;;  %3881 = vmatmul.msk.bf16.gmra.mxu0 %vm1793_vm2, %v5317_v30 }
 0x364   : > { %v1862_v33 = vpop.f32.mrf.mxu3  ;;  %v1911_v34 = vpop.f32.mrf.mxu0 }
 0x36c   : > { %v1864_v35 = vpop.f32.mrf.mxu3  ;;  %v1913_v36 = vpop.f32.mrf.mxu0 }
 0x36d   : > { %v5325_v37 = vpack.c.bf16 %v1864_v35, %v1862_v33  ;;  %v5327_v38 = vpack.c.bf16 %v1913_v36, %v1911_v34 }
 0x36f   : > { %2319 = vmatmul.bf16.gmra.mxu1 %v5325_v37  ;;  %3874 = vmatmul.msk.bf16.gmra.mxu2 %vm1793_vm2, %v5327_v38 }
 0x370   : > { %2417 = vmatmul.bf16.gmra.mxu3 %v5325_v37  ;;  %3882 = vmatmul.msk.bf16.gmra.mxu0 %vm1793_vm2, %v5327_v38 }
 0x37c   : > { %v2285_v42 = vpop.f32.mrf.mxu1 }
 0x37d   : > { %v2432_v43 = vpop.f32.mrf.mxu0 }
 0x37f   : > { %2480 = vmatmul.bf16.vlgmr.msrb.gmra.mxu1 %v5141_v56  ;;  %3883 = vmatmul.msk.bf16.vlgmr.msra.gmra.mxu2 %vm1793_vm2, %v5143_v57 }
 0x380   : > { %2578 = vmatmul.bf16.vlgmr.msrb.gmra.mxu3 %v5141_v56  ;;  %3891 = vmatmul.msk.bf16.vlgmr.msrb.gmra.mxu0 %vm1793_vm2, %v5143_v57 }
 0x382   : > { %v2334_v47 = vpop.f32.mrf.mxu2 }
 0x383   : > { %v2335_v48 = vadd.f32 %v2334_v47, %v2285_v42  ;;  %v2383_v49 = vpop.f32.mrf.mxu3  ;;  %v4164_v42 = vld [vmem:[%s5610_s5 + $0xc0] sm:$0xf0] }
 0x384   : > { %v2433_v50 = vadd.f32 %v2432_v43, %v2383_v49  ;;  %v2287_v51 = vpop.f32.mrf.mxu1  ;;  %v3766_v43 = vor.u32 %v4164_v42, %v3765_v41 }
 0x385   : > { %2770 = vst [vmem:[%s5354_s23] sm:$0xff] %v2335_v48  ;;  %v2434_v54 = vpop.f32.mrf.mxu0 }
 0x386   : > { %3911 = vst [vmem:[%s5354_s23 + $0x80] sm:$0xff] %v2433_v50  ;;  %2671 = vmatpush.bf16.msra.mxu1 %v3766_v43  ;;  %v3845_v50 = vld [vmem:[%s5610_s5 + $0x150] sm:$0xf] }
 0x38a   : > { %v2336_v55 = vpop.f32.mrf.mxu2  ;;  %2672 = vmatpush.bf16.msra.mxu1 %v3746_v3 }
 0x38b   : > { %v2337_v58 = vadd.f32 %v2336_v55, %v2287_v51  ;;  %v2385_v59 = vpop.f32.mrf.mxu3  ;;  %v4184_v51 = vld [vmem:[%s5610_s5 + $0x160] sm:$0xf0] }
 0x38c   : > { %v2435_v60 = vadd.f32 %v2434_v54, %v2385_v59  ;;  %v2290_v61 = vpop.f32.mrf.mxu1  ;;  %v3846_v54 = vor.u32 %v4184_v51, %v3845_v50 }
 0x38d   : > { %2771 = vst [vmem:[%s5354_s23 + $0x8] sm:$0xff] %v2337_v58  ;;  %v2437_v62 = vpop.f32.mrf.mxu0 }
 0x38e   : > { %3912 = vst [vmem:[%s5354_s23 + $0x88] sm:$0xff] %v2435_v60  ;;  %2724 = vmatpush.bf16.msrb.mxu2 %v3846_v54  ;;  %2673 = vmatpush.bf16.msra.mxu1 %v3726_v22 }
 0x38f   : > { %2485 = vmatmul.bf16.gmra.mxu1 %v5157_v1  ;;  %3884 = vmatmul.msk.bf16.gmra.mxu2 %vm1793_vm2, %v5159_v2 }
 0x390   : > { %2583 = vmatmul.bf16.gmra.mxu3 %v5157_v1  ;;  %3892 = vmatmul.msk.bf16.gmra.mxu0 %vm1793_vm2, %v5159_v2 }
 0x392   : > { %v2339_v4 = vpop.f32.mrf.mxu2 }
 0x393   : > { %v2340_v5 = vadd.f32 %v2339_v4, %v2290_v61  ;;  %v2388_v6 = vpop.f32.mrf.mxu3 }
 0x394   : > { %v2438_v7 = vadd.f32 %v2437_v62, %v2388_v6  ;;  %v2292_v8 = vpop.f32.mrf.mxu1 }
 0x395   : > { %2772 = vst [vmem:[%s5354_s23 + $0x10] sm:$0xff] %v2340_v5  ;;  %v2439_v9 = vpop.f32.mrf.mxu0 }
 0x396   : > { %3913 = vst [vmem:[%s5354_s23 + $0x90] sm:$0xff] %v2438_v7 }
 0x39a   : > { %v2341_v12 = vpop.f32.mrf.mxu2 }
 0x39b   : > { %v2342_v13 = vadd.f32 %v2341_v12, %v2292_v8  ;;  %v2390_v14 = vpop.f32.mrf.mxu3 }
 0x39c   : > { %v2440_v15 = vadd.f32 %v2439_v9, %v2390_v14  ;;  %v2295_v16 = vpop.f32.mrf.mxu1 }
 0x39d   : > { %2773 = vst [vmem:[%s5354_s23 + $0x18] sm:$0xff] %v2342_v13  ;;  %v2442_v17 = vpop.f32.mrf.mxu0 }
 0x39e   : > { %3914 = vst [vmem:[%s5354_s23 + $0x98] sm:$0xff] %v2440_v15 }
 0x39f   : > { %2490 = vmatmul.bf16.gmra.mxu1 %v5173_v10  ;;  %3885 = vmatmul.msk.bf16.gmra.mxu2 %vm1793_vm2, %v5175_v11 }
 0x3a0   : > { %2588 = vmatmul.bf16.gmra.mxu3 %v5173_v10  ;;  %3893 = vmatmul.msk.bf16.gmra.mxu0 %vm1793_vm2, %v5175_v11 }
 0x3a2   : > { %v2344_v23 = vpop.f32.mrf.mxu2 }
 0x3a3   : > { %v2345_v24 = vadd.f32 %v2344_v23, %v2295_v16  ;;  %v2393_v25 = vpop.f32.mrf.mxu3 }
 0x3a4   : > { %v2443_v26 = vadd.f32 %v2442_v17, %v2393_v25  ;;  %v2297_v27 = vpop.f32.mrf.mxu1 }
 0x3a5   : > { %2774 = vst [vmem:[%s5354_s23 + $0x20] sm:$0xff] %v2345_v24  ;;  %v2444_v28 = vpop.f32.mrf.mxu0 }
 0x3a6   : > { %3915 = vst [vmem:[%s5354_s23 + $0xa0] sm:$0xff] %v2443_v26 }
 0x3aa   : > { %v2346_v33 = vpop.f32.mrf.mxu2 }
 0x3ab   : > { %v2347_v34 = vadd.f32 %v2346_v33, %v2297_v27  ;;  %v2395_v35 = vpop.f32.mrf.mxu3  ;;  %v3705_v33 = vld [vmem:[%s5610_s5 + $0x38] sm:$0xf] }
 0x3ac   : > { %v2445_v36 = vadd.f32 %v2444_v28, %v2395_v35  ;;  %v2300_v39 = vpop.f32.mrf.mxu1 }
 0x3ad   : > { %2775 = vst [vmem:[%s5354_s23 + $0x28] sm:$0xff] %v2347_v34  ;;  %v2447_v40 = vpop.f32.mrf.mxu0  ;;  %v4149_v34 = vld [vmem:[%s5610_s5 + $0x48] sm:$0xf0] }
 0x3ae   : > { %3916 = vst [vmem:[%s5354_s23 + $0xa8] sm:$0xff] %v2445_v36  ;;  %v3706_v35 = vor.u32 %v4149_v34, %v3705_v33 }
 0x3af   : > { %2495 = vmatmul.bf16.gmra.mxu1 %v5189_v19  ;;  %3886 = vmatmul.msk.bf16.gmra.mxu2 %vm1793_vm2, %v5191_v20 }
 0x3b0   : > { %2593 = vmatmul.bf16.gmra.mxu3 %v5189_v19  ;;  %3894 = vmatmul.msk.bf16.gmra.mxu0 %vm1793_vm2, %v5191_v20 }
 0x3b1   : > { %2674 = vmatpush.bf16.msra.mxu1 %v3706_v35 }
 0x3b2   : > { %v2349_v44 = vpop.f32.mrf.mxu2 }
 0x3b3   : > { %v2350_v45 = vadd.f32 %v2349_v44, %v2300_v39  ;;  %v2398_v46 = vpop.f32.mrf.mxu3  ;;  %v3685_v39 = vld [vmem:[%s5610_s5 + $0x10] sm:$0xf] }
 0x3b4   : > { %v2448_v47 = vadd.f32 %v2447_v40, %v2398_v46  ;;  %v2302_v48 = vpop.f32.mrf.mxu1  ;;  %v4144_v40 = vld [vmem:[%s5610_s5 + $0x20] sm:$0xf0] }
 0x3b5   : > { %2776 = vst [vmem:[%s5354_s23 + $0x30] sm:$0xff] %v2350_v45  ;;  %v2449_v49 = vpop.f32.mrf.mxu0  ;;  %v3686_v43 = vor.u32 %v4144_v40, %v3685_v39 }
 0x3b6   : > { %3917 = vst [vmem:[%s5354_s23 + $0xb0] sm:$0xff] %v2448_v47 }
 0x3b7   : > { %2675 = vmatpush.bf16.msra.mxu1 %v3686_v43 }
 0x3ba   : > { %v2351_v55 = vpop.f32.mrf.mxu2 }
 0x3bb   : > { %v2352_v58 = vadd.f32 %v2351_v55, %v2302_v48  ;;  %v2400_v59 = vpop.f32.mrf.mxu3 }
 0x3bc   : > { %v2450_v60 = vadd.f32 %v2449_v49, %v2400_v59  ;;  %v2305_v61 = vpop.f32.mrf.mxu1 }
 0x3bd   : > { %2777 = vst [vmem:[%s5354_s23 + $0x38] sm:$0xff] %v2352_v58  ;;  %v2452_v62 = vpop.f32.mrf.mxu0 }
 0x3be   : > { %3918 = vst [vmem:[%s5354_s23 + $0xb8] sm:$0xff] %v2450_v60 }
 0x3bf   : > { %2500 = vmatmul.bf16.gmra.mxu1 %v5211_v31  ;;  %3887 = vmatmul.msk.bf16.gmra.mxu2 %vm1793_vm2, %v5213_v32 }
 0x3c0   : > { %2598 = vmatmul.bf16.gmra.mxu3 %v5211_v31  ;;  %3895 = vmatmul.msk.bf16.gmra.mxu0 %vm1793_vm2, %v5213_v32 }
 0x3c2   : > { %v2354_v4 = vpop.f32.mrf.mxu2 }
 0x3c3   : > { %v2355_v5 = vadd.f32 %v2354_v4, %v2305_v61  ;;  %v2403_v6 = vpop.f32.mrf.mxu3 }
 0x3c4   : > { %v2453_v7 = vadd.f32 %v2452_v62, %v2403_v6  ;;  %v2307_v8 = vpop.f32.mrf.mxu1 }
 0x3c5   : > { %2778 = vst [vmem:[%s5354_s23 + $0x40] sm:$0xff] %v2355_v5  ;;  %v2454_v9 = vpop.f32.mrf.mxu0 }
 0x3c6   : > { %3919 = vst [vmem:[%s5354_s23 + $0xc0] sm:$0xff] %v2453_v7 }
 0x3ca   : > { %v2356_v12 = vpop.f32.mrf.mxu2 }
 0x3cb   : > { %v2357_v13 = vadd.f32 %v2356_v12, %v2307_v8  ;;  %v2405_v14 = vpop.f32.mrf.mxu3 }
 0x3cc   : > { %v2455_v15 = vadd.f32 %v2454_v9, %v2405_v14  ;;  %v2310_v16 = vpop.f32.mrf.mxu1 }
 0x3cd   : > { %2779 = vst [vmem:[%s5354_s23 + $0x48] sm:$0xff] %v2357_v13  ;;  %v2457_v17 = vpop.f32.mrf.mxu0 }
 0x3ce   : > { %3920 = vst [vmem:[%s5354_s23 + $0xc8] sm:$0xff] %v2455_v15 }
 0x3cf   : > { %2505 = vmatmul.bf16.gmra.mxu1 %v5251_v52  ;;  %3888 = vmatmul.msk.bf16.gmra.mxu2 %vm1793_vm2, %v5253_v53 }
 0x3d0   : > { %2603 = vmatmul.bf16.gmra.mxu3 %v5251_v52  ;;  %3896 = vmatmul.msk.bf16.gmra.mxu0 %vm1793_vm2, %v5253_v53 }
 0x3d2   : > { %v2359_v23 = vpop.f32.mrf.mxu2 }
 0x3d3   : > { %v2360_v24 = vadd.f32 %v2359_v23, %v2310_v16  ;;  %v2408_v25 = vpop.f32.mrf.mxu3 }
 0x3d4   : > { %v2458_v26 = vadd.f32 %v2457_v17, %v2408_v25  ;;  %v2312_v27 = vpop.f32.mrf.mxu1 }
 0x3d5   : > { %2780 = vst [vmem:[%s5354_s23 + $0x50] sm:$0xff] %v2360_v24  ;;  %v2459_v28 = vpop.f32.mrf.mxu0 }
 0x3d6   : > { %3921 = vst [vmem:[%s5354_s23 + $0xd0] sm:$0xff] %v2458_v26 }
 0x3da   : > { %v2361_v36 = vpop.f32.mrf.mxu2 }
 0x3db   : > { %v2362_v41 = vadd.f32 %v2361_v36, %v2312_v27  ;;  %v2410_v42 = vpop.f32.mrf.mxu3 }
 0x3dc   : > { %v2460_v44 = vadd.f32 %v2459_v28, %v2410_v42  ;;  %v2315_v45 = vpop.f32.mrf.mxu1 }
 0x3dd   : > { %2781 = vst [vmem:[%s5354_s23 + $0x58] sm:$0xff] %v2362_v41  ;;  %v2462_v46 = vpop.f32.mrf.mxu0 }
 0x3de   : > { %3922 = vst [vmem:[%s5354_s23 + $0xd8] sm:$0xff] %v2460_v44 }
 0x3df   : > { %2510 = vmatmul.bf16.gmra.mxu1 %v5315_v29  ;;  %3889 = vmatmul.msk.bf16.gmra.mxu2 %vm1793_vm2, %v5317_v30 }
 0x3e0   : > { %2608 = vmatmul.bf16.gmra.mxu3 %v5315_v29  ;;  %3897 = vmatmul.msk.bf16.gmra.mxu0 %vm1793_vm2, %v5317_v30 }
 0x3e2   : > { %v2364_v47 = vpop.f32.mrf.mxu2 }
 0x3e3   : > { %v2365_v48 = vadd.f32 %v2364_v47, %v2315_v45  ;;  %v2413_v49 = vpop.f32.mrf.mxu3 }
 0x3e4   : > { %v2463_v50 = vadd.f32 %v2462_v46, %v2413_v49  ;;  %v2317_v51 = vpop.f32.mrf.mxu1 }
 0x3e5   : > { %2782 = vst [vmem:[%s5354_s23 + $0x60] sm:$0xff] %v2365_v48  ;;  %v2464_v54 = vpop.f32.mrf.mxu0 }
 0x3e6   : > { %3923 = vst [vmem:[%s5354_s23 + $0xe0] sm:$0xff] %v2463_v50 }
 0x3ea   : > { %v2366_v55 = vpop.f32.mrf.mxu2 }
 0x3eb   : > { %v2367_v58 = vadd.f32 %v2366_v55, %v2317_v51  ;;  %v2415_v59 = vpop.f32.mrf.mxu3 }
 0x3ec   : > { %v2465_v60 = vadd.f32 %v2464_v54, %v2415_v59  ;;  %v2320_v61 = vpop.f32.mrf.mxu1 }
 0x3ed   : > { %2783 = vst [vmem:[%s5354_s23 + $0x68] sm:$0xff] %v2367_v58  ;;  %v2467_v62 = vpop.f32.mrf.mxu0 }
 0x3ee   : > { %3924 = vst [vmem:[%s5354_s23 + $0xe8] sm:$0xff] %v2465_v60 }
 0x3ef   : > { %2515 = vmatmul.bf16.gmra.mxu1 %v5325_v37  ;;  %3890 = vmatmul.msk.bf16.gmra.mxu2 %vm1793_vm2, %v5327_v38 }
 0x3f0   : > { %2613 = vmatmul.bf16.gmra.mxu3 %v5325_v37  ;;  %3898 = vmatmul.msk.bf16.gmra.mxu0 %vm1793_vm2, %v5327_v38 }
 0x3f2   : > { %v2369_v63 = vpop.f32.mrf.mxu2 }
 0x3f3   : > { %v2370_v0 = vadd.f32 %v2369_v63, %v2320_v61  ;;  %v2418_v3 = vpop.f32.mrf.mxu3 }
 0x3f4   : > { %v2468_v4 = vadd.f32 %v2467_v62, %v2418_v3  ;;  %v2322_v5 = vpop.f32.mrf.mxu1 }
 0x3f5   : > { %2784 = vst [vmem:[%s5354_s23 + $0x70] sm:$0xff] %v2370_v0  ;;  %v2469_v6 = vpop.f32.mrf.mxu0 }
 0x3f6   : > { %3925 = vst [vmem:[%s5354_s23 + $0xf0] sm:$0xff] %v2468_v4 }
 0x3fa   : > { %v2371_v7 = vpop.f32.mrf.mxu2 }
 0x3fb   : > { %v2372_v8 = vadd.f32 %v2371_v7, %v2322_v5  ;;  %v2420_v9 = vpop.f32.mrf.mxu3 }
 0x3fc   : > { %v2470_v12 = vadd.f32 %v2469_v6, %v2420_v9  ;;  %v2481_v13 = vpop.f32.mrf.mxu1 }
 0x3fd   : > { %2785 = vst [vmem:[%s5354_s23 + $0x78] sm:$0xff] %v2372_v8  ;;  %v2628_v14 = vpop.f32.mrf.mxu0 }
 0x3fe   : > { %3926 = vst [vmem:[%s5354_s23 + $0xf8] sm:$0xff] %v2470_v12 }
 0x3ff   : > { %2676 = vmatmul.bf16.vlgmr.msra.gmra.mxu1 %v5141_v56  ;;  %3899 = vmatmul.msk.bf16.vlgmr.msrb.gmra.mxu2 %vm1793_vm2, %v5143_v57 }
 0x402   : > { %v2530_v15 = vpop.f32.mrf.mxu2 }
 0x403   : > { %v2531_v16 = vadd.f32 %v2530_v15, %v2481_v13  ;;  %v2579_v17 = vpop.f32.mrf.mxu3 }
 0x404   : > { %v2629_v18 = vadd.f32 %v2628_v14, %v2579_v17  ;;  %v2483_v21 = vpop.f32.mrf.mxu1 }
 0x405   : > { %3931 = vst [vmem:[%s5354_s23 + $0x100] sm:$0xff] %v2531_v16  ;;  %v2630_v22 = vpop.f32.mrf.mxu0 }
 0x406   : > { %3951 = vst [vmem:[%s5354_s23 + $0x180] sm:$0xff] %v2629_v18 }
 0x40a   : > { %v2532_v23 = vpop.f32.mrf.mxu2 }
 0x40b   : > { %v2533_v24 = vadd.f32 %v2532_v23, %v2483_v21  ;;  %v2581_v25 = vpop.f32.mrf.mxu3 }
 0x40c   : > { %v2631_v26 = vadd.f32 %v2630_v22, %v2581_v25  ;;  %v2486_v27 = vpop.f32.mrf.mxu1 }
 0x40d   : > { %3932 = vst [vmem:[%s5354_s23 + $0x108] sm:$0xff] %v2533_v24  ;;  %v2633_v56 = vpop.f32.mrf.mxu0 }
 0x40e   : > { %3952 = vst [vmem:[%s5354_s23 + $0x188] sm:$0xff] %v2631_v26 }
 0x40f   : > { %2681 = vmatmul.bf16.gmra.mxu1 %v5157_v1  ;;  %3900 = vmatmul.msk.bf16.gmra.mxu2 %vm1793_vm2, %v5159_v2 }
 0x412   : > { %v2535_v57 = vpop.f32.mrf.mxu2 }
 0x413   : > { %v2536_v28 = vadd.f32 %v2535_v57, %v2486_v27  ;;  %v2584_v33 = vpop.f32.mrf.mxu3 }
 0x414   : > { %v2634_v34 = vadd.f32 %v2633_v56, %v2584_v33  ;;  %v2488_v35 = vpop.f32.mrf.mxu1 }
 0x415   : > { %3933 = vst [vmem:[%s5354_s23 + $0x110] sm:$0xff] %v2536_v28  ;;  %v2635_v36 = vpop.f32.mrf.mxu0 }
 0x416   : > { %3953 = vst [vmem:[%s5354_s23 + $0x190] sm:$0xff] %v2634_v34 }
 0x41a   : > { %v2537_v39 = vpop.f32.mrf.mxu2 }
 0x41b   : > { %v2538_v40 = vadd.f32 %v2537_v39, %v2488_v35  ;;  %v2586_v41 = vpop.f32.mrf.mxu3 }
 0x41c   : > { %v2636_v42 = vadd.f32 %v2635_v36, %v2586_v41  ;;  %v2491_v43 = vpop.f32.mrf.mxu1 }
 0x41d   : > { %3934 = vst [vmem:[%s5354_s23 + $0x118] sm:$0xff] %v2538_v40  ;;  %v2638_v1 = vpop.f32.mrf.mxu0 }
 0x41e   : > { %3954 = vst [vmem:[%s5354_s23 + $0x198] sm:$0xff] %v2636_v42 }
 0x41f   : > { %2686 = vmatmul.bf16.gmra.mxu1 %v5173_v10  ;;  %3901 = vmatmul.msk.bf16.gmra.mxu2 %vm1793_vm2, %v5175_v11 }
 0x422   : > { %v2540_v2 = vpop.f32.mrf.mxu2 }
 0x423   : > { %v2541_v44 = vadd.f32 %v2540_v2, %v2491_v43  ;;  %v2589_v45 = vpop.f32.mrf.mxu3 }
 0x424   : > { %v2639_v46 = vadd.f32 %v2638_v1, %v2589_v45  ;;  %v2493_v47 = vpop.f32.mrf.mxu1 }
 0x425   : > { %3935 = vst [vmem:[%s5354_s23 + $0x120] sm:$0xff] %v2541_v44  ;;  %v2640_v48 = vpop.f32.mrf.mxu0 }
 0x426   : > { %3955 = vst [vmem:[%s5354_s23 + $0x1a0] sm:$0xff] %v2639_v46 }
 0x42a   : > { %v2542_v49 = vpop.f32.mrf.mxu2 }
 0x42b   : > { %v2543_v50 = vadd.f32 %v2542_v49, %v2493_v47  ;;  %v2591_v51 = vpop.f32.mrf.mxu3 }
 0x42c   : > { %v2641_v54 = vadd.f32 %v2640_v48, %v2591_v51  ;;  %v2496_v55 = vpop.f32.mrf.mxu1 }
 0x42d   : > { %3936 = vst [vmem:[%s5354_s23 + $0x128] sm:$0xff] %v2543_v50  ;;  %v2643_v10 = vpop.f32.mrf.mxu0 }
 0x42e   : > { %3956 = vst [vmem:[%s5354_s23 + $0x1a8] sm:$0xff] %v2641_v54 }
 0x42f   : > { %2691 = vmatmul.bf16.gmra.mxu1 %v5189_v19  ;;  %3902 = vmatmul.msk.bf16.gmra.mxu2 %vm1793_vm2, %v5191_v20 }
 0x432   : > { %v2545_v11 = vpop.f32.mrf.mxu2 }
 0x433   : > { %v2546_v58 = vadd.f32 %v2545_v11, %v2496_v55  ;;  %v2594_v59 = vpop.f32.mrf.mxu3 }
 0x434   : > { %v2644_v60 = vadd.f32 %v2643_v10, %v2594_v59  ;;  %v2498_v61 = vpop.f32.mrf.mxu1 }
 0x435   : > { %3937 = vst [vmem:[%s5354_s23 + $0x130] sm:$0xff] %v2546_v58  ;;  %v2645_v62 = vpop.f32.mrf.mxu0 }
 0x436   : > { %3957 = vst [vmem:[%s5354_s23 + $0x1b0] sm:$0xff] %v2644_v60 }
 0x43a   : > { %v2547_v63 = vpop.f32.mrf.mxu2 }
 0x43b   : > { %v2548_v0 = vadd.f32 %v2547_v63, %v2498_v61  ;;  %v2596_v3 = vpop.f32.mrf.mxu3 }
 0x43c   : > { %v2646_v4 = vadd.f32 %v2645_v62, %v2596_v3  ;;  %v2501_v5 = vpop.f32.mrf.mxu1 }
 0x43d   : > { %3938 = vst [vmem:[%s5354_s23 + $0x138] sm:$0xff] %v2548_v0  ;;  %v2648_v19 = vpop.f32.mrf.mxu0 }
 0x43e   : > { %3958 = vst [vmem:[%s5354_s23 + $0x1b8] sm:$0xff] %v2646_v4 }
 0x43f   : > { %2696 = vmatmul.bf16.gmra.mxu1 %v5211_v31  ;;  %3903 = vmatmul.msk.bf16.gmra.mxu2 %vm1793_vm2, %v5213_v32 }
 0x442   : > { %v2550_v20 = vpop.f32.mrf.mxu2 }
 0x443   : > { %v2551_v6 = vadd.f32 %v2550_v20, %v2501_v5  ;;  %v2599_v7 = vpop.f32.mrf.mxu3 }
 0x444   : > { %v2649_v8 = vadd.f32 %v2648_v19, %v2599_v7  ;;  %v2503_v9 = vpop.f32.mrf.mxu1 }
 0x445   : > { %3939 = vst [vmem:[%s5354_s23 + $0x140] sm:$0xff] %v2551_v6  ;;  %v2650_v12 = vpop.f32.mrf.mxu0 }
 0x446   : > { %3959 = vst [vmem:[%s5354_s23 + $0x1c0] sm:$0xff] %v2649_v8 }
 0x44a   : > { %v2552_v13 = vpop.f32.mrf.mxu2 }
 0x44b   : > { %v2553_v14 = vadd.f32 %v2552_v13, %v2503_v9  ;;  %v2601_v15 = vpop.f32.mrf.mxu3 }
 0x44c   : > { %v2651_v16 = vadd.f32 %v2650_v12, %v2601_v15  ;;  %v2506_v17 = vpop.f32.mrf.mxu1 }
 0x44d   : > { %3940 = vst [vmem:[%s5354_s23 + $0x148] sm:$0xff] %v2553_v14  ;;  %v2653_v31 = vpop.f32.mrf.mxu0 }
 0x44e   : > { %3960 = vst [vmem:[%s5354_s23 + $0x1c8] sm:$0xff] %v2651_v16 }
 0x44f   : > { %2701 = vmatmul.bf16.gmra.mxu1 %v5251_v52  ;;  %3904 = vmatmul.msk.bf16.gmra.mxu2 %vm1793_vm2, %v5253_v53 }
 0x452   : > { %v2555_v32 = vpop.f32.mrf.mxu2 }
 0x453   : > { %v2556_v18 = vadd.f32 %v2555_v32, %v2506_v17  ;;  %v2604_v21 = vpop.f32.mrf.mxu3 }
 0x454   : > { %v2654_v22 = vadd.f32 %v2653_v31, %v2604_v21  ;;  %v2508_v23 = vpop.f32.mrf.mxu1 }
 0x455   : > { %3941 = vst [vmem:[%s5354_s23 + $0x150] sm:$0xff] %v2556_v18  ;;  %v2655_v24 = vpop.f32.mrf.mxu0 }
 0x456   : > { %3961 = vst [vmem:[%s5354_s23 + $0x1d0] sm:$0xff] %v2654_v22 }
 0x45a   : > { %v2557_v25 = vpop.f32.mrf.mxu2 }
 0x45b   : > { %v2558_v26 = vadd.f32 %v2557_v25, %v2508_v23  ;;  %v2606_v27 = vpop.f32.mrf.mxu3 }
 0x45c   : > { %v2656_v56 = vadd.f32 %v2655_v24, %v2606_v27  ;;  %v2511_v57 = vpop.f32.mrf.mxu1 }
 0x45d   : > { %3942 = vst [vmem:[%s5354_s23 + $0x158] sm:$0xff] %v2558_v26  ;;  %v2658_v52 = vpop.f32.mrf.mxu0 }
 0x45e   : > { %3962 = vst [vmem:[%s5354_s23 + $0x1d8] sm:$0xff] %v2656_v56 }
 0x45f   : > { %2706 = vmatmul.bf16.gmra.mxu1 %v5315_v29  ;;  %3905 = vmatmul.msk.bf16.gmra.mxu2 %vm1793_vm2, %v5317_v30 }
 0x462   : > { %v2560_v53 = vpop.f32.mrf.mxu2 }
 0x463   : > { %v2561_v28 = vadd.f32 %v2560_v53, %v2511_v57  ;;  %v2609_v33 = vpop.f32.mrf.mxu3 }
 0x464   : > { %v2659_v34 = vadd.f32 %v2658_v52, %v2609_v33  ;;  %v2513_v35 = vpop.f32.mrf.mxu1 }
 0x465   : > { %3943 = vst [vmem:[%s5354_s23 + $0x160] sm:$0xff] %v2561_v28  ;;  %v2660_v36 = vpop.f32.mrf.mxu0 }
 0x466   : > { %3963 = vst [vmem:[%s5354_s23 + $0x1e0] sm:$0xff] %v2659_v34 }
 0x46a   : > { %v2562_v39 = vpop.f32.mrf.mxu2 }
 0x46b   : > { %v2563_v40 = vadd.f32 %v2562_v39, %v2513_v35  ;;  %v2611_v41 = vpop.f32.mrf.mxu3 }
 0x46c   : > { %v2661_v42 = vadd.f32 %v2660_v36, %v2611_v41  ;;  %v2516_v29 = vpop.f32.mrf.mxu1 }
 0x46d   : > { %3944 = vst [vmem:[%s5354_s23 + $0x168] sm:$0xff] %v2563_v40  ;;  %v2663_v30 = vpop.f32.mrf.mxu0 }
 0x46e   : > { %3964 = vst [vmem:[%s5354_s23 + $0x1e8] sm:$0xff] %v2661_v42 }
 0x46f   : > { %2711 = vmatmul.bf16.gmra.mxu1 %v5325_v37  ;;  %3906 = vmatmul.msk.bf16.gmra.mxu2 %vm1793_vm2, %v5327_v38 }
 0x472   : > { %v2565_v43 = vpop.f32.mrf.mxu2 }
 0x473   : > { %v2566_v1 = vadd.f32 %v2565_v43, %v2516_v29  ;;  %v2614_v2 = vpop.f32.mrf.mxu3 }
 0x474   : > { %v2664_v44 = vadd.f32 %v2663_v30, %v2614_v2  ;;  %v2518_v45 = vpop.f32.mrf.mxu1 }
 0x475   : > { %3945 = vst [vmem:[%s5354_s23 + $0x170] sm:$0xff] %v2566_v1  ;;  %v2665_v47 = vpop.f32.mrf.mxu0 }
 0x476   : > { %3965 = vst [vmem:[%s5354_s23 + $0x1f0] sm:$0xff] %v2664_v44 }
 0x47a   : > { %v2567_v46 = vpop.f32.mrf.mxu2 }
 0x47b   : > { %v2568_v48 = vadd.f32 %v2567_v46, %v2518_v45  ;;  %v2616_v37 = vpop.f32.mrf.mxu3 }
 0x47c   : > { %v2666_v49 = vadd.f32 %v2665_v47, %v2616_v37  ;;  %v2677_v38 = vpop.f32.mrf.mxu1 }
 0x47d   : > { %3946 = vst [vmem:[%s5354_s23 + $0x178] sm:$0xff] %v2568_v48 }
 0x47e   : > { %3966 = vst [vmem:[%s5354_s23 + $0x1f8] sm:$0xff] %v2666_v49 }
 0x47f   : > { %4270 = shalt.err (!%p4267_p3)
}
 0x480   : > { %s4342_s13 = smov 128   ;;  %s4343_s29 = smov 8  }
 0x481   : > { %4194 = dma.vmem_to_hbm [thread:$0]  (%p4422_p5), %s2933_s14, 2560, %s2935_s15, %s2915_s17, %s4342_s13, %s4342_s13, %s4343_s29  }
 0x482   : > { %v2726_v50 = vpop.f32.mrf.mxu2  ;;  %s4193_s0 = smul.u32 640, %s4405_s28  ;;  %s2949_s17 = sshll.u32 %s5354_s23, 4  ;;  %s2950_s17 = int_to_ptr.vmem [resolvable:$true] %s2949_s17 }
 0x483   : > { %v2727_v51 = vadd.f32 %v2726_v50, %v2677_v38  ;;  %s2920_s16 = scalar_lea.sflag [#allocation5], %s4922_s8  ;;  %s4291_s22 = scalar_lea.hbm %s5612_s7, 1280 }
 0x484   : > { %v2679_v54 = vpop.f32.mrf.mxu1  ;;  %s2948_s15 = scalar_lea.hbm %s5612_s7, %s4193_s0 }
 0x485   : > { %3971 = vst [vmem:[%s5354_s23 + $0x200] sm:$0xff] %v2727_v51  ;;  %s2951_s18 = sshll.u32 %s2948_s15, 4  ;;  %s2952_s18 = int_to_ptr.hbm [resolvable:$true] %s2951_s18 }
 0x486   : > { %s4285_s19 = sshra.s32 %s2952_s18, 4  ;;  %s4286_s19 = int_to_ptr.hbm [resolvable:$true] %s4285_s19 }
 0x487   : > { %s4287_s28 = scalar_lea.hbm %s4286_s19, 640  ;;  %p4292_p9 = scmp.lt.s32.totalorder %s4286_s19, %s5612_s7 }
 0x488   : > { %p4288_p4 = scmp.ne.s32.totalorder %s4286_s19, %s4287_s28  ;;  %p4293_p10 = scmp.lt.s32.totalorder %s4291_s22, %s4287_s28 }
 0x48a   : > { %v2728_v55 = vpop.f32.mrf.mxu2  ;;  %p4289_p7 = pnand %p4288_p4, %p4422_p5  ;;  %p4294_p11 = por %p4293_p10, %p4292_p9 }
 0x48b   : > { %v2729_v10 = vadd.f32 %v2728_v55, %v2679_v54 }
 0x48c   : > { %v2682_v11 = vpop.f32.mrf.mxu1  ;;  %p4290_p8 = pneg %p4289_p7 }
 0x48d   : > { %3972 = vst [vmem:[%s5354_s23 + $0x208] sm:$0xff] %v2729_v10 }
 0x48e   : > { %p4295_p12 = pnand %p4294_p11, %p4290_p8 }
 0x492   : > { %v2731_v58 = vpop.f32.mrf.mxu2 }
 0x493   : > { %v2732_v59 = vadd.f32 %v2731_v58, %v2682_v11 }
 0x494   : > { %v2684_v60 = vpop.f32.mrf.mxu1 }
 0x495   : > { %3973 = vst [vmem:[%s5354_s23 + $0x210] sm:$0xff] %v2732_v59 }
 0x49a   : > { %v2733_v61 = vpop.f32.mrf.mxu2 }
 0x49b   : > { %v2734_v62 = vadd.f32 %v2733_v61, %v2684_v60 }
 0x49c   : > { %v2687_v63 = vpop.f32.mrf.mxu1 }
 0x49d   : > { %3974 = vst [vmem:[%s5354_s23 + $0x218] sm:$0xff] %v2734_v62 }
 0x4a2   : > { %v2736_v0 = vpop.f32.mrf.mxu2 }
 0x4a3   : > { %v2737_v3 = vadd.f32 %v2736_v0, %v2687_v63 }
 0x4a4   : > { %v2689_v4 = vpop.f32.mrf.mxu1 }
 0x4a5   : > { %3975 = vst [vmem:[%s5354_s23 + $0x220] sm:$0xff] %v2737_v3 }
 0x4aa   : > { %v2738_v5 = vpop.f32.mrf.mxu2 }
 0x4ab   : > { %v2739_v19 = vadd.f32 %v2738_v5, %v2689_v4 }
 0x4ac   : > { %v2692_v20 = vpop.f32.mrf.mxu1 }
 0x4ad   : > { %3976 = vst [vmem:[%s5354_s23 + $0x228] sm:$0xff] %v2739_v19 }
 0x4b2   : > { %v2741_v6 = vpop.f32.mrf.mxu2 }
 0x4b3   : > { %v2742_v7 = vadd.f32 %v2741_v6, %v2692_v20 }
 0x4b4   : > { %v2694_v8 = vpop.f32.mrf.mxu1 }
 0x4b5   : > { %3977 = vst [vmem:[%s5354_s23 + $0x230] sm:$0xff] %v2742_v7 }
 0x4ba   : > { %v2743_v9 = vpop.f32.mrf.mxu2 }
 0x4bb   : > { %v2744_v12 = vadd.f32 %v2743_v9, %v2694_v8 }
 0x4bc   : > { %v2697_v13 = vpop.f32.mrf.mxu1 }
 0x4bd   : > { %3978 = vst [vmem:[%s5354_s23 + $0x238] sm:$0xff] %v2744_v12 }
 0x4c2   : > { %v2746_v14 = vpop.f32.mrf.mxu2 }
 0x4c3   : > { %v2747_v15 = vadd.f32 %v2746_v14, %v2697_v13 }
 0x4c4   : > { %v2699_v16 = vpop.f32.mrf.mxu1 }
 0x4c5   : > { %3979 = vst [vmem:[%s5354_s23 + $0x240] sm:$0xff] %v2747_v15 }
 0x4ca   : > { %v2748_v17 = vpop.f32.mrf.mxu2 }
 0x4cb   : > { %v2749_v31 = vadd.f32 %v2748_v17, %v2699_v16 }
 0x4cc   : > { %v2702_v32 = vpop.f32.mrf.mxu1 }
 0x4cd   : > { %3980 = vst [vmem:[%s5354_s23 + $0x248] sm:$0xff] %v2749_v31 }
 0x4d2   : > { %v2751_v18 = vpop.f32.mrf.mxu2 }
 0x4d3   : > { %v2752_v21 = vadd.f32 %v2751_v18, %v2702_v32 }
 0x4d4   : > { %v2704_v22 = vpop.f32.mrf.mxu1 }
 0x4d5   : > { %3981 = vst [vmem:[%s5354_s23 + $0x250] sm:$0xff] %v2752_v21 }
 0x4da   : > { %v2753_v23 = vpop.f32.mrf.mxu2 }
 0x4db   : > { %v2754_v24 = vadd.f32 %v2753_v23, %v2704_v22 }
 0x4dc   : > { %v2707_v25 = vpop.f32.mrf.mxu1 }
 0x4dd   : > { %3982 = vst [vmem:[%s5354_s23 + $0x258] sm:$0xff] %v2754_v24 }
 0x4e2   : > { %v2756_v26 = vpop.f32.mrf.mxu2 }
 0x4e3   : > { %v2757_v27 = vadd.f32 %v2756_v26, %v2707_v25 }
 0x4e4   : > { %v2709_v56 = vpop.f32.mrf.mxu1 }
 0x4e5   : > { %3983 = vst [vmem:[%s5354_s23 + $0x260] sm:$0xff] %v2757_v27 }
 0x4ea   : > { %v2758_v57 = vpop.f32.mrf.mxu2 }
 0x4eb   : > { %v2759_v52 = vadd.f32 %v2758_v57, %v2709_v56 }
 0x4ec   : > { %v2712_v53 = vpop.f32.mrf.mxu1 }
 0x4ed   : > { %3984 = vst [vmem:[%s5354_s23 + $0x268] sm:$0xff] %v2759_v52 }
 0x4f2   : > { %v2761_v28 = vpop.f32.mrf.mxu2 }
 0x4f3   : > { %v2762_v33 = vadd.f32 %v2761_v28, %v2712_v53 }
 0x4f4   : > { %v2714_v34 = vpop.f32.mrf.mxu1 }
 0x4f5   : > { %3985 = vst [vmem:[%s5354_s23 + $0x270] sm:$0xff] %v2762_v33 }
 0x4fa   : > { %v2763_v35 = vpop.f32.mrf.mxu2 }
 0x4fb   : > { %v2764_v36 = vadd.f32 %v2763_v35, %v2714_v34 }
 0x4fd   : > { %3986 = vst [vmem:[%s5354_s23 + $0x278] sm:$0xff] %v2764_v36 }
 0x4fe   : > { %4298 = shalt.err (!%p4295_p12)
}
 0x4ff   : > { %4195 = dma.vmem_to_hbm [thread:$0]  (%p4422_p5), %s2950_s17, 10240, %s2952_s18, %s2920_s16, %s4342_s13, %s4342_s13, %s4343_s29  }
 0x500 PF: > { %p4205_p13 = scmp.ge.s32.totalorder %s4337_s27, 2  ;;  %s2966_s8 = sand.u32 1, %s4325_s24  }
 0x501   : > { %s2967_s23 = scalar_lea.sflag [#allocation3], %s2966_s8 }
 0x502   : > { %p4199_p0 = pnand %p4205_p13, %p4426_p6 }
 0x504   : > { %p4200_p1 = pneg %p4199_p0 }
 0x506   : > { %4316 = dma.done.wait (%p4200_p1), %s2967_s23, 2560  }
 0x507   : > { %4318 = vsyncadd (%p4200_p1), %s2967_s23, 4294964736  ;;  %s2977_s14 = scalar_lea.sflag [#allocation5], %s2966_s8 }
 0x508   : > { %4320 = dma.done.wait (%p4200_p1), %s2977_s14, 10240  }
 0x509   : > { %4322 = vsyncadd (%p4200_p1), %s2977_s14, 4294957056  ;;  %p21_p5 = scmp.ge.s32.totalorder %s4409_s30, 4   ;;  %s5617_s24 = smov %s4329_s25 }
 0x50a   : > { %s5618_s25 = smov %s4333_s26  ;;  %s5619_s26 = smov %s4420_s10 }
 0x50b   : > { %s5620_s27 = smov %s4409_s30  ;;  %23 = sbr.rel (!%p21_p5) target bundleno = 7 (0x7), region = 104 }
 0x510   :  { %2983 = vsyncpa [#allocation3], 1 }
 0x511   :  { %2985 = vsyncpa [#allocation3 + $0x1], 1 }
 0x512   :  { %2986 = vsyncpa [#allocation5], 1 }
 0x513   :  { %2988 = vsyncpa [#allocation5 + $0x1], 1 }

</bundles_post_ra>
